<compile_context>
chip_gen: v6e
topology: v6e:2x2x1
jax: 0.10.0
libtpu: 0.0.40
codegen_flags: <defaults>
</compile_context>

<pallas_src>
import functools

import jax
import jax.numpy as jnp
from jax.experimental import pallas as pl
from jax.experimental.pallas import tpu as pltpu

LEAKY_SLOPE = 0.10  # net_utils.activation_func('leaky_relu') -> LeakyReLU(0.10)


# ---------------------------------------------------------------------------
# Pallas kernel: multi-output fused matmul + LeakyReLU epilogue
#   out_g = leaky_relu( sum_i  a_{g,i} @ w_{g,i} )   for every output group g
# All groups share the M (rows) axis; each (a, w) pair uses a single
# full-extent K block; the grid is 1-D over M.  Operands are bf16 (MXU-native),
# accumulation is fp32, outputs fp32.
# ---------------------------------------------------------------------------
def _fused_matmul_act_kernel(*refs, pair_counts, apply_act):
    n_out = len(pair_counts)
    in_refs = refs[:-n_out]
    out_refs = refs[-n_out:]
    idx = 0
    for o, n_pairs in enumerate(pair_counts):
        acc = jnp.dot(in_refs[idx][...], in_refs[idx + 1][...],
                      preferred_element_type=jnp.float32)
        idx += 2
        for _ in range(1, n_pairs):
            acc = acc + jnp.dot(in_refs[idx][...], in_refs[idx + 1][...],
                                preferred_element_type=jnp.float32)
            idx += 2
        if apply_act:
            acc = jnp.where(acc >= 0.0, acc, LEAKY_SLOPE * acc)
        out_refs[o][...] = acc.astype(out_refs[o].dtype)


def fused_matmul_leaky(groups, apply_act=True, tm_max=512,
                       vmem_budget_bytes=24 * 1024 * 1024):
    """outs[g] = leaky_relu(sum_i a_{g,i} @ w_{g,i}).

    groups: list of groups; each group is a list of (a, w) pairs with
            a: (M, K_i), w: (K_i, N_g).  All groups share M.
    Returns one (M, N_g) fp32 array per group from a single pallas_call.
    """
    M = int(groups[0][0][0].shape[0])

    # Lane-degenerate outputs (N=1 depth projection): pad only the tiny weight
    # so stores are lane-dense; slice the padded columns away afterwards
    # (leaky_relu(0) == 0, so padded columns are exact zeros).
    padded = []
    for pairs in groups:
        N = int(pairs[0][1].shape[1])
        Np = N
        if N < 16:
            Np = 128
            pairs = [(a, jnp.pad(w, ((0, 0), (0, Np - N)))) for a, w in pairs]
        padded.append((pairs, N, Np))

    def vmem_footprint(tm):
        total = 0
        for pairs, _, Np in padded:
            for a, _ in pairs:
                K = int(a.shape[1])
                total += 2 * tm * K * 2 + 2 * K * Np * 2  # dbl-buf A + weight
            total += 2 * tm * Np * 4                      # dbl-buf f32 output
        return total

    if M <= tm_max:
        tm = M                                # full-extent M block, grid of 1+
    else:
        tm = tm_max                           # multiple of 8 by construction
        while tm > 8 and vmem_footprint(tm) > vmem_budget_bytes:
            tm = max(8, tm // 2)
    grid = (pl.cdiv(M, tm),)

    operands, in_specs = [], []
    out_shapes, out_specs, pair_counts = [], [], []
    flops, bytes_accessed = 0, 0
    for pairs, _, Np in padded:
        pair_counts.append(len(pairs))
        for a, w in pairs:
            K = int(a.shape[1])
            assert int(a.shape[0]) == M and tuple(w.shape) == (K, Np)
            operands.append(a.astype(jnp.bfloat16))
            operands.append(w.astype(jnp.bfloat16))
            # A: tile M, full-extent K (legal: block dim == full array dim).
            in_specs.append(pl.BlockSpec((tm, K), lambda i: (i, 0)))
            # W: single block, constant index -> stays resident across the grid.
            in_specs.append(pl.BlockSpec((K, Np), lambda i: (0, 0)))
            flops += 2 * M * K * Np
            bytes_accessed += M * K * 2 + K * Np * 2
        out_shapes.append(jax.ShapeDtypeStruct((M, Np), jnp.float32))
        out_specs.append(pl.BlockSpec((tm, Np), lambda i: (i, 0)))
        bytes_accessed += M * Np * 4

    kernel = functools.partial(_fused_matmul_act_kernel,
                               pair_counts=tuple(pair_counts),
                               apply_act=apply_act)
    outs = pl.pallas_call(
        kernel,
        out_shape=tuple(out_shapes),
        grid_spec=pltpu.PrefetchScalarGridSpec(
            num_scalar_prefetch=0,
            grid=grid,
            in_specs=in_specs,
            out_specs=out_specs),
        compiler_params=pltpu.CompilerParams(
            dimension_semantics=("parallel",),
            vmem_limit_bytes=32 * 1024 * 1024),
        cost_estimate=pl.CostEstimate(flops=flops, transcendentals=0,
                                      bytes_accessed=bytes_accessed),
    )(*operands)

    results = []
    for out, (_, N, Np) in zip(outs, padded):
        results.append(out[:, :N] if Np != N else out)
    return results


# ---------------------------------------------------------------------------
# Conv2d = (bf16 im2col / strided subsample glue) + Pallas fused matmul+LeakyReLU
# ---------------------------------------------------------------------------
def _im2col(x, kh, kw, stride):
    B, H, W, C = x.shape
    ph, pw = kh // 2, kw // 2
    Ho = (H + 2 * ph - kh) // stride + 1
    Wo = (W + 2 * pw - kw) // stride + 1
    xp = jnp.pad(x, ((0, 0), (ph, ph), (pw, pw), (0, 0)))
    cols = []
    for i in range(kh):
        for j in range(kw):
            cols.append(xp[:, i:i + stride * (Ho - 1) + 1:stride,
                           j:j + stride * (Wo - 1) + 1:stride, :])
    patches = jnp.concatenate(cols, axis=-1)            # (B, Ho, Wo, kh*kw*C) bf16
    return patches.reshape(B * Ho * Wo, kh * kw * C), (B, Ho, Wo)


def _subsample(x, stride):
    xs = x[:, ::stride, ::stride, :]
    B, Ho, Wo, C = xs.shape
    return xs.reshape(B * Ho * Wo, C), (B, Ho, Wo)


def conv_pairs(inputs, weight, stride):
    """Build the (a, w) matmul pairs for one conv (bias=False).

    `inputs` may be a list of NHWC tensors: they are treated as an implicit
    channel-concatenation.  The weight is split along Cin into per-input slabs
    and the partial matmuls are accumulated inside the Pallas kernel, so the
    concatenated activation tensor is never written to HBM.
    """
    if not isinstance(inputs, (list, tuple)):
        inputs = [inputs]
    kh, kw, cin_total, cout = weight.shape
    assert cin_total == sum(int(x.shape[-1]) for x in inputs)

    pairs, c0, shape_info = [], 0, None
    for x in inputs:
        c = int(x.shape[-1])
        w_slab = weight[:, :, c0:c0 + c, :].reshape(kh * kw * c, cout)
        c0 += c
        xb = x.astype(jnp.bfloat16)         # bf16 before im2col halves HBM traffic
        if kh == 1 and kw == 1:
            a, shape_info = _subsample(xb, stride)      # 1x1 conv: no im2col at all
        else:
            a, shape_info = _im2col(xb, kh, kw, stride)
        pairs.append((a, w_slab))
    B, Ho, Wo = shape_info
    return pairs, (B, Ho, Wo, cout)


def conv_group(conv_defs, apply_act=True):
    """Evaluate several convs sharing the same output spatial grid in ONE
    pallas_call.  conv_defs: list of (inputs, weight, stride).  Returns NHWC
    outputs in the same order."""
    groups, shapes = [], []
    for inputs, weight, stride in conv_defs:
        pairs, oshape = conv_pairs(inputs, weight, stride)
        groups.append(pairs)
        shapes.append(oshape)
    flat = fused_matmul_leaky(groups, apply_act=apply_act)
    return [y.reshape(s) for y, s in zip(flat, shapes)]


def conv2d(inputs, weight, stride, apply_act=True):
    """Single Conv2d (bias=False) + LeakyReLU(0.10)."""
    return conv_group([(inputs, weight, stride)], apply_act=apply_act)[0]


# ---------------------------------------------------------------------------
# Parameters (deterministic synthetic init; bias=False like net_utils.Conv2d)
# ---------------------------------------------------------------------------
def _init_conv(key, kh, kw, cin, cout):
    fan_in = kh * kw * cin
    bound = (6.0 / fan_in) ** 0.5                        # kaiming_uniform-style
    return jax.random.uniform(key, (kh, kw, cin, cout), jnp.float32, -bound, bound)


def init_params(key):
    keys = iter(jax.random.split(key, 32))
    p = {}
    # resolution 0 stem (3x3 stride-1 convs)
    p['conv0_image'] = _init_conv(next(keys), 3, 3, 3, 48)
    p['conv0_depth'] = _init_conv(next(keys), 3, 3, 1, 16)
    # CalibratedBackprojectionBlock 1
    p['kb1'] = dict(conv_image=_init_conv(next(keys), 3, 3, 48, 48),
                    conv_depth=_init_conv(next(keys), 3, 3, 16 + 3, 16),
                    proj_depth=_init_conv(next(keys), 1, 1, 16, 1),
                    conv_fused=_init_conv(next(keys), 1, 1, 48 + 3, 48))
    # CalibratedBackprojectionBlock 2 (fused in-channels = 48 image + 48 fused + 3 xyz)
    p['kb2'] = dict(conv_image=_init_conv(next(keys), 3, 3, 48, 96),
                    conv_depth=_init_conv(next(keys), 3, 3, 16 + 3, 32),
                    proj_depth=_init_conv(next(keys), 1, 1, 16, 1),
                    conv_fused=_init_conv(next(keys), 1, 1, 96 + 3, 96))
    # CalibratedBackprojectionBlock 3 (fused in-channels = 96 image + 96 fused + 3 xyz)
    p['kb3'] = dict(conv_image=_init_conv(next(keys), 3, 3, 96, 192),
                    conv_depth=_init_conv(next(keys), 3, 3, 32 + 3, 64),
                    proj_depth=_init_conv(next(keys), 1, 1, 32, 1),
                    conv_fused=_init_conv(next(keys), 1, 1, 192 + 3, 192))
    # VGGNetBlocks with n_conv=1 -> single 3x3 stride-2 conv each
    p['conv4_image'] = _init_conv(next(keys), 3, 3, 192, 384)
    p['conv4_depth'] = _init_conv(next(keys), 3, 3, 64, 128)
    p['conv5_image'] = _init_conv(next(keys), 3, 3, 384, 384)
    p['conv5_depth'] = _init_conv(next(keys), 3, 3, 128, 128)
    return p


# ---------------------------------------------------------------------------
# Geometry helpers (tiny 3x3 work -> plain JAX glue, fused by XLA under jit)
# ---------------------------------------------------------------------------
def camera_coordinates_nhwc(batch, height, width, k):
    x = jnp.arange(width, dtype=jnp.float32)
    y = jnp.arange(height, dtype=jnp.float32)
    gy, gx = jnp.meshgrid(y, x, indexing='ij')
    xy_h = jnp.stack([gx, gy, jnp.ones_like(gx)], axis=0)             # (3,H,W)
    xy_h = jnp.broadcast_to(xy_h[None], (batch, 3, height, width))
    xy_h = xy_h.reshape(batch, 3, -1)
    coords = jnp.matmul(jnp.linalg.inv(k), xy_h)                      # (B,3,HW)
    coords = coords.reshape(batch, 3, height, width)
    return jnp.transpose(coords, (0, 2, 3, 1))                        # NHWC


def scale_intrinsics(k, sx, sy):
    scale = jnp.array([[sx, 1.0, sx],
                       [1.0, sy, sy],
                       [1.0, 1.0, 1.0]], jnp.float32)
    return k * scale[None]


# ---------------------------------------------------------------------------
# CalibratedBackprojectionBlock + KBNetEncoder forward
# ---------------------------------------------------------------------------
def kb_block(p, image_feat, depth_feat, coords, fused):
    z = conv2d(depth_feat, p['proj_depth'], 1)             # 1x1 s1 + leaky, (B,H,W,1)
    xyz = coords * z                                       # backprojection (XLA fuses)
    fused_in = [image_feat, xyz] + ([fused] if fused is not None else [])
    # The three stride-2 convs share the output grid -> one pallas_call.
    conv_image, conv_depth, conv_fused = conv_group([
        (image_feat, p['conv_image'], 2),                  # 3x3 s2
        ([depth_feat, xyz], p['conv_depth'], 2),           # 3x3 s2, implicit concat
        (fused_in, p['conv_fused'], 2),                    # 1x1 s2, implicit concat
    ])
    return conv_image, conv_depth, conv_fused


def kbnet_encoder_forward(params, image, depth, intrinsics):
    """image: (B,3,H,W), depth: (B,1,H,W), intrinsics: (B,3,3).  Returns NCHW outputs."""
    B, _, H0, W0 = image.shape
    img = jnp.transpose(image, (0, 2, 3, 1))
    dep = jnp.transpose(depth, (0, 2, 3, 1))
    layers = []

    # ---- resolution 0 (backprojection) ----
    coords0 = camera_coordinates_nhwc(B, H0, W0, intrinsics)
    conv0_image, conv0_depth = conv_group([
        (img, params['conv0_image'], 1),
        (dep, params['conv0_depth'], 1)])
    conv1_image, conv1_depth, conv1_fused = kb_block(
        params['kb1'], conv0_image, conv0_depth, coords0, None)
    layers.append(jnp.concatenate([conv1_fused, conv1_depth], axis=-1))

    H1, W1 = conv1_image.shape[1], conv1_image.shape[2]
    # NOTE: the reference forward's scale_intrinsics closure always uses the
    # (level-1 / level-0) resolution ratio regardless of the level it is called
    # at -- reproduced here for exact semantics.
    k_scaled = scale_intrinsics(intrinsics, W1 / W0, H1 / H0)

    # ---- resolution 1 (backprojection) ----
    coords1 = camera_coordinates_nhwc(B, H1, W1, k_scaled)
    conv2_image, conv2_depth, conv2_fused = kb_block(
        params['kb2'], conv1_image, conv1_depth, coords1, conv1_fused)
    layers.append(jnp.concatenate([conv2_fused, conv2_depth], axis=-1))

    H2, W2 = conv2_image.shape[1], conv2_image.shape[2]
    # ---- resolution 2 (backprojection; same closure-captured intrinsics scale) ----
    coords2 = camera_coordinates_nhwc(B, H2, W2, k_scaled)
    conv3_image, conv3_depth, conv3_fused = kb_block(
        params['kb3'], conv2_image, conv2_depth, coords2, conv2_fused)
    layers.append(jnp.concatenate([conv3_fused, conv3_depth], axis=-1))

    # ---- resolution 3 (plain VGG block; previous fused exists -> use it) ----
    conv4_image, conv4_depth = conv_group([
        (conv3_fused, params['conv4_image'], 2),
        (conv3_depth, params['conv4_depth'], 2)])
    layers.append(jnp.concatenate([conv4_image, conv4_depth], axis=-1))

    # ---- resolution 4 (plain VGG block; previous fused is None -> image branch) ----
    conv5_image, conv5_depth = conv_group([
        (conv4_image, params['conv5_image'], 2),
        (conv4_depth, params['conv5_depth'], 2)])
    layers.append(jnp.concatenate([conv5_image, conv5_depth], axis=-1))

    layers = [jnp.transpose(l, (0, 3, 1, 2)) for l in layers]          # back to NCHW
    return layers[-1], layers[:-1]


# ---------------------------------------------------------------------------
if __name__ == "__main__":
    key = jax.random.PRNGKey(0)
    pkey, ikey, dkey = jax.random.split(key, 3)
    params = init_params(pkey)

    B, H, W = 2, 16, 16
    image = jax.random.normal(ikey, (B, 3, H, W), jnp.float32)
    depth = jax.random.uniform(dkey, (B, 1, H, W), jnp.float32, minval=0.1, maxval=10.0)
    k = jnp.array([[W / 2.0, 0.0, W / 2.0],
                   [0.0, H / 2.0, H / 2.0],
                   [0.0, 0.0, 1.0]], jnp.float32)
    intrinsics = jnp.broadcast_to(k[None], (B, 3, 3))

    forward = jax.jit(kbnet_encoder_forward)
    last, skips = forward(params, image, depth, intrinsics)
    jax.block_until_ready(last)
    for s in skips:
        jax.block_until_ready(s)

    # Sanity: expected channel counts / resolutions of the 5 levels
    shapes = [tuple(s.shape) for s in skips] + [tuple(last.shape)]
    assert shapes[0] == (B, 64, H // 2, W // 2), shapes[0]
    assert shapes[1] == (B, 128, H // 4, W // 4), shapes[1]
    assert shapes[2] == (B, 256, H // 8, W // 8), shapes[2]
    assert shapes[3] == (B, 512, 1, 1), shapes[3]
    assert shapes[4] == (B, 512, 1, 1), shapes[4]
    assert all(bool(jnp.all(jnp.isfinite(s))) for s in skips + [last])

    print("KERNEL_OK")
</pallas_src>

<mosaic_0001>
module attributes {stable_mosaic.version = 11 : i64} {
  func.func @_fused_matmul_act_kernel(%arg0: i32, %arg1: memref<512x27xbf16, #tpu.memory_space<vmem>>, %arg2: memref<27x48xbf16, #tpu.memory_space<vmem>>, %arg3: memref<512x9xbf16, #tpu.memory_space<vmem>>, %arg4: memref<9x16xbf16, #tpu.memory_space<vmem>>, %arg5: memref<512x48xf32, #tpu.memory_space<vmem>>, %arg6: memref<512x16xf32, #tpu.memory_space<vmem>>) attributes {dimension_semantics = [#tpu.dimension_semantics<parallel>], iteration_bounds = array<i64: 1>, scalar_prefetch = 0 : i64, scratch_operands = 0 : i64, tpu.core_type = #tpu.core_type<tc>, window_params = [{transform_indices = @transform_0, window_bounds = array<i64: 512, 27>}, {pipeline_mode = #tpu.pipeline_mode<synchronous>, transform_indices = @transform_1, window_bounds = array<i64: 27, 48>}, {transform_indices = @transform_2, window_bounds = array<i64: 512, 9>}, {pipeline_mode = #tpu.pipeline_mode<synchronous>, transform_indices = @transform_3, window_bounds = array<i64: 9, 16>}, {transform_indices = @transform_4, window_bounds = array<i64: 512, 48>}, {transform_indices = @transform_5, window_bounds = array<i64: 512, 16>}]} {
    %c0 = arith.constant 0 : index
    %c0_0 = arith.constant 0 : index
    %0 = vector.load %arg1[%c0, %c0_0] : memref<512x27xbf16, #tpu.memory_space<vmem>>, vector<512x27xbf16>
    %c0_1 = arith.constant 0 : index
    %c0_2 = arith.constant 0 : index
    %1 = vector.load %arg2[%c0_1, %c0_2] : memref<27x48xbf16, #tpu.memory_space<vmem>>, vector<27x48xbf16>
    %cst = arith.constant dense<0.000000e+00> : vector<512x48xf32>
    %2 = tpu.matmul %0, %1, %cst {dimension_numbers = #tpu.dot_dimension_numbers<[1], [0], [0], [1], [0, 0, 1, 1], [], []>} : vector<512x27xbf16>, vector<27x48xbf16>, vector<512x48xf32> -> vector<512x48xf32>
    %cst_3 = arith.constant 0.000000e+00 : f32
    %3 = vector.broadcast %cst_3 : f32 to vector<512x48xf32>
    %4 = arith.cmpf oge, %2, %3 : vector<512x48xf32>
    %cst_4 = arith.constant 1.000000e-01 : f32
    %5 = vector.broadcast %cst_4 : f32 to vector<512x48xf32>
    %6 = arith.mulf %5, %2 : vector<512x48xf32>
    %7 = arith.select %4, %2, %6 : vector<512x48xi1>, vector<512x48xf32>
    %c0_5 = arith.constant 0 : index
    %c0_6 = arith.constant 0 : index
    %8 = vector.load %arg5[%c0_5, %c0_6] : memref<512x48xf32, #tpu.memory_space<vmem>>, vector<512x48xf32>
    tpu.vector_store %arg5[%c0_5, %c0_6], %7 {strides = array<i32>} : memref<512x48xf32, #tpu.memory_space<vmem>>, vector<512x48xf32>,
    %c0_7 = arith.constant 0 : index
    %c0_8 = arith.constant 0 : index
    %9 = vector.load %arg3[%c0_7, %c0_8] : memref<512x9xbf16, #tpu.memory_space<vmem>>, vector<512x9xbf16>
    %c0_9 = arith.constant 0 : index
    %c0_10 = arith.constant 0 : index
    %10 = vector.load %arg4[%c0_9, %c0_10] : memref<9x16xbf16, #tpu.memory_space<vmem>>, vector<9x16xbf16>
    %cst_11 = arith.constant dense<0.000000e+00> : vector<512x16xf32>
    %11 = tpu.matmul %9, %10, %cst_11 {dimension_numbers = #tpu.dot_dimension_numbers<[1], [0], [0], [1], [0, 0, 1, 1], [], []>} : vector<512x9xbf16>, vector<9x16xbf16>, vector<512x16xf32> -> vector<512x16xf32>
    %cst_12 = arith.constant 0.000000e+00 : f32
    %12 = vector.broadcast %cst_12 : f32 to vector<512x16xf32>
    %13 = arith.cmpf oge, %11, %12 : vector<512x16xf32>
    %cst_13 = arith.constant 1.000000e-01 : f32
    %14 = vector.broadcast %cst_13 : f32 to vector<512x16xf32>
    %15 = arith.mulf %14, %11 : vector<512x16xf32>
    %16 = arith.select %13, %11, %15 : vector<512x16xi1>, vector<512x16xf32>
    %c0_14 = arith.constant 0 : index
    %c0_15 = arith.constant 0 : index
    %17 = vector.load %arg6[%c0_14, %c0_15] : memref<512x16xf32, #tpu.memory_space<vmem>>, vector<512x16xf32>
    tpu.vector_store %arg6[%c0_14, %c0_15], %16 {strides = array<i32>} : memref<512x16xf32, #tpu.memory_space<vmem>>, vector<512x16xf32>,
    return
  }
  func.func @transform_0(%arg0: i32) -> (i32, i32) {
    %c0_i32 = arith.constant 0 : i32
    %c0_i32_0 = arith.constant 0 : i32
    return %arg0, %c0_i32 : i32, i32
  }
  func.func @transform_1(%arg0: i32) -> (i32, i32) {
    %c0_i32 = arith.constant 0 : i32
    %c0_i32_0 = arith.constant 0 : i32
    %c0_i32_1 = arith.constant 0 : i32
    return %c0_i32, %c0_i32_0 : i32, i32
  }
  func.func @transform_2(%arg0: i32) -> (i32, i32) {
    %c0_i32 = arith.constant 0 : i32
    %c0_i32_0 = arith.constant 0 : i32
    return %arg0, %c0_i32 : i32, i32
  }
  func.func @transform_3(%arg0: i32) -> (i32, i32) {
    %c0_i32 = arith.constant 0 : i32
    %c0_i32_0 = arith.constant 0 : i32
    %c0_i32_1 = arith.constant 0 : i32
    return %c0_i32, %c0_i32_0 : i32, i32
  }
  func.func @transform_4(%arg0: i32) -> (i32, i32) {
    %c0_i32 = arith.constant 0 : i32
    %c0_i32_0 = arith.constant 0 : i32
    return %arg0, %c0_i32 : i32, i32
  }
  func.func @transform_5(%arg0: i32) -> (i32, i32) {
    %c0_i32 = arith.constant 0 : i32
    %c0_i32_0 = arith.constant 0 : i32
    return %arg0, %c0_i32 : i32, i32
  }
}

module attributes {stable_mosaic.version = 11 : i64} {
  func.func @_fused_matmul_act_kernel(%arg0: i32, %arg1: memref<512x16xbf16, #tpu.memory_space<vmem>>, %arg2: memref<16x128xbf16, #tpu.memory_space<vmem>>, %arg3: memref<512x128xf32, #tpu.memory_space<vmem>>) attributes {dimension_semantics = [#tpu.dimension_semantics<parallel>], iteration_bounds = array<i64: 1>, scalar_prefetch = 0 : i64, scratch_operands = 0 : i64, tpu.core_type = #tpu.core_type<tc>, window_params = [{transform_indices = @transform_0, window_bounds = array<i64: 512, 16>}, {pipeline_mode = #tpu.pipeline_mode<synchronous>, transform_indices = @transform_1, window_bounds = array<i64: 16, 128>}, {transform_indices = @transform_2, window_bounds = array<i64: 512, 128>}]} {
    %c0 = arith.constant 0 : index
    %c0_0 = arith.constant 0 : index
    %0 = vector.load %arg1[%c0, %c0_0] : memref<512x16xbf16, #tpu.memory_space<vmem>>, vector<512x16xbf16>
    %c0_1 = arith.constant 0 : index
    %c0_2 = arith.constant 0 : index
    %1 = vector.load %arg2[%c0_1, %c0_2] : memref<16x128xbf16, #tpu.memory_space<vmem>>, vector<16x128xbf16>
    %cst = arith.constant dense<0.000000e+00> : vector<512x128xf32>
    %2 = tpu.matmul %0, %1, %cst {dimension_numbers = #tpu.dot_dimension_numbers<[1], [0], [0], [1], [0, 0, 1, 1], [], []>} : vector<512x16xbf16>, vector<16x128xbf16>, vector<512x128xf32> -> vector<512x128xf32>
    %cst_3 = arith.constant 0.000000e+00 : f32
    %3 = vector.broadcast %cst_3 : f32 to vector<512x128xf32>
    %4 = arith.cmpf oge, %2, %3 : vector<512x128xf32>
    %cst_4 = arith.constant 1.000000e-01 : f32
    %5 = vector.broadcast %cst_4 : f32 to vector<512x128xf32>
    %6 = arith.mulf %5, %2 : vector<512x128xf32>
    %7 = arith.select %4, %2, %6 : vector<512x128xi1>, vector<512x128xf32>
    %c0_5 = arith.constant 0 : index
    %c0_6 = arith.constant 0 : index
    %8 = vector.load %arg3[%c0_5, %c0_6] : memref<512x128xf32, #tpu.memory_space<vmem>>, vector<512x128xf32>
    tpu.vector_store %arg3[%c0_5, %c0_6], %7 {strides = array<i32>} : memref<512x128xf32, #tpu.memory_space<vmem>>, vector<512x128xf32>,
    return
  }
  func.func @transform_0(%arg0: i32) -> (i32, i32) {
    %c0_i32 = arith.constant 0 : i32
    %c0_i32_0 = arith.constant 0 : i32
    return %arg0, %c0_i32 : i32, i32
  }
  func.func @transform_1(%arg0: i32) -> (i32, i32) {
    %c0_i32 = arith.constant 0 : i32
    %c0_i32_0 = arith.constant 0 : i32
    %c0_i32_1 = arith.constant 0 : i32
    return %c0_i32, %c0_i32_0 : i32, i32
  }
  func.func @transform_2(%arg0: i32) -> (i32, i32) {
    %c0_i32 = arith.constant 0 : i32
    %c0_i32_0 = arith.constant 0 : i32
    return %arg0, %c0_i32 : i32, i32
  }
}

module attributes {stable_mosaic.version = 11 : i64} {
  func.func @_fused_matmul_act_kernel(%arg0: i32, %arg1: memref<128x432xbf16, #tpu.memory_space<vmem>>, %arg2: memref<432x48xbf16, #tpu.memory_space<vmem>>, %arg3: memref<128x144xbf16, #tpu.memory_space<vmem>>, %arg4: memref<144x16xbf16, #tpu.memory_space<vmem>>, %arg5: memref<128x27xbf16, #tpu.memory_space<vmem>>, %arg6: memref<27x16xbf16, #tpu.memory_space<vmem>>, %arg7: memref<128x48xbf16, #tpu.memory_space<vmem>>, %arg8: memref<48x48xbf16, #tpu.memory_space<vmem>>, %arg9: memref<128x3xbf16, #tpu.memory_space<vmem>>, %arg10: memref<3x48xbf16, #tpu.memory_space<vmem>>, %arg11: memref<128x48xf32, #tpu.memory_space<vmem>>, %arg12: memref<128x16xf32, #tpu.memory_space<vmem>>, %arg13: memref<128x48xf32, #tpu.memory_space<vmem>>) attributes {dimension_semantics = [#tpu.dimension_semantics<parallel>], iteration_bounds = array<i64: 1>, scalar_prefetch = 0 : i64, scratch_operands = 0 : i64, tpu.core_type = #tpu.core_type<tc>, window_params = [{transform_indices = @transform_0, window_bounds = array<i64: 128, 432>}, {pipeline_mode = #tpu.pipeline_mode<synchronous>, transform_indices = @transform_1, window_bounds = array<i64: 432, 48>}, {transform_indices = @transform_2, window_bounds = array<i64: 128, 144>}, {pipeline_mode = #tpu.pipeline_mode<synchronous>, transform_indices = @transform_3, window_bounds = array<i64: 144, 16>}, {transform_indices = @transform_4, window_bounds = array<i64: 128, 27>}, {pipeline_mode = #tpu.pipeline_mode<synchronous>, transform_indices = @transform_5, window_bounds = array<i64: 27, 16>}, {transform_indices = @transform_6, window_bounds = array<i64: 128, 48>}, {pipeline_mode = #tpu.pipeline_mode<synchronous>, transform_indices = @transform_7, window_bounds = array<i64: 48, 48>}, {transform_indices = @transform_8, window_bounds = array<i64: 128, 3>}, {pipeline_mode = #tpu.pipeline_mode<synchronous>, transform_indices = @transform_9, window_bounds = array<i64: 3, 48>}, {transform_indices = @transform_10, window_bounds = array<i64: 128, 48>}, {transform_indices = @transform_11, window_bounds = array<i64: 128, 16>}, {transform_indices = @transform_12, window_bounds = array<i64: 128, 48>}]} {
    %c0 = arith.constant 0 : index
    %c0_0 = arith.constant 0 : index
    %0 = vector.load %arg1[%c0, %c0_0] : memref<128x432xbf16, #tpu.memory_space<vmem>>, vector<128x432xbf16>
    %c0_1 = arith.constant 0 : index
    %c0_2 = arith.constant 0 : index
    %1 = vector.load %arg2[%c0_1, %c0_2] : memref<432x48xbf16, #tpu.memory_space<vmem>>, vector<432x48xbf16>
    %cst = arith.constant dense<0.000000e+00> : vector<128x48xf32>
    %2 = tpu.matmul %0, %1, %cst {dimension_numbers = #tpu.dot_dimension_numbers<[1], [0], [0], [1], [0, 0, 1, 1], [], []>} : vector<128x432xbf16>, vector<432x48xbf16>, vector<128x48xf32> -> vector<128x48xf32>
    %cst_3 = arith.constant 0.000000e+00 : f32
    %3 = vector.broadcast %cst_3 : f32 to vector<128x48xf32>
    %4 = arith.cmpf oge, %2, %3 : vector<128x48xf32>
    %cst_4 = arith.constant 1.000000e-01 : f32
    %5 = vector.broadcast %cst_4 : f32 to vector<128x48xf32>
    %6 = arith.mulf %5, %2 : vector<128x48xf32>
    %7 = arith.select %4, %2, %6 : vector<128x48xi1>, vector<128x48xf32>
    %c0_5 = arith.constant 0 : index
    %c0_6 = arith.constant 0 : index
    %8 = vector.load %arg11[%c0_5, %c0_6] : memref<128x48xf32, #tpu.memory_space<vmem>>, vector<128x48xf32>
    tpu.vector_store %arg11[%c0_5, %c0_6], %7 {strides = array<i32>} : memref<128x48xf32, #tpu.memory_space<vmem>>, vector<128x48xf32>,
    %c0_7 = arith.constant 0 : index
    %c0_8 = arith.constant 0 : index
    %9 = vector.load %arg3[%c0_7, %c0_8] : memref<128x144xbf16, #tpu.memory_space<vmem>>, vector<128x144xbf16>
    %c0_9 = arith.constant 0 : index
    %c0_10 = arith.constant 0 : index
    %10 = vector.load %arg4[%c0_9, %c0_10] : memref<144x16xbf16, #tpu.memory_space<vmem>>, vector<144x16xbf16>
    %cst_11 = arith.constant dense<0.000000e+00> : vector<128x16xf32>
    %11 = tpu.matmul %9, %10, %cst_11 {dimension_numbers = #tpu.dot_dimension_numbers<[1], [0], [0], [1], [0, 0, 1, 1], [], []>} : vector<128x144xbf16>, vector<144x16xbf16>, vector<128x16xf32> -> vector<128x16xf32>
    %c0_12 = arith.constant 0 : index
    %c0_13 = arith.constant 0 : index
    %12 = vector.load %arg5[%c0_12, %c0_13] : memref<128x27xbf16, #tpu.memory_space<vmem>>, vector<128x27xbf16>
    %c0_14 = arith.constant 0 : index
    %c0_15 = arith.constant 0 : index
    %13 = vector.load %arg6[%c0_14, %c0_15] : memref<27x16xbf16, #tpu.memory_space<vmem>>, vector<27x16xbf16>
    %cst_16 = arith.constant dense<0.000000e+00> : vector<128x16xf32>
    %14 = tpu.matmul %12, %13, %cst_16 {dimension_numbers = #tpu.dot_dimension_numbers<[1], [0], [0], [1], [0, 0, 1, 1], [], []>} : vector<128x27xbf16>, vector<27x16xbf16>, vector<128x16xf32> -> vector<128x16xf32>
    %15 = arith.addf %11, %14 : vector<128x16xf32>
    %cst_17 = arith.constant 0.000000e+00 : f32
    %16 = vector.broadcast %cst_17 : f32 to vector<128x16xf32>
    %17 = arith.cmpf oge, %15, %16 : vector<128x16xf32>
    %cst_18 = arith.constant 1.000000e-01 : f32
    %18 = vector.broadcast %cst_18 : f32 to vector<128x16xf32>
    %19 = arith.mulf %18, %15 : vector<128x16xf32>
    %20 = arith.select %17, %15, %19 : vector<128x16xi1>, vector<128x16xf32>
    %c0_19 = arith.constant 0 : index
    %c0_20 = arith.constant 0 : index
    %21 = vector.load %arg12[%c0_19, %c0_20] : memref<128x16xf32, #tpu.memory_space<vmem>>, vector<128x16xf32>
    tpu.vector_store %arg12[%c0_19, %c0_20], %20 {strides = array<i32>} : memref<128x16xf32, #tpu.memory_space<vmem>>, vector<128x16xf32>,
    %c0_21 = arith.constant 0 : index
    %c0_22 = arith.constant 0 : index
    %22 = vector.load %arg7[%c0_21, %c0_22] : memref<128x48xbf16, #tpu.memory_space<vmem>>, vector<128x48xbf16>
    %c0_23 = arith.constant 0 : index
    %c0_24 = arith.constant 0 : index
    %23 = vector.load %arg8[%c0_23, %c0_24] : memref<48x48xbf16, #tpu.memory_space<vmem>>, vector<48x48xbf16>
    %cst_25 = arith.constant dense<0.000000e+00> : vector<128x48xf32>
    %24 = tpu.matmul %22, %23, %cst_25 {dimension_numbers = #tpu.dot_dimension_numbers<[1], [0], [0], [1], [0, 0, 1, 1], [], []>} : vector<128x48xbf16>, vector<48x48xbf16>, vector<128x48xf32> -> vector<128x48xf32>
    %c0_26 = arith.constant 0 : index
    %c0_27 = arith.constant 0 : index
    %25 = vector.load %arg9[%c0_26, %c0_27] : memref<128x3xbf16, #tpu.memory_space<vmem>>, vector<128x3xbf16>
    %c0_28 = arith.constant 0 : index
    %c0_29 = arith.constant 0 : index
    %26 = vector.load %arg10[%c0_28, %c0_29] : memref<3x48xbf16, #tpu.memory_space<vmem>>, vector<3x48xbf16>
    %cst_30 = arith.constant dense<0.000000e+00> : vector<128x48xf32>
    %27 = tpu.matmul %25, %26, %cst_30 {dimension_numbers = #tpu.dot_dimension_numbers<[1], [0], [0], [1], [0, 0, 1, 1], [], []>} : vector<128x3xbf16>, vector<3x48xbf16>, vector<128x48xf32> -> vector<128x48xf32>
    %28 = arith.addf %24, %27 : vector<128x48xf32>
    %cst_31 = arith.constant 0.000000e+00 : f32
    %29 = vector.broadcast %cst_31 : f32 to vector<128x48xf32>
    %30 = arith.cmpf oge, %28, %29 : vector<128x48xf32>
    %cst_32 = arith.constant 1.000000e-01 : f32
    %31 = vector.broadcast %cst_32 : f32 to vector<128x48xf32>
    %32 = arith.mulf %31, %28 : vector<128x48xf32>
    %33 = arith.select %30, %28, %32 : vector<128x48xi1>, vector<128x48xf32>
    %c0_33 = arith.constant 0 : index
    %c0_34 = arith.constant 0 : index
    %34 = vector.load %arg13[%c0_33, %c0_34] : memref<128x48xf32, #tpu.memory_space<vmem>>, vector<128x48xf32>
    tpu.vector_store %arg13[%c0_33, %c0_34], %33 {strides = array<i32>} : memref<128x48xf32, #tpu.memory_space<vmem>>, vector<128x48xf32>,
    return
  }
  func.func @transform_0(%arg0: i32) -> (i32, i32) {
    %c0_i32 = arith.constant 0 : i32
    %c0_i32_0 = arith.constant 0 : i32
    return %arg0, %c0_i32 : i32, i32
  }
  func.func @transform_1(%arg0: i32) -> (i32, i32) {
    %c0_i32 = arith.constant 0 : i32
    %c0_i32_0 = arith.constant 0 : i32
    %c0_i32_1 = arith.constant 0 : i32
    return %c0_i32, %c0_i32_0 : i32, i32
  }
  func.func @transform_2(%arg0: i32) -> (i32, i32) {
    %c0_i32 = arith.constant 0 : i32
    %c0_i32_0 = arith.constant 0 : i32
    return %arg0, %c0_i32 : i32, i32
  }
  func.func @transform_3(%arg0: i32) -> (i32, i32) {
    %c0_i32 = arith.constant 0 : i32
    %c0_i32_0 = arith.constant 0 : i32
    %c0_i32_1 = arith.constant 0 : i32
    return %c0_i32, %c0_i32_0 : i32, i32
  }
  func.func @transform_4(%arg0: i32) -> (i32, i32) {
    %c0_i32 = arith.constant 0 : i32
    %c0_i32_0 = arith.constant 0 : i32
    return %arg0, %c0_i32 : i32, i32
  }
  func.func @transform_5(%arg0: i32) -> (i32, i32) {
    %c0_i32 = arith.constant 0 : i32
    %c0_i32_0 = arith.constant 0 : i32
    %c0_i32_1 = arith.constant 0 : i32
    return %c0_i32, %c0_i32_0 : i32, i32
  }
  func.func @transform_6(%arg0: i32) -> (i32, i32) {
    %c0_i32 = arith.constant 0 : i32
    %c0_i32_0 = arith.constant 0 : i32
    return %arg0, %c0_i32 : i32, i32
  }
  func.func @transform_7(%arg0: i32) -> (i32, i32) {
    %c0_i32 = arith.constant 0 : i32
    %c0_i32_0 = arith.constant 0 : i32
    %c0_i32_1 = arith.constant 0 : i32
    return %c0_i32, %c0_i32_0 : i32, i32
  }
  func.func @transform_8(%arg0: i32) -> (i32, i32) {
    %c0_i32 = arith.constant 0 : i32
    %c0_i32_0 = arith.constant 0 : i32
    return %arg0, %c0_i32 : i32, i32
  }
  func.func @transform_9(%arg0: i32) -> (i32, i32) {
    %c0_i32 = arith.constant 0 : i32
    %c0_i32_0 = arith.constant 0 : i32
    %c0_i32_1 = arith.constant 0 : i32
    return %c0_i32, %c0_i32_0 : i32, i32
  }
  func.func @transform_10(%arg0: i32) -> (i32, i32) {
    %c0_i32 = arith.constant 0 : i32
    %c0_i32_0 = arith.constant 0 : i32
    return %arg0, %c0_i32 : i32, i32
  }
  func.func @transform_11(%arg0: i32) -> (i32, i32) {
    %c0_i32 = arith.constant 0 : i32
    %c0_i32_0 = arith.constant 0 : i32
    return %arg0, %c0_i32 : i32, i32
  }
  func.func @transform_12(%arg0: i32) -> (i32, i32) {
    %c0_i32 = arith.constant 0 : i32
    %c0_i32_0 = arith.constant 0 : i32
    return %arg0, %c0_i32 : i32, i32
  }
}

module attributes {stable_mosaic.version = 11 : i64} {
  func.func @_fused_matmul_act_kernel(%arg0: i32, %arg1: memref<128x16xbf16, #tpu.memory_space<vmem>>, %arg2: memref<16x128xbf16, #tpu.memory_space<vmem>>, %arg3: memref<128x128xf32, #tpu.memory_space<vmem>>) attributes {dimension_semantics = [#tpu.dimension_semantics<parallel>], iteration_bounds = array<i64: 1>, scalar_prefetch = 0 : i64, scratch_operands = 0 : i64, tpu.core_type = #tpu.core_type<tc>, window_params = [{transform_indices = @transform_0, window_bounds = array<i64: 128, 16>}, {pipeline_mode = #tpu.pipeline_mode<synchronous>, transform_indices = @transform_1, window_bounds = array<i64: 16, 128>}, {transform_indices = @transform_2, window_bounds = array<i64: 128, 128>}]} {
    %c0 = arith.constant 0 : index
    %c0_0 = arith.constant 0 : index
    %0 = vector.load %arg1[%c0, %c0_0] : memref<128x16xbf16, #tpu.memory_space<vmem>>, vector<128x16xbf16>
    %c0_1 = arith.constant 0 : index
    %c0_2 = arith.constant 0 : index
    %1 = vector.load %arg2[%c0_1, %c0_2] : memref<16x128xbf16, #tpu.memory_space<vmem>>, vector<16x128xbf16>
    %cst = arith.constant dense<0.000000e+00> : vector<128x128xf32>
    %2 = tpu.matmul %0, %1, %cst {dimension_numbers = #tpu.dot_dimension_numbers<[1], [0], [0], [1], [0, 0, 1, 1], [], []>} : vector<128x16xbf16>, vector<16x128xbf16>, vector<128x128xf32> -> vector<128x128xf32>
    %cst_3 = arith.constant 0.000000e+00 : f32
    %3 = vector.broadcast %cst_3 : f32 to vector<128x128xf32>
    %4 = arith.cmpf oge, %2, %3 : vector<128x128xf32>
    %cst_4 = arith.constant 1.000000e-01 : f32
    %5 = vector.broadcast %cst_4 : f32 to vector<128x128xf32>
    %6 = arith.mulf %5, %2 : vector<128x128xf32>
    %7 = arith.select %4, %2, %6 : vector<128x128xi1>, vector<128x128xf32>
    %c0_5 = arith.constant 0 : index
    %c0_6 = arith.constant 0 : index
    %8 = vector.load %arg3[%c0_5, %c0_6] : memref<128x128xf32, #tpu.memory_space<vmem>>, vector<128x128xf32>
    tpu.vector_store %arg3[%c0_5, %c0_6], %7 {strides = array<i32>} : memref<128x128xf32, #tpu.memory_space<vmem>>, vector<128x128xf32>,
    return
  }
  func.func @transform_0(%arg0: i32) -> (i32, i32) {
    %c0_i32 = arith.constant 0 : i32
    %c0_i32_0 = arith.constant 0 : i32
    return %arg0, %c0_i32 : i32, i32
  }
  func.func @transform_1(%arg0: i32) -> (i32, i32) {
    %c0_i32 = arith.constant 0 : i32
    %c0_i32_0 = arith.constant 0 : i32
    %c0_i32_1 = arith.constant 0 : i32
    return %c0_i32, %c0_i32_0 : i32, i32
  }
  func.func @transform_2(%arg0: i32) -> (i32, i32) {
    %c0_i32 = arith.constant 0 : i32
    %c0_i32_0 = arith.constant 0 : i32
    return %arg0, %c0_i32 : i32, i32
  }
}

module attributes {stable_mosaic.version = 11 : i64} {
  func.func @_fused_matmul_act_kernel(%arg0: i32, %arg1: memref<32x432xbf16, #tpu.memory_space<vmem>>, %arg2: memref<432x96xbf16, #tpu.memory_space<vmem>>, %arg3: memref<32x144xbf16, #tpu.memory_space<vmem>>, %arg4: memref<144x32xbf16, #tpu.memory_space<vmem>>, %arg5: memref<32x27xbf16, #tpu.memory_space<vmem>>, %arg6: memref<27x32xbf16, #tpu.memory_space<vmem>>, %arg7: memref<32x48xbf16, #tpu.memory_space<vmem>>, %arg8: memref<48x96xbf16, #tpu.memory_space<vmem>>, %arg9: memref<32x3xbf16, #tpu.memory_space<vmem>>, %arg10: memref<3x96xbf16, #tpu.memory_space<vmem>>, %arg11: memref<32x48xbf16, #tpu.memory_space<vmem>>, %arg12: memref<48x96xbf16, #tpu.memory_space<vmem>>, %arg13: memref<32x96xf32, #tpu.memory_space<vmem>>, %arg14: memref<32x32xf32, #tpu.memory_space<vmem>>, %arg15: memref<32x96xf32, #tpu.memory_space<vmem>>) attributes {dimension_semantics = [#tpu.dimension_semantics<parallel>], iteration_bounds = array<i64: 1>, scalar_prefetch = 0 : i64, scratch_operands = 0 : i64, tpu.core_type = #tpu.core_type<tc>, window_params = [{transform_indices = @transform_0, window_bounds = array<i64: 32, 432>}, {pipeline_mode = #tpu.pipeline_mode<synchronous>, transform_indices = @transform_1, window_bounds = array<i64: 432, 96>}, {transform_indices = @transform_2, window_bounds = array<i64: 32, 144>}, {pipeline_mode = #tpu.pipeline_mode<synchronous>, transform_indices = @transform_3, window_bounds = array<i64: 144, 32>}, {transform_indices = @transform_4, window_bounds = array<i64: 32, 27>}, {pipeline_mode = #tpu.pipeline_mode<synchronous>, transform_indices = @transform_5, window_bounds = array<i64: 27, 32>}, {transform_indices = @transform_6, window_bounds = array<i64: 32, 48>}, {pipeline_mode = #tpu.pipeline_mode<synchronous>, transform_indices = @transform_7, window_bounds = array<i64: 48, 96>}, {transform_indices = @transform_8, window_bounds = array<i64: 32, 3>}, {pipeline_mode = #tpu.pipeline_mode<synchronous>, transform_indices = @transform_9, window_bounds = array<i64: 3, 96>}, {transform_indices = @transform_10, window_bounds = array<i64: 32, 48>}, {pipeline_mode = #tpu.pipeline_mode<synchronous>, transform_indices = @transform_11, window_bounds = array<i64: 48, 96>}, {transform_indices = @transform_12, window_bounds = array<i64: 32, 96>}, {transform_indices = @transform_13, window_bounds = array<i64: 32, 32>}, {transform_indices = @transform_14, window_bounds = array<i64: 32, 96>}]} {
    %c0 = arith.constant 0 : index
    %c0_0 = arith.constant 0 : index
    %0 = vector.load %arg1[%c0, %c0_0] : memref<32x432xbf16, #tpu.memory_space<vmem>>, vector<32x432xbf16>
    %c0_1 = arith.constant 0 : index
    %c0_2 = arith.constant 0 : index
    %1 = vector.load %arg2[%c0_1, %c0_2] : memref<432x96xbf16, #tpu.memory_space<vmem>>, vector<432x96xbf16>
    %cst = arith.constant dense<0.000000e+00> : vector<32x96xf32>
    %2 = tpu.matmul %0, %1, %cst {dimension_numbers = #tpu.dot_dimension_numbers<[1], [0], [0], [1], [0, 0, 1, 1], [], []>} : vector<32x432xbf16>, vector<432x96xbf16>, vector<32x96xf32> -> vector<32x96xf32>
    %cst_3 = arith.constant 0.000000e+00 : f32
    %3 = vector.broadcast %cst_3 : f32 to vector<32x96xf32>
    %4 = arith.cmpf oge, %2, %3 : vector<32x96xf32>
    %cst_4 = arith.constant 1.000000e-01 : f32
    %5 = vector.broadcast %cst_4 : f32 to vector<32x96xf32>
    %6 = arith.mulf %5, %2 : vector<32x96xf32>
    %7 = arith.select %4, %2, %6 : vector<32x96xi1>, vector<32x96xf32>
    %c0_5 = arith.constant 0 : index
    %c0_6 = arith.constant 0 : index
    %8 = vector.load %arg13[%c0_5, %c0_6] : memref<32x96xf32, #tpu.memory_space<vmem>>, vector<32x96xf32>
    tpu.vector_store %arg13[%c0_5, %c0_6], %7 {strides = array<i32>} : memref<32x96xf32, #tpu.memory_space<vmem>>, vector<32x96xf32>,
    %c0_7 = arith.constant 0 : index
    %c0_8 = arith.constant 0 : index
    %9 = vector.load %arg3[%c0_7, %c0_8] : memref<32x144xbf16, #tpu.memory_space<vmem>>, vector<32x144xbf16>
    %c0_9 = arith.constant 0 : index
    %c0_10 = arith.constant 0 : index
    %10 = vector.load %arg4[%c0_9, %c0_10] : memref<144x32xbf16, #tpu.memory_space<vmem>>, vector<144x32xbf16>
    %cst_11 = arith.constant dense<0.000000e+00> : vector<32x32xf32>
    %11 = tpu.matmul %9, %10, %cst_11 {dimension_numbers = #tpu.dot_dimension_numbers<[1], [0], [0], [1], [0, 0, 1, 1], [], []>} : vector<32x144xbf16>, vector<144x32xbf16>, vector<32x32xf32> -> vector<32x32xf32>
    %c0_12 = arith.constant 0 : index
    %c0_13 = arith.constant 0 : index
    %12 = vector.load %arg5[%c0_12, %c0_13] : memref<32x27xbf16, #tpu.memory_space<vmem>>, vector<32x27xbf16>
    %c0_14 = arith.constant 0 : index
    %c0_15 = arith.constant 0 : index
    %13 = vector.load %arg6[%c0_14, %c0_15] : memref<27x32xbf16, #tpu.memory_space<vmem>>, vector<27x32xbf16>
    %cst_16 = arith.constant dense<0.000000e+00> : vector<32x32xf32>
    %14 = tpu.matmul %12, %13, %cst_16 {dimension_numbers = #tpu.dot_dimension_numbers<[1], [0], [0], [1], [0, 0, 1, 1], [], []>} : vector<32x27xbf16>, vector<27x32xbf16>, vector<32x32xf32> -> vector<32x32xf32>
    %15 = arith.addf %11, %14 : vector<32x32xf32>
    %cst_17 = arith.constant 0.000000e+00 : f32
    %16 = vector.broadcast %cst_17 : f32 to vector<32x32xf32>
    %17 = arith.cmpf oge, %15, %16 : vector<32x32xf32>
    %cst_18 = arith.constant 1.000000e-01 : f32
    %18 = vector.broadcast %cst_18 : f32 to vector<32x32xf32>
    %19 = arith.mulf %18, %15 : vector<32x32xf32>
    %20 = arith.select %17, %15, %19 : vector<32x32xi1>, vector<32x32xf32>
    %c0_19 = arith.constant 0 : index
    %c0_20 = arith.constant 0 : index
    %21 = vector.load %arg14[%c0_19, %c0_20] : memref<32x32xf32, #tpu.memory_space<vmem>>, vector<32x32xf32>
    tpu.vector_store %arg14[%c0_19, %c0_20], %20 {strides = array<i32>} : memref<32x32xf32, #tpu.memory_space<vmem>>, vector<32x32xf32>,
    %c0_21 = arith.constant 0 : index
    %c0_22 = arith.constant 0 : index
    %22 = vector.load %arg7[%c0_21, %c0_22] : memref<32x48xbf16, #tpu.memory_space<vmem>>, vector<32x48xbf16>
    %c0_23 = arith.constant 0 : index
    %c0_24 = arith.constant 0 : index
    %23 = vector.load %arg8[%c0_23, %c0_24] : memref<48x96xbf16, #tpu.memory_space<vmem>>, vector<48x96xbf16>
    %cst_25 = arith.constant dense<0.000000e+00> : vector<32x96xf32>
    %24 = tpu.matmul %22, %23, %cst_25 {dimension_numbers = #tpu.dot_dimension_numbers<[1], [0], [0], [1], [0, 0, 1, 1], [], []>} : vector<32x48xbf16>, vector<48x96xbf16>, vector<32x96xf32> -> vector<32x96xf32>
    %c0_26 = arith.constant 0 : index
    %c0_27 = arith.constant 0 : index
    %25 = vector.load %arg9[%c0_26, %c0_27] : memref<32x3xbf16, #tpu.memory_space<vmem>>, vector<32x3xbf16>
    %c0_28 = arith.constant 0 : index
    %c0_29 = arith.constant 0 : index
    %26 = vector.load %arg10[%c0_28, %c0_29] : memref<3x96xbf16, #tpu.memory_space<vmem>>, vector<3x96xbf16>
    %cst_30 = arith.constant dense<0.000000e+00> : vector<32x96xf32>
    %27 = tpu.matmul %25, %26, %cst_30 {dimension_numbers = #tpu.dot_dimension_numbers<[1], [0], [0], [1], [0, 0, 1, 1], [], []>} : vector<32x3xbf16>, vector<3x96xbf16>, vector<32x96xf32> -> vector<32x96xf32>
    %28 = arith.addf %24, %27 : vector<32x96xf32>
    %c0_31 = arith.constant 0 : index
    %c0_32 = arith.constant 0 : index
    %29 = vector.load %arg11[%c0_31, %c0_32] : memref<32x48xbf16, #tpu.memory_space<vmem>>, vector<32x48xbf16>
    %c0_33 = arith.constant 0 : index
    %c0_34 = arith.constant 0 : index
    %30 = vector.load %arg12[%c0_33, %c0_34] : memref<48x96xbf16, #tpu.memory_space<vmem>>, vector<48x96xbf16>
    %cst_35 = arith.constant dense<0.000000e+00> : vector<32x96xf32>
    %31 = tpu.matmul %29, %30, %cst_35 {dimension_numbers = #tpu.dot_dimension_numbers<[1], [0], [0], [1], [0, 0, 1, 1], [], []>} : vector<32x48xbf16>, vector<48x96xbf16>, vector<32x96xf32> -> vector<32x96xf32>
    %32 = arith.addf %28, %31 : vector<32x96xf32>
    %cst_36 = arith.constant 0.000000e+00 : f32
    %33 = vector.broadcast %cst_36 : f32 to vector<32x96xf32>
    %34 = arith.cmpf oge, %32, %33 : vector<32x96xf32>
    %cst_37 = arith.constant 1.000000e-01 : f32
    %35 = vector.broadcast %cst_37 : f32 to vector<32x96xf32>
    %36 = arith.mulf %35, %32 : vector<32x96xf32>
    %37 = arith.select %34, %32, %36 : vector<32x96xi1>, vector<32x96xf32>
    %c0_38 = arith.constant 0 : index
    %c0_39 = arith.constant 0 : index
    %38 = vector.load %arg15[%c0_38, %c0_39] : memref<32x96xf32, #tpu.memory_space<vmem>>, vector<32x96xf32>
    tpu.vector_store %arg15[%c0_38, %c0_39], %37 {strides = array<i32>} : memref<32x96xf32, #tpu.memory_space<vmem>>, vector<32x96xf32>,
    return
  }
  func.func @transform_0(%arg0: i32) -> (i32, i32) {
    %c0_i32 = arith.constant 0 : i32
    %c0_i32_0 = arith.constant 0 : i32
    return %arg0, %c0_i32 : i32, i32
  }
  func.func @transform_1(%arg0: i32) -> (i32, i32) {
    %c0_i32 = arith.constant 0 : i32
    %c0_i32_0 = arith.constant 0 : i32
    %c0_i32_1 = arith.constant 0 : i32
    return %c0_i32, %c0_i32_0 : i32, i32
  }
  func.func @transform_2(%arg0: i32) -> (i32, i32) {
    %c0_i32 = arith.constant 0 : i32
    %c0_i32_0 = arith.constant 0 : i32
    return %arg0, %c0_i32 : i32, i32
  }
  func.func @transform_3(%arg0: i32) -> (i32, i32) {
    %c0_i32 = arith.constant 0 : i32
    %c0_i32_0 = arith.constant 0 : i32
    %c0_i32_1 = arith.constant 0 : i32
    return %c0_i32, %c0_i32_0 : i32, i32
  }
  func.func @transform_4(%arg0: i32) -> (i32, i32) {
    %c0_i32 = arith.constant 0 : i32
    %c0_i32_0 = arith.constant 0 : i32
    return %arg0, %c0_i32 : i32, i32
  }
  func.func @transform_5(%arg0: i32) -> (i32, i32) {
    %c0_i32 = arith.constant 0 : i32
    %c0_i32_0 = arith.constant 0 : i32
    %c0_i32_1 = arith.constant 0 : i32
    return %c0_i32, %c0_i32_0 : i32, i32
  }
  func.func @transform_6(%arg0: i32) -> (i32, i32) {
    %c0_i32 = arith.constant 0 : i32
    %c0_i32_0 = arith.constant 0 : i32
    return %arg0, %c0_i32 : i32, i32
  }
  func.func @transform_7(%arg0: i32) -> (i32, i32) {
    %c0_i32 = arith.constant 0 : i32
    %c0_i32_0 = arith.constant 0 : i32
    %c0_i32_1 = arith.constant 0 : i32
    return %c0_i32, %c0_i32_0 : i32, i32
  }
  func.func @transform_8(%arg0: i32) -> (i32, i32) {
    %c0_i32 = arith.constant 0 : i32
    %c0_i32_0 = arith.constant 0 : i32
    return %arg0, %c0_i32 : i32, i32
  }
  func.func @transform_9(%arg0: i32) -> (i32, i32) {
    %c0_i32 = arith.constant 0 : i32
    %c0_i32_0 = arith.constant 0 : i32
    %c0_i32_1 = arith.constant 0 : i32
    return %c0_i32, %c0_i32_0 : i32, i32
  }
  func.func @transform_10(%arg0: i32) -> (i32, i32) {
    %c0_i32 = arith.constant 0 : i32
    %c0_i32_0 = arith.constant 0 : i32
    return %arg0, %c0_i32 : i32, i32
  }
  func.func @transform_11(%arg0: i32) -> (i32, i32) {
    %c0_i32 = arith.constant 0 : i32
    %c0_i32_0 = arith.constant 0 : i32
    %c0_i32_1 = arith.constant 0 : i32
    return %c0_i32, %c0_i32_0 : i32, i32
  }
  func.func @transform_12(%arg0: i32) -> (i32, i32) {
    %c0_i32 = arith.constant 0 : i32
    %c0_i32_0 = arith.constant 0 : i32
    return %arg0, %c0_i32 : i32, i32
  }
  func.func @transform_13(%arg0: i32) -> (i32, i32) {
    %c0_i32 = arith.constant 0 : i32
    %c0_i32_0 = arith.constant 0 : i32
    return %arg0, %c0_i32 : i32, i32
  }
  func.func @transform_14(%arg0: i32) -> (i32, i32) {
    %c0_i32 = arith.constant 0 : i32
    %c0_i32_0 = arith.constant 0 : i32
    return %arg0, %c0_i32 : i32, i32
  }
}

module attributes {stable_mosaic.version = 11 : i64} {
  func.func @_fused_matmul_act_kernel(%arg0: i32, %arg1: memref<32x32xbf16, #tpu.memory_space<vmem>>, %arg2: memref<32x128xbf16, #tpu.memory_space<vmem>>, %arg3: memref<32x128xf32, #tpu.memory_space<vmem>>) attributes {dimension_semantics = [#tpu.dimension_semantics<parallel>], iteration_bounds = array<i64: 1>, scalar_prefetch = 0 : i64, scratch_operands = 0 : i64, tpu.core_type = #tpu.core_type<tc>, window_params = [{transform_indices = @transform_0, window_bounds = array<i64: 32, 32>}, {pipeline_mode = #tpu.pipeline_mode<synchronous>, transform_indices = @transform_1, window_bounds = array<i64: 32, 128>}, {transform_indices = @transform_2, window_bounds = array<i64: 32, 128>}]} {
    %c0 = arith.constant 0 : index
    %c0_0 = arith.constant 0 : index
    %0 = vector.load %arg1[%c0, %c0_0] : memref<32x32xbf16, #tpu.memory_space<vmem>>, vector<32x32xbf16>
    %c0_1 = arith.constant 0 : index
    %c0_2 = arith.constant 0 : index
    %1 = vector.load %arg2[%c0_1, %c0_2] : memref<32x128xbf16, #tpu.memory_space<vmem>>, vector<32x128xbf16>
    %cst = arith.constant dense<0.000000e+00> : vector<32x128xf32>
    %2 = tpu.matmul %0, %1, %cst {dimension_numbers = #tpu.dot_dimension_numbers<[1], [0], [0], [1], [0, 0, 1, 1], [], []>} : vector<32x32xbf16>, vector<32x128xbf16>, vector<32x128xf32> -> vector<32x128xf32>
    %cst_3 = arith.constant 0.000000e+00 : f32
    %3 = vector.broadcast %cst_3 : f32 to vector<32x128xf32>
    %4 = arith.cmpf oge, %2, %3 : vector<32x128xf32>
    %cst_4 = arith.constant 1.000000e-01 : f32
    %5 = vector.broadcast %cst_4 : f32 to vector<32x128xf32>
    %6 = arith.mulf %5, %2 : vector<32x128xf32>
    %7 = arith.select %4, %2, %6 : vector<32x128xi1>, vector<32x128xf32>
    %c0_5 = arith.constant 0 : index
    %c0_6 = arith.constant 0 : index
    %8 = vector.load %arg3[%c0_5, %c0_6] : memref<32x128xf32, #tpu.memory_space<vmem>>, vector<32x128xf32>
    tpu.vector_store %arg3[%c0_5, %c0_6], %7 {strides = array<i32>} : memref<32x128xf32, #tpu.memory_space<vmem>>, vector<32x128xf32>,
    return
  }
  func.func @transform_0(%arg0: i32) -> (i32, i32) {
    %c0_i32 = arith.constant 0 : i32
    %c0_i32_0 = arith.constant 0 : i32
    return %arg0, %c0_i32 : i32, i32
  }
  func.func @transform_1(%arg0: i32) -> (i32, i32) {
    %c0_i32 = arith.constant 0 : i32
    %c0_i32_0 = arith.constant 0 : i32
    %c0_i32_1 = arith.constant 0 : i32
    return %c0_i32, %c0_i32_0 : i32, i32
  }
  func.func @transform_2(%arg0: i32) -> (i32, i32) {
    %c0_i32 = arith.constant 0 : i32
    %c0_i32_0 = arith.constant 0 : i32
    return %arg0, %c0_i32 : i32, i32
  }
}

module attributes {stable_mosaic.version = 11 : i64} {
  func.func @_fused_matmul_act_kernel(%arg0: i32, %arg1: memref<8x864xbf16, #tpu.memory_space<vmem>>, %arg2: memref<864x192xbf16, #tpu.memory_space<vmem>>, %arg3: memref<8x288xbf16, #tpu.memory_space<vmem>>, %arg4: memref<288x64xbf16, #tpu.memory_space<vmem>>, %arg5: memref<8x27xbf16, #tpu.memory_space<vmem>>, %arg6: memref<27x64xbf16, #tpu.memory_space<vmem>>, %arg7: memref<8x96xbf16, #tpu.memory_space<vmem>>, %arg8: memref<96x192xbf16, #tpu.memory_space<vmem>>, %arg9: memref<8x3xbf16, #tpu.memory_space<vmem>>, %arg10: memref<3x192xbf16, #tpu.memory_space<vmem>>, %arg11: memref<8x96xbf16, #tpu.memory_space<vmem>>, %arg12: memref<96x192xbf16, #tpu.memory_space<vmem>>, %arg13: memref<8x192xf32, #tpu.memory_space<vmem>>, %arg14: memref<8x64xf32, #tpu.memory_space<vmem>>, %arg15: memref<8x192xf32, #tpu.memory_space<vmem>>) attributes {dimension_semantics = [#tpu.dimension_semantics<parallel>], iteration_bounds = array<i64: 1>, scalar_prefetch = 0 : i64, scratch_operands = 0 : i64, tpu.core_type = #tpu.core_type<tc>, window_params = [{transform_indices = @transform_0, window_bounds = array<i64: 8, 864>}, {pipeline_mode = #tpu.pipeline_mode<synchronous>, transform_indices = @transform_1, window_bounds = array<i64: 864, 192>}, {transform_indices = @transform_2, window_bounds = array<i64: 8, 288>}, {pipeline_mode = #tpu.pipeline_mode<synchronous>, transform_indices = @transform_3, window_bounds = array<i64: 288, 64>}, {transform_indices = @transform_4, window_bounds = array<i64: 8, 27>}, {pipeline_mode = #tpu.pipeline_mode<synchronous>, transform_indices = @transform_5, window_bounds = array<i64: 27, 64>}, {transform_indices = @transform_6, window_bounds = array<i64: 8, 96>}, {pipeline_mode = #tpu.pipeline_mode<synchronous>, transform_indices = @transform_7, window_bounds = array<i64: 96, 192>}, {transform_indices = @transform_8, window_bounds = array<i64: 8, 3>}, {pipeline_mode = #tpu.pipeline_mode<synchronous>, transform_indices = @transform_9, window_bounds = array<i64: 3, 192>}, {transform_indices = @transform_10, window_bounds = array<i64: 8, 96>}, {pipeline_mode = #tpu.pipeline_mode<synchronous>, transform_indices = @transform_11, window_bounds = array<i64: 96, 192>}, {transform_indices = @transform_12, window_bounds = array<i64: 8, 192>}, {transform_indices = @transform_13, window_bounds = array<i64: 8, 64>}, {transform_indices = @transform_14, window_bounds = array<i64: 8, 192>}]} {
    %c0 = arith.constant 0 : index
    %c0_0 = arith.constant 0 : index
    %0 = vector.load %arg1[%c0, %c0_0] : memref<8x864xbf16, #tpu.memory_space<vmem>>, vector<8x864xbf16>
    %c0_1 = arith.constant 0 : index
    %c0_2 = arith.constant 0 : index
    %1 = vector.load %arg2[%c0_1, %c0_2] : memref<864x192xbf16, #tpu.memory_space<vmem>>, vector<864x192xbf16>
    %cst = arith.constant dense<0.000000e+00> : vector<8x192xf32>
    %2 = tpu.matmul %0, %1, %cst {dimension_numbers = #tpu.dot_dimension_numbers<[1], [0], [0], [1], [0, 0, 1, 1], [], []>} : vector<8x864xbf16>, vector<864x192xbf16>, vector<8x192xf32> -> vector<8x192xf32>
    %cst_3 = arith.constant 0.000000e+00 : f32
    %3 = vector.broadcast %cst_3 : f32 to vector<8x192xf32>
    %4 = arith.cmpf oge, %2, %3 : vector<8x192xf32>
    %cst_4 = arith.constant 1.000000e-01 : f32
    %5 = vector.broadcast %cst_4 : f32 to vector<8x192xf32>
    %6 = arith.mulf %5, %2 : vector<8x192xf32>
    %7 = arith.select %4, %2, %6 : vector<8x192xi1>, vector<8x192xf32>
    %c0_5 = arith.constant 0 : index
    %c0_6 = arith.constant 0 : index
    %8 = vector.load %arg13[%c0_5, %c0_6] : memref<8x192xf32, #tpu.memory_space<vmem>>, vector<8x192xf32>
    tpu.vector_store %arg13[%c0_5, %c0_6], %7 {strides = array<i32>} : memref<8x192xf32, #tpu.memory_space<vmem>>, vector<8x192xf32>,
    %c0_7 = arith.constant 0 : index
    %c0_8 = arith.constant 0 : index
    %9 = vector.load %arg3[%c0_7, %c0_8] : memref<8x288xbf16, #tpu.memory_space<vmem>>, vector<8x288xbf16>
    %c0_9 = arith.constant 0 : index
    %c0_10 = arith.constant 0 : index
    %10 = vector.load %arg4[%c0_9, %c0_10] : memref<288x64xbf16, #tpu.memory_space<vmem>>, vector<288x64xbf16>
    %cst_11 = arith.constant dense<0.000000e+00> : vector<8x64xf32>
    %11 = tpu.matmul %9, %10, %cst_11 {dimension_numbers = #tpu.dot_dimension_numbers<[1], [0], [0], [1], [0, 0, 1, 1], [], []>} : vector<8x288xbf16>, vector<288x64xbf16>, vector<8x64xf32> -> vector<8x64xf32>
    %c0_12 = arith.constant 0 : index
    %c0_13 = arith.constant 0 : index
    %12 = vector.load %arg5[%c0_12, %c0_13] : memref<8x27xbf16, #tpu.memory_space<vmem>>, vector<8x27xbf16>
    %c0_14 = arith.constant 0 : index
    %c0_15 = arith.constant 0 : index
    %13 = vector.load %arg6[%c0_14, %c0_15] : memref<27x64xbf16, #tpu.memory_space<vmem>>, vector<27x64xbf16>
    %cst_16 = arith.constant dense<0.000000e+00> : vector<8x64xf32>
    %14 = tpu.matmul %12, %13, %cst_16 {dimension_numbers = #tpu.dot_dimension_numbers<[1], [0], [0], [1], [0, 0, 1, 1], [], []>} : vector<8x27xbf16>, vector<27x64xbf16>, vector<8x64xf32> -> vector<8x64xf32>
    %15 = arith.addf %11, %14 : vector<8x64xf32>
    %cst_17 = arith.constant 0.000000e+00 : f32
    %16 = vector.broadcast %cst_17 : f32 to vector<8x64xf32>
    %17 = arith.cmpf oge, %15, %16 : vector<8x64xf32>
    %cst_18 = arith.constant 1.000000e-01 : f32
    %18 = vector.broadcast %cst_18 : f32 to vector<8x64xf32>
    %19 = arith.mulf %18, %15 : vector<8x64xf32>
    %20 = arith.select %17, %15, %19 : vector<8x64xi1>, vector<8x64xf32>
    %c0_19 = arith.constant 0 : index
    %c0_20 = arith.constant 0 : index
    %21 = vector.load %arg14[%c0_19, %c0_20] : memref<8x64xf32, #tpu.memory_space<vmem>>, vector<8x64xf32>
    tpu.vector_store %arg14[%c0_19, %c0_20], %20 {strides = array<i32>} : memref<8x64xf32, #tpu.memory_space<vmem>>, vector<8x64xf32>,
    %c0_21 = arith.constant 0 : index
    %c0_22 = arith.constant 0 : index
    %22 = vector.load %arg7[%c0_21, %c0_22] : memref<8x96xbf16, #tpu.memory_space<vmem>>, vector<8x96xbf16>
    %c0_23 = arith.constant 0 : index
    %c0_24 = arith.constant 0 : index
    %23 = vector.load %arg8[%c0_23, %c0_24] : memref<96x192xbf16, #tpu.memory_space<vmem>>, vector<96x192xbf16>
    %cst_25 = arith.constant dense<0.000000e+00> : vector<8x192xf32>
    %24 = tpu.matmul %22, %23, %cst_25 {dimension_numbers = #tpu.dot_dimension_numbers<[1], [0], [0], [1], [0, 0, 1, 1], [], []>} : vector<8x96xbf16>, vector<96x192xbf16>, vector<8x192xf32> -> vector<8x192xf32>
    %c0_26 = arith.constant 0 : index
    %c0_27 = arith.constant 0 : index
    %25 = vector.load %arg9[%c0_26, %c0_27] : memref<8x3xbf16, #tpu.memory_space<vmem>>, vector<8x3xbf16>
    %c0_28 = arith.constant 0 : index
    %c0_29 = arith.constant 0 : index
    %26 = vector.load %arg10[%c0_28, %c0_29] : memref<3x192xbf16, #tpu.memory_space<vmem>>, vector<3x192xbf16>
    %cst_30 = arith.constant dense<0.000000e+00> : vector<8x192xf32>
    %27 = tpu.matmul %25, %26, %cst_30 {dimension_numbers = #tpu.dot_dimension_numbers<[1], [0], [0], [1], [0, 0, 1, 1], [], []>} : vector<8x3xbf16>, vector<3x192xbf16>, vector<8x192xf32> -> vector<8x192xf32>
    %28 = arith.addf %24, %27 : vector<8x192xf32>
    %c0_31 = arith.constant 0 : index
    %c0_32 = arith.constant 0 : index
    %29 = vector.load %arg11[%c0_31, %c0_32] : memref<8x96xbf16, #tpu.memory_space<vmem>>, vector<8x96xbf16>
    %c0_33 = arith.constant 0 : index
    %c0_34 = arith.constant 0 : index
    %30 = vector.load %arg12[%c0_33, %c0_34] : memref<96x192xbf16, #tpu.memory_space<vmem>>, vector<96x192xbf16>
    %cst_35 = arith.constant dense<0.000000e+00> : vector<8x192xf32>
    %31 = tpu.matmul %29, %30, %cst_35 {dimension_numbers = #tpu.dot_dimension_numbers<[1], [0], [0], [1], [0, 0, 1, 1], [], []>} : vector<8x96xbf16>, vector<96x192xbf16>, vector<8x192xf32> -> vector<8x192xf32>
    %32 = arith.addf %28, %31 : vector<8x192xf32>
    %cst_36 = arith.constant 0.000000e+00 : f32
    %33 = vector.broadcast %cst_36 : f32 to vector<8x192xf32>
    %34 = arith.cmpf oge, %32, %33 : vector<8x192xf32>
    %cst_37 = arith.constant 1.000000e-01 : f32
    %35 = vector.broadcast %cst_37 : f32 to vector<8x192xf32>
    %36 = arith.mulf %35, %32 : vector<8x192xf32>
    %37 = arith.select %34, %32, %36 : vector<8x192xi1>, vector<8x192xf32>
    %c0_38 = arith.constant 0 : index
    %c0_39 = arith.constant 0 : index
    %38 = vector.load %arg15[%c0_38, %c0_39] : memref<8x192xf32, #tpu.memory_space<vmem>>, vector<8x192xf32>
    tpu.vector_store %arg15[%c0_38, %c0_39], %37 {strides = array<i32>} : memref<8x192xf32, #tpu.memory_space<vmem>>, vector<8x192xf32>,
    return
  }
  func.func @transform_0(%arg0: i32) -> (i32, i32) {
    %c0_i32 = arith.constant 0 : i32
    %c0_i32_0 = arith.constant 0 : i32
    return %arg0, %c0_i32 : i32, i32
  }
  func.func @transform_1(%arg0: i32) -> (i32, i32) {
    %c0_i32 = arith.constant 0 : i32
    %c0_i32_0 = arith.constant 0 : i32
    %c0_i32_1 = arith.constant 0 : i32
    return %c0_i32, %c0_i32_0 : i32, i32
  }
  func.func @transform_2(%arg0: i32) -> (i32, i32) {
    %c0_i32 = arith.constant 0 : i32
    %c0_i32_0 = arith.constant 0 : i32
    return %arg0, %c0_i32 : i32, i32
  }
  func.func @transform_3(%arg0: i32) -> (i32, i32) {
    %c0_i32 = arith.constant 0 : i32
    %c0_i32_0 = arith.constant 0 : i32
    %c0_i32_1 = arith.constant 0 : i32
    return %c0_i32, %c0_i32_0 : i32, i32
  }
  func.func @transform_4(%arg0: i32) -> (i32, i32) {
    %c0_i32 = arith.constant 0 : i32
    %c0_i32_0 = arith.constant 0 : i32
    return %arg0, %c0_i32 : i32, i32
  }
  func.func @transform_5(%arg0: i32) -> (i32, i32) {
    %c0_i32 = arith.constant 0 : i32
    %c0_i32_0 = arith.constant 0 : i32
    %c0_i32_1 = arith.constant 0 : i32
    return %c0_i32, %c0_i32_0 : i32, i32
  }
  func.func @transform_6(%arg0: i32) -> (i32, i32) {
    %c0_i32 = arith.constant 0 : i32
    %c0_i32_0 = arith.constant 0 : i32
    return %arg0, %c0_i32 : i32, i32
  }
  func.func @transform_7(%arg0: i32) -> (i32, i32) {
    %c0_i32 = arith.constant 0 : i32
    %c0_i32_0 = arith.constant 0 : i32
    %c0_i32_1 = arith.constant 0 : i32
    return %c0_i32, %c0_i32_0 : i32, i32
  }
  func.func @transform_8(%arg0: i32) -> (i32, i32) {
    %c0_i32 = arith.constant 0 : i32
    %c0_i32_0 = arith.constant 0 : i32
    return %arg0, %c0_i32 : i32, i32
  }
  func.func @transform_9(%arg0: i32) -> (i32, i32) {
    %c0_i32 = arith.constant 0 : i32
    %c0_i32_0 = arith.constant 0 : i32
    %c0_i32_1 = arith.constant 0 : i32
    return %c0_i32, %c0_i32_0 : i32, i32
  }
  func.func @transform_10(%arg0: i32) -> (i32, i32) {
    %c0_i32 = arith.constant 0 : i32
    %c0_i32_0 = arith.constant 0 : i32
    return %arg0, %c0_i32 : i32, i32
  }
  func.func @transform_11(%arg0: i32) -> (i32, i32) {
    %c0_i32 = arith.constant 0 : i32
    %c0_i32_0 = arith.constant 0 : i32
    %c0_i32_1 = arith.constant 0 : i32
    return %c0_i32, %c0_i32_0 : i32, i32
  }
  func.func @transform_12(%arg0: i32) -> (i32, i32) {
    %c0_i32 = arith.constant 0 : i32
    %c0_i32_0 = arith.constant 0 : i32
    return %arg0, %c0_i32 : i32, i32
  }
  func.func @transform_13(%arg0: i32) -> (i32, i32) {
    %c0_i32 = arith.constant 0 : i32
    %c0_i32_0 = arith.constant 0 : i32
    return %arg0, %c0_i32 : i32, i32
  }
  func.func @transform_14(%arg0: i32) -> (i32, i32) {
    %c0_i32 = arith.constant 0 : i32
    %c0_i32_0 = arith.constant 0 : i32
    return %arg0, %c0_i32 : i32, i32
  }
}

module attributes {stable_mosaic.version = 11 : i64} {
  func.func @_fused_matmul_act_kernel(%arg0: i32, %arg1: memref<2x1728xbf16, #tpu.memory_space<vmem>>, %arg2: memref<1728x384xbf16, #tpu.memory_space<vmem>>, %arg3: memref<2x576xbf16, #tpu.memory_space<vmem>>, %arg4: memref<576x128xbf16, #tpu.memory_space<vmem>>, %arg5: memref<2x384xf32, #tpu.memory_space<vmem>>, %arg6: memref<2x128xf32, #tpu.memory_space<vmem>>) attributes {dimension_semantics = [#tpu.dimension_semantics<parallel>], iteration_bounds = array<i64: 1>, scalar_prefetch = 0 : i64, scratch_operands = 0 : i64, tpu.core_type = #tpu.core_type<tc>, window_params = [{transform_indices = @transform_0, window_bounds = array<i64: 2, 1728>}, {pipeline_mode = #tpu.pipeline_mode<synchronous>, transform_indices = @transform_1, window_bounds = array<i64: 1728, 384>}, {transform_indices = @transform_2, window_bounds = array<i64: 2, 576>}, {pipeline_mode = #tpu.pipeline_mode<synchronous>, transform_indices = @transform_3, window_bounds = array<i64: 576, 128>}, {transform_indices = @transform_4, window_bounds = array<i64: 2, 384>}, {transform_indices = @transform_5, window_bounds = array<i64: 2, 128>}]} {
    %c0 = arith.constant 0 : index
    %c0_0 = arith.constant 0 : index
    %0 = vector.load %arg1[%c0, %c0_0] : memref<2x1728xbf16, #tpu.memory_space<vmem>>, vector<2x1728xbf16>
    %c0_1 = arith.constant 0 : index
    %c0_2 = arith.constant 0 : index
    %1 = vector.load %arg2[%c0_1, %c0_2] : memref<1728x384xbf16, #tpu.memory_space<vmem>>, vector<1728x384xbf16>
    %cst = arith.constant dense<0.000000e+00> : vector<2x384xf32>
    %2 = tpu.matmul %0, %1, %cst {dimension_numbers = #tpu.dot_dimension_numbers<[1], [0], [0], [1], [0, 0, 1, 1], [], []>} : vector<2x1728xbf16>, vector<1728x384xbf16>, vector<2x384xf32> -> vector<2x384xf32>
    %cst_3 = arith.constant 0.000000e+00 : f32
    %3 = vector.broadcast %cst_3 : f32 to vector<2x384xf32>
    %4 = arith.cmpf oge, %2, %3 : vector<2x384xf32>
    %cst_4 = arith.constant 1.000000e-01 : f32
    %5 = vector.broadcast %cst_4 : f32 to vector<2x384xf32>
    %6 = arith.mulf %5, %2 : vector<2x384xf32>
    %7 = arith.select %4, %2, %6 : vector<2x384xi1>, vector<2x384xf32>
    %c0_5 = arith.constant 0 : index
    %c0_6 = arith.constant 0 : index
    %8 = vector.load %arg5[%c0_5, %c0_6] : memref<2x384xf32, #tpu.memory_space<vmem>>, vector<2x384xf32>
    tpu.vector_store %arg5[%c0_5, %c0_6], %7 {strides = array<i32>} : memref<2x384xf32, #tpu.memory_space<vmem>>, vector<2x384xf32>,
    %c0_7 = arith.constant 0 : index
    %c0_8 = arith.constant 0 : index
    %9 = vector.load %arg3[%c0_7, %c0_8] : memref<2x576xbf16, #tpu.memory_space<vmem>>, vector<2x576xbf16>
    %c0_9 = arith.constant 0 : index
    %c0_10 = arith.constant 0 : index
    %10 = vector.load %arg4[%c0_9, %c0_10] : memref<576x128xbf16, #tpu.memory_space<vmem>>, vector<576x128xbf16>
    %cst_11 = arith.constant dense<0.000000e+00> : vector<2x128xf32>
    %11 = tpu.matmul %9, %10, %cst_11 {dimension_numbers = #tpu.dot_dimension_numbers<[1], [0], [0], [1], [0, 0, 1, 1], [], []>} : vector<2x576xbf16>, vector<576x128xbf16>, vector<2x128xf32> -> vector<2x128xf32>
    %cst_12 = arith.constant 0.000000e+00 : f32
    %12 = vector.broadcast %cst_12 : f32 to vector<2x128xf32>
    %13 = arith.cmpf oge, %11, %12 : vector<2x128xf32>
    %cst_13 = arith.constant 1.000000e-01 : f32
    %14 = vector.broadcast %cst_13 : f32 to vector<2x128xf32>
    %15 = arith.mulf %14, %11 : vector<2x128xf32>
    %16 = arith.select %13, %11, %15 : vector<2x128xi1>, vector<2x128xf32>
    %c0_14 = arith.constant 0 : index
    %c0_15 = arith.constant 0 : index
    %17 = vector.load %arg6[%c0_14, %c0_15] : memref<2x128xf32, #tpu.memory_space<vmem>>, vector<2x128xf32>
    tpu.vector_store %arg6[%c0_14, %c0_15], %16 {strides = array<i32>} : memref<2x128xf32, #tpu.memory_space<vmem>>, vector<2x128xf32>,
    return
  }
  func.func @transform_0(%arg0: i32) -> (i32, i32) {
    %c0_i32 = arith.constant 0 : i32
    %c0_i32_0 = arith.constant 0 : i32
    return %arg0, %c0_i32 : i32, i32
  }
  func.func @transform_1(%arg0: i32) -> (i32, i32) {
    %c0_i32 = arith.constant 0 : i32
    %c0_i32_0 = arith.constant 0 : i32
    %c0_i32_1 = arith.constant 0 : i32
    return %c0_i32, %c0_i32_0 : i32, i32
  }
  func.func @transform_2(%arg0: i32) -> (i32, i32) {
    %c0_i32 = arith.constant 0 : i32
    %c0_i32_0 = arith.constant 0 : i32
    return %arg0, %c0_i32 : i32, i32
  }
  func.func @transform_3(%arg0: i32) -> (i32, i32) {
    %c0_i32 = arith.constant 0 : i32
    %c0_i32_0 = arith.constant 0 : i32
    %c0_i32_1 = arith.constant 0 : i32
    return %c0_i32, %c0_i32_0 : i32, i32
  }
  func.func @transform_4(%arg0: i32) -> (i32, i32) {
    %c0_i32 = arith.constant 0 : i32
    %c0_i32_0 = arith.constant 0 : i32
    return %arg0, %c0_i32 : i32, i32
  }
  func.func @transform_5(%arg0: i32) -> (i32, i32) {
    %c0_i32 = arith.constant 0 : i32
    %c0_i32_0 = arith.constant 0 : i32
    return %arg0, %c0_i32 : i32, i32
  }
}

module attributes {stable_mosaic.version = 11 : i64} {
  func.func @_fused_matmul_act_kernel(%arg0: i32, %arg1: memref<2x3456xbf16, #tpu.memory_space<vmem>>, %arg2: memref<3456x384xbf16, #tpu.memory_space<vmem>>, %arg3: memref<2x1152xbf16, #tpu.memory_space<vmem>>, %arg4: memref<1152x128xbf16, #tpu.memory_space<vmem>>, %arg5: memref<2x384xf32, #tpu.memory_space<vmem>>, %arg6: memref<2x128xf32, #tpu.memory_space<vmem>>) attributes {dimension_semantics = [#tpu.dimension_semantics<parallel>], iteration_bounds = array<i64: 1>, scalar_prefetch = 0 : i64, scratch_operands = 0 : i64, tpu.core_type = #tpu.core_type<tc>, window_params = [{transform_indices = @transform_0, window_bounds = array<i64: 2, 3456>}, {pipeline_mode = #tpu.pipeline_mode<synchronous>, transform_indices = @transform_1, window_bounds = array<i64: 3456, 384>}, {transform_indices = @transform_2, window_bounds = array<i64: 2, 1152>}, {pipeline_mode = #tpu.pipeline_mode<synchronous>, transform_indices = @transform_3, window_bounds = array<i64: 1152, 128>}, {transform_indices = @transform_4, window_bounds = array<i64: 2, 384>}, {transform_indices = @transform_5, window_bounds = array<i64: 2, 128>}]} {
    %c0 = arith.constant 0 : index
    %c0_0 = arith.constant 0 : index
    %0 = vector.load %arg1[%c0, %c0_0] : memref<2x3456xbf16, #tpu.memory_space<vmem>>, vector<2x3456xbf16>
    %c0_1 = arith.constant 0 : index
    %c0_2 = arith.constant 0 : index
    %1 = vector.load %arg2[%c0_1, %c0_2] : memref<3456x384xbf16, #tpu.memory_space<vmem>>, vector<3456x384xbf16>
    %cst = arith.constant dense<0.000000e+00> : vector<2x384xf32>
    %2 = tpu.matmul %0, %1, %cst {dimension_numbers = #tpu.dot_dimension_numbers<[1], [0], [0], [1], [0, 0, 1, 1], [], []>} : vector<2x3456xbf16>, vector<3456x384xbf16>, vector<2x384xf32> -> vector<2x384xf32>
    %cst_3 = arith.constant 0.000000e+00 : f32
    %3 = vector.broadcast %cst_3 : f32 to vector<2x384xf32>
    %4 = arith.cmpf oge, %2, %3 : vector<2x384xf32>
    %cst_4 = arith.constant 1.000000e-01 : f32
    %5 = vector.broadcast %cst_4 : f32 to vector<2x384xf32>
    %6 = arith.mulf %5, %2 : vector<2x384xf32>
    %7 = arith.select %4, %2, %6 : vector<2x384xi1>, vector<2x384xf32>
    %c0_5 = arith.constant 0 : index
    %c0_6 = arith.constant 0 : index
    %8 = vector.load %arg5[%c0_5, %c0_6] : memref<2x384xf32, #tpu.memory_space<vmem>>, vector<2x384xf32>
    tpu.vector_store %arg5[%c0_5, %c0_6], %7 {strides = array<i32>} : memref<2x384xf32, #tpu.memory_space<vmem>>, vector<2x384xf32>,
    %c0_7 = arith.constant 0 : index
    %c0_8 = arith.constant 0 : index
    %9 = vector.load %arg3[%c0_7, %c0_8] : memref<2x1152xbf16, #tpu.memory_space<vmem>>, vector<2x1152xbf16>
    %c0_9 = arith.constant 0 : index
    %c0_10 = arith.constant 0 : index
    %10 = vector.load %arg4[%c0_9, %c0_10] : memref<1152x128xbf16, #tpu.memory_space<vmem>>, vector<1152x128xbf16>
    %cst_11 = arith.constant dense<0.000000e+00> : vector<2x128xf32>
    %11 = tpu.matmul %9, %10, %cst_11 {dimension_numbers = #tpu.dot_dimension_numbers<[1], [0], [0], [1], [0, 0, 1, 1], [], []>} : vector<2x1152xbf16>, vector<1152x128xbf16>, vector<2x128xf32> -> vector<2x128xf32>
    %cst_12 = arith.constant 0.000000e+00 : f32
    %12 = vector.broadcast %cst_12 : f32 to vector<2x128xf32>
    %13 = arith.cmpf oge, %11, %12 : vector<2x128xf32>
    %cst_13 = arith.constant 1.000000e-01 : f32
    %14 = vector.broadcast %cst_13 : f32 to vector<2x128xf32>
    %15 = arith.mulf %14, %11 : vector<2x128xf32>
    %16 = arith.select %13, %11, %15 : vector<2x128xi1>, vector<2x128xf32>
    %c0_14 = arith.constant 0 : index
    %c0_15 = arith.constant 0 : index
    %17 = vector.load %arg6[%c0_14, %c0_15] : memref<2x128xf32, #tpu.memory_space<vmem>>, vector<2x128xf32>
    tpu.vector_store %arg6[%c0_14, %c0_15], %16 {strides = array<i32>} : memref<2x128xf32, #tpu.memory_space<vmem>>, vector<2x128xf32>,
    return
  }
  func.func @transform_0(%arg0: i32) -> (i32, i32) {
    %c0_i32 = arith.constant 0 : i32
    %c0_i32_0 = arith.constant 0 : i32
    return %arg0, %c0_i32 : i32, i32
  }
  func.func @transform_1(%arg0: i32) -> (i32, i32) {
    %c0_i32 = arith.constant 0 : i32
    %c0_i32_0 = arith.constant 0 : i32
    %c0_i32_1 = arith.constant 0 : i32
    return %c0_i32, %c0_i32_0 : i32, i32
  }
  func.func @transform_2(%arg0: i32) -> (i32, i32) {
    %c0_i32 = arith.constant 0 : i32
    %c0_i32_0 = arith.constant 0 : i32
    return %arg0, %c0_i32 : i32, i32
  }
  func.func @transform_3(%arg0: i32) -> (i32, i32) {
    %c0_i32 = arith.constant 0 : i32
    %c0_i32_0 = arith.constant 0 : i32
    %c0_i32_1 = arith.constant 0 : i32
    return %c0_i32, %c0_i32_0 : i32, i32
  }
  func.func @transform_4(%arg0: i32) -> (i32, i32) {
    %c0_i32 = arith.constant 0 : i32
    %c0_i32_0 = arith.constant 0 : i32
    return %arg0, %c0_i32 : i32, i32
  }
  func.func @transform_5(%arg0: i32) -> (i32, i32) {
    %c0_i32 = arith.constant 0 : i32
    %c0_i32_0 = arith.constant 0 : i32
    return %arg0, %c0_i32 : i32, i32
  }
}

</mosaic_0001>

<bundles_post_ra>
// kernel: custom-call.27
= control target key start
LH: loop header
LB: loop body
LE: loop exit
PB: predicated region body
PF: predicated region fallthrough
CT: control target
= control target key end

     0   :  { %5 = vsyncpa [#allocation6], 0  ;;  %s909_s0 = inlined_call_operand.vmem [shape: f32[2,3,3], index: 0, kind: input, shape index: {}]   ;;  %s910_s1 = inlined_call_operand.vmem [shape: f32[2,3,3], index: 1, kind: output, shape index: {0}]   ;;  %s911_s2 = inlined_call_operand.hbm [shape: s32[2,3], index: 2, kind: output, shape index: {1}]   ;;  %s912_s3 = inlined_call_operand.vmem [shape: s32[2,3], index: 3, kind: output, shape index: {2}]  }
   0x1   :  { %7 = vsyncpa [#allocation6 + $0x1], 0  ;;  %s726_s12 = smov 0   ;;  %s728_s13 = smov 0  }
   0x2   :  { %s730_s14 = smov 0   ;;  %s732_s15 = smov 0  }
   0x3 LB: > { %s747_s16 = sadd.s32 4294967295, %s698_s15   ;;  %s563_s17 = sadd.s32 4294967294, %s698_s15   ;;  %s698_s15 = sphi %s732_s15, %s920_s15   ;;  %s694_s14 = sphi %s730_s14, %s919_s14   ;;  %s690_s13 = sphi %s728_s13, %s918_s13   ;;  %s686_s12 = sphi %s726_s12, %s917_s12  }
   0x4   : > { %s751_s18 = sadd.s32 1, %s698_s15   ;;  %s17_s19 = sshrl.u32 %s698_s15, 3 }
   0x5   : > { %s18_s20 = sshrl.u32 %s751_s18, 3  ;;  %s22_s21 = sadd.s32 1, %s694_s14 }
   0x6   : > { %s19_s22 = ssub.s32 %s17_s19, %s18_s20  ;;  %p32_p0 = scmp.ne.s32.totalorder %s694_s14, %s690_s13 }
   0x7   : > { %p20_p1 = scmp.eq.s32.totalorder %s19_s22, 0  ;;  %p33_p2 = scmp.eq.s32.totalorder %s747_s16, 1 }
   0x8   : > { %p38_p3 = scmp.ne.s32.totalorder %s690_s13, %s686_s12  ;;  %p39_p4 = scmp.eq.s32.totalorder %s563_s17, 1 }
   0x9   : > { %s762_s23 = scalar_select %p20_p1, %s694_s14, %s22_s21  }
   0xa   : > { %p764_p5 = por %p33_p2, %p32_p0  ;;  %p768_p6 = por %p39_p4, %p38_p3 }
   0xb   : > { %p565_p7 = scmp.ge.s32.totalorder %s698_s15, 2 }
   0xc   : > { %s85_s26 = sand.u32 (!%p565_p7), 1, %s698_s15   ;;  %s567_s27 = sshll.u32 (!%p565_p7), %s698_s15, 2 }
   0xd   : > { %83 = sbr.rel (%p565_p7) target bundleno = 20 (0x14), region = 16  ;;  %s566_s28 = sshll.u32 (!%p565_p7), %s85_s26, 2 }
   0xe   : > { %s89_s4 = scalar_lea.vmem (!%p565_p7), %s909_s0, %s567_s27  ;;  %s87_s5 = scalar_lea.vmem (!%p565_p7), [#allocation1], %s566_s28 }
  0x12   : > { %v106_v0 = vld [vmem:[%s89_s4] sm:$0xf] }
  0x13   : > { %107 = vst [vmem:[%s87_s5] sm:$0xf] %v106_v0 }
  0x14 PF: > { %p568_p8 = scmp.ge.s32.totalorder %s698_s15, 1  ;;  %p124_p9 = scmp.lt.s32.totalorder %s698_s15, 3 }
  0x16   : > { %p125_p10 = pnand %p568_p8, %p124_p9 }
  0x18   : > { %128 = sbr.rel (%p125_p10) target bundleno = 446 (0x1be), region = 50 }
  0x1d   : > { %s135_s6 = sand.u32 1, %s747_s16   ;;  %s146_s7 = sand.u32 1, %s690_s13   ;;  %v169_v1 = vlaneseq  ;;  %v704_v4 = vmov 0  }
  0x1e   : > { %s784_s8 = sshll.u32 %s135_s6, 2  ;;  %s788_s9 = sshll.u32 %s146_s7, 1 }
  0x1f   : > { %v791_v2 = vshrl.u32 %v169_v1, 7  ;;  %s137_s10 = scalar_lea.vmem [#allocation1], %s784_s8  ;;  %s164_s11 = sand.u32 7, %s747_s16  }
  0x20   : > { %v158_v3 = vld [vmem:[%s137_s10] sm:$0xf]  ;;  %s796_s17 = scalar_lea.vmem [#allocation4], %s164_s11  ;;  %s141_s19 = scalar_lea.vmem [#allocation3], %s784_s8 }
  0x21   : > { %159 = vst [vmem:[#allocation0] sm:$0xf] %v158_v3  ;;  %173 = vst [vmem:[#allocation9] sm:$0xff] %v791_v2  ;;  %s148_s20 = scalar_lea.vmem [#allocation5], %s788_s9  ;;  %s154_s21 = scalar_lea.vmem [#allocation8], %s788_s9 }
  0x22   : > { %168 = vst [vmem:[%s796_s17] sm:$0x1] %v704_v4  ;;  %s802_s22 = scalar_lea.vmem [#allocation7], %s164_s11  ;;  %s804_s26 = smov 0  }
  0x28   : > { %v162_v5 = vld [vmem:[#allocation0] sm:$0xff] }
  0x29   : > { %163 = vst [vmem:[#allocation2] sm:$0xff] %v162_v5 }
  0x2a LB: >> { %vm189_vm0 = vcmp.lt.s32.totalorder %v791_v2, 3  ;;  %v811_v8 = vstv %s702_s26  ;;  %s230_s27 = ssub.s32 128, %s702_s26  ;;  %v236_v38 = vand.u32 127, %v169_v1  ;;  %v239_v40 = vld [vmem:[%s796_s17] ss:$0 sm:$0xff]  ;;  %s242_s28 = scalar_lea.vmem [#allocation2], %s702_s26  ;;  %s702_s26 = sphi %s804_s26, %s179_s26  }
  0x2b   : >> { %vm188_vm1 = vcmp.ge.s32.totalorder %v791_v2, %v811_v8  ;;  %s248_s30 = scalar_lea.vmem [#allocation9], %s702_s26  ;;  %vm268_vm15 = vcmp.gt.s32.totalorder %v791_v2, %v811_v8  ;;  %s179_s26 = sadd.s32 1, %s702_s26  }
  0x2c   : >> { %vm190_vm3 = vmand %vm188_vm1, %vm189_vm0  ;;  %vm260_vm12 = vcmp.gt.s32.totalorder %v236_v38, %v811_v8  ;;  %vm237_vm13 = vcmp.eq.s32.totalorder %v236_v38, %v811_v8  ;;  %v250_v42 = vld [vmem:[%s248_s30] ss:$0 sm:$0xff]  ;;  %p176_p11 = scmp.ge.s32.totalorder %s179_s26, 3  }
  0x2d   : >> { %vm272_vm1 = vmand %vm268_vm15, %vm237_vm13  ;;  %s913_s6 = sshrl.u32 (%p176_p11), %s747_s16, 3  ;;  %s577_s10 = sshll.u32 (%p176_p11), %s747_s16, 2 }
  0x2e   : > { %s578_s11 = sshll.u32 (%p176_p11), %s913_s6, 5 }
  0x30   : >> { %v184_v6 = vld [vmem:[#allocation2] sm:$0xff]  ;;  %v244_v41 = vld [vmem:[%s242_s28] ss:$0 sm:$0xff] }
  0x31   : >> { %v185_v7 = vand.u32 2147483647, %v184_v6 }
  0x33   : >> { %vm573_vm2 = vcmp.gt.f32.partialorder %v185_v7, -inf }
  0x34   : >> { %vm192_vm4 = vmand %vm190_vm3, %vm573_vm2 }
  0x35   : >> { %v193_v9 = vsel %vm192_vm4, %v791_v2, %v811_v8  ;;  %v194_v10 = vsel %vm192_vm4, %v185_v7, -inf }
  0x36   : >> { %v195_v11 = vrot.slane %v194_v10, 1  ;;  %v196_v12 = vrot.slane %v193_v9, 1 }
  0x38   : >> { %vm197_vm5 = vcmp.ge.f32.partialorder %v195_v11, %v194_v10  ;;  %v200_v13 = vrot.slane %v195_v11, 1  ;;  %v201_v14 = vrot.slane %v196_v12, 1 }
  0x39   : >> { %v198_v15 = vsel %vm197_vm5, %v195_v11, %v194_v10  ;;  %v199_v16 = vsel %vm197_vm5, %v196_v12, %v193_v9 }
  0x3a   : >> { %vm202_vm6 = vcmp.ge.f32.partialorder %v200_v13, %v198_v15  ;;  %v205_v17 = vrot.slane %v200_v13, 1  ;;  %v206_v18 = vrot.slane %v201_v14, 1 }
  0x3b   : >> { %v203_v19 = vsel %vm202_vm6, %v200_v13, %v198_v15  ;;  %v204_v20 = vsel %vm202_vm6, %v201_v14, %v199_v16 }
  0x3c   : >> { %vm207_vm7 = vcmp.ge.f32.partialorder %v205_v17, %v203_v19  ;;  %v210_v21 = vrot.slane %v205_v17, 1  ;;  %v211_v22 = vrot.slane %v206_v18, 1 }
  0x3d   : >> { %v208_v23 = vsel %vm207_vm7, %v205_v17, %v203_v19  ;;  %v209_v24 = vsel %vm207_vm7, %v206_v18, %v204_v20 }
  0x3e   : >> { %vm212_vm8 = vcmp.ge.f32.partialorder %v210_v21, %v208_v23  ;;  %v215_v25 = vrot.slane %v210_v21, 1  ;;  %v216_v26 = vrot.slane %v211_v22, 1 }
  0x3f   : >> { %v213_v27 = vsel %vm212_vm8, %v210_v21, %v208_v23  ;;  %v214_v28 = vsel %vm212_vm8, %v211_v22, %v209_v24 }
  0x40   : >> { %vm217_vm9 = vcmp.ge.f32.partialorder %v215_v25, %v213_v27  ;;  %v220_v29 = vrot.slane %v215_v25, 1  ;;  %v221_v30 = vrot.slane %v216_v26, 1 }
  0x41   : >> { %v218_v31 = vsel %vm217_vm9, %v215_v25, %v213_v27  ;;  %v219_v32 = vsel %vm217_vm9, %v216_v26, %v214_v28 }
  0x42   : >> { %vm222_vm10 = vcmp.ge.f32.partialorder %v220_v29, %v218_v31  ;;  %v225_v33 = vrot.slane %v220_v29, 1  ;;  %v226_v34 = vrot.slane %v221_v30, 1 }
  0x43   : >> { %v223_v35 = vsel %vm222_vm10, %v220_v29, %v218_v31  ;;  %v224_v36 = vsel %vm222_vm10, %v221_v30, %v219_v32 }
  0x44   : >> { %vm227_vm11 = vcmp.ge.f32.partialorder %v225_v33, %v223_v35 }
  0x45   : >> { %v229_v37 = vsel %vm227_vm11, %v226_v34, %v224_v36 }
  0x46   : >> { %231 = vrot.lane.b32.xlu0 %v229_v37, %s230_s27  ;;  %s849_s27 = scalar_lea.vmem (%p176_p11), %s910_s1, %s577_s10 }
  0xb8   : >> { %v232_v39 = vpop.permute.xlu0 %231 }
  0xb9   : >> { %582 = vpush %v232_v39 }
  0xea   : >> { %s583_s29 = spop %582 }
  0xeb   : >> { %v238_v43 = vstv %s583_s29  ;;  %s243_s4 = scalar_lea.vmem [#allocation2], %s583_s29  ;;  %s249_s5 = scalar_lea.vmem [#allocation9], %s583_s29 }
  0xec   : >> { %v245_v44 = vld [vmem:[%s243_s4] ss:$0 sm:$0xff]  ;;  %v240_v46 = vsel %vm237_vm13, %v238_v43, %v239_v40 }
  0xed   : >> { %v251_v45 = vld [vmem:[%s249_s5] ss:$0 sm:$0xff]  ;;  %246 = vst [vmem:[%s243_s4] sm:$0x1] %v244_v41  ;;  %vm254_vm14 = vcmp.ne.f32.partialorder %v245_v44, 0.0  ;;  %241 = vst [vmem:[%s796_s17] sm:$0x1] %v240_v46  ;;  %v261_v53 = vsel %vm260_vm12, %v245_v44, 0.0 }
  0xee   : >> { %252 = vst [vmem:[%s249_s5] sm:$0x1] %v250_v42  ;;  %247 = vst [vmem:[%s242_s28] sm:$0x1] %v245_v44  ;;  %s410_s4 = sshll.u32 (%p176_p11), %s148_s20, 4  ;;  %s357_s5 = scalar_lea.sflag (%p176_p11), [#allocation6], %s146_s7  ;;  %s411_s4 = int_to_ptr.vmem [resolvable:$true] %s410_s4 }
  0xef   : >> { %253 = vst [vmem:[%s248_s30] sm:$0x1] %v251_v45  ;;  %vm255_vm0 = vmand %vm237_vm13, %vm254_vm14  ;;  %s854_s30 = scalar_lea.hbm (%p176_p11), %s911_s2, %s578_s11  ;;  %s634_s6 = scalar_lea.vmem (%p176_p11), %s411_s4, 32 }
  0xf0   : >> { %v256_v47 = vsel %vm255_vm0, %v245_v44, 1.0  ;;  %p635_p12 = scmp.ne.s32.totalorder (%p176_p11), %s411_s4, %s634_s6  ;;  %s705_s17 = smov (%p176_p11), [#allocation5]  }
  0xf1   : >> { %v269_v48 = vsel %vm268_vm15, %v256_v47, 1.0  ;;  %s638_s10 = sshll.u32 (%p176_p11), %s705_s17, 4  ;;  %s639_s10 = int_to_ptr.vmem [resolvable:$false] %s638_s10 }
  0xf2   : >> { %632 = vrcp.f32 %v269_v48  ;;  %p636_p13 = pnand (%p176_p11), %p635_p12, %p764_p5  ;;  %s640_s26 = scalar_lea.vmem (%p176_p11), %s639_s10, 64 }
  0xf3   : > { %p641_p1 = scmp.lt.s32.totalorder (%p176_p11), %s411_s4, %s639_s10  ;;  %p642_p2 = scmp.lt.s32.totalorder (%p176_p11), %s640_s26, %s634_s6 }
  0xf4   : > { %v340_v59 = vld [vmem:[#allocation4] sm:$0x3] (%p176_p11)  ;;  %p637_p0 = pneg (%p176_p11), %p636_p13 }
  0xf5   : >> { %v265_v50 = vld [vmem:[#allocation2] sm:$0xff]  ;;  %343 = vst [vmem:[%s148_s20] sm:$0x3] (%p176_p11), %v340_v59  ;;  %p643_p3 = por (%p176_p11), %p642_p2, %p641_p1 }
  0xf6   : > { %v279_v57 = vld [vmem:[#allocation9] sm:$0xff] (%p176_p11) }
  0xf7   : > { %p644_p4 = pnand (%p176_p11), %p643_p3, %p637_p0 }
  0xff   : >> { %v633_v49 = vpop.eup %632 }
 0x100   : >> { %v271_v51 = vmul.f32 %v633_v49, %v265_v50 }
 0x102   : >> { %v273_v52 = vsel %vm272_vm1, %v271_v51, 0.0 }
 0x103   : >> { %274 = vadd.xlane.f32.xlu0 %v273_v52 }
 0x130   : > { %295 = vxpose.xlu0.b32.start.end [1/1] (short) (narrow) (%p176_p11), %v279_v57, 8 }
 0x18c   : >> { %v275_v54 = vpop.xlane.xlu0 %274 }
 0x18d   : >> { %v276_v55 = vmul.f32 %v275_v54, %v261_v53  ;;  %178 = sbr.rel (!%p176_p11) target bundleno = 42 (0x2a), region = 202 }
 0x18f   : >> { %v277_v56 = vsub.f32 %v271_v51, %v276_v55 }
 0x191   : >> { %278 = vst [vmem:[#allocation2] sm:$0xff] %v277_v56 }
 0x198   : > { %v332_v58 = vld [vmem:[#allocation2] sm:$0xf] }
 0x199   : > { %335 = vst [vmem:[%s141_s19] sm:$0xf] %v332_v58 }
 0x1a0   : > { %v383_v60 = vld [vmem:[%s141_s19] sm:$0xf] }
 0x1a1   : > { %647 = shalt.err (!%p644_p4)
}
 0x1a2   : > { %s648_s8 = scalar_lea.hbm %s854_s30, 32  ;;  %s652_s20 = scalar_lea.hbm %s911_s2, 32 }
 0x1a3   : > { %p649_p8 = scmp.ne.s32.totalorder %s854_s30, %s648_s8  ;;  %p653_p11 = scmp.lt.s32.totalorder %s854_s30, %s911_s2 }
 0x1a4   : > { %p654_p12 = scmp.lt.s32.totalorder %s652_s20, %s648_s8 }
 0x1a5   : > { %p650_p9 = pnand %p649_p8, %p764_p5 }
 0x1a6   : > { %p655_p13 = por %p654_p12, %p653_p11 }
 0x1a7   : > { %p651_p10 = pneg %p650_p9 }
 0x1a9   : > { %p656_p0 = pnand %p655_p13, %p651_p10 }
 0x1ab   : > { %659 = shalt.err (!%p656_p0)
}
 0x1ac   : > { %584 = dma.vmem_to_hbm [thread:$0]  (%p764_p5), %s411_s4, 32, %s854_s30, %s357_s5   ;;  %384 = vst [vmem:[%s849_s27] sm:$0xf] %v383_v60  ;;  %v311_v61 = vpop.trf.xlu0 }
 0x1ad   : > { %327 = vst [vmem:[%s802_s22] sm:$0x1] %v311_v61  ;;  %s916_s6 = sshrl.u32 (%p764_p5), %s747_s16, 3 }
 0x1ae   : > { %s579_s29 = sshll.u32 (%p764_p5), %s916_s6, 1 }
 0x1af   : > { %s419_s26 = scalar_lea.vmem (%p764_p5), %s912_s3, %s579_s29 }
 0x1b1   : > { %416 = sbr.rel (!%p764_p5) target bundleno = 446 (0x1be), region = 96 }
 0x1b4   : > { %v348_v62 = vld [vmem:[#allocation7] sm:$0x3] }
 0x1b5   : > { %351 = vst [vmem:[%s154_s21] sm:$0x3] %v348_v62 }
 0x1bc   : > { %v436_v63 = vld [vmem:[%s154_s21] sm:$0x3] }
 0x1bd   : > { %437 = vst [vmem:[%s419_s26] sm:$0x3] %v436_v63 }
 0x1be PF: > { %s465_s22 = sand.u32 1, %s686_s12   ;;  %p587_p5 = pnand %p565_p7, %p768_p6 }
 0x1bf   : > { %s466_s16 = scalar_lea.sflag [#allocation6], %s465_s22 }
 0x1c0   : > { %p588_p1 = pneg %p587_p5 }
 0x1c2   : > { %681 = dma.done.wait (%p588_p1), %s466_s16, 32  }
 0x1c3   : > { %683 = vsyncadd (%p588_p1), %s466_s16, 4294967264  ;;  %p10_p2 = scmp.ge.s32.totalorder %s751_s18, 4   ;;  %s917_s12 = smov %s690_s13 }
 0x1c4   : > { %s918_s13 = smov %s694_s14  ;;  %s919_s14 = smov %s762_s23 }
 0x1c5   : > { %s920_s15 = smov %s751_s18  ;;  %12 = sbr.rel (!%p10_p2) target bundleno = 3 (0x3), region = 213 }
 0x1ca   :  { %478 = vsyncpa [#allocation6], 1 }
 0x1cb   :  { %480 = vsyncpa [#allocation6 + $0x1], 1 }

// kernel: custom-call.23
= control target key start
LH: loop header
LB: loop body
LE: loop exit
PB: predicated region body
PF: predicated region fallthrough
CT: control target
= control target key end

     0   :  { %s349_s6 = smov 0   ;;  %s351_s7 = smov 0   ;;  %s396_s0 = inlined_call_operand.vmem [shape: f32[2,1,3,3], index: 0, kind: input, shape index: {}]   ;;  %s397_s1 = inlined_call_operand.vmem [shape: f32[2,1,3,3], index: 1, kind: output, shape index: {}]  }
   0x1   :  { %s353_s8 = smov 0  }
   0x2 LB: > { %s275_s9 = sadd.s32 4294967295, %s336_s8   ;;  %s33_s10 = sadd.s32 1, %s332_s7  ;;  %s336_s8 = sphi %s353_s8, %s7_s8   ;;  %s332_s7 = sphi %s351_s7, %s399_s7   ;;  %s328_s6 = sphi %s349_s6, %s398_s6  }
   0x3   : > { %p35_p0 = scmp.ge.s32.totalorder %s33_s10, 2  ;;  %p277_p1 = scmp.ge.s32.totalorder %s336_s8, 2 }
   0x4   : > { %s49_s11 = sand.u32 (!%p277_p1), 1, %s336_s8   ;;  %s279_s12 = sshll.u32 (!%p277_p1), %s332_s7, 2 }
   0x5   : > { %s401_s10 = smov (%p35_p0, %s33_s10), 0  ;;  %47 = sbr.rel (%p277_p1) target bundleno = 12 (0xc), region = 16 }
   0x6   : > { %s278_s13 = sshll.u32 (!%p277_p1), %s49_s11, 2  ;;  %s56_s16 = scalar_lea.vmem (!%p277_p1), %s396_s0, %s279_s12 }
   0x7   : > { %s51_s17 = scalar_lea.vmem (!%p277_p1), [#allocation1], %s278_s13 }
   0xa   : > { %v73_v0 = vld [vmem:[%s56_s16] sm:$0xf] }
   0xb   : > { %74 = vst [vmem:[%s51_s17] sm:$0xf] %v73_v0 }
   0xc PF: > { %p280_p2 = scmp.ge.s32.totalorder %s336_s8, 1  ;;  %p91_p3 = scmp.lt.s32.totalorder %s336_s8, 3 }
   0xe   : > { %p92_p4 = pnand %p280_p2, %p91_p3 }
  0x10   : > { %95 = sbr.rel (%p92_p4) target bundleno = 500 (0x1f4), region = 50 }
  0x15   : > { %s376_s18 = sand.u32 1, %s275_s9   ;;  %v114_v1 = vlaneseq  ;;  %v338_v11 = vmov -1.0   ;;  %s284_s22 = sshll.u32 %s328_s6, 2 }
  0x16   : > { %s281_s19 = sshll.u32 %s376_s18, 2  ;;  %s182_s25 = scalar_lea.vmem %s397_s1, %s284_s22 }
  0x17   : > { %s104_s20 = scalar_lea.vmem [#allocation1], %s281_s19  ;;  %v115_v3 = vand.u32 127, %v114_v1  ;;  %v118_v4 = vshrl.u32 %v114_v1, 7  ;;  %s108_s21 = scalar_lea.vmem [#allocation3], %s281_s19 }
  0x18   : > { %v112_v2 = vld [vmem:[%s104_s20] sm:$0xf] }
  0x19   : > { %113 = vst [vmem:[#allocation0] sm:$0xf] %v112_v2  ;;  %vm116_vm0 = vcmp.lt.s32.totalorder %v115_v3, 3  ;;  %vm125_vm1 = vcmp.le.s32.totalorder %v118_v4, %v115_v3  ;;  %vm120_vm2 = vcmp.eq.s32.totalorder %v118_v4, %v115_v3  ;;  %vm139_vm4 = vcmp.eq.s32.totalorder %v115_v3, 2 }
  0x1a   : > { %vm126_vm3 = vmand %vm125_vm1, %vm116_vm0  ;;  %vm136_vm5 = vcmp.eq.s32.totalorder %v115_v3, %v118_v4  ;;  %v140_v12 = vsel %vm139_vm4, 1.0, %v338_v11  ;;  %vm147_vm6 = vcmp.eq.s32.totalorder %v115_v3, 1  ;;  %vm156_vm7 = vcmp.eq.s32.totalorder %v115_v3, 0 }
  0x1b   : > { %v141_v13 = vsel %vm136_vm5, %v140_v12, 0.0 }
  0x20   : > { %v121_v5 = vld [vmem:[#allocation0] sm:$0xff] }
  0x21   : > { %v122_v6 = vsel %vm120_vm2, %v121_v5, 0.0  ;;  %v127_v7 = vsel %vm126_vm3, %v121_v5, 0.0 }
  0x22   : > { %123 = vadd.xlane.f32.xlu0 %v122_v6 }
  0xab   : > { %v124_v8 = vpop.xlane.xlu0 %123 }
  0xac   : > { %312 = vrcp.f32 %v124_v8  ;;  %vm163_vm8 = vweird.f32 %v124_v8 }
  0xb9   : > { %v313_v9 = vpop.eup %312 }
  0xba   : > { %v129_v10 = vmul.f32 %v313_v9, %v127_v7 }
  0xbc   : > { %130 = vst [vmem:[#allocation4] sm:$0xff] %v129_v10 }
  0xc3   : > { %v143_v14 = vld [vmem:[#allocation4 + $0x1] ss:$0 sm:$0xff]  ;;  %v152_v17 = vld [vmem:[#allocation4] ss:$0 sm:$0xff] }
  0xc4   : > { %v144_v15 = vxor.u32 2147483648, %v143_v14  ;;  %v153_v19 = vxor.u32 2147483648, %v152_v17 }
  0xc6   : > { %v148_v16 = vmul.f32 %v144_v15, %v141_v13 }
  0xc8   : > { %149 = vadd.xlane.f32.xlu0 %v148_v16 }
 0x151   : > { %v150_v18 = vpop.xlane.xlu0 %149 }
 0x152   : > { %v151_v20 = vsel %vm147_vm6, %v150_v18, %v141_v13 }
 0x153   : > { %v157_v21 = vmul.f32 %v153_v19, %v151_v20 }
 0x155   : > { %158 = vadd.xlane.f32.xlu1 %v157_v21 }
 0x1de   : > { %v159_v22 = vpop.xlane.xlu1 %158 }
 0x1df   : > { %v160_v23 = vsel %vm156_vm7, %v159_v22, %v151_v20 }
 0x1e0   : > { %v162_v24 = vmul.f32 %v313_v9, %v160_v23 }
 0x1e2   : > { %v164_v25 = vsel %vm163_vm8, %v160_v23, %v162_v24 }
 0x1e3   : > { %165 = vst [vmem:[#allocation2] sm:$0xff] %v164_v25 }
 0x1ea   : > { %v170_v26 = vld [vmem:[#allocation2] sm:$0xf] }
 0x1eb   : > { %173 = vst [vmem:[%s108_s21] sm:$0xf] %v170_v26 }
 0x1f2   : > { %v199_v27 = vld [vmem:[%s108_s21] sm:$0xf] }
 0x1f3   : > { %200 = vst [vmem:[%s182_s25] sm:$0xf] %v199_v27 }
 0x1f4 PF: > { %s7_s8 = sadd.s32 1, %s336_s8   ;;  %s398_s6 = smov %s332_s7 }
 0x1f5   : > { %p4_p5 = scmp.ge.s32.totalorder %s7_s8, 4   ;;  %s399_s7 = smov %s401_s10 }
 0x1f7   :  { %6 = sbr.rel (!%p4_p5) target bundleno = 2 (0x2), region = 111 }

// kernel: custom-call.24
= control target key start
LH: loop header
LB: loop body
LE: loop exit
PB: predicated region body
PF: predicated region fallthrough
CT: control target
= control target key end

     0   :  { %s350_s6 = smov 0   ;;  %s352_s7 = smov 0   ;;  %s397_s0 = inlined_call_operand.vmem [shape: f32[2,1,3,3], index: 0, kind: input, shape index: {}]   ;;  %s398_s1 = inlined_call_operand.vmem [shape: f32[2,1,3,3], index: 1, kind: output, shape index: {}]  }
   0x1   :  { %s354_s8 = smov 0  }
   0x2 LB: > { %s276_s9 = sadd.s32 4294967295, %s337_s8   ;;  %s33_s10 = sadd.s32 1, %s333_s7  ;;  %s337_s8 = sphi %s354_s8, %s7_s8   ;;  %s333_s7 = sphi %s352_s7, %s400_s7   ;;  %s329_s6 = sphi %s350_s6, %s399_s6  }
   0x3   : > { %p35_p0 = scmp.ge.s32.totalorder %s33_s10, 2  ;;  %p278_p1 = scmp.ge.s32.totalorder %s337_s8, 2 }
   0x4   : > { %s49_s11 = sand.u32 (!%p278_p1), 1, %s337_s8   ;;  %s280_s12 = sshll.u32 (!%p278_p1), %s333_s7, 2 }
   0x5   : > { %s402_s10 = smov (%p35_p0, %s33_s10), 0  ;;  %47 = sbr.rel (%p278_p1) target bundleno = 12 (0xc), region = 16 }
   0x6   : > { %s279_s13 = sshll.u32 (!%p278_p1), %s49_s11, 2  ;;  %s56_s16 = scalar_lea.vmem (!%p278_p1), %s397_s0, %s280_s12 }
   0x7   : > { %s51_s17 = scalar_lea.vmem (!%p278_p1), [#allocation1], %s279_s13 }
   0xa   : > { %v73_v0 = vld [vmem:[%s56_s16] sm:$0xf] }
   0xb   : > { %74 = vst [vmem:[%s51_s17] sm:$0xf] %v73_v0 }
   0xc PF: > { %p281_p2 = scmp.ge.s32.totalorder %s337_s8, 1  ;;  %p91_p3 = scmp.lt.s32.totalorder %s337_s8, 3 }
   0xe   : > { %p92_p4 = pnand %p281_p2, %p91_p3 }
  0x10   : > { %95 = sbr.rel (%p92_p4) target bundleno = 500 (0x1f4), region = 50 }
  0x15   : > { %s377_s18 = sand.u32 1, %s276_s9   ;;  %v114_v1 = vlaneseq  ;;  %v339_v11 = vmov -1.0   ;;  %s285_s22 = sshll.u32 %s329_s6, 2 }
  0x16   : > { %s282_s19 = sshll.u32 %s377_s18, 2  ;;  %s183_s25 = scalar_lea.vmem %s398_s1, %s285_s22 }
  0x17   : > { %s104_s20 = scalar_lea.vmem [#allocation1], %s282_s19  ;;  %v115_v3 = vand.u32 127, %v114_v1  ;;  %v118_v4 = vshrl.u32 %v114_v1, 7  ;;  %s108_s21 = scalar_lea.vmem [#allocation3], %s282_s19 }
  0x18   : > { %v112_v2 = vld [vmem:[%s104_s20] sm:$0xf] }
  0x19   : > { %113 = vst [vmem:[#allocation0] sm:$0xf] %v112_v2  ;;  %vm116_vm0 = vcmp.lt.s32.totalorder %v115_v3, 3  ;;  %vm125_vm1 = vcmp.ge.s32.totalorder %v118_v4, %v115_v3  ;;  %vm120_vm2 = vcmp.eq.s32.totalorder %v118_v4, %v115_v3  ;;  %vm139_vm4 = vcmp.eq.s32.totalorder %v115_v3, 0 }
  0x1a   : > { %vm126_vm3 = vmand %vm125_vm1, %vm116_vm0  ;;  %vm136_vm5 = vcmp.eq.s32.totalorder %v115_v3, %v118_v4  ;;  %v140_v12 = vsel %vm139_vm4, 1.0, %v339_v11  ;;  %vm147_vm6 = vcmp.eq.s32.totalorder %v115_v3, 1  ;;  %vm157_vm7 = vcmp.eq.s32.totalorder %v115_v3, 2 }
  0x1b   : > { %v141_v13 = vsel %vm136_vm5, %v140_v12, 0.0 }
  0x20   : > { %v121_v5 = vld [vmem:[#allocation0] sm:$0xff] }
  0x21   : > { %v122_v6 = vsel %vm120_vm2, %v121_v5, 0.0  ;;  %v127_v7 = vsel %vm126_vm3, %v121_v5, 0.0 }
  0x22   : > { %123 = vadd.xlane.f32.xlu0 %v122_v6 }
  0xab   : > { %v124_v8 = vpop.xlane.xlu0 %123 }
  0xac   : > { %313 = vrcp.f32 %v124_v8  ;;  %vm164_vm8 = vweird.f32 %v124_v8 }
  0xb9   : > { %v314_v9 = vpop.eup %313 }
  0xba   : > { %v129_v10 = vmul.f32 %v314_v9, %v127_v7 }
  0xbc   : > { %130 = vst [vmem:[#allocation4] sm:$0xff] %v129_v10 }
  0xc3   : > { %v143_v14 = vld [vmem:[#allocation4 + $0x1] ss:$0 sm:$0xff]  ;;  %v153_v17 = vld [vmem:[#allocation4 + $0x2] ss:$0 sm:$0xff] }
  0xc4   : > { %v144_v15 = vxor.u32 2147483648, %v143_v14  ;;  %v154_v19 = vxor.u32 2147483648, %v153_v17 }
  0xc6   : > { %v148_v16 = vmul.f32 %v144_v15, %v141_v13 }
  0xc8   : > { %149 = vadd.xlane.f32.xlu0 %v148_v16 }
 0x151   : > { %v150_v18 = vpop.xlane.xlu0 %149 }
 0x152   : > { %v151_v20 = vsel %vm147_vm6, %v150_v18, %v141_v13 }
 0x153   : > { %v158_v21 = vmul.f32 %v154_v19, %v151_v20 }
 0x155   : > { %159 = vadd.xlane.f32.xlu1 %v158_v21 }
 0x1de   : > { %v160_v22 = vpop.xlane.xlu1 %159 }
 0x1df   : > { %v161_v23 = vsel %vm157_vm7, %v160_v22, %v151_v20 }
 0x1e0   : > { %v163_v24 = vmul.f32 %v314_v9, %v161_v23 }
 0x1e2   : > { %v165_v25 = vsel %vm164_vm8, %v161_v23, %v163_v24 }
 0x1e3   : > { %166 = vst [vmem:[#allocation2] sm:$0xff] %v165_v25 }
 0x1ea   : > { %v171_v26 = vld [vmem:[#allocation2] sm:$0xf] }
 0x1eb   : > { %174 = vst [vmem:[%s108_s21] sm:$0xf] %v171_v26 }
 0x1f2   : > { %v200_v27 = vld [vmem:[%s108_s21] sm:$0xf] }
 0x1f3   : > { %201 = vst [vmem:[%s183_s25] sm:$0xf] %v200_v27 }
 0x1f4 PF: > { %s7_s8 = sadd.s32 1, %s337_s8   ;;  %s399_s6 = smov %s333_s7 }
 0x1f5   : > { %p4_p5 = scmp.ge.s32.totalorder %s7_s8, 4   ;;  %s400_s7 = smov %s402_s10 }
 0x1f7   :  { %6 = sbr.rel (!%p4_p5) target bundleno = 2 (0x2), region = 112 }

// kernel: mul.17
= control target key start
LH: loop header
LB: loop body
LE: loop exit
PB: predicated region body
PF: predicated region fallthrough
CT: control target
= control target key end

     0   :  { %s67_s8 = smov 80   ;;  %vm8_vm0 = vcmask 130048   ;;  %s68_s11 = smov 96   ;;  %s118_s0 = inlined_call_operand.vmem [shape: f32[512], index: 0, kind: input, shape index: {}]   ;;  %s119_s1 = inlined_call_operand.vmem [shape: f32[2,16,16], index: 1, kind: output, shape index: {}]  }
   0x1   :  { %v5_v0 = vld [vmem:[%s118_s0] sm:$0xf]  ;;  %s66_s0 = smov 112   ;;  %s69_s12 = smov 64  }
   0x2   :  { %6 = vst [vmem:[#allocation0] sm:$0xf] %v5_v0  ;;  %s70_s13 = smov 48   ;;  %s71_s14 = smov 32  }
   0x3   :  { %s72_s15 = smov 16  }
   0x9   :  { %v10_v1 = vld [vmem:[#allocation0] sm:$0xf]  }
   0xa   :  { %v22_v2 = vld [vmem:[#allocation0] sm:$0xf]   ;;  %11 = vrot.lane.b32.xlu0 %v10_v1, %s66_s0 }
   0xb   :  { %23 = vrot.lane.b32.xlu1 %v22_v2, %s67_s8  ;;  %v16_v3 = vld [vmem:[#allocation0] sm:$0xf]  }
   0xc   :  { %v28_v4 = vld [vmem:[#allocation0] sm:$0xf]  }
   0xd   :  { %v7_v5 = vld [vmem:[#allocation0] sm:$0xf]  }
   0xe   :  { %9 = vst.msk [vmem:[%s119_s1] ss:$8 sm:$0xf] %vm8_vm0, %v7_v5   ;;  %17 = vrot.lane.b32.xlu0 %v16_v3, %s68_s11  ;;  %v34_v6 = vld [vmem:[#allocation0] sm:$0xf]  }
   0xf   :  { %29 = vrot.lane.b32.xlu1 %v28_v4, %s69_s12  ;;  %v40_v7 = vld [vmem:[#allocation0] sm:$0xf]  }
  0x10   :  { %v46_v8 = vld [vmem:[#allocation0] sm:$0xf]  }
  0x12   :  { %35 = vrot.lane.b32.xlu0 %v34_v6, %s70_s13 }
  0x13   :  { %41 = vrot.lane.b32.xlu1 %v40_v7, %s71_s14 }
  0x16   :  { %47 = vrot.lane.b32.xlu0 %v46_v8, %s72_s15 }
  0x7c   :  { %v12_v9 = vpop.permute.xlu0 %11  }
  0x7d   :  { %v24_v10 = vpop.permute.xlu1 %23   ;;  %52 = vst.msk [vmem:[%s119_s1 + $0x1] ss:$8 sm:$0xf] %vm8_vm0, %v12_v9  }
  0x7e   :  { %54 = vst.msk [vmem:[%s119_s1 + $0x3] ss:$8 sm:$0xf] %vm8_vm0, %v24_v10  }
  0x80   :  { %v18_v11 = vpop.permute.xlu0 %17  }
  0x81   :  { %v30_v12 = vpop.permute.xlu1 %29   ;;  %53 = vst.msk [vmem:[%s119_s1 + $0x2] ss:$8 sm:$0xf] %vm8_vm0, %v18_v11  }
  0x82   :  { %55 = vst.msk [vmem:[%s119_s1 + $0x4] ss:$8 sm:$0xf] %vm8_vm0, %v30_v12  }
  0x84   :  { %v36_v13 = vpop.permute.xlu0 %35  }
  0x85   :  { %v42_v14 = vpop.permute.xlu1 %41   ;;  %56 = vst.msk [vmem:[%s119_s1 + $0x5] ss:$8 sm:$0xf] %vm8_vm0, %v36_v13  }
  0x86   :  { %57 = vst.msk [vmem:[%s119_s1 + $0x6] ss:$8 sm:$0xf] %vm8_vm0, %v42_v14  }
  0x88   :  { %v48_v15 = vpop.permute.xlu0 %47  }
  0x89   :  { %58 = vst.msk [vmem:[%s119_s1 + $0x7] ss:$8 sm:$0xf] %vm8_vm0, %v48_v15  }

// kernel: kbnet_encoder_forward.9
= control target key start
LH: loop header
LB: loop body
LE: loop exit
PB: predicated region body
PF: predicated region fallthrough
CT: control target
= control target key end

     0   :  { %vm356_vm0 = vcmask 1044480   ;;  %vm357_vm1 = vcmask 1045504   ;;  %vm1237_vm2 = vcmask 1043456   ;;  %v2197_v1 = vmov 65535   ;;  %s3005_s1 = inlined_call_operand.vmem [shape: bf16[27,48], index: 1, kind: input, shape index: {}]   ;;  %s3006_s3 = inlined_call_operand.vmem [shape: bf16[9,16], index: 3, kind: input, shape index: {}]   ;;  %s3007_s2 = inlined_call_operand.vmem [shape: bf16[512,9], index: 2, kind: input, shape index: {}]   ;;  %s3008_s0 = inlined_call_operand.vmem [shape: bf16[512,27], index: 0, kind: input, shape index: {}]   ;;  %s3009_s5 = inlined_call_operand.vmem [shape: f32[512,16], index: 5, kind: output, shape index: {1}]   ;;  %s3010_s4 = inlined_call_operand.vmem [shape: f32[512,48], index: 4, kind: output, shape index: {0}]  }
   0x1   :  { %v2130_v0 = vld [vmem:[%s3005_s1 + $0x8] sm:$0x3f]   ;;  %v358_v2 = vsel %vm356_vm0, 4294967295, %v2197_v1  ;;  %v1238_v3 = vsel %vm1237_vm2, 4294967295, %v2197_v1  ;;  %v2131_v5 = vld [vmem:[%s3006_s3] sm:$0x1f]  }
   0x2   :  { %v359_v4 = vsel %vm357_vm1, %v358_v2, 0  ;;  %v1239_v6 = vsel %vm356_vm0, %v1238_v3, 0  ;;  %v2132_v8 = vld [vmem:[%s3007_s2] sm:$0xff]   ;;  %vm1140_vm3 = vcmask 72704   ;;  %v2134_v11 = vld [vmem:[%s3007_s2 + $0x8] sm:$0xff]   ;;  %vm259_vm4 = vcmask 220160  }
   0x3   :  { %v361_v7 = vand.u32 %v2130_v0, %v359_v4  ;;  %v1241_v9 = vand.u32 %v2131_v5, %v1239_v6  ;;  %v2133_v10 = vld [vmem:[%s3005_s1] sm:$0xff]   ;;  %2065 = vmatprep.mubr.msk.bf16.mxu1 %vm1140_vm3, %v2132_v8  ;;  %v2137_v13 = vld [vmem:[%s3007_s2 + $0x10] sm:$0xff]   ;;  %v2136_v14 = vld [vmem:[%s3008_s0 + $0x8] sm:$0xff]   ;;  %vm1724_vm6 = vcmask 130048   ;;  %vm844_vm9 = vcmask 392192  }
   0x4   :  { %v2135_v12 = vld [vmem:[%s3008_s0] sm:$0xff]   ;;  %v2139_v15 = vld [vmem:[%s3008_s0 + $0x10] sm:$0xff]   ;;  %v2138_v16 = vld [vmem:[%s3007_s2 + $0x18] sm:$0xff]  }
   0x5   :  { %1995 = vmatprep.subr.bf16.mxu0 %v361_v7  ;;  %2063 = vmatprep.subr.bf16.mxu1 %v1241_v9  ;;  %v2141_v17 = vld [vmem:[%s3007_s2 + $0x20] sm:$0xff]   ;;  %v2140_v18 = vld [vmem:[%s3008_s0 + $0x18] sm:$0xff]   ;;  %v2142_v20 = vld [vmem:[%s3007_s2 + $0x28] sm:$0xff]  }
   0x6   :  { %1996 = vmatpush3.bf16.msra.mxu0 %v361_v7  ;;  %2064 = vmatpush3.bf16.msra.mxu1 %v1241_v9  ;;  %v2143_v19 = vld [vmem:[%s3008_s0 + $0x20] sm:$0xff]   ;;  %v2145_v21 = vld [vmem:[%s3007_s2 + $0x30] sm:$0xff]   ;;  %v2144_v22 = vld [vmem:[%s3008_s0 + $0x28] sm:$0xff]  }
   0x7   :  { %1997 = vmatprep.subr.bf16.mxu0 %v2133_v10  ;;  %1999 = vmatprep.mubr.msk.bf16.mxu0 %vm259_vm4, %v2135_v12  ;;  %v2147_v23 = vld [vmem:[%s3008_s0 + $0x30] sm:$0xff]   ;;  %v2146_v24 = vld [vmem:[%s3007_s2 + $0x38] sm:$0xff]   ;;  %v2149_v25 = vld [vmem:[%s3007_s2 + $0x40] sm:$0xff]  }
   0x8   :  { %v2148_v26 = vld [vmem:[%s3008_s0 + $0x38] sm:$0xff]   ;;  %v2151_v27 = vld [vmem:[%s3008_s0 + $0x40] sm:$0xff]   ;;  %v2150_v28 = vld [vmem:[%s3007_s2 + $0x48] sm:$0xff]  }
   0x9   :  { %2066 = vmatmul.mubr.msk.bf16.vlgmr.msra.gmra.mxu1 %vm1140_vm3, %v2134_v11  ;;  %v2153_v29 = vld [vmem:[%s3007_s2 + $0x50] sm:$0xff]   ;;  %v2152_v30 = vld [vmem:[%s3008_s0 + $0x48] sm:$0xff]   ;;  %v2154_v32 = vld [vmem:[%s3007_s2 + $0x58] sm:$0xff]  }
   0xa   :  { %1998 = vmatpush3.bf16.msra.mxu0 %v2133_v10  ;;  %2069 = vmatprep.mubr.msk.bf16.mxu1 %vm1140_vm3, %v2137_v13  ;;  %v2155_v31 = vld [vmem:[%s3008_s0 + $0x50] sm:$0xff]   ;;  %v2157_v33 = vld [vmem:[%s3007_s2 + $0x60] sm:$0xff]   ;;  %v2156_v34 = vld [vmem:[%s3008_s0 + $0x58] sm:$0xff]  }
   0xb   :  { %v2159_v35 = vld [vmem:[%s3008_s0 + $0x60] sm:$0xff]   ;;  %v2158_v36 = vld [vmem:[%s3007_s2 + $0x68] sm:$0xff]   ;;  %v2161_v37 = vld [vmem:[%s3007_s2 + $0x70] sm:$0xff]  }
   0xc   :  { %v2160_v38 = vld [vmem:[%s3008_s0 + $0x68] sm:$0xff]   ;;  %v2163_v39 = vld [vmem:[%s3008_s0 + $0x70] sm:$0xff]   ;;  %v2162_v40 = vld [vmem:[%s3007_s2 + $0x78] sm:$0xff]  }
   0xd   :  { %2000 = vmatmul.mubr.msk.bf16.vlgmr.msra.gmra.mxu0 %vm259_vm4, %v2136_v14  ;;  %v2165_v41 = vld [vmem:[%s3007_s2 + $0x80] sm:$0xff]   ;;  %v2164_v42 = vld [vmem:[%s3008_s0 + $0x78] sm:$0xff]   ;;  %v2166_v44 = vld [vmem:[%s3007_s2 + $0x88] sm:$0xff]  }
   0xe   :  { %2003 = vmatprep.mubr.msk.bf16.mxu0 %vm259_vm4, %v2139_v15  ;;  %v2167_v43 = vld [vmem:[%s3008_s0 + $0x80] sm:$0xff]   ;;  %v2169_v45 = vld [vmem:[%s3007_s2 + $0x90] sm:$0xff]   ;;  %v2168_v46 = vld [vmem:[%s3008_s0 + $0x88] sm:$0xff]  }
   0xf   :  { %v2171_v47 = vld [vmem:[%s3008_s0 + $0x90] sm:$0xff]   ;;  %v2170_v48 = vld [vmem:[%s3007_s2 + $0x98] sm:$0xff]   ;;  %v2173_v49 = vld [vmem:[%s3007_s2 + $0xa0] sm:$0xff]  }
  0x10   :  { %v2172_v50 = vld [vmem:[%s3008_s0 + $0x98] sm:$0xff]   ;;  %v2175_v51 = vld [vmem:[%s3008_s0 + $0xa0] sm:$0xff]   ;;  %v2174_v52 = vld [vmem:[%s3007_s2 + $0xa8] sm:$0xff]  }
  0x11   :  { %2070 = vmatmul.mubr.msk.bf16.gmra.mxu1 %vm1140_vm3, %v2138_v16  ;;  %v2177_v53 = vld [vmem:[%s3007_s2 + $0xb0] sm:$0xff]   ;;  %v2176_v54 = vld [vmem:[%s3008_s0 + $0xa8] sm:$0xff]   ;;  %v2178_v56 = vld [vmem:[%s3007_s2 + $0xb8] sm:$0xff]  }
  0x12   :  { %2073 = vmatprep.mubr.msk.bf16.mxu1 %vm1140_vm3, %v2141_v17  ;;  %v2179_v55 = vld [vmem:[%s3008_s0 + $0xb0] sm:$0xff]   ;;  %v2181_v57 = vld [vmem:[%s3007_s2 + $0xc0] sm:$0xff]   ;;  %v2180_v58 = vld [vmem:[%s3008_s0 + $0xb8] sm:$0xff]  }
  0x13   :  { %v2183_v59 = vld [vmem:[%s3008_s0 + $0xc0] sm:$0xff]   ;;  %v2182_v60 = vld [vmem:[%s3007_s2 + $0xc8] sm:$0xff]   ;;  %v2185_v61 = vld [vmem:[%s3007_s2 + $0xd0] sm:$0xff]  }
  0x14   :  { %v2184_v62 = vld [vmem:[%s3008_s0 + $0xc8] sm:$0xff]   ;;  %v2187_v63 = vld [vmem:[%s3008_s0 + $0xd0] sm:$0xff]   ;;  %v2186_v0 = vld [vmem:[%s3007_s2 + $0xd8] sm:$0xff]  }
  0x15   :  { %2004 = vmatmul.mubr.msk.bf16.gmra.mxu0 %vm259_vm4, %v2140_v18  ;;  %v2189_v1 = vld [vmem:[%s3007_s2 + $0xe0] sm:$0xff]   ;;  %v2188_v2 = vld [vmem:[%s3008_s0 + $0xd8] sm:$0xff]   ;;  %v2190_v4 = vld [vmem:[%s3007_s2 + $0xe8] sm:$0xff]  }
  0x16   :  { %2007 = vmatprep.mubr.msk.bf16.mxu0 %vm259_vm4, %v2143_v19  ;;  %v2191_v3 = vld [vmem:[%s3008_s0 + $0xe0] sm:$0xff]   ;;  %v2193_v5 = vld [vmem:[%s3007_s2 + $0xf0] sm:$0xff]   ;;  %v2192_v6 = vld [vmem:[%s3008_s0 + $0xe8] sm:$0xff]  }
  0x17   :  { %v2195_v7 = vld [vmem:[%s3008_s0 + $0xf0] sm:$0xff]   ;;  %v2194_v8 = vld [vmem:[%s3007_s2 + $0xf8] sm:$0xff]  }
  0x18   :  { %v2196_v9 = vld [vmem:[%s3008_s0 + $0xf8] sm:$0xff]  }
  0x19   :  { %2074 = vmatmul.mubr.msk.bf16.gmra.mxu1 %vm1140_vm3, %v2142_v20 }
  0x1a   :  { %2077 = vmatprep.mubr.msk.bf16.mxu1 %vm1140_vm3, %v2145_v21 }
  0x1d   :  { %2008 = vmatmul.mubr.msk.bf16.gmra.mxu0 %vm259_vm4, %v2144_v22 }
  0x1e   :  { %2011 = vmatprep.mubr.msk.bf16.mxu0 %vm259_vm4, %v2147_v23 }
  0x21   :  { %2078 = vmatmul.mubr.msk.bf16.gmra.mxu1 %vm1140_vm3, %v2146_v24 }
  0x22   :  { %2081 = vmatprep.mubr.msk.bf16.mxu1 %vm1140_vm3, %v2149_v25 }
  0x25   :  { %2012 = vmatmul.mubr.msk.bf16.gmra.mxu0 %vm259_vm4, %v2148_v26 }
  0x26   :  { %2015 = vmatprep.mubr.msk.bf16.mxu0 %vm259_vm4, %v2151_v27 }
  0x29   :  { %2082 = vmatmul.mubr.msk.bf16.gmra.mxu1 %vm1140_vm3, %v2150_v28 }
  0x2a   :  { %2085 = vmatprep.mubr.msk.bf16.mxu1 %vm1140_vm3, %v2153_v29 }
  0x2d   :  { %2016 = vmatmul.mubr.msk.bf16.gmra.mxu0 %vm259_vm4, %v2152_v30 }
  0x2e   :  { %2019 = vmatprep.mubr.msk.bf16.mxu0 %vm259_vm4, %v2155_v31 }
  0x31   :  { %2086 = vmatmul.mubr.msk.bf16.gmra.mxu1 %vm1140_vm3, %v2154_v32 }
  0x32   :  { %2089 = vmatprep.mubr.msk.bf16.mxu1 %vm1140_vm3, %v2157_v33 }
  0x35   :  { %2020 = vmatmul.mubr.msk.bf16.gmra.mxu0 %vm259_vm4, %v2156_v34 }
  0x36   :  { %2023 = vmatprep.mubr.msk.bf16.mxu0 %vm259_vm4, %v2159_v35 }
  0x39   :  { %2090 = vmatmul.mubr.msk.bf16.gmra.mxu1 %vm1140_vm3, %v2158_v36 }
  0x3a   :  { %2093 = vmatprep.mubr.msk.bf16.mxu1 %vm1140_vm3, %v2161_v37 }
  0x3d   :  { %2024 = vmatmul.mubr.msk.bf16.gmra.mxu0 %vm259_vm4, %v2160_v38 }
  0x3e   :  { %2027 = vmatprep.mubr.msk.bf16.mxu0 %vm259_vm4, %v2163_v39 }
  0x41   :  { %2094 = vmatmul.mubr.msk.bf16.gmra.mxu1 %vm1140_vm3, %v2162_v40 }
  0x42   :  { %2097 = vmatprep.mubr.msk.bf16.mxu1 %vm1140_vm3, %v2165_v41 }
  0x45   :  { %2028 = vmatmul.mubr.msk.bf16.gmra.mxu0 %vm259_vm4, %v2164_v42 }
  0x46   :  { %2031 = vmatprep.mubr.msk.bf16.mxu0 %vm259_vm4, %v2167_v43 }
  0x49   :  { %2098 = vmatmul.mubr.msk.bf16.gmra.mxu1 %vm1140_vm3, %v2166_v44 }
  0x4a   :  { %2101 = vmatprep.mubr.msk.bf16.mxu1 %vm1140_vm3, %v2169_v45 }
  0x4d   :  { %2032 = vmatmul.mubr.msk.bf16.gmra.mxu0 %vm259_vm4, %v2168_v46 }
  0x4e   :  { %2035 = vmatprep.mubr.msk.bf16.mxu0 %vm259_vm4, %v2171_v47 }
  0x51   :  { %2102 = vmatmul.mubr.msk.bf16.gmra.mxu1 %vm1140_vm3, %v2170_v48 }
  0x52   :  { %2105 = vmatprep.mubr.msk.bf16.mxu1 %vm1140_vm3, %v2173_v49 }
  0x55   :  { %2036 = vmatmul.mubr.msk.bf16.gmra.mxu0 %vm259_vm4, %v2172_v50 }
  0x56   :  { %2039 = vmatprep.mubr.msk.bf16.mxu0 %vm259_vm4, %v2175_v51 }
  0x59   :  { %2106 = vmatmul.mubr.msk.bf16.gmra.mxu1 %vm1140_vm3, %v2174_v52 }
  0x5a   :  { %2109 = vmatprep.mubr.msk.bf16.mxu1 %vm1140_vm3, %v2177_v53 }
  0x5d   :  { %2040 = vmatmul.mubr.msk.bf16.gmra.mxu0 %vm259_vm4, %v2176_v54 }
  0x5e   :  { %2043 = vmatprep.mubr.msk.bf16.mxu0 %vm259_vm4, %v2179_v55 }
  0x61   :  { %2110 = vmatmul.mubr.msk.bf16.gmra.mxu1 %vm1140_vm3, %v2178_v56 }
  0x62   :  { %2113 = vmatprep.mubr.msk.bf16.mxu1 %vm1140_vm3, %v2181_v57 }
  0x65   :  { %2044 = vmatmul.mubr.msk.bf16.gmra.mxu0 %vm259_vm4, %v2180_v58 }
  0x66   :  { %2047 = vmatprep.mubr.msk.bf16.mxu0 %vm259_vm4, %v2183_v59 }
  0x69   :  { %2114 = vmatmul.mubr.msk.bf16.gmra.mxu1 %vm1140_vm3, %v2182_v60 }
  0x6a   :  { %2117 = vmatprep.mubr.msk.bf16.mxu1 %vm1140_vm3, %v2185_v61 }
  0x6d   :  { %2048 = vmatmul.mubr.msk.bf16.gmra.mxu0 %vm259_vm4, %v2184_v62 }
  0x6e   :  { %2051 = vmatprep.mubr.msk.bf16.mxu0 %vm259_vm4, %v2187_v63 }
  0x71   :  { %2118 = vmatmul.mubr.msk.bf16.gmra.mxu1 %vm1140_vm3, %v2186_v0 }
  0x72   :  { %2121 = vmatprep.mubr.msk.bf16.mxu1 %vm1140_vm3, %v2189_v1 }
  0x75   :  { %2052 = vmatmul.mubr.msk.bf16.gmra.mxu0 %vm259_vm4, %v2188_v2 }
  0x76   :  { %2055 = vmatprep.mubr.msk.bf16.mxu0 %vm259_vm4, %v2191_v3 }
  0x79   :  { %2122 = vmatmul.mubr.msk.bf16.gmra.mxu1 %vm1140_vm3, %v2190_v4 }
  0x7a   :  { %2125 = vmatprep.mubr.msk.bf16.mxu1 %vm1140_vm3, %v2193_v5 }
  0x7d   :  { %2056 = vmatmul.mubr.msk.bf16.gmra.mxu0 %vm259_vm4, %v2192_v6 }
  0x7e   :  { %2059 = vmatprep.mubr.msk.bf16.mxu0 %vm259_vm4, %v2195_v7 }
  0x81   :  { %2126 = vmatmul.mubr.msk.bf16.gmra.mxu1 %vm1140_vm3, %v2194_v8 }
  0x85   :  { %2060 = vmatmul.mubr.msk.bf16.gmra.mxu0 %vm259_vm4, %v2196_v9 }
  0xc9   :  { %v2067_v10 = vpop.f32.mrf.mxu1 }
  0xca   :  { %vm1534_vm5 = vcmp.ge.f32.partialorder %v2067_v10, 0.0  ;;  %v1598_v11 = vmul.f32 0.1, %v2067_v10 }
  0xcb   :  { %v1277_v12 = vpop.f32.mrf.mxu1 }
  0xcc   :  { %v1662_v13 = vsel %vm1534_vm5, %v2067_v10, %v1598_v11  ;;  %vm1532_vm7 = vcmp.ge.f32.partialorder %v1277_v12, 0.0  ;;  %v1596_v14 = vmul.f32 0.1, %v1277_v12 }
  0xcd   :  { %v2001_v15 = vpop.f32.mrf.mxu0  ;;  %1727 = vst.msk [vmem:[%s3009_s5 + $0x10] sm:$0xff] %vm1724_vm6, %v1662_v13  ;;  %v2068_v17 = vpop.f32.mrf.mxu1 }
  0xce   :  { %vm654_vm8 = vcmp.ge.f32.partialorder %v2001_v15, 0.0  ;;  %v718_v16 = vmul.f32 0.1, %v2001_v15  ;;  %v1660_v18 = vsel %vm1532_vm7, %v1277_v12, %v1596_v14  ;;  %vm1535_vm10 = vcmp.ge.f32.partialorder %v2068_v17, 0.0 }
  0xcf   :  { %v1599_v19 = vmul.f32 0.1, %v2068_v17  ;;  %v397_v20 = vpop.f32.mrf.mxu0  ;;  %1725 = vst.msk [vmem:[%s3009_s5] sm:$0xff] %vm1724_vm6, %v1660_v18  ;;  %v1280_v23 = vpop.f32.mrf.mxu1 }
  0xd0   :  { %v782_v21 = vsel %vm654_vm8, %v2001_v15, %v718_v16  ;;  %vm652_vm11 = vcmp.ge.f32.partialorder %v397_v20, 0.0  ;;  %v716_v22 = vmul.f32 0.1, %v397_v20  ;;  %vm1533_vm12 = vcmp.ge.f32.partialorder %v1280_v23, 0.0 }
  0xd1   :  { %847 = vst.msk [vmem:[%s3010_s4 + $0x10] sm:$0xff] %vm844_vm9, %v782_v21  ;;  %v1663_v24 = vsel %vm1535_vm10, %v2068_v17, %v1599_v19  ;;  %v1597_v25 = vmul.f32 0.1, %v1280_v23  ;;  %v2002_v26 = vpop.f32.mrf.mxu0  ;;  %v2071_v29 = vpop.f32.mrf.mxu1 }
  0xd2   :  { %1728 = vst.msk [vmem:[%s3009_s5 + $0x18] sm:$0xff] %vm1724_vm6, %v1663_v24  ;;  %v780_v27 = vsel %vm652_vm11, %v397_v20, %v716_v22  ;;  %vm655_vm13 = vcmp.ge.f32.partialorder %v2002_v26, 0.0  ;;  %v719_v28 = vmul.f32 0.1, %v2002_v26  ;;  %vm1538_vm14 = vcmp.ge.f32.partialorder %v2071_v29, 0.0 }
  0xd3   :  { %845 = vst.msk [vmem:[%s3010_s4] sm:$0xff] %vm844_vm9, %v780_v27  ;;  %v1661_v30 = vsel %vm1533_vm12, %v1280_v23, %v1597_v25  ;;  %v1602_v31 = vmul.f32 0.1, %v2071_v29  ;;  %v400_v32 = vpop.f32.mrf.mxu0  ;;  %v1293_v35 = vpop.f32.mrf.mxu1 }
  0xd4   :  { %1726 = vst.msk [vmem:[%s3009_s5 + $0x8] sm:$0xff] %vm1724_vm6, %v1661_v30  ;;  %v783_v33 = vsel %vm655_vm13, %v2002_v26, %v719_v28  ;;  %vm653_vm15 = vcmp.ge.f32.partialorder %v400_v32, 0.0  ;;  %v717_v34 = vmul.f32 0.1, %v400_v32  ;;  %vm1536_vm0 = vcmp.ge.f32.partialorder %v1293_v35, 0.0 }
  0xd5   :  { %848 = vst.msk [vmem:[%s3010_s4 + $0x18] sm:$0xff] %vm844_vm9, %v783_v33  ;;  %v1666_v36 = vsel %vm1538_vm14, %v2071_v29, %v1602_v31  ;;  %v1600_v37 = vmul.f32 0.1, %v1293_v35  ;;  %v2005_v38 = vpop.f32.mrf.mxu0  ;;  %v2072_v41 = vpop.f32.mrf.mxu1 }
  0xd6   :  { %1731 = vst.msk [vmem:[%s3009_s5 + $0x30] sm:$0xff] %vm1724_vm6, %v1666_v36  ;;  %v781_v39 = vsel %vm653_vm15, %v400_v32, %v717_v34  ;;  %vm658_vm1 = vcmp.ge.f32.partialorder %v2005_v38, 0.0  ;;  %v722_v40 = vmul.f32 0.1, %v2005_v38  ;;  %vm1539_vm2 = vcmp.ge.f32.partialorder %v2072_v41, 0.0 }
  0xd7   :  { %846 = vst.msk [vmem:[%s3010_s4 + $0x8] sm:$0xff] %vm844_vm9, %v781_v39  ;;  %v1664_v42 = vsel %vm1536_vm0, %v1293_v35, %v1600_v37  ;;  %v1603_v43 = vmul.f32 0.1, %v2072_v41  ;;  %v413_v44 = vpop.f32.mrf.mxu0  ;;  %v1296_v47 = vpop.f32.mrf.mxu1 }
  0xd8   :  { %1729 = vst.msk [vmem:[%s3009_s5 + $0x20] sm:$0xff] %vm1724_vm6, %v1664_v42  ;;  %v786_v45 = vsel %vm658_vm1, %v2005_v38, %v722_v40  ;;  %vm656_vm3 = vcmp.ge.f32.partialorder %v413_v44, 0.0  ;;  %v720_v46 = vmul.f32 0.1, %v413_v44  ;;  %vm1537_vm4 = vcmp.ge.f32.partialorder %v1296_v47, 0.0 }
  0xd9   :  { %851 = vst.msk [vmem:[%s3010_s4 + $0x30] sm:$0xff] %vm844_vm9, %v786_v45  ;;  %v1667_v48 = vsel %vm1539_vm2, %v2072_v41, %v1603_v43  ;;  %v1601_v49 = vmul.f32 0.1, %v1296_v47  ;;  %v2006_v50 = vpop.f32.mrf.mxu0  ;;  %v2075_v53 = vpop.f32.mrf.mxu1 }
  0xda   :  { %1732 = vst.msk [vmem:[%s3009_s5 + $0x38] sm:$0xff] %vm1724_vm6, %v1667_v48  ;;  %v784_v51 = vsel %vm656_vm3, %v413_v44, %v720_v46  ;;  %vm659_vm5 = vcmp.ge.f32.partialorder %v2006_v50, 0.0  ;;  %v723_v52 = vmul.f32 0.1, %v2006_v50  ;;  %vm1542_vm7 = vcmp.ge.f32.partialorder %v2075_v53, 0.0 }
  0xdb   :  { %849 = vst.msk [vmem:[%s3010_s4 + $0x20] sm:$0xff] %vm844_vm9, %v784_v51  ;;  %v1665_v54 = vsel %vm1537_vm4, %v1296_v47, %v1601_v49  ;;  %v1606_v55 = vmul.f32 0.1, %v2075_v53  ;;  %v416_v56 = vpop.f32.mrf.mxu0  ;;  %v1309_v59 = vpop.f32.mrf.mxu1 }
  0xdc   :  { %1730 = vst.msk [vmem:[%s3009_s5 + $0x28] sm:$0xff] %vm1724_vm6, %v1665_v54  ;;  %v787_v57 = vsel %vm659_vm5, %v2006_v50, %v723_v52  ;;  %vm657_vm8 = vcmp.ge.f32.partialorder %v416_v56, 0.0  ;;  %v721_v58 = vmul.f32 0.1, %v416_v56  ;;  %vm1540_vm10 = vcmp.ge.f32.partialorder %v1309_v59, 0.0 }
  0xdd   :  { %852 = vst.msk [vmem:[%s3010_s4 + $0x38] sm:$0xff] %vm844_vm9, %v787_v57  ;;  %v1670_v60 = vsel %vm1542_vm7, %v2075_v53, %v1606_v55  ;;  %v1604_v61 = vmul.f32 0.1, %v1309_v59  ;;  %v2009_v62 = vpop.f32.mrf.mxu0  ;;  %v2076_v1 = vpop.f32.mrf.mxu1 }
  0xde   :  { %1735 = vst.msk [vmem:[%s3009_s5 + $0x50] sm:$0xff] %vm1724_vm6, %v1670_v60  ;;  %v785_v63 = vsel %vm657_vm8, %v416_v56, %v721_v58  ;;  %vm662_vm11 = vcmp.ge.f32.partialorder %v2009_v62, 0.0  ;;  %v726_v0 = vmul.f32 0.1, %v2009_v62  ;;  %vm1543_vm12 = vcmp.ge.f32.partialorder %v2076_v1, 0.0 }
  0xdf   :  { %850 = vst.msk [vmem:[%s3010_s4 + $0x28] sm:$0xff] %vm844_vm9, %v785_v63  ;;  %v1668_v2 = vsel %vm1540_vm10, %v1309_v59, %v1604_v61  ;;  %v1607_v3 = vmul.f32 0.1, %v2076_v1  ;;  %v429_v4 = vpop.f32.mrf.mxu0  ;;  %v1312_v7 = vpop.f32.mrf.mxu1 }
  0xe0   :  { %1733 = vst.msk [vmem:[%s3009_s5 + $0x40] sm:$0xff] %vm1724_vm6, %v1668_v2  ;;  %v790_v5 = vsel %vm662_vm11, %v2009_v62, %v726_v0  ;;  %vm660_vm13 = vcmp.ge.f32.partialorder %v429_v4, 0.0  ;;  %v724_v6 = vmul.f32 0.1, %v429_v4  ;;  %vm1541_vm14 = vcmp.ge.f32.partialorder %v1312_v7, 0.0 }
  0xe1   :  { %855 = vst.msk [vmem:[%s3010_s4 + $0x50] sm:$0xff] %vm844_vm9, %v790_v5  ;;  %v1671_v8 = vsel %vm1543_vm12, %v2076_v1, %v1607_v3  ;;  %v1605_v9 = vmul.f32 0.1, %v1312_v7  ;;  %v2010_v10 = vpop.f32.mrf.mxu0  ;;  %v2079_v13 = vpop.f32.mrf.mxu1 }
  0xe2   :  { %1736 = vst.msk [vmem:[%s3009_s5 + $0x58] sm:$0xff] %vm1724_vm6, %v1671_v8  ;;  %v788_v11 = vsel %vm660_vm13, %v429_v4, %v724_v6  ;;  %vm663_vm15 = vcmp.ge.f32.partialorder %v2010_v10, 0.0  ;;  %v727_v12 = vmul.f32 0.1, %v2010_v10  ;;  %vm1546_vm0 = vcmp.ge.f32.partialorder %v2079_v13, 0.0 }
  0xe3   :  { %853 = vst.msk [vmem:[%s3010_s4 + $0x40] sm:$0xff] %vm844_vm9, %v788_v11  ;;  %v1669_v14 = vsel %vm1541_vm14, %v1312_v7, %v1605_v9  ;;  %v1610_v15 = vmul.f32 0.1, %v2079_v13  ;;  %v432_v16 = vpop.f32.mrf.mxu0  ;;  %v1325_v19 = vpop.f32.mrf.mxu1 }
  0xe4   :  { %1734 = vst.msk [vmem:[%s3009_s5 + $0x48] sm:$0xff] %vm1724_vm6, %v1669_v14  ;;  %v791_v17 = vsel %vm663_vm15, %v2010_v10, %v727_v12  ;;  %vm661_vm1 = vcmp.ge.f32.partialorder %v432_v16, 0.0  ;;  %v725_v18 = vmul.f32 0.1, %v432_v16  ;;  %vm1544_vm2 = vcmp.ge.f32.partialorder %v1325_v19, 0.0 }
  0xe5   :  { %856 = vst.msk [vmem:[%s3010_s4 + $0x58] sm:$0xff] %vm844_vm9, %v791_v17  ;;  %v1674_v20 = vsel %vm1546_vm0, %v2079_v13, %v1610_v15  ;;  %v1608_v21 = vmul.f32 0.1, %v1325_v19  ;;  %v2013_v22 = vpop.f32.mrf.mxu0  ;;  %v2080_v25 = vpop.f32.mrf.mxu1 }
  0xe6   :  { %1739 = vst.msk [vmem:[%s3009_s5 + $0x70] sm:$0xff] %vm1724_vm6, %v1674_v20  ;;  %v789_v23 = vsel %vm661_vm1, %v432_v16, %v725_v18  ;;  %vm666_vm3 = vcmp.ge.f32.partialorder %v2013_v22, 0.0  ;;  %v730_v24 = vmul.f32 0.1, %v2013_v22  ;;  %vm1547_vm4 = vcmp.ge.f32.partialorder %v2080_v25, 0.0 }
  0xe7   :  { %854 = vst.msk [vmem:[%s3010_s4 + $0x48] sm:$0xff] %vm844_vm9, %v789_v23  ;;  %v1672_v26 = vsel %vm1544_vm2, %v1325_v19, %v1608_v21  ;;  %v1611_v27 = vmul.f32 0.1, %v2080_v25  ;;  %v445_v28 = vpop.f32.mrf.mxu0  ;;  %v1328_v31 = vpop.f32.mrf.mxu1 }
  0xe8   :  { %1737 = vst.msk [vmem:[%s3009_s5 + $0x60] sm:$0xff] %vm1724_vm6, %v1672_v26  ;;  %v794_v29 = vsel %vm666_vm3, %v2013_v22, %v730_v24  ;;  %vm664_vm5 = vcmp.ge.f32.partialorder %v445_v28, 0.0  ;;  %v728_v30 = vmul.f32 0.1, %v445_v28  ;;  %vm1545_vm7 = vcmp.ge.f32.partialorder %v1328_v31, 0.0 }
  0xe9   :  { %859 = vst.msk [vmem:[%s3010_s4 + $0x70] sm:$0xff] %vm844_vm9, %v794_v29  ;;  %v1675_v32 = vsel %vm1547_vm4, %v2080_v25, %v1611_v27  ;;  %v1609_v33 = vmul.f32 0.1, %v1328_v31  ;;  %v2014_v34 = vpop.f32.mrf.mxu0  ;;  %v2083_v37 = vpop.f32.mrf.mxu1 }
  0xea   :  { %1740 = vst.msk [vmem:[%s3009_s5 + $0x78] sm:$0xff] %vm1724_vm6, %v1675_v32  ;;  %v792_v35 = vsel %vm664_vm5, %v445_v28, %v728_v30  ;;  %vm667_vm8 = vcmp.ge.f32.partialorder %v2014_v34, 0.0  ;;  %v731_v36 = vmul.f32 0.1, %v2014_v34  ;;  %vm1550_vm10 = vcmp.ge.f32.partialorder %v2083_v37, 0.0 }
  0xeb   :  { %857 = vst.msk [vmem:[%s3010_s4 + $0x60] sm:$0xff] %vm844_vm9, %v792_v35  ;;  %v1673_v38 = vsel %vm1545_vm7, %v1328_v31, %v1609_v33  ;;  %v1614_v39 = vmul.f32 0.1, %v2083_v37  ;;  %v448_v40 = vpop.f32.mrf.mxu0  ;;  %v1341_v43 = vpop.f32.mrf.mxu1 }
  0xec   :  { %1738 = vst.msk [vmem:[%s3009_s5 + $0x68] sm:$0xff] %vm1724_vm6, %v1673_v38  ;;  %v795_v41 = vsel %vm667_vm8, %v2014_v34, %v731_v36  ;;  %vm665_vm11 = vcmp.ge.f32.partialorder %v448_v40, 0.0  ;;  %v729_v42 = vmul.f32 0.1, %v448_v40  ;;  %vm1548_vm12 = vcmp.ge.f32.partialorder %v1341_v43, 0.0 }
  0xed   :  { %860 = vst.msk [vmem:[%s3010_s4 + $0x78] sm:$0xff] %vm844_vm9, %v795_v41  ;;  %v1678_v44 = vsel %vm1550_vm10, %v2083_v37, %v1614_v39  ;;  %v1612_v45 = vmul.f32 0.1, %v1341_v43  ;;  %v2017_v46 = vpop.f32.mrf.mxu0  ;;  %v2084_v49 = vpop.f32.mrf.mxu1 }
  0xee   :  { %1743 = vst.msk [vmem:[%s3009_s5 + $0x90] sm:$0xff] %vm1724_vm6, %v1678_v44  ;;  %v793_v47 = vsel %vm665_vm11, %v448_v40, %v729_v42  ;;  %vm670_vm13 = vcmp.ge.f32.partialorder %v2017_v46, 0.0  ;;  %v734_v48 = vmul.f32 0.1, %v2017_v46  ;;  %vm1551_vm14 = vcmp.ge.f32.partialorder %v2084_v49, 0.0 }
  0xef   :  { %858 = vst.msk [vmem:[%s3010_s4 + $0x68] sm:$0xff] %vm844_vm9, %v793_v47  ;;  %v1676_v50 = vsel %vm1548_vm12, %v1341_v43, %v1612_v45  ;;  %v1615_v51 = vmul.f32 0.1, %v2084_v49  ;;  %v461_v52 = vpop.f32.mrf.mxu0  ;;  %v1344_v55 = vpop.f32.mrf.mxu1 }
  0xf0   :  { %1741 = vst.msk [vmem:[%s3009_s5 + $0x80] sm:$0xff] %vm1724_vm6, %v1676_v50  ;;  %v798_v53 = vsel %vm670_vm13, %v2017_v46, %v734_v48  ;;  %vm668_vm15 = vcmp.ge.f32.partialorder %v461_v52, 0.0  ;;  %v732_v54 = vmul.f32 0.1, %v461_v52  ;;  %vm1549_vm0 = vcmp.ge.f32.partialorder %v1344_v55, 0.0 }
  0xf1   :  { %863 = vst.msk [vmem:[%s3010_s4 + $0x90] sm:$0xff] %vm844_vm9, %v798_v53  ;;  %v1679_v56 = vsel %vm1551_vm14, %v2084_v49, %v1615_v51  ;;  %v1613_v57 = vmul.f32 0.1, %v1344_v55  ;;  %v2018_v58 = vpop.f32.mrf.mxu0  ;;  %v2087_v61 = vpop.f32.mrf.mxu1 }
  0xf2   :  { %1744 = vst.msk [vmem:[%s3009_s5 + $0x98] sm:$0xff] %vm1724_vm6, %v1679_v56  ;;  %v796_v59 = vsel %vm668_vm15, %v461_v52, %v732_v54  ;;  %vm671_vm1 = vcmp.ge.f32.partialorder %v2018_v58, 0.0  ;;  %v735_v60 = vmul.f32 0.1, %v2018_v58  ;;  %vm1554_vm2 = vcmp.ge.f32.partialorder %v2087_v61, 0.0 }
  0xf3   :  { %861 = vst.msk [vmem:[%s3010_s4 + $0x80] sm:$0xff] %vm844_vm9, %v796_v59  ;;  %v1677_v62 = vsel %vm1549_vm0, %v1344_v55, %v1613_v57  ;;  %v1618_v63 = vmul.f32 0.1, %v2087_v61  ;;  %v464_v0 = vpop.f32.mrf.mxu0  ;;  %v1357_v3 = vpop.f32.mrf.mxu1 }
  0xf4   :  { %1742 = vst.msk [vmem:[%s3009_s5 + $0x88] sm:$0xff] %vm1724_vm6, %v1677_v62  ;;  %v799_v1 = vsel %vm671_vm1, %v2018_v58, %v735_v60  ;;  %vm669_vm3 = vcmp.ge.f32.partialorder %v464_v0, 0.0  ;;  %v733_v2 = vmul.f32 0.1, %v464_v0  ;;  %vm1552_vm4 = vcmp.ge.f32.partialorder %v1357_v3, 0.0 }
  0xf5   :  { %864 = vst.msk [vmem:[%s3010_s4 + $0x98] sm:$0xff] %vm844_vm9, %v799_v1  ;;  %v1682_v4 = vsel %vm1554_vm2, %v2087_v61, %v1618_v63  ;;  %v1616_v5 = vmul.f32 0.1, %v1357_v3  ;;  %v2021_v6 = vpop.f32.mrf.mxu0  ;;  %v2088_v9 = vpop.f32.mrf.mxu1 }
  0xf6   :  { %1747 = vst.msk [vmem:[%s3009_s5 + $0xb0] sm:$0xff] %vm1724_vm6, %v1682_v4  ;;  %v797_v7 = vsel %vm669_vm3, %v464_v0, %v733_v2  ;;  %vm674_vm5 = vcmp.ge.f32.partialorder %v2021_v6, 0.0  ;;  %v738_v8 = vmul.f32 0.1, %v2021_v6  ;;  %vm1555_vm7 = vcmp.ge.f32.partialorder %v2088_v9, 0.0 }
  0xf7   :  { %862 = vst.msk [vmem:[%s3010_s4 + $0x88] sm:$0xff] %vm844_vm9, %v797_v7  ;;  %v1680_v10 = vsel %vm1552_vm4, %v1357_v3, %v1616_v5  ;;  %v1619_v11 = vmul.f32 0.1, %v2088_v9  ;;  %v477_v12 = vpop.f32.mrf.mxu0  ;;  %v1360_v15 = vpop.f32.mrf.mxu1 }
  0xf8   :  { %1745 = vst.msk [vmem:[%s3009_s5 + $0xa0] sm:$0xff] %vm1724_vm6, %v1680_v10  ;;  %v802_v13 = vsel %vm674_vm5, %v2021_v6, %v738_v8  ;;  %vm672_vm8 = vcmp.ge.f32.partialorder %v477_v12, 0.0  ;;  %v736_v14 = vmul.f32 0.1, %v477_v12  ;;  %vm1553_vm10 = vcmp.ge.f32.partialorder %v1360_v15, 0.0 }
  0xf9   :  { %867 = vst.msk [vmem:[%s3010_s4 + $0xb0] sm:$0xff] %vm844_vm9, %v802_v13  ;;  %v1683_v16 = vsel %vm1555_vm7, %v2088_v9, %v1619_v11  ;;  %v1617_v17 = vmul.f32 0.1, %v1360_v15  ;;  %v2022_v18 = vpop.f32.mrf.mxu0  ;;  %v2091_v21 = vpop.f32.mrf.mxu1 }
  0xfa   :  { %1748 = vst.msk [vmem:[%s3009_s5 + $0xb8] sm:$0xff] %vm1724_vm6, %v1683_v16  ;;  %v800_v19 = vsel %vm672_vm8, %v477_v12, %v736_v14  ;;  %vm675_vm11 = vcmp.ge.f32.partialorder %v2022_v18, 0.0  ;;  %v739_v20 = vmul.f32 0.1, %v2022_v18  ;;  %vm1558_vm12 = vcmp.ge.f32.partialorder %v2091_v21, 0.0 }
  0xfb   :  { %865 = vst.msk [vmem:[%s3010_s4 + $0xa0] sm:$0xff] %vm844_vm9, %v800_v19  ;;  %v1681_v22 = vsel %vm1553_vm10, %v1360_v15, %v1617_v17  ;;  %v1622_v23 = vmul.f32 0.1, %v2091_v21  ;;  %v480_v24 = vpop.f32.mrf.mxu0  ;;  %v1373_v27 = vpop.f32.mrf.mxu1 }
  0xfc   :  { %1746 = vst.msk [vmem:[%s3009_s5 + $0xa8] sm:$0xff] %vm1724_vm6, %v1681_v22  ;;  %v803_v25 = vsel %vm675_vm11, %v2022_v18, %v739_v20  ;;  %vm673_vm13 = vcmp.ge.f32.partialorder %v480_v24, 0.0  ;;  %v737_v26 = vmul.f32 0.1, %v480_v24  ;;  %vm1556_vm14 = vcmp.ge.f32.partialorder %v1373_v27, 0.0 }
  0xfd   :  { %868 = vst.msk [vmem:[%s3010_s4 + $0xb8] sm:$0xff] %vm844_vm9, %v803_v25  ;;  %v1686_v28 = vsel %vm1558_vm12, %v2091_v21, %v1622_v23  ;;  %v1620_v29 = vmul.f32 0.1, %v1373_v27  ;;  %v2025_v30 = vpop.f32.mrf.mxu0  ;;  %v2092_v33 = vpop.f32.mrf.mxu1 }
  0xfe   :  { %1751 = vst.msk [vmem:[%s3009_s5 + $0xd0] sm:$0xff] %vm1724_vm6, %v1686_v28  ;;  %v801_v31 = vsel %vm673_vm13, %v480_v24, %v737_v26  ;;  %vm678_vm15 = vcmp.ge.f32.partialorder %v2025_v30, 0.0  ;;  %v742_v32 = vmul.f32 0.1, %v2025_v30  ;;  %vm1559_vm0 = vcmp.ge.f32.partialorder %v2092_v33, 0.0 }
  0xff   :  { %866 = vst.msk [vmem:[%s3010_s4 + $0xa8] sm:$0xff] %vm844_vm9, %v801_v31  ;;  %v1684_v34 = vsel %vm1556_vm14, %v1373_v27, %v1620_v29  ;;  %v1623_v35 = vmul.f32 0.1, %v2092_v33  ;;  %v493_v36 = vpop.f32.mrf.mxu0  ;;  %v1376_v39 = vpop.f32.mrf.mxu1 }
 0x100   :  { %1749 = vst.msk [vmem:[%s3009_s5 + $0xc0] sm:$0xff] %vm1724_vm6, %v1684_v34  ;;  %v806_v37 = vsel %vm678_vm15, %v2025_v30, %v742_v32  ;;  %vm676_vm1 = vcmp.ge.f32.partialorder %v493_v36, 0.0  ;;  %v740_v38 = vmul.f32 0.1, %v493_v36  ;;  %vm1557_vm2 = vcmp.ge.f32.partialorder %v1376_v39, 0.0 }
 0x101   :  { %871 = vst.msk [vmem:[%s3010_s4 + $0xd0] sm:$0xff] %vm844_vm9, %v806_v37  ;;  %v1687_v40 = vsel %vm1559_vm0, %v2092_v33, %v1623_v35  ;;  %v1621_v41 = vmul.f32 0.1, %v1376_v39  ;;  %v2026_v42 = vpop.f32.mrf.mxu0  ;;  %v2095_v45 = vpop.f32.mrf.mxu1 }
 0x102   :  { %1752 = vst.msk [vmem:[%s3009_s5 + $0xd8] sm:$0xff] %vm1724_vm6, %v1687_v40  ;;  %v804_v43 = vsel %vm676_vm1, %v493_v36, %v740_v38  ;;  %vm679_vm3 = vcmp.ge.f32.partialorder %v2026_v42, 0.0  ;;  %v743_v44 = vmul.f32 0.1, %v2026_v42  ;;  %vm1562_vm4 = vcmp.ge.f32.partialorder %v2095_v45, 0.0 }
 0x103   :  { %869 = vst.msk [vmem:[%s3010_s4 + $0xc0] sm:$0xff] %vm844_vm9, %v804_v43  ;;  %v1685_v46 = vsel %vm1557_vm2, %v1376_v39, %v1621_v41  ;;  %v1626_v47 = vmul.f32 0.1, %v2095_v45  ;;  %v496_v48 = vpop.f32.mrf.mxu0  ;;  %v1389_v51 = vpop.f32.mrf.mxu1 }
 0x104   :  { %1750 = vst.msk [vmem:[%s3009_s5 + $0xc8] sm:$0xff] %vm1724_vm6, %v1685_v46  ;;  %v807_v49 = vsel %vm679_vm3, %v2026_v42, %v743_v44  ;;  %vm677_vm5 = vcmp.ge.f32.partialorder %v496_v48, 0.0  ;;  %v741_v50 = vmul.f32 0.1, %v496_v48  ;;  %vm1560_vm7 = vcmp.ge.f32.partialorder %v1389_v51, 0.0 }
 0x105   :  { %872 = vst.msk [vmem:[%s3010_s4 + $0xd8] sm:$0xff] %vm844_vm9, %v807_v49  ;;  %v1690_v52 = vsel %vm1562_vm4, %v2095_v45, %v1626_v47  ;;  %v1624_v53 = vmul.f32 0.1, %v1389_v51  ;;  %v2029_v54 = vpop.f32.mrf.mxu0  ;;  %v2096_v57 = vpop.f32.mrf.mxu1 }
 0x106   :  { %1755 = vst.msk [vmem:[%s3009_s5 + $0xf0] sm:$0xff] %vm1724_vm6, %v1690_v52  ;;  %v805_v55 = vsel %vm677_vm5, %v496_v48, %v741_v50  ;;  %vm682_vm8 = vcmp.ge.f32.partialorder %v2029_v54, 0.0  ;;  %v746_v56 = vmul.f32 0.1, %v2029_v54  ;;  %vm1563_vm10 = vcmp.ge.f32.partialorder %v2096_v57, 0.0 }
 0x107   :  { %870 = vst.msk [vmem:[%s3010_s4 + $0xc8] sm:$0xff] %vm844_vm9, %v805_v55  ;;  %v1688_v58 = vsel %vm1560_vm7, %v1389_v51, %v1624_v53  ;;  %v1627_v59 = vmul.f32 0.1, %v2096_v57  ;;  %v509_v60 = vpop.f32.mrf.mxu0  ;;  %v1392_v63 = vpop.f32.mrf.mxu1 }
 0x108   :  { %1753 = vst.msk [vmem:[%s3009_s5 + $0xe0] sm:$0xff] %vm1724_vm6, %v1688_v58  ;;  %v810_v61 = vsel %vm682_vm8, %v2029_v54, %v746_v56  ;;  %vm680_vm11 = vcmp.ge.f32.partialorder %v509_v60, 0.0  ;;  %v744_v62 = vmul.f32 0.1, %v509_v60  ;;  %vm1561_vm12 = vcmp.ge.f32.partialorder %v1392_v63, 0.0 }
 0x109   :  { %875 = vst.msk [vmem:[%s3010_s4 + $0xf0] sm:$0xff] %vm844_vm9, %v810_v61  ;;  %v1691_v0 = vsel %vm1563_vm10, %v2096_v57, %v1627_v59  ;;  %v1625_v1 = vmul.f32 0.1, %v1392_v63  ;;  %v2030_v2 = vpop.f32.mrf.mxu0  ;;  %v2099_v5 = vpop.f32.mrf.mxu1 }
 0x10a   :  { %1756 = vst.msk [vmem:[%s3009_s5 + $0xf8] sm:$0xff] %vm1724_vm6, %v1691_v0  ;;  %v808_v3 = vsel %vm680_vm11, %v509_v60, %v744_v62  ;;  %vm683_vm13 = vcmp.ge.f32.partialorder %v2030_v2, 0.0  ;;  %v747_v4 = vmul.f32 0.1, %v2030_v2  ;;  %vm1566_vm14 = vcmp.ge.f32.partialorder %v2099_v5, 0.0 }
 0x10b   :  { %873 = vst.msk [vmem:[%s3010_s4 + $0xe0] sm:$0xff] %vm844_vm9, %v808_v3  ;;  %v1689_v6 = vsel %vm1561_vm12, %v1392_v63, %v1625_v1  ;;  %v1630_v7 = vmul.f32 0.1, %v2099_v5  ;;  %v512_v8 = vpop.f32.mrf.mxu0  ;;  %v1405_v11 = vpop.f32.mrf.mxu1 }
 0x10c   :  { %1754 = vst.msk [vmem:[%s3009_s5 + $0xe8] sm:$0xff] %vm1724_vm6, %v1689_v6  ;;  %v811_v9 = vsel %vm683_vm13, %v2030_v2, %v747_v4  ;;  %vm681_vm15 = vcmp.ge.f32.partialorder %v512_v8, 0.0  ;;  %v745_v10 = vmul.f32 0.1, %v512_v8  ;;  %vm1564_vm0 = vcmp.ge.f32.partialorder %v1405_v11, 0.0 }
 0x10d   :  { %876 = vst.msk [vmem:[%s3010_s4 + $0xf8] sm:$0xff] %vm844_vm9, %v811_v9  ;;  %v1694_v12 = vsel %vm1566_vm14, %v2099_v5, %v1630_v7  ;;  %v1628_v13 = vmul.f32 0.1, %v1405_v11  ;;  %v2033_v14 = vpop.f32.mrf.mxu0  ;;  %v2100_v17 = vpop.f32.mrf.mxu1 }
 0x10e   :  { %1759 = vst.msk [vmem:[%s3009_s5 + $0x110] sm:$0xff] %vm1724_vm6, %v1694_v12  ;;  %v809_v15 = vsel %vm681_vm15, %v512_v8, %v745_v10  ;;  %vm686_vm1 = vcmp.ge.f32.partialorder %v2033_v14, 0.0  ;;  %v750_v16 = vmul.f32 0.1, %v2033_v14  ;;  %vm1567_vm2 = vcmp.ge.f32.partialorder %v2100_v17, 0.0 }
 0x10f   :  { %874 = vst.msk [vmem:[%s3010_s4 + $0xe8] sm:$0xff] %vm844_vm9, %v809_v15  ;;  %v1692_v18 = vsel %vm1564_vm0, %v1405_v11, %v1628_v13  ;;  %v1631_v19 = vmul.f32 0.1, %v2100_v17  ;;  %v525_v20 = vpop.f32.mrf.mxu0  ;;  %v1408_v23 = vpop.f32.mrf.mxu1 }
 0x110   :  { %1757 = vst.msk [vmem:[%s3009_s5 + $0x100] sm:$0xff] %vm1724_vm6, %v1692_v18  ;;  %v814_v21 = vsel %vm686_vm1, %v2033_v14, %v750_v16  ;;  %vm684_vm3 = vcmp.ge.f32.partialorder %v525_v20, 0.0  ;;  %v748_v22 = vmul.f32 0.1, %v525_v20  ;;  %vm1565_vm4 = vcmp.ge.f32.partialorder %v1408_v23, 0.0 }
 0x111   :  { %879 = vst.msk [vmem:[%s3010_s4 + $0x110] sm:$0xff] %vm844_vm9, %v814_v21  ;;  %v1695_v24 = vsel %vm1567_vm2, %v2100_v17, %v1631_v19  ;;  %v1629_v25 = vmul.f32 0.1, %v1408_v23  ;;  %v2034_v26 = vpop.f32.mrf.mxu0  ;;  %v2103_v29 = vpop.f32.mrf.mxu1 }
 0x112   :  { %1760 = vst.msk [vmem:[%s3009_s5 + $0x118] sm:$0xff] %vm1724_vm6, %v1695_v24  ;;  %v812_v27 = vsel %vm684_vm3, %v525_v20, %v748_v22  ;;  %vm687_vm5 = vcmp.ge.f32.partialorder %v2034_v26, 0.0  ;;  %v751_v28 = vmul.f32 0.1, %v2034_v26  ;;  %vm1570_vm7 = vcmp.ge.f32.partialorder %v2103_v29, 0.0 }
 0x113   :  { %877 = vst.msk [vmem:[%s3010_s4 + $0x100] sm:$0xff] %vm844_vm9, %v812_v27  ;;  %v1693_v30 = vsel %vm1565_vm4, %v1408_v23, %v1629_v25  ;;  %v1634_v31 = vmul.f32 0.1, %v2103_v29  ;;  %v528_v32 = vpop.f32.mrf.mxu0  ;;  %v1421_v35 = vpop.f32.mrf.mxu1 }
 0x114   :  { %1758 = vst.msk [vmem:[%s3009_s5 + $0x108] sm:$0xff] %vm1724_vm6, %v1693_v30  ;;  %v815_v33 = vsel %vm687_vm5, %v2034_v26, %v751_v28  ;;  %vm685_vm8 = vcmp.ge.f32.partialorder %v528_v32, 0.0  ;;  %v749_v34 = vmul.f32 0.1, %v528_v32  ;;  %vm1568_vm10 = vcmp.ge.f32.partialorder %v1421_v35, 0.0 }
 0x115   :  { %880 = vst.msk [vmem:[%s3010_s4 + $0x118] sm:$0xff] %vm844_vm9, %v815_v33  ;;  %v1698_v36 = vsel %vm1570_vm7, %v2103_v29, %v1634_v31  ;;  %v1632_v37 = vmul.f32 0.1, %v1421_v35  ;;  %v2037_v38 = vpop.f32.mrf.mxu0  ;;  %v2104_v41 = vpop.f32.mrf.mxu1 }
 0x116   :  { %1763 = vst.msk [vmem:[%s3009_s5 + $0x130] sm:$0xff] %vm1724_vm6, %v1698_v36  ;;  %v813_v39 = vsel %vm685_vm8, %v528_v32, %v749_v34  ;;  %vm690_vm11 = vcmp.ge.f32.partialorder %v2037_v38, 0.0  ;;  %v754_v40 = vmul.f32 0.1, %v2037_v38  ;;  %vm1571_vm12 = vcmp.ge.f32.partialorder %v2104_v41, 0.0 }
 0x117   :  { %878 = vst.msk [vmem:[%s3010_s4 + $0x108] sm:$0xff] %vm844_vm9, %v813_v39  ;;  %v1696_v42 = vsel %vm1568_vm10, %v1421_v35, %v1632_v37  ;;  %v1635_v43 = vmul.f32 0.1, %v2104_v41  ;;  %v541_v44 = vpop.f32.mrf.mxu0  ;;  %v1424_v47 = vpop.f32.mrf.mxu1 }
 0x118   :  { %1761 = vst.msk [vmem:[%s3009_s5 + $0x120] sm:$0xff] %vm1724_vm6, %v1696_v42  ;;  %v818_v45 = vsel %vm690_vm11, %v2037_v38, %v754_v40  ;;  %vm688_vm13 = vcmp.ge.f32.partialorder %v541_v44, 0.0  ;;  %v752_v46 = vmul.f32 0.1, %v541_v44  ;;  %vm1569_vm14 = vcmp.ge.f32.partialorder %v1424_v47, 0.0 }
 0x119   :  { %883 = vst.msk [vmem:[%s3010_s4 + $0x130] sm:$0xff] %vm844_vm9, %v818_v45  ;;  %v1699_v48 = vsel %vm1571_vm12, %v2104_v41, %v1635_v43  ;;  %v1633_v49 = vmul.f32 0.1, %v1424_v47  ;;  %v2038_v50 = vpop.f32.mrf.mxu0  ;;  %v2107_v53 = vpop.f32.mrf.mxu1 }
 0x11a   :  { %1764 = vst.msk [vmem:[%s3009_s5 + $0x138] sm:$0xff] %vm1724_vm6, %v1699_v48  ;;  %v816_v51 = vsel %vm688_vm13, %v541_v44, %v752_v46  ;;  %vm691_vm15 = vcmp.ge.f32.partialorder %v2038_v50, 0.0  ;;  %v755_v52 = vmul.f32 0.1, %v2038_v50  ;;  %vm1574_vm0 = vcmp.ge.f32.partialorder %v2107_v53, 0.0 }
 0x11b   :  { %881 = vst.msk [vmem:[%s3010_s4 + $0x120] sm:$0xff] %vm844_vm9, %v816_v51  ;;  %v1697_v54 = vsel %vm1569_vm14, %v1424_v47, %v1633_v49  ;;  %v1638_v55 = vmul.f32 0.1, %v2107_v53  ;;  %v544_v56 = vpop.f32.mrf.mxu0  ;;  %v1437_v59 = vpop.f32.mrf.mxu1 }
 0x11c   :  { %1762 = vst.msk [vmem:[%s3009_s5 + $0x128] sm:$0xff] %vm1724_vm6, %v1697_v54  ;;  %v819_v57 = vsel %vm691_vm15, %v2038_v50, %v755_v52  ;;  %vm689_vm1 = vcmp.ge.f32.partialorder %v544_v56, 0.0  ;;  %v753_v58 = vmul.f32 0.1, %v544_v56  ;;  %vm1572_vm2 = vcmp.ge.f32.partialorder %v1437_v59, 0.0 }
 0x11d   :  { %884 = vst.msk [vmem:[%s3010_s4 + $0x138] sm:$0xff] %vm844_vm9, %v819_v57  ;;  %v1702_v60 = vsel %vm1574_vm0, %v2107_v53, %v1638_v55  ;;  %v1636_v61 = vmul.f32 0.1, %v1437_v59  ;;  %v2041_v62 = vpop.f32.mrf.mxu0  ;;  %v2108_v1 = vpop.f32.mrf.mxu1 }
 0x11e   :  { %1767 = vst.msk [vmem:[%s3009_s5 + $0x150] sm:$0xff] %vm1724_vm6, %v1702_v60  ;;  %v817_v63 = vsel %vm689_vm1, %v544_v56, %v753_v58  ;;  %vm694_vm3 = vcmp.ge.f32.partialorder %v2041_v62, 0.0  ;;  %v758_v0 = vmul.f32 0.1, %v2041_v62  ;;  %vm1575_vm4 = vcmp.ge.f32.partialorder %v2108_v1, 0.0 }
 0x11f   :  { %882 = vst.msk [vmem:[%s3010_s4 + $0x128] sm:$0xff] %vm844_vm9, %v817_v63  ;;  %v1700_v2 = vsel %vm1572_vm2, %v1437_v59, %v1636_v61  ;;  %v1639_v3 = vmul.f32 0.1, %v2108_v1  ;;  %v557_v4 = vpop.f32.mrf.mxu0  ;;  %v1440_v7 = vpop.f32.mrf.mxu1 }
 0x120   :  { %1765 = vst.msk [vmem:[%s3009_s5 + $0x140] sm:$0xff] %vm1724_vm6, %v1700_v2  ;;  %v822_v5 = vsel %vm694_vm3, %v2041_v62, %v758_v0  ;;  %vm692_vm5 = vcmp.ge.f32.partialorder %v557_v4, 0.0  ;;  %v756_v6 = vmul.f32 0.1, %v557_v4  ;;  %vm1573_vm7 = vcmp.ge.f32.partialorder %v1440_v7, 0.0 }
 0x121   :  { %887 = vst.msk [vmem:[%s3010_s4 + $0x150] sm:$0xff] %vm844_vm9, %v822_v5  ;;  %v1703_v8 = vsel %vm1575_vm4, %v2108_v1, %v1639_v3  ;;  %v1637_v9 = vmul.f32 0.1, %v1440_v7  ;;  %v2042_v10 = vpop.f32.mrf.mxu0  ;;  %v2111_v13 = vpop.f32.mrf.mxu1 }
 0x122   :  { %1768 = vst.msk [vmem:[%s3009_s5 + $0x158] sm:$0xff] %vm1724_vm6, %v1703_v8  ;;  %v820_v11 = vsel %vm692_vm5, %v557_v4, %v756_v6  ;;  %vm695_vm8 = vcmp.ge.f32.partialorder %v2042_v10, 0.0  ;;  %v759_v12 = vmul.f32 0.1, %v2042_v10  ;;  %vm1578_vm10 = vcmp.ge.f32.partialorder %v2111_v13, 0.0 }
 0x123   :  { %885 = vst.msk [vmem:[%s3010_s4 + $0x140] sm:$0xff] %vm844_vm9, %v820_v11  ;;  %v1701_v14 = vsel %vm1573_vm7, %v1440_v7, %v1637_v9  ;;  %v1642_v15 = vmul.f32 0.1, %v2111_v13  ;;  %v560_v16 = vpop.f32.mrf.mxu0  ;;  %v1453_v19 = vpop.f32.mrf.mxu1 }
 0x124   :  { %1766 = vst.msk [vmem:[%s3009_s5 + $0x148] sm:$0xff] %vm1724_vm6, %v1701_v14  ;;  %v823_v17 = vsel %vm695_vm8, %v2042_v10, %v759_v12  ;;  %vm693_vm11 = vcmp.ge.f32.partialorder %v560_v16, 0.0  ;;  %v757_v18 = vmul.f32 0.1, %v560_v16  ;;  %vm1576_vm12 = vcmp.ge.f32.partialorder %v1453_v19, 0.0 }
 0x125   :  { %888 = vst.msk [vmem:[%s3010_s4 + $0x158] sm:$0xff] %vm844_vm9, %v823_v17  ;;  %v1706_v20 = vsel %vm1578_vm10, %v2111_v13, %v1642_v15  ;;  %v1640_v21 = vmul.f32 0.1, %v1453_v19  ;;  %v2045_v22 = vpop.f32.mrf.mxu0  ;;  %v2112_v25 = vpop.f32.mrf.mxu1 }
 0x126   :  { %1771 = vst.msk [vmem:[%s3009_s5 + $0x170] sm:$0xff] %vm1724_vm6, %v1706_v20  ;;  %v821_v23 = vsel %vm693_vm11, %v560_v16, %v757_v18  ;;  %vm698_vm13 = vcmp.ge.f32.partialorder %v2045_v22, 0.0  ;;  %v762_v24 = vmul.f32 0.1, %v2045_v22  ;;  %vm1579_vm14 = vcmp.ge.f32.partialorder %v2112_v25, 0.0 }
 0x127   :  { %886 = vst.msk [vmem:[%s3010_s4 + $0x148] sm:$0xff] %vm844_vm9, %v821_v23  ;;  %v1704_v26 = vsel %vm1576_vm12, %v1453_v19, %v1640_v21  ;;  %v1643_v27 = vmul.f32 0.1, %v2112_v25  ;;  %v573_v28 = vpop.f32.mrf.mxu0  ;;  %v1456_v31 = vpop.f32.mrf.mxu1 }
 0x128   :  { %1769 = vst.msk [vmem:[%s3009_s5 + $0x160] sm:$0xff] %vm1724_vm6, %v1704_v26  ;;  %v826_v29 = vsel %vm698_vm13, %v2045_v22, %v762_v24  ;;  %vm696_vm15 = vcmp.ge.f32.partialorder %v573_v28, 0.0  ;;  %v760_v30 = vmul.f32 0.1, %v573_v28  ;;  %vm1577_vm0 = vcmp.ge.f32.partialorder %v1456_v31, 0.0 }
 0x129   :  { %891 = vst.msk [vmem:[%s3010_s4 + $0x170] sm:$0xff] %vm844_vm9, %v826_v29  ;;  %v1707_v32 = vsel %vm1579_vm14, %v2112_v25, %v1643_v27  ;;  %v1641_v33 = vmul.f32 0.1, %v1456_v31  ;;  %v2046_v34 = vpop.f32.mrf.mxu0  ;;  %v2115_v37 = vpop.f32.mrf.mxu1 }
 0x12a   :  { %1772 = vst.msk [vmem:[%s3009_s5 + $0x178] sm:$0xff] %vm1724_vm6, %v1707_v32  ;;  %v824_v35 = vsel %vm696_vm15, %v573_v28, %v760_v30  ;;  %vm699_vm1 = vcmp.ge.f32.partialorder %v2046_v34, 0.0  ;;  %v763_v36 = vmul.f32 0.1, %v2046_v34  ;;  %vm1582_vm2 = vcmp.ge.f32.partialorder %v2115_v37, 0.0 }
 0x12b   :  { %889 = vst.msk [vmem:[%s3010_s4 + $0x160] sm:$0xff] %vm844_vm9, %v824_v35  ;;  %v1705_v38 = vsel %vm1577_vm0, %v1456_v31, %v1641_v33  ;;  %v1646_v39 = vmul.f32 0.1, %v2115_v37  ;;  %v576_v40 = vpop.f32.mrf.mxu0  ;;  %v1469_v43 = vpop.f32.mrf.mxu1 }
 0x12c   :  { %1770 = vst.msk [vmem:[%s3009_s5 + $0x168] sm:$0xff] %vm1724_vm6, %v1705_v38  ;;  %v827_v41 = vsel %vm699_vm1, %v2046_v34, %v763_v36  ;;  %vm697_vm3 = vcmp.ge.f32.partialorder %v576_v40, 0.0  ;;  %v761_v42 = vmul.f32 0.1, %v576_v40  ;;  %vm1580_vm4 = vcmp.ge.f32.partialorder %v1469_v43, 0.0 }
 0x12d   :  { %892 = vst.msk [vmem:[%s3010_s4 + $0x178] sm:$0xff] %vm844_vm9, %v827_v41  ;;  %v1710_v44 = vsel %vm1582_vm2, %v2115_v37, %v1646_v39  ;;  %v1644_v45 = vmul.f32 0.1, %v1469_v43  ;;  %v2049_v46 = vpop.f32.mrf.mxu0  ;;  %v2116_v49 = vpop.f32.mrf.mxu1 }
 0x12e   :  { %1775 = vst.msk [vmem:[%s3009_s5 + $0x190] sm:$0xff] %vm1724_vm6, %v1710_v44  ;;  %v825_v47 = vsel %vm697_vm3, %v576_v40, %v761_v42  ;;  %vm702_vm5 = vcmp.ge.f32.partialorder %v2049_v46, 0.0  ;;  %v766_v48 = vmul.f32 0.1, %v2049_v46  ;;  %vm1583_vm7 = vcmp.ge.f32.partialorder %v2116_v49, 0.0 }
 0x12f   :  { %890 = vst.msk [vmem:[%s3010_s4 + $0x168] sm:$0xff] %vm844_vm9, %v825_v47  ;;  %v1708_v50 = vsel %vm1580_vm4, %v1469_v43, %v1644_v45  ;;  %v1647_v51 = vmul.f32 0.1, %v2116_v49  ;;  %v589_v52 = vpop.f32.mrf.mxu0  ;;  %v1472_v55 = vpop.f32.mrf.mxu1 }
 0x130   :  { %1773 = vst.msk [vmem:[%s3009_s5 + $0x180] sm:$0xff] %vm1724_vm6, %v1708_v50  ;;  %v830_v53 = vsel %vm702_vm5, %v2049_v46, %v766_v48  ;;  %vm700_vm8 = vcmp.ge.f32.partialorder %v589_v52, 0.0  ;;  %v764_v54 = vmul.f32 0.1, %v589_v52  ;;  %vm1581_vm10 = vcmp.ge.f32.partialorder %v1472_v55, 0.0 }
 0x131   :  { %895 = vst.msk [vmem:[%s3010_s4 + $0x190] sm:$0xff] %vm844_vm9, %v830_v53  ;;  %v1711_v56 = vsel %vm1583_vm7, %v2116_v49, %v1647_v51  ;;  %v1645_v57 = vmul.f32 0.1, %v1472_v55  ;;  %v2050_v58 = vpop.f32.mrf.mxu0  ;;  %v2119_v61 = vpop.f32.mrf.mxu1 }
 0x132   :  { %1776 = vst.msk [vmem:[%s3009_s5 + $0x198] sm:$0xff] %vm1724_vm6, %v1711_v56  ;;  %v828_v59 = vsel %vm700_vm8, %v589_v52, %v764_v54  ;;  %vm703_vm11 = vcmp.ge.f32.partialorder %v2050_v58, 0.0  ;;  %v767_v60 = vmul.f32 0.1, %v2050_v58  ;;  %vm1586_vm12 = vcmp.ge.f32.partialorder %v2119_v61, 0.0 }
 0x133   :  { %893 = vst.msk [vmem:[%s3010_s4 + $0x180] sm:$0xff] %vm844_vm9, %v828_v59  ;;  %v1709_v62 = vsel %vm1581_vm10, %v1472_v55, %v1645_v57  ;;  %v1650_v63 = vmul.f32 0.1, %v2119_v61  ;;  %v592_v0 = vpop.f32.mrf.mxu0  ;;  %v1485_v3 = vpop.f32.mrf.mxu1 }
 0x134   :  { %1774 = vst.msk [vmem:[%s3009_s5 + $0x188] sm:$0xff] %vm1724_vm6, %v1709_v62  ;;  %v831_v1 = vsel %vm703_vm11, %v2050_v58, %v767_v60  ;;  %vm701_vm13 = vcmp.ge.f32.partialorder %v592_v0, 0.0  ;;  %v765_v2 = vmul.f32 0.1, %v592_v0  ;;  %vm1584_vm14 = vcmp.ge.f32.partialorder %v1485_v3, 0.0 }
 0x135   :  { %896 = vst.msk [vmem:[%s3010_s4 + $0x198] sm:$0xff] %vm844_vm9, %v831_v1  ;;  %v1714_v4 = vsel %vm1586_vm12, %v2119_v61, %v1650_v63  ;;  %v1648_v5 = vmul.f32 0.1, %v1485_v3  ;;  %v2053_v6 = vpop.f32.mrf.mxu0  ;;  %v2120_v9 = vpop.f32.mrf.mxu1 }
 0x136   :  { %1779 = vst.msk [vmem:[%s3009_s5 + $0x1b0] sm:$0xff] %vm1724_vm6, %v1714_v4  ;;  %v829_v7 = vsel %vm701_vm13, %v592_v0, %v765_v2  ;;  %vm706_vm15 = vcmp.ge.f32.partialorder %v2053_v6, 0.0  ;;  %v770_v8 = vmul.f32 0.1, %v2053_v6  ;;  %vm1587_vm0 = vcmp.ge.f32.partialorder %v2120_v9, 0.0 }
 0x137   :  { %894 = vst.msk [vmem:[%s3010_s4 + $0x188] sm:$0xff] %vm844_vm9, %v829_v7  ;;  %v1712_v10 = vsel %vm1584_vm14, %v1485_v3, %v1648_v5  ;;  %v1651_v11 = vmul.f32 0.1, %v2120_v9  ;;  %v605_v12 = vpop.f32.mrf.mxu0  ;;  %v1488_v15 = vpop.f32.mrf.mxu1 }
 0x138   :  { %1777 = vst.msk [vmem:[%s3009_s5 + $0x1a0] sm:$0xff] %vm1724_vm6, %v1712_v10  ;;  %v834_v13 = vsel %vm706_vm15, %v2053_v6, %v770_v8  ;;  %vm704_vm1 = vcmp.ge.f32.partialorder %v605_v12, 0.0  ;;  %v768_v14 = vmul.f32 0.1, %v605_v12  ;;  %vm1585_vm2 = vcmp.ge.f32.partialorder %v1488_v15, 0.0 }
 0x139   :  { %899 = vst.msk [vmem:[%s3010_s4 + $0x1b0] sm:$0xff] %vm844_vm9, %v834_v13  ;;  %v1715_v16 = vsel %vm1587_vm0, %v2120_v9, %v1651_v11  ;;  %v1649_v17 = vmul.f32 0.1, %v1488_v15  ;;  %v2054_v18 = vpop.f32.mrf.mxu0  ;;  %v2123_v21 = vpop.f32.mrf.mxu1 }
 0x13a   :  { %1780 = vst.msk [vmem:[%s3009_s5 + $0x1b8] sm:$0xff] %vm1724_vm6, %v1715_v16  ;;  %v832_v19 = vsel %vm704_vm1, %v605_v12, %v768_v14  ;;  %vm707_vm3 = vcmp.ge.f32.partialorder %v2054_v18, 0.0  ;;  %v771_v20 = vmul.f32 0.1, %v2054_v18  ;;  %vm1590_vm4 = vcmp.ge.f32.partialorder %v2123_v21, 0.0 }
 0x13b   :  { %897 = vst.msk [vmem:[%s3010_s4 + $0x1a0] sm:$0xff] %vm844_vm9, %v832_v19  ;;  %v1713_v22 = vsel %vm1585_vm2, %v1488_v15, %v1649_v17  ;;  %v1654_v23 = vmul.f32 0.1, %v2123_v21  ;;  %v608_v24 = vpop.f32.mrf.mxu0  ;;  %v1501_v27 = vpop.f32.mrf.mxu1 }
 0x13c   :  { %1778 = vst.msk [vmem:[%s3009_s5 + $0x1a8] sm:$0xff] %vm1724_vm6, %v1713_v22  ;;  %v835_v25 = vsel %vm707_vm3, %v2054_v18, %v771_v20  ;;  %vm705_vm5 = vcmp.ge.f32.partialorder %v608_v24, 0.0  ;;  %v769_v26 = vmul.f32 0.1, %v608_v24  ;;  %vm1588_vm7 = vcmp.ge.f32.partialorder %v1501_v27, 0.0 }
 0x13d   :  { %900 = vst.msk [vmem:[%s3010_s4 + $0x1b8] sm:$0xff] %vm844_vm9, %v835_v25  ;;  %v1718_v28 = vsel %vm1590_vm4, %v2123_v21, %v1654_v23  ;;  %v1652_v29 = vmul.f32 0.1, %v1501_v27  ;;  %v2057_v30 = vpop.f32.mrf.mxu0  ;;  %v2124_v33 = vpop.f32.mrf.mxu1 }
 0x13e   :  { %1783 = vst.msk [vmem:[%s3009_s5 + $0x1d0] sm:$0xff] %vm1724_vm6, %v1718_v28  ;;  %v833_v31 = vsel %vm705_vm5, %v608_v24, %v769_v26  ;;  %vm710_vm8 = vcmp.ge.f32.partialorder %v2057_v30, 0.0  ;;  %v774_v32 = vmul.f32 0.1, %v2057_v30  ;;  %vm1591_vm10 = vcmp.ge.f32.partialorder %v2124_v33, 0.0 }
 0x13f   :  { %898 = vst.msk [vmem:[%s3010_s4 + $0x1a8] sm:$0xff] %vm844_vm9, %v833_v31  ;;  %v1716_v34 = vsel %vm1588_vm7, %v1501_v27, %v1652_v29  ;;  %v1655_v35 = vmul.f32 0.1, %v2124_v33  ;;  %v621_v36 = vpop.f32.mrf.mxu0  ;;  %v1504_v39 = vpop.f32.mrf.mxu1 }
 0x140   :  { %1781 = vst.msk [vmem:[%s3009_s5 + $0x1c0] sm:$0xff] %vm1724_vm6, %v1716_v34  ;;  %v838_v37 = vsel %vm710_vm8, %v2057_v30, %v774_v32  ;;  %vm708_vm11 = vcmp.ge.f32.partialorder %v621_v36, 0.0  ;;  %v772_v38 = vmul.f32 0.1, %v621_v36  ;;  %vm1589_vm12 = vcmp.ge.f32.partialorder %v1504_v39, 0.0 }
 0x141   :  { %903 = vst.msk [vmem:[%s3010_s4 + $0x1d0] sm:$0xff] %vm844_vm9, %v838_v37  ;;  %v1719_v40 = vsel %vm1591_vm10, %v2124_v33, %v1655_v35  ;;  %v1653_v41 = vmul.f32 0.1, %v1504_v39  ;;  %v2058_v42 = vpop.f32.mrf.mxu0  ;;  %v2127_v45 = vpop.f32.mrf.mxu1 }
 0x142   :  { %1784 = vst.msk [vmem:[%s3009_s5 + $0x1d8] sm:$0xff] %vm1724_vm6, %v1719_v40  ;;  %v836_v43 = vsel %vm708_vm11, %v621_v36, %v772_v38  ;;  %vm711_vm13 = vcmp.ge.f32.partialorder %v2058_v42, 0.0  ;;  %v775_v44 = vmul.f32 0.1, %v2058_v42  ;;  %vm1594_vm14 = vcmp.ge.f32.partialorder %v2127_v45, 0.0 }
 0x143   :  { %901 = vst.msk [vmem:[%s3010_s4 + $0x1c0] sm:$0xff] %vm844_vm9, %v836_v43  ;;  %v1717_v46 = vsel %vm1589_vm12, %v1504_v39, %v1653_v41  ;;  %v1658_v47 = vmul.f32 0.1, %v2127_v45  ;;  %v624_v48 = vpop.f32.mrf.mxu0  ;;  %v1517_v51 = vpop.f32.mrf.mxu1 }
 0x144   :  { %1782 = vst.msk [vmem:[%s3009_s5 + $0x1c8] sm:$0xff] %vm1724_vm6, %v1717_v46  ;;  %v839_v49 = vsel %vm711_vm13, %v2058_v42, %v775_v44  ;;  %vm709_vm15 = vcmp.ge.f32.partialorder %v624_v48, 0.0  ;;  %v773_v50 = vmul.f32 0.1, %v624_v48  ;;  %vm1592_vm0 = vcmp.ge.f32.partialorder %v1517_v51, 0.0 }
 0x145   :  { %904 = vst.msk [vmem:[%s3010_s4 + $0x1d8] sm:$0xff] %vm844_vm9, %v839_v49  ;;  %v1722_v52 = vsel %vm1594_vm14, %v2127_v45, %v1658_v47  ;;  %v1656_v53 = vmul.f32 0.1, %v1517_v51  ;;  %v2061_v54 = vpop.f32.mrf.mxu0  ;;  %v2128_v57 = vpop.f32.mrf.mxu1 }
 0x146   :  { %1787 = vst.msk [vmem:[%s3009_s5 + $0x1f0] sm:$0xff] %vm1724_vm6, %v1722_v52  ;;  %v837_v55 = vsel %vm709_vm15, %v624_v48, %v773_v50  ;;  %vm714_vm1 = vcmp.ge.f32.partialorder %v2061_v54, 0.0  ;;  %v778_v56 = vmul.f32 0.1, %v2061_v54  ;;  %vm1595_vm2 = vcmp.ge.f32.partialorder %v2128_v57, 0.0 }
 0x147   :  { %902 = vst.msk [vmem:[%s3010_s4 + $0x1c8] sm:$0xff] %vm844_vm9, %v837_v55  ;;  %v1720_v58 = vsel %vm1592_vm0, %v1517_v51, %v1656_v53  ;;  %v1659_v59 = vmul.f32 0.1, %v2128_v57  ;;  %v637_v60 = vpop.f32.mrf.mxu0  ;;  %v1520_v63 = vpop.f32.mrf.mxu1 }
 0x148   :  { %1785 = vst.msk [vmem:[%s3009_s5 + $0x1e0] sm:$0xff] %vm1724_vm6, %v1720_v58  ;;  %v842_v61 = vsel %vm714_vm1, %v2061_v54, %v778_v56  ;;  %vm712_vm3 = vcmp.ge.f32.partialorder %v637_v60, 0.0  ;;  %v776_v62 = vmul.f32 0.1, %v637_v60  ;;  %vm1593_vm4 = vcmp.ge.f32.partialorder %v1520_v63, 0.0 }
 0x149   :  { %907 = vst.msk [vmem:[%s3010_s4 + $0x1f0] sm:$0xff] %vm844_vm9, %v842_v61  ;;  %v1723_v0 = vsel %vm1595_vm2, %v2128_v57, %v1659_v59  ;;  %v1657_v1 = vmul.f32 0.1, %v1520_v63  ;;  %v2062_v2 = vpop.f32.mrf.mxu0 }
 0x14a   :  { %1788 = vst.msk [vmem:[%s3009_s5 + $0x1f8] sm:$0xff] %vm1724_vm6, %v1723_v0  ;;  %v840_v3 = vsel %vm712_vm3, %v637_v60, %v776_v62  ;;  %vm715_vm5 = vcmp.ge.f32.partialorder %v2062_v2, 0.0  ;;  %v779_v4 = vmul.f32 0.1, %v2062_v2 }
 0x14b   :  { %905 = vst.msk [vmem:[%s3010_s4 + $0x1e0] sm:$0xff] %vm844_vm9, %v840_v3  ;;  %v1721_v5 = vsel %vm1593_vm4, %v1520_v63, %v1657_v1  ;;  %v640_v6 = vpop.f32.mrf.mxu0 }
 0x14c   :  { %1786 = vst.msk [vmem:[%s3009_s5 + $0x1e8] sm:$0xff] %vm1724_vm6, %v1721_v5  ;;  %v843_v7 = vsel %vm715_vm5, %v2062_v2, %v779_v4  ;;  %vm713_vm7 = vcmp.ge.f32.partialorder %v640_v6, 0.0  ;;  %v777_v8 = vmul.f32 0.1, %v640_v6 }
 0x14d   :  { %908 = vst.msk [vmem:[%s3010_s4 + $0x1f8] sm:$0xff] %vm844_vm9, %v843_v7 }
 0x14e   :  { %v841_v9 = vsel %vm713_vm7, %v640_v6, %v777_v8 }
 0x14f   :  { %906 = vst.msk [vmem:[%s3010_s4 + $0x1e8] sm:$0xff] %vm844_vm9, %v841_v9 }

// kernel: kbnet_encoder_forward.10
= control target key start
LH: loop header
LB: loop body
LE: loop exit
PB: predicated region body
PF: predicated region fallthrough
CT: control target
= control target key end

     0   :  { %vm244_vm0 = vcmask 130048   ;;  %s1427_s1 = inlined_call_operand.vmem [shape: bf16[16,128], index: 1, kind: input, shape index: {}]   ;;  %s1428_s0 = inlined_call_operand.vmem [shape: bf16[512,16], index: 0, kind: input, shape index: {}]   ;;  %s1429_s2 = inlined_call_operand.vmem [shape: f32[512,128], index: 2, kind: output, shape index: {}]  }
   0x1   :  { %v1056_v0 = vld [vmem:[%s1427_s1] sm:$0xff]   ;;  %v1059_v3 = vld [vmem:[%s1428_s0 + $0x8] sm:$0xff]   ;;  %v1061_v5 = vld [vmem:[%s1428_s0 + $0x10] sm:$0xff]  }
   0x2   :  { %v1057_v1 = vld [vmem:[%s1428_s0] sm:$0xff]   ;;  %988 = vmatprep.subr.bf16.mxu0 %v1056_v0  ;;  %1054 = vmatprep.subr.bf16.mxu1 %v1056_v0  ;;  %v1060_v4 = vld [vmem:[%s1428_s0 + $0x88] sm:$0xff]   ;;  %v1062_v6 = vld [vmem:[%s1428_s0 + $0x90] sm:$0xff]  }
   0x3   :  { %v1058_v2 = vld [vmem:[%s1428_s0 + $0x80] sm:$0xff]   ;;  %989 = vmatpush3.bf16.msra.mxu0 %v1056_v0  ;;  %1055 = vmatpush3.bf16.msra.mxu1 %v1056_v0  ;;  %v1063_v7 = vld [vmem:[%s1428_s0 + $0x18] sm:$0xff]   ;;  %v1067_v11 = vld [vmem:[%s1428_s0 + $0x28] sm:$0xff]  }
   0x4   :  { %990 = vmatprep.mubr.msk.bf16.mxu0 %vm244_vm0, %v1057_v1  ;;  %1022 = vmatprep.mubr.msk.bf16.mxu1 %vm244_vm0, %v1058_v2  ;;  %v1064_v8 = vld [vmem:[%s1428_s0 + $0x98] sm:$0xff]   ;;  %v1065_v9 = vld [vmem:[%s1428_s0 + $0x20] sm:$0xff]   ;;  %v1068_v12 = vld [vmem:[%s1428_s0 + $0xa8] sm:$0xff]  }
   0x5   :  { %v1066_v10 = vld [vmem:[%s1428_s0 + $0xa0] sm:$0xff]   ;;  %v1069_v13 = vld [vmem:[%s1428_s0 + $0x30] sm:$0xff]   ;;  %v1071_v15 = vld [vmem:[%s1428_s0 + $0x38] sm:$0xff]  }
   0x6   :  { %991 = vmatmul.mubr.msk.bf16.vlgmr.msra.gmra.mxu0 %vm244_vm0, %v1059_v3  ;;  %1023 = vmatmul.mubr.msk.bf16.vlgmr.msra.gmra.mxu1 %vm244_vm0, %v1060_v4  ;;  %v1070_v14 = vld [vmem:[%s1428_s0 + $0xb0] sm:$0xff]   ;;  %v1072_v16 = vld [vmem:[%s1428_s0 + $0xb8] sm:$0xff]   ;;  %v1073_v17 = vld [vmem:[%s1428_s0 + $0x40] sm:$0xff]  }
   0x7   :  { %994 = vmatprep.mubr.msk.bf16.mxu0 %vm244_vm0, %v1061_v5  ;;  %1026 = vmatprep.mubr.msk.bf16.mxu1 %vm244_vm0, %v1062_v6  ;;  %v1074_v18 = vld [vmem:[%s1428_s0 + $0xc0] sm:$0xff]   ;;  %v1075_v19 = vld [vmem:[%s1428_s0 + $0x48] sm:$0xff]   ;;  %v1077_v21 = vld [vmem:[%s1428_s0 + $0x50] sm:$0xff]  }
   0x8   :  { %v1076_v20 = vld [vmem:[%s1428_s0 + $0xc8] sm:$0xff]   ;;  %v1078_v22 = vld [vmem:[%s1428_s0 + $0xd0] sm:$0xff]   ;;  %v1079_v23 = vld [vmem:[%s1428_s0 + $0x58] sm:$0xff]  }
   0x9   :  { %v1080_v24 = vld [vmem:[%s1428_s0 + $0xd8] sm:$0xff]   ;;  %v1081_v25 = vld [vmem:[%s1428_s0 + $0x60] sm:$0xff]   ;;  %v1083_v27 = vld [vmem:[%s1428_s0 + $0x68] sm:$0xff]  }
   0xa   :  { %v1082_v26 = vld [vmem:[%s1428_s0 + $0xe0] sm:$0xff]   ;;  %v1084_v28 = vld [vmem:[%s1428_s0 + $0xe8] sm:$0xff]   ;;  %v1085_v29 = vld [vmem:[%s1428_s0 + $0x70] sm:$0xff]  }
   0xb   :  { %v1086_v30 = vld [vmem:[%s1428_s0 + $0xf0] sm:$0xff]   ;;  %v1087_v31 = vld [vmem:[%s1428_s0 + $0x78] sm:$0xff]  }
   0xc   :  { %v1088_v32 = vld [vmem:[%s1428_s0 + $0xf8] sm:$0xff]  }
   0xe   :  { %995 = vmatmul.mubr.msk.bf16.gmra.mxu0 %vm244_vm0, %v1063_v7  ;;  %1027 = vmatmul.mubr.msk.bf16.gmra.mxu1 %vm244_vm0, %v1064_v8 }
   0xf   :  { %998 = vmatprep.mubr.msk.bf16.mxu0 %vm244_vm0, %v1065_v9  ;;  %1030 = vmatprep.mubr.msk.bf16.mxu1 %vm244_vm0, %v1066_v10 }
  0x16   :  { %999 = vmatmul.mubr.msk.bf16.gmra.mxu0 %vm244_vm0, %v1067_v11  ;;  %1031 = vmatmul.mubr.msk.bf16.gmra.mxu1 %vm244_vm0, %v1068_v12 }
  0x17   :  { %1002 = vmatprep.mubr.msk.bf16.mxu0 %vm244_vm0, %v1069_v13  ;;  %1034 = vmatprep.mubr.msk.bf16.mxu1 %vm244_vm0, %v1070_v14 }
  0x1e   :  { %1003 = vmatmul.mubr.msk.bf16.gmra.mxu0 %vm244_vm0, %v1071_v15  ;;  %1035 = vmatmul.mubr.msk.bf16.gmra.mxu1 %vm244_vm0, %v1072_v16 }
  0x1f   :  { %1006 = vmatprep.mubr.msk.bf16.mxu0 %vm244_vm0, %v1073_v17  ;;  %1038 = vmatprep.mubr.msk.bf16.mxu1 %vm244_vm0, %v1074_v18 }
  0x26   :  { %1007 = vmatmul.mubr.msk.bf16.gmra.mxu0 %vm244_vm0, %v1075_v19  ;;  %1039 = vmatmul.mubr.msk.bf16.gmra.mxu1 %vm244_vm0, %v1076_v20 }
  0x27   :  { %1010 = vmatprep.mubr.msk.bf16.mxu0 %vm244_vm0, %v1077_v21  ;;  %1042 = vmatprep.mubr.msk.bf16.mxu1 %vm244_vm0, %v1078_v22 }
  0x2e   :  { %1011 = vmatmul.mubr.msk.bf16.gmra.mxu0 %vm244_vm0, %v1079_v23  ;;  %1043 = vmatmul.mubr.msk.bf16.gmra.mxu1 %vm244_vm0, %v1080_v24 }
  0x2f   :  { %1014 = vmatprep.mubr.msk.bf16.mxu0 %vm244_vm0, %v1081_v25  ;;  %1046 = vmatprep.mubr.msk.bf16.mxu1 %vm244_vm0, %v1082_v26 }
  0x36   :  { %1015 = vmatmul.mubr.msk.bf16.gmra.mxu0 %vm244_vm0, %v1083_v27  ;;  %1047 = vmatmul.mubr.msk.bf16.gmra.mxu1 %vm244_vm0, %v1084_v28 }
  0x37   :  { %1018 = vmatprep.mubr.msk.bf16.mxu0 %vm244_vm0, %v1085_v29  ;;  %1050 = vmatprep.mubr.msk.bf16.mxu1 %vm244_vm0, %v1086_v30 }
  0x3e   :  { %1019 = vmatmul.mubr.msk.bf16.gmra.mxu0 %vm244_vm0, %v1087_v31  ;;  %1051 = vmatmul.mubr.msk.bf16.gmra.mxu1 %vm244_vm0, %v1088_v32 }
  0xc6   :  { %v992_v33 = vpop.f32.mrf.mxu0  ;;  %v1024_v34 = vpop.f32.mrf.mxu1 }
  0xc7   :  { %vm632_vm1 = vcmp.ge.f32.partialorder %v992_v33, 0.0  ;;  %v696_v35 = vmul.f32 0.1, %v992_v33  ;;  %vm664_vm2 = vcmp.ge.f32.partialorder %v1024_v34, 0.0  ;;  %v728_v36 = vmul.f32 0.1, %v1024_v34 }
  0xc8   :  { %v375_v37 = vpop.f32.mrf.mxu0  ;;  %v503_v38 = vpop.f32.mrf.mxu1 }
  0xc9   :  { %v760_v39 = vsel %vm632_vm1, %v992_v33, %v696_v35  ;;  %v792_v40 = vsel %vm664_vm2, %v1024_v34, %v728_v36  ;;  %vm630_vm3 = vcmp.ge.f32.partialorder %v375_v37, 0.0  ;;  %v694_v41 = vmul.f32 0.1, %v375_v37 }
  0xca   :  { %824 = vst [vmem:[%s1429_s2 + $0x10] sm:$0xff] %v760_v39  ;;  %856 = vst [vmem:[%s1429_s2 + $0x110] sm:$0xff] %v792_v40  ;;  %vm662_vm4 = vcmp.ge.f32.partialorder %v503_v38, 0.0  ;;  %v726_v42 = vmul.f32 0.1, %v503_v38  ;;  %v993_v43 = vpop.f32.mrf.mxu0  ;;  %v1025_v44 = vpop.f32.mrf.mxu1 }
  0xcb   :  { %v758_v45 = vsel %vm630_vm3, %v375_v37, %v694_v41  ;;  %vm633_vm5 = vcmp.ge.f32.partialorder %v993_v43, 0.0  ;;  %v697_v46 = vmul.f32 0.1, %v993_v43  ;;  %vm665_vm6 = vcmp.ge.f32.partialorder %v1025_v44, 0.0 }
  0xcc   :  { %822 = vst [vmem:[%s1429_s2] sm:$0xff] %v758_v45  ;;  %v790_v47 = vsel %vm662_vm4, %v503_v38, %v726_v42  ;;  %v729_v48 = vmul.f32 0.1, %v1025_v44  ;;  %v378_v49 = vpop.f32.mrf.mxu0  ;;  %v506_v50 = vpop.f32.mrf.mxu1 }
  0xcd   :  { %854 = vst [vmem:[%s1429_s2 + $0x100] sm:$0xff] %v790_v47  ;;  %v761_v51 = vsel %vm633_vm5, %v993_v43, %v697_v46  ;;  %vm631_vm7 = vcmp.ge.f32.partialorder %v378_v49, 0.0  ;;  %v695_v52 = vmul.f32 0.1, %v378_v49  ;;  %vm663_vm8 = vcmp.ge.f32.partialorder %v506_v50, 0.0 }
  0xce   :  { %825 = vst [vmem:[%s1429_s2 + $0x18] sm:$0xff] %v761_v51  ;;  %v793_v53 = vsel %vm665_vm6, %v1025_v44, %v729_v48  ;;  %v727_v54 = vmul.f32 0.1, %v506_v50  ;;  %v996_v55 = vpop.f32.mrf.mxu0  ;;  %v1028_v56 = vpop.f32.mrf.mxu1 }
  0xcf   :  { %857 = vst [vmem:[%s1429_s2 + $0x118] sm:$0xff] %v793_v53  ;;  %v759_v57 = vsel %vm631_vm7, %v378_v49, %v695_v52  ;;  %vm636_vm9 = vcmp.ge.f32.partialorder %v996_v55, 0.0  ;;  %v700_v58 = vmul.f32 0.1, %v996_v55  ;;  %vm668_vm10 = vcmp.ge.f32.partialorder %v1028_v56, 0.0 }
  0xd0   :  { %823 = vst [vmem:[%s1429_s2 + $0x8] sm:$0xff] %v759_v57  ;;  %v791_v59 = vsel %vm663_vm8, %v506_v50, %v727_v54  ;;  %v732_v60 = vmul.f32 0.1, %v1028_v56  ;;  %v391_v61 = vpop.f32.mrf.mxu0  ;;  %v519_v62 = vpop.f32.mrf.mxu1 }
  0xd1   :  { %855 = vst [vmem:[%s1429_s2 + $0x108] sm:$0xff] %v791_v59  ;;  %v764_v63 = vsel %vm636_vm9, %v996_v55, %v700_v58  ;;  %vm634_vm11 = vcmp.ge.f32.partialorder %v391_v61, 0.0  ;;  %v698_v0 = vmul.f32 0.1, %v391_v61  ;;  %vm666_vm12 = vcmp.ge.f32.partialorder %v519_v62, 0.0 }
  0xd2   :  { %828 = vst [vmem:[%s1429_s2 + $0x30] sm:$0xff] %v764_v63  ;;  %v796_v1 = vsel %vm668_vm10, %v1028_v56, %v732_v60  ;;  %v730_v2 = vmul.f32 0.1, %v519_v62  ;;  %v997_v3 = vpop.f32.mrf.mxu0  ;;  %v1029_v4 = vpop.f32.mrf.mxu1 }
  0xd3   :  { %860 = vst [vmem:[%s1429_s2 + $0x130] sm:$0xff] %v796_v1  ;;  %v762_v5 = vsel %vm634_vm11, %v391_v61, %v698_v0  ;;  %vm637_vm13 = vcmp.ge.f32.partialorder %v997_v3, 0.0  ;;  %v701_v6 = vmul.f32 0.1, %v997_v3  ;;  %vm669_vm14 = vcmp.ge.f32.partialorder %v1029_v4, 0.0 }
  0xd4   :  { %826 = vst [vmem:[%s1429_s2 + $0x20] sm:$0xff] %v762_v5  ;;  %v794_v7 = vsel %vm666_vm12, %v519_v62, %v730_v2  ;;  %v733_v8 = vmul.f32 0.1, %v1029_v4  ;;  %v394_v9 = vpop.f32.mrf.mxu0  ;;  %v522_v10 = vpop.f32.mrf.mxu1 }
  0xd5   :  { %858 = vst [vmem:[%s1429_s2 + $0x120] sm:$0xff] %v794_v7  ;;  %v765_v11 = vsel %vm637_vm13, %v997_v3, %v701_v6  ;;  %vm635_vm15 = vcmp.ge.f32.partialorder %v394_v9, 0.0  ;;  %v699_v12 = vmul.f32 0.1, %v394_v9  ;;  %vm667_vm0 = vcmp.ge.f32.partialorder %v522_v10, 0.0 }
  0xd6   :  { %829 = vst [vmem:[%s1429_s2 + $0x38] sm:$0xff] %v765_v11  ;;  %v797_v13 = vsel %vm669_vm14, %v1029_v4, %v733_v8  ;;  %v731_v14 = vmul.f32 0.1, %v522_v10  ;;  %v1000_v15 = vpop.f32.mrf.mxu0  ;;  %v1032_v16 = vpop.f32.mrf.mxu1 }
  0xd7   :  { %861 = vst [vmem:[%s1429_s2 + $0x138] sm:$0xff] %v797_v13  ;;  %v763_v17 = vsel %vm635_vm15, %v394_v9, %v699_v12  ;;  %vm640_vm1 = vcmp.ge.f32.partialorder %v1000_v15, 0.0  ;;  %v704_v18 = vmul.f32 0.1, %v1000_v15  ;;  %vm672_vm2 = vcmp.ge.f32.partialorder %v1032_v16, 0.0 }
  0xd8   :  { %827 = vst [vmem:[%s1429_s2 + $0x28] sm:$0xff] %v763_v17  ;;  %v795_v19 = vsel %vm667_vm0, %v522_v10, %v731_v14  ;;  %v736_v20 = vmul.f32 0.1, %v1032_v16  ;;  %v407_v21 = vpop.f32.mrf.mxu0  ;;  %v535_v22 = vpop.f32.mrf.mxu1 }
  0xd9   :  { %859 = vst [vmem:[%s1429_s2 + $0x128] sm:$0xff] %v795_v19  ;;  %v768_v23 = vsel %vm640_vm1, %v1000_v15, %v704_v18  ;;  %vm638_vm3 = vcmp.ge.f32.partialorder %v407_v21, 0.0  ;;  %v702_v24 = vmul.f32 0.1, %v407_v21  ;;  %vm670_vm4 = vcmp.ge.f32.partialorder %v535_v22, 0.0 }
  0xda   :  { %832 = vst [vmem:[%s1429_s2 + $0x50] sm:$0xff] %v768_v23  ;;  %v800_v25 = vsel %vm672_vm2, %v1032_v16, %v736_v20  ;;  %v734_v26 = vmul.f32 0.1, %v535_v22  ;;  %v1001_v27 = vpop.f32.mrf.mxu0  ;;  %v1033_v28 = vpop.f32.mrf.mxu1 }
  0xdb   :  { %864 = vst [vmem:[%s1429_s2 + $0x150] sm:$0xff] %v800_v25  ;;  %v766_v29 = vsel %vm638_vm3, %v407_v21, %v702_v24  ;;  %vm641_vm5 = vcmp.ge.f32.partialorder %v1001_v27, 0.0  ;;  %v705_v30 = vmul.f32 0.1, %v1001_v27  ;;  %vm673_vm6 = vcmp.ge.f32.partialorder %v1033_v28, 0.0 }
  0xdc   :  { %830 = vst [vmem:[%s1429_s2 + $0x40] sm:$0xff] %v766_v29  ;;  %v798_v31 = vsel %vm670_vm4, %v535_v22, %v734_v26  ;;  %v737_v32 = vmul.f32 0.1, %v1033_v28  ;;  %v410_v33 = vpop.f32.mrf.mxu0  ;;  %v538_v34 = vpop.f32.mrf.mxu1 }
  0xdd   :  { %862 = vst [vmem:[%s1429_s2 + $0x140] sm:$0xff] %v798_v31  ;;  %v769_v35 = vsel %vm641_vm5, %v1001_v27, %v705_v30  ;;  %vm639_vm7 = vcmp.ge.f32.partialorder %v410_v33, 0.0  ;;  %v703_v36 = vmul.f32 0.1, %v410_v33  ;;  %vm671_vm8 = vcmp.ge.f32.partialorder %v538_v34, 0.0 }
  0xde   :  { %833 = vst [vmem:[%s1429_s2 + $0x58] sm:$0xff] %v769_v35  ;;  %v801_v37 = vsel %vm673_vm6, %v1033_v28, %v737_v32  ;;  %v735_v38 = vmul.f32 0.1, %v538_v34  ;;  %v1004_v39 = vpop.f32.mrf.mxu0  ;;  %v1036_v40 = vpop.f32.mrf.mxu1 }
  0xdf   :  { %865 = vst [vmem:[%s1429_s2 + $0x158] sm:$0xff] %v801_v37  ;;  %v767_v41 = vsel %vm639_vm7, %v410_v33, %v703_v36  ;;  %vm644_vm9 = vcmp.ge.f32.partialorder %v1004_v39, 0.0  ;;  %v708_v42 = vmul.f32 0.1, %v1004_v39  ;;  %vm676_vm10 = vcmp.ge.f32.partialorder %v1036_v40, 0.0 }
  0xe0   :  { %831 = vst [vmem:[%s1429_s2 + $0x48] sm:$0xff] %v767_v41  ;;  %v799_v43 = vsel %vm671_vm8, %v538_v34, %v735_v38  ;;  %v740_v44 = vmul.f32 0.1, %v1036_v40  ;;  %v423_v45 = vpop.f32.mrf.mxu0  ;;  %v551_v46 = vpop.f32.mrf.mxu1 }
  0xe1   :  { %863 = vst [vmem:[%s1429_s2 + $0x148] sm:$0xff] %v799_v43  ;;  %v772_v47 = vsel %vm644_vm9, %v1004_v39, %v708_v42  ;;  %vm642_vm11 = vcmp.ge.f32.partialorder %v423_v45, 0.0  ;;  %v706_v48 = vmul.f32 0.1, %v423_v45  ;;  %vm674_vm12 = vcmp.ge.f32.partialorder %v551_v46, 0.0 }
  0xe2   :  { %836 = vst [vmem:[%s1429_s2 + $0x70] sm:$0xff] %v772_v47  ;;  %v804_v49 = vsel %vm676_vm10, %v1036_v40, %v740_v44  ;;  %v738_v50 = vmul.f32 0.1, %v551_v46  ;;  %v1005_v51 = vpop.f32.mrf.mxu0  ;;  %v1037_v52 = vpop.f32.mrf.mxu1 }
  0xe3   :  { %868 = vst [vmem:[%s1429_s2 + $0x170] sm:$0xff] %v804_v49  ;;  %v770_v53 = vsel %vm642_vm11, %v423_v45, %v706_v48  ;;  %vm645_vm13 = vcmp.ge.f32.partialorder %v1005_v51, 0.0  ;;  %v709_v54 = vmul.f32 0.1, %v1005_v51  ;;  %vm677_vm14 = vcmp.ge.f32.partialorder %v1037_v52, 0.0 }
  0xe4   :  { %834 = vst [vmem:[%s1429_s2 + $0x60] sm:$0xff] %v770_v53  ;;  %v802_v55 = vsel %vm674_vm12, %v551_v46, %v738_v50  ;;  %v741_v56 = vmul.f32 0.1, %v1037_v52  ;;  %v426_v57 = vpop.f32.mrf.mxu0  ;;  %v554_v58 = vpop.f32.mrf.mxu1 }
  0xe5   :  { %866 = vst [vmem:[%s1429_s2 + $0x160] sm:$0xff] %v802_v55  ;;  %v773_v59 = vsel %vm645_vm13, %v1005_v51, %v709_v54  ;;  %vm643_vm15 = vcmp.ge.f32.partialorder %v426_v57, 0.0  ;;  %v707_v60 = vmul.f32 0.1, %v426_v57  ;;  %vm675_vm0 = vcmp.ge.f32.partialorder %v554_v58, 0.0 }
  0xe6   :  { %837 = vst [vmem:[%s1429_s2 + $0x78] sm:$0xff] %v773_v59  ;;  %v805_v61 = vsel %vm677_vm14, %v1037_v52, %v741_v56  ;;  %v739_v62 = vmul.f32 0.1, %v554_v58  ;;  %v1008_v63 = vpop.f32.mrf.mxu0  ;;  %v1040_v0 = vpop.f32.mrf.mxu1 }
  0xe7   :  { %869 = vst [vmem:[%s1429_s2 + $0x178] sm:$0xff] %v805_v61  ;;  %v771_v1 = vsel %vm643_vm15, %v426_v57, %v707_v60  ;;  %vm648_vm1 = vcmp.ge.f32.partialorder %v1008_v63, 0.0  ;;  %v712_v2 = vmul.f32 0.1, %v1008_v63  ;;  %vm680_vm2 = vcmp.ge.f32.partialorder %v1040_v0, 0.0 }
  0xe8   :  { %835 = vst [vmem:[%s1429_s2 + $0x68] sm:$0xff] %v771_v1  ;;  %v803_v3 = vsel %vm675_vm0, %v554_v58, %v739_v62  ;;  %v744_v4 = vmul.f32 0.1, %v1040_v0  ;;  %v439_v5 = vpop.f32.mrf.mxu0  ;;  %v567_v6 = vpop.f32.mrf.mxu1 }
  0xe9   :  { %867 = vst [vmem:[%s1429_s2 + $0x168] sm:$0xff] %v803_v3  ;;  %v776_v7 = vsel %vm648_vm1, %v1008_v63, %v712_v2  ;;  %vm646_vm3 = vcmp.ge.f32.partialorder %v439_v5, 0.0  ;;  %v710_v8 = vmul.f32 0.1, %v439_v5  ;;  %vm678_vm4 = vcmp.ge.f32.partialorder %v567_v6, 0.0 }
  0xea   :  { %840 = vst [vmem:[%s1429_s2 + $0x90] sm:$0xff] %v776_v7  ;;  %v808_v9 = vsel %vm680_vm2, %v1040_v0, %v744_v4  ;;  %v742_v10 = vmul.f32 0.1, %v567_v6  ;;  %v1009_v11 = vpop.f32.mrf.mxu0  ;;  %v1041_v12 = vpop.f32.mrf.mxu1 }
  0xeb   :  { %872 = vst [vmem:[%s1429_s2 + $0x190] sm:$0xff] %v808_v9  ;;  %v774_v13 = vsel %vm646_vm3, %v439_v5, %v710_v8  ;;  %vm649_vm5 = vcmp.ge.f32.partialorder %v1009_v11, 0.0  ;;  %v713_v14 = vmul.f32 0.1, %v1009_v11  ;;  %vm681_vm6 = vcmp.ge.f32.partialorder %v1041_v12, 0.0 }
  0xec   :  { %838 = vst [vmem:[%s1429_s2 + $0x80] sm:$0xff] %v774_v13  ;;  %v806_v15 = vsel %vm678_vm4, %v567_v6, %v742_v10  ;;  %v745_v16 = vmul.f32 0.1, %v1041_v12  ;;  %v442_v17 = vpop.f32.mrf.mxu0  ;;  %v570_v18 = vpop.f32.mrf.mxu1 }
  0xed   :  { %870 = vst [vmem:[%s1429_s2 + $0x180] sm:$0xff] %v806_v15  ;;  %v777_v19 = vsel %vm649_vm5, %v1009_v11, %v713_v14  ;;  %vm647_vm7 = vcmp.ge.f32.partialorder %v442_v17, 0.0  ;;  %v711_v20 = vmul.f32 0.1, %v442_v17  ;;  %vm679_vm8 = vcmp.ge.f32.partialorder %v570_v18, 0.0 }
  0xee   :  { %841 = vst [vmem:[%s1429_s2 + $0x98] sm:$0xff] %v777_v19  ;;  %v809_v21 = vsel %vm681_vm6, %v1041_v12, %v745_v16  ;;  %v743_v22 = vmul.f32 0.1, %v570_v18  ;;  %v1012_v23 = vpop.f32.mrf.mxu0  ;;  %v1044_v24 = vpop.f32.mrf.mxu1 }
  0xef   :  { %873 = vst [vmem:[%s1429_s2 + $0x198] sm:$0xff] %v809_v21  ;;  %v775_v25 = vsel %vm647_vm7, %v442_v17, %v711_v20  ;;  %vm652_vm9 = vcmp.ge.f32.partialorder %v1012_v23, 0.0  ;;  %v716_v26 = vmul.f32 0.1, %v1012_v23  ;;  %vm684_vm10 = vcmp.ge.f32.partialorder %v1044_v24, 0.0 }
  0xf0   :  { %839 = vst [vmem:[%s1429_s2 + $0x88] sm:$0xff] %v775_v25  ;;  %v807_v27 = vsel %vm679_vm8, %v570_v18, %v743_v22  ;;  %v748_v28 = vmul.f32 0.1, %v1044_v24  ;;  %v455_v29 = vpop.f32.mrf.mxu0  ;;  %v583_v30 = vpop.f32.mrf.mxu1 }
  0xf1   :  { %871 = vst [vmem:[%s1429_s2 + $0x188] sm:$0xff] %v807_v27  ;;  %v780_v31 = vsel %vm652_vm9, %v1012_v23, %v716_v26  ;;  %vm650_vm11 = vcmp.ge.f32.partialorder %v455_v29, 0.0  ;;  %v714_v32 = vmul.f32 0.1, %v455_v29  ;;  %vm682_vm12 = vcmp.ge.f32.partialorder %v583_v30, 0.0 }
  0xf2   :  { %844 = vst [vmem:[%s1429_s2 + $0xb0] sm:$0xff] %v780_v31  ;;  %v812_v33 = vsel %vm684_vm10, %v1044_v24, %v748_v28  ;;  %v746_v34 = vmul.f32 0.1, %v583_v30  ;;  %v1013_v35 = vpop.f32.mrf.mxu0  ;;  %v1045_v36 = vpop.f32.mrf.mxu1 }
  0xf3   :  { %876 = vst [vmem:[%s1429_s2 + $0x1b0] sm:$0xff] %v812_v33  ;;  %v778_v37 = vsel %vm650_vm11, %v455_v29, %v714_v32  ;;  %vm653_vm13 = vcmp.ge.f32.partialorder %v1013_v35, 0.0  ;;  %v717_v38 = vmul.f32 0.1, %v1013_v35  ;;  %vm685_vm14 = vcmp.ge.f32.partialorder %v1045_v36, 0.0 }
  0xf4   :  { %842 = vst [vmem:[%s1429_s2 + $0xa0] sm:$0xff] %v778_v37  ;;  %v810_v39 = vsel %vm682_vm12, %v583_v30, %v746_v34  ;;  %v749_v40 = vmul.f32 0.1, %v1045_v36  ;;  %v458_v41 = vpop.f32.mrf.mxu0  ;;  %v586_v42 = vpop.f32.mrf.mxu1 }
  0xf5   :  { %874 = vst [vmem:[%s1429_s2 + $0x1a0] sm:$0xff] %v810_v39  ;;  %v781_v43 = vsel %vm653_vm13, %v1013_v35, %v717_v38  ;;  %vm651_vm15 = vcmp.ge.f32.partialorder %v458_v41, 0.0  ;;  %v715_v44 = vmul.f32 0.1, %v458_v41  ;;  %vm683_vm0 = vcmp.ge.f32.partialorder %v586_v42, 0.0 }
  0xf6   :  { %845 = vst [vmem:[%s1429_s2 + $0xb8] sm:$0xff] %v781_v43  ;;  %v813_v45 = vsel %vm685_vm14, %v1045_v36, %v749_v40  ;;  %v747_v46 = vmul.f32 0.1, %v586_v42  ;;  %v1016_v47 = vpop.f32.mrf.mxu0  ;;  %v1048_v48 = vpop.f32.mrf.mxu1 }
  0xf7   :  { %877 = vst [vmem:[%s1429_s2 + $0x1b8] sm:$0xff] %v813_v45  ;;  %v779_v49 = vsel %vm651_vm15, %v458_v41, %v715_v44  ;;  %vm656_vm1 = vcmp.ge.f32.partialorder %v1016_v47, 0.0  ;;  %v720_v50 = vmul.f32 0.1, %v1016_v47  ;;  %vm688_vm2 = vcmp.ge.f32.partialorder %v1048_v48, 0.0 }
  0xf8   :  { %843 = vst [vmem:[%s1429_s2 + $0xa8] sm:$0xff] %v779_v49  ;;  %v811_v51 = vsel %vm683_vm0, %v586_v42, %v747_v46  ;;  %v752_v52 = vmul.f32 0.1, %v1048_v48  ;;  %v471_v53 = vpop.f32.mrf.mxu0  ;;  %v599_v54 = vpop.f32.mrf.mxu1 }
  0xf9   :  { %875 = vst [vmem:[%s1429_s2 + $0x1a8] sm:$0xff] %v811_v51  ;;  %v784_v55 = vsel %vm656_vm1, %v1016_v47, %v720_v50  ;;  %vm654_vm3 = vcmp.ge.f32.partialorder %v471_v53, 0.0  ;;  %v718_v56 = vmul.f32 0.1, %v471_v53  ;;  %vm686_vm4 = vcmp.ge.f32.partialorder %v599_v54, 0.0 }
  0xfa   :  { %848 = vst [vmem:[%s1429_s2 + $0xd0] sm:$0xff] %v784_v55  ;;  %v816_v57 = vsel %vm688_vm2, %v1048_v48, %v752_v52  ;;  %v750_v58 = vmul.f32 0.1, %v599_v54  ;;  %v1017_v59 = vpop.f32.mrf.mxu0  ;;  %v1049_v60 = vpop.f32.mrf.mxu1 }
  0xfb   :  { %880 = vst [vmem:[%s1429_s2 + $0x1d0] sm:$0xff] %v816_v57  ;;  %v782_v61 = vsel %vm654_vm3, %v471_v53, %v718_v56  ;;  %vm657_vm5 = vcmp.ge.f32.partialorder %v1017_v59, 0.0  ;;  %v721_v62 = vmul.f32 0.1, %v1017_v59  ;;  %vm689_vm6 = vcmp.ge.f32.partialorder %v1049_v60, 0.0 }
  0xfc   :  { %846 = vst [vmem:[%s1429_s2 + $0xc0] sm:$0xff] %v782_v61  ;;  %v814_v63 = vsel %vm686_vm4, %v599_v54, %v750_v58  ;;  %v753_v0 = vmul.f32 0.1, %v1049_v60  ;;  %v474_v1 = vpop.f32.mrf.mxu0  ;;  %v602_v2 = vpop.f32.mrf.mxu1 }
  0xfd   :  { %878 = vst [vmem:[%s1429_s2 + $0x1c0] sm:$0xff] %v814_v63  ;;  %v785_v3 = vsel %vm657_vm5, %v1017_v59, %v721_v62  ;;  %vm655_vm7 = vcmp.ge.f32.partialorder %v474_v1, 0.0  ;;  %v719_v4 = vmul.f32 0.1, %v474_v1  ;;  %vm687_vm8 = vcmp.ge.f32.partialorder %v602_v2, 0.0 }
  0xfe   :  { %849 = vst [vmem:[%s1429_s2 + $0xd8] sm:$0xff] %v785_v3  ;;  %v817_v5 = vsel %vm689_vm6, %v1049_v60, %v753_v0  ;;  %v751_v6 = vmul.f32 0.1, %v602_v2  ;;  %v1020_v7 = vpop.f32.mrf.mxu0  ;;  %v1052_v8 = vpop.f32.mrf.mxu1 }
  0xff   :  { %881 = vst [vmem:[%s1429_s2 + $0x1d8] sm:$0xff] %v817_v5  ;;  %v783_v9 = vsel %vm655_vm7, %v474_v1, %v719_v4  ;;  %vm660_vm9 = vcmp.ge.f32.partialorder %v1020_v7, 0.0  ;;  %v724_v10 = vmul.f32 0.1, %v1020_v7  ;;  %vm692_vm10 = vcmp.ge.f32.partialorder %v1052_v8, 0.0 }
 0x100   :  { %847 = vst [vmem:[%s1429_s2 + $0xc8] sm:$0xff] %v783_v9  ;;  %v815_v11 = vsel %vm687_vm8, %v602_v2, %v751_v6  ;;  %v756_v12 = vmul.f32 0.1, %v1052_v8  ;;  %v487_v13 = vpop.f32.mrf.mxu0  ;;  %v615_v14 = vpop.f32.mrf.mxu1 }
 0x101   :  { %879 = vst [vmem:[%s1429_s2 + $0x1c8] sm:$0xff] %v815_v11  ;;  %v788_v15 = vsel %vm660_vm9, %v1020_v7, %v724_v10  ;;  %vm658_vm11 = vcmp.ge.f32.partialorder %v487_v13, 0.0  ;;  %v722_v16 = vmul.f32 0.1, %v487_v13  ;;  %vm690_vm12 = vcmp.ge.f32.partialorder %v615_v14, 0.0 }
 0x102   :  { %852 = vst [vmem:[%s1429_s2 + $0xf0] sm:$0xff] %v788_v15  ;;  %v820_v17 = vsel %vm692_vm10, %v1052_v8, %v756_v12  ;;  %v754_v18 = vmul.f32 0.1, %v615_v14  ;;  %v1021_v19 = vpop.f32.mrf.mxu0  ;;  %v1053_v20 = vpop.f32.mrf.mxu1 }
 0x103   :  { %884 = vst [vmem:[%s1429_s2 + $0x1f0] sm:$0xff] %v820_v17  ;;  %v786_v21 = vsel %vm658_vm11, %v487_v13, %v722_v16  ;;  %vm661_vm13 = vcmp.ge.f32.partialorder %v1021_v19, 0.0  ;;  %v725_v22 = vmul.f32 0.1, %v1021_v19  ;;  %vm693_vm14 = vcmp.ge.f32.partialorder %v1053_v20, 0.0 }
 0x104   :  { %850 = vst [vmem:[%s1429_s2 + $0xe0] sm:$0xff] %v786_v21  ;;  %v818_v23 = vsel %vm690_vm12, %v615_v14, %v754_v18  ;;  %v757_v24 = vmul.f32 0.1, %v1053_v20  ;;  %v490_v25 = vpop.f32.mrf.mxu0  ;;  %v618_v26 = vpop.f32.mrf.mxu1 }
 0x105   :  { %882 = vst [vmem:[%s1429_s2 + $0x1e0] sm:$0xff] %v818_v23  ;;  %v789_v27 = vsel %vm661_vm13, %v1021_v19, %v725_v22  ;;  %vm659_vm15 = vcmp.ge.f32.partialorder %v490_v25, 0.0  ;;  %v723_v28 = vmul.f32 0.1, %v490_v25  ;;  %vm691_vm0 = vcmp.ge.f32.partialorder %v618_v26, 0.0 }
 0x106   :  { %853 = vst [vmem:[%s1429_s2 + $0xf8] sm:$0xff] %v789_v27  ;;  %v821_v29 = vsel %vm693_vm14, %v1053_v20, %v757_v24  ;;  %v755_v30 = vmul.f32 0.1, %v618_v26 }
 0x107   :  { %885 = vst [vmem:[%s1429_s2 + $0x1f8] sm:$0xff] %v821_v29  ;;  %v787_v31 = vsel %vm659_vm15, %v490_v25, %v723_v28 }
 0x108   :  { %851 = vst [vmem:[%s1429_s2 + $0xe8] sm:$0xff] %v787_v31  ;;  %v819_v32 = vsel %vm691_vm0, %v618_v26, %v755_v30 }
 0x109   :  { %883 = vst [vmem:[%s1429_s2 + $0x1e8] sm:$0xff] %v819_v32 }

// kernel: mul.25
= control target key start
LH: loop header
LB: loop body
LE: loop exit
PB: predicated region body
PF: predicated region fallthrough
CT: control target
= control target key end

     0   :  { %s131_s8 = smov 104   ;;  %s132_s9 = smov 112   ;;  %vm8_vm0 = vcmask 64512   ;;  %s222_s0 = inlined_call_operand.vmem [shape: f32[128], index: 0, kind: input, shape index: {}]   ;;  %s223_s1 = inlined_call_operand.vmem [shape: f32[2,8,8], index: 1, kind: output, shape index: {}]  }
   0x1   :  { %v5_v0 = vld [vmem:[%s222_s0] sm:$0x1]  ;;  %s130_s0 = smov 120   ;;  %s133_s10 = smov 96  }
   0x2   :  { %6 = vst [vmem:[#allocation0] sm:$0x1] %v5_v0  ;;  %s134_s11 = smov 88   ;;  %s135_s12 = smov 80  }
   0x3   :  { %s136_s13 = smov 72   ;;  %s137_s14 = smov 64  }
   0x4   :  { %s138_s17 = smov 56   ;;  %s139_s18 = smov 48  }
   0x5   :  { %s140_s19 = smov 40   ;;  %s141_s20 = smov 32  }
   0x6   :  { %s142_s21 = smov 24   ;;  %s143_s22 = smov 16  }
   0x7   :  { %s144_s23 = smov 8  }
   0x9   :  { %v10_v1 = vld [vmem:[#allocation0] sm:$0x1]  }
   0xa   :  { %v22_v2 = vld [vmem:[#allocation0] sm:$0x1]   ;;  %11 = vrot.lane.b32.xlu0 %v10_v1, %s130_s0 }
   0xb   :  { %23 = vrot.lane.b32.xlu1 %v22_v2, %s131_s8  ;;  %v16_v3 = vld [vmem:[#allocation0] sm:$0x1]  }
   0xc   :  { %v28_v4 = vld [vmem:[#allocation0] sm:$0x1]  }
   0xd   :  { %v34_v5 = vld [vmem:[#allocation0] sm:$0x1]  }
   0xe   :  { %17 = vrot.lane.b32.xlu0 %v16_v3, %s132_s9  ;;  %v40_v6 = vld [vmem:[#allocation0] sm:$0x1]  }
   0xf   :  { %29 = vrot.lane.b32.xlu1 %v28_v4, %s133_s10  ;;  %v46_v7 = vld [vmem:[#allocation0] sm:$0x1]  }
  0x10   :  { %v52_v8 = vld [vmem:[#allocation0] sm:$0x1]  }
  0x11   :  { %v58_v9 = vld [vmem:[#allocation0] sm:$0x1]  }
  0x12   :  { %35 = vrot.lane.b32.xlu0 %v34_v5, %s134_s11  ;;  %v64_v10 = vld [vmem:[#allocation0] sm:$0x1]  }
  0x13   :  { %41 = vrot.lane.b32.xlu1 %v40_v6, %s135_s12  ;;  %v7_v11 = vld [vmem:[#allocation0] sm:$0x1]  }
  0x14   :  { %9 = vst.msk [vmem:[%s223_s1] sm:$0x1] %vm8_vm0, %v7_v11   ;;  %v70_v12 = vld [vmem:[#allocation0] sm:$0x1]  }
  0x15   :  { %v76_v13 = vld [vmem:[#allocation0] sm:$0x1]  }
  0x16   :  { %47 = vrot.lane.b32.xlu0 %v46_v7, %s136_s13  ;;  %v82_v14 = vld [vmem:[#allocation0] sm:$0x1]  }
  0x17   :  { %53 = vrot.lane.b32.xlu1 %v52_v8, %s137_s14  ;;  %v88_v15 = vld [vmem:[#allocation0] sm:$0x1]  }
  0x18   :  { %v94_v16 = vld [vmem:[#allocation0] sm:$0x1]  }
  0x1a   :  { %59 = vrot.lane.b32.xlu0 %v58_v9, %s138_s17 }
  0x1b   :  { %65 = vrot.lane.b32.xlu1 %v64_v10, %s139_s18 }
  0x1e   :  { %71 = vrot.lane.b32.xlu0 %v70_v12, %s140_s19 }
  0x1f   :  { %77 = vrot.lane.b32.xlu1 %v76_v13, %s141_s20 }
  0x22   :  { %83 = vrot.lane.b32.xlu0 %v82_v14, %s142_s21 }
  0x23   :  { %89 = vrot.lane.b32.xlu1 %v88_v15, %s143_s22 }
  0x26   :  { %95 = vrot.lane.b32.xlu0 %v94_v16, %s144_s23 }
  0x7c   :  { %v12_v17 = vpop.permute.xlu0 %11  }
  0x7d   :  { %v24_v18 = vpop.permute.xlu1 %23   ;;  %100 = vst.msk [vmem:[%s223_s1 + $0x1] sm:$0x1] %vm8_vm0, %v12_v17  }
  0x7e   :  { %102 = vst.msk [vmem:[%s223_s1 + $0x3] sm:$0x1] %vm8_vm0, %v24_v18  }
  0x80   :  { %v18_v19 = vpop.permute.xlu0 %17  }
  0x81   :  { %v30_v20 = vpop.permute.xlu1 %29   ;;  %101 = vst.msk [vmem:[%s223_s1 + $0x2] sm:$0x1] %vm8_vm0, %v18_v19  }
  0x82   :  { %103 = vst.msk [vmem:[%s223_s1 + $0x4] sm:$0x1] %vm8_vm0, %v30_v20  }
  0x84   :  { %v36_v21 = vpop.permute.xlu0 %35  }
  0x85   :  { %v42_v22 = vpop.permute.xlu1 %41   ;;  %104 = vst.msk [vmem:[%s223_s1 + $0x5] sm:$0x1] %vm8_vm0, %v36_v21  }
  0x86   :  { %105 = vst.msk [vmem:[%s223_s1 + $0x6] sm:$0x1] %vm8_vm0, %v42_v22  }
  0x88   :  { %v48_v23 = vpop.permute.xlu0 %47  }
  0x89   :  { %v54_v24 = vpop.permute.xlu1 %53   ;;  %106 = vst.msk [vmem:[%s223_s1 + $0x7] sm:$0x1] %vm8_vm0, %v48_v23  }
  0x8a   :  { %107 = vst.msk [vmem:[%s223_s1 + $0x8] sm:$0x1] %vm8_vm0, %v54_v24  }
  0x8c   :  { %v60_v25 = vpop.permute.xlu0 %59  }
  0x8d   :  { %v66_v26 = vpop.permute.xlu1 %65   ;;  %108 = vst.msk [vmem:[%s223_s1 + $0x9] sm:$0x1] %vm8_vm0, %v60_v25  }
  0x8e   :  { %109 = vst.msk [vmem:[%s223_s1 + $0xa] sm:$0x1] %vm8_vm0, %v66_v26  }
  0x90   :  { %v72_v27 = vpop.permute.xlu0 %71  }
  0x91   :  { %v78_v28 = vpop.permute.xlu1 %77   ;;  %110 = vst.msk [vmem:[%s223_s1 + $0xb] sm:$0x1] %vm8_vm0, %v72_v27  }
  0x92   :  { %111 = vst.msk [vmem:[%s223_s1 + $0xc] sm:$0x1] %vm8_vm0, %v78_v28  }
  0x94   :  { %v84_v29 = vpop.permute.xlu0 %83  }
  0x95   :  { %v90_v30 = vpop.permute.xlu1 %89   ;;  %112 = vst.msk [vmem:[%s223_s1 + $0xd] sm:$0x1] %vm8_vm0, %v84_v29  }
  0x96   :  { %113 = vst.msk [vmem:[%s223_s1 + $0xe] sm:$0x1] %vm8_vm0, %v90_v30  }
  0x98   :  { %v96_v31 = vpop.permute.xlu0 %95  }
  0x99   :  { %114 = vst.msk [vmem:[%s223_s1 + $0xf] sm:$0x1] %vm8_vm0, %v96_v31  }

// kernel: kbnet_encoder_forward.12
= control target key start
LH: loop header
LB: loop body
LE: loop exit
PB: predicated region body
PF: predicated region fallthrough
CT: control target
= control target key end

     0   :  { %vm76_vm0 = vcmask 130048   ;;  %s419_s1 = inlined_call_operand.vmem [shape: bf16[16,128], index: 1, kind: input, shape index: {}]   ;;  %s420_s0 = inlined_call_operand.vmem [shape: bf16[128,16], index: 0, kind: input, shape index: {}]   ;;  %s421_s2 = inlined_call_operand.vmem [shape: f32[128,128], index: 2, kind: output, shape index: {}]  }
   0x1   :  { %v312_v0 = vld [vmem:[%s419_s1] sm:$0xff]   ;;  %v315_v3 = vld [vmem:[%s420_s0 + $0x8] sm:$0xff]   ;;  %v317_v5 = vld [vmem:[%s420_s0 + $0x10] sm:$0xff]  }
   0x2   :  { %v313_v1 = vld [vmem:[%s420_s0] sm:$0xff]   ;;  %292 = vmatprep.subr.bf16.mxu0 %v312_v0  ;;  %310 = vmatprep.subr.bf16.mxu1 %v312_v0  ;;  %v316_v4 = vld [vmem:[%s420_s0 + $0x28] sm:$0xff]   ;;  %v318_v6 = vld [vmem:[%s420_s0 + $0x30] sm:$0xff]  }
   0x3   :  { %v314_v2 = vld [vmem:[%s420_s0 + $0x20] sm:$0xff]   ;;  %293 = vmatpush3.bf16.msra.mxu0 %v312_v0  ;;  %311 = vmatpush3.bf16.msra.mxu1 %v312_v0  ;;  %v319_v7 = vld [vmem:[%s420_s0 + $0x18] sm:$0xff]  }
   0x4   :  { %294 = vmatprep.mubr.msk.bf16.mxu0 %vm76_vm0, %v313_v1  ;;  %302 = vmatprep.mubr.msk.bf16.mxu1 %vm76_vm0, %v314_v2  ;;  %v320_v8 = vld [vmem:[%s420_s0 + $0x38] sm:$0xff]  }
   0x6   :  { %295 = vmatmul.mubr.msk.bf16.vlgmr.msra.gmra.mxu0 %vm76_vm0, %v315_v3  ;;  %303 = vmatmul.mubr.msk.bf16.vlgmr.msra.gmra.mxu1 %vm76_vm0, %v316_v4 }
   0x7   :  { %298 = vmatprep.mubr.msk.bf16.mxu0 %vm76_vm0, %v317_v5  ;;  %306 = vmatprep.mubr.msk.bf16.mxu1 %vm76_vm0, %v318_v6 }
   0xe   :  { %299 = vmatmul.mubr.msk.bf16.gmra.mxu0 %vm76_vm0, %v319_v7  ;;  %307 = vmatmul.mubr.msk.bf16.gmra.mxu1 %vm76_vm0, %v320_v8 }
  0xc6   :  { %v296_v9 = vpop.f32.mrf.mxu0  ;;  %v304_v10 = vpop.f32.mrf.mxu1 }
  0xc7   :  { %vm200_vm1 = vcmp.ge.f32.partialorder %v296_v9, 0.0  ;;  %v216_v11 = vmul.f32 0.1, %v296_v9  ;;  %vm208_vm2 = vcmp.ge.f32.partialorder %v304_v10, 0.0  ;;  %v224_v12 = vmul.f32 0.1, %v304_v10 }
  0xc8   :  { %v135_v13 = vpop.f32.mrf.mxu0  ;;  %v167_v14 = vpop.f32.mrf.mxu1 }
  0xc9   :  { %v232_v15 = vsel %vm200_vm1, %v296_v9, %v216_v11  ;;  %v240_v16 = vsel %vm208_vm2, %v304_v10, %v224_v12  ;;  %vm198_vm3 = vcmp.ge.f32.partialorder %v135_v13, 0.0  ;;  %v214_v17 = vmul.f32 0.1, %v135_v13 }
  0xca   :  { %248 = vst [vmem:[%s421_s2 + $0x10] sm:$0xff] %v232_v15  ;;  %256 = vst [vmem:[%s421_s2 + $0x50] sm:$0xff] %v240_v16  ;;  %vm206_vm4 = vcmp.ge.f32.partialorder %v167_v14, 0.0  ;;  %v222_v18 = vmul.f32 0.1, %v167_v14  ;;  %v297_v19 = vpop.f32.mrf.mxu0  ;;  %v305_v20 = vpop.f32.mrf.mxu1 }
  0xcb   :  { %v230_v21 = vsel %vm198_vm3, %v135_v13, %v214_v17  ;;  %vm201_vm5 = vcmp.ge.f32.partialorder %v297_v19, 0.0  ;;  %v217_v22 = vmul.f32 0.1, %v297_v19  ;;  %vm209_vm6 = vcmp.ge.f32.partialorder %v305_v20, 0.0 }
  0xcc   :  { %246 = vst [vmem:[%s421_s2] sm:$0xff] %v230_v21  ;;  %v238_v23 = vsel %vm206_vm4, %v167_v14, %v222_v18  ;;  %v225_v24 = vmul.f32 0.1, %v305_v20  ;;  %v138_v25 = vpop.f32.mrf.mxu0  ;;  %v170_v26 = vpop.f32.mrf.mxu1 }
  0xcd   :  { %254 = vst [vmem:[%s421_s2 + $0x40] sm:$0xff] %v238_v23  ;;  %v233_v27 = vsel %vm201_vm5, %v297_v19, %v217_v22  ;;  %vm199_vm7 = vcmp.ge.f32.partialorder %v138_v25, 0.0  ;;  %v215_v28 = vmul.f32 0.1, %v138_v25  ;;  %vm207_vm8 = vcmp.ge.f32.partialorder %v170_v26, 0.0 }
  0xce   :  { %249 = vst [vmem:[%s421_s2 + $0x18] sm:$0xff] %v233_v27  ;;  %v241_v29 = vsel %vm209_vm6, %v305_v20, %v225_v24  ;;  %v223_v30 = vmul.f32 0.1, %v170_v26  ;;  %v300_v31 = vpop.f32.mrf.mxu0  ;;  %v308_v32 = vpop.f32.mrf.mxu1 }
  0xcf   :  { %257 = vst [vmem:[%s421_s2 + $0x58] sm:$0xff] %v241_v29  ;;  %v231_v33 = vsel %vm199_vm7, %v138_v25, %v215_v28  ;;  %vm204_vm9 = vcmp.ge.f32.partialorder %v300_v31, 0.0  ;;  %v220_v34 = vmul.f32 0.1, %v300_v31  ;;  %vm212_vm10 = vcmp.ge.f32.partialorder %v308_v32, 0.0 }
  0xd0   :  { %247 = vst [vmem:[%s421_s2 + $0x8] sm:$0xff] %v231_v33  ;;  %v239_v35 = vsel %vm207_vm8, %v170_v26, %v223_v30  ;;  %v228_v36 = vmul.f32 0.1, %v308_v32  ;;  %v151_v37 = vpop.f32.mrf.mxu0  ;;  %v183_v38 = vpop.f32.mrf.mxu1 }
  0xd1   :  { %255 = vst [vmem:[%s421_s2 + $0x48] sm:$0xff] %v239_v35  ;;  %v236_v39 = vsel %vm204_vm9, %v300_v31, %v220_v34  ;;  %vm202_vm11 = vcmp.ge.f32.partialorder %v151_v37, 0.0  ;;  %v218_v40 = vmul.f32 0.1, %v151_v37  ;;  %vm210_vm12 = vcmp.ge.f32.partialorder %v183_v38, 0.0 }
  0xd2   :  { %252 = vst [vmem:[%s421_s2 + $0x30] sm:$0xff] %v236_v39  ;;  %v244_v41 = vsel %vm212_vm10, %v308_v32, %v228_v36  ;;  %v226_v42 = vmul.f32 0.1, %v183_v38  ;;  %v301_v43 = vpop.f32.mrf.mxu0  ;;  %v309_v44 = vpop.f32.mrf.mxu1 }
  0xd3   :  { %260 = vst [vmem:[%s421_s2 + $0x70] sm:$0xff] %v244_v41  ;;  %v234_v45 = vsel %vm202_vm11, %v151_v37, %v218_v40  ;;  %vm205_vm13 = vcmp.ge.f32.partialorder %v301_v43, 0.0  ;;  %v221_v46 = vmul.f32 0.1, %v301_v43  ;;  %vm213_vm14 = vcmp.ge.f32.partialorder %v309_v44, 0.0 }
  0xd4   :  { %250 = vst [vmem:[%s421_s2 + $0x20] sm:$0xff] %v234_v45  ;;  %v242_v47 = vsel %vm210_vm12, %v183_v38, %v226_v42  ;;  %v229_v48 = vmul.f32 0.1, %v309_v44  ;;  %v154_v49 = vpop.f32.mrf.mxu0  ;;  %v186_v50 = vpop.f32.mrf.mxu1 }
  0xd5   :  { %258 = vst [vmem:[%s421_s2 + $0x60] sm:$0xff] %v242_v47  ;;  %v237_v51 = vsel %vm205_vm13, %v301_v43, %v221_v46  ;;  %vm203_vm15 = vcmp.ge.f32.partialorder %v154_v49, 0.0  ;;  %v219_v52 = vmul.f32 0.1, %v154_v49  ;;  %vm211_vm0 = vcmp.ge.f32.partialorder %v186_v50, 0.0 }
  0xd6   :  { %253 = vst [vmem:[%s421_s2 + $0x38] sm:$0xff] %v237_v51  ;;  %v245_v53 = vsel %vm213_vm14, %v309_v44, %v229_v48  ;;  %v227_v54 = vmul.f32 0.1, %v186_v50 }
  0xd7   :  { %261 = vst [vmem:[%s421_s2 + $0x78] sm:$0xff] %v245_v53  ;;  %v235_v55 = vsel %vm203_vm15, %v154_v49, %v219_v52 }
  0xd8   :  { %251 = vst [vmem:[%s421_s2 + $0x28] sm:$0xff] %v235_v55  ;;  %v243_v56 = vsel %vm211_vm0, %v186_v50, %v227_v54 }
  0xd9   :  { %259 = vst [vmem:[%s421_s2 + $0x68] sm:$0xff] %v243_v56 }

// kernel: kbnet_encoder_forward.11
= control target key start
LH: loop header
LB: loop body
LE: loop exit
PB: predicated region body
PF: predicated region fallthrough
CT: control target
= control target key end

     0   :  { %v2179_v0 = vmov 0   ;;  %vm852_vm0 = vcmask 1044480   ;;  %vm853_vm1 = vcmask 1045504   ;;  %v2180_v22 = vmov 65535   ;;  %s2902_s1 = inlined_call_operand.vmem [shape: bf16[432,48], index: 1, kind: input, shape index: {}]   ;;  %s2903_s0 = inlined_call_operand.vmem [shape: bf16[128,432], index: 0, kind: input, shape index: {}]   ;;  %s2904_s5 = inlined_call_operand.vmem [shape: bf16[27,16], index: 5, kind: input, shape index: {}]   ;;  %s2905_s3 = inlined_call_operand.vmem [shape: bf16[144,16], index: 3, kind: input, shape index: {}]   ;;  %s2906_s4 = inlined_call_operand.vmem [shape: bf16[128,27], index: 4, kind: input, shape index: {}]   ;;  %s2907_s9 = inlined_call_operand.vmem [shape: bf16[3,48], index: 9, kind: input, shape index: {}]   ;;  %s2908_s2 = inlined_call_operand.vmem [shape: bf16[128,144], index: 2, kind: input, shape index: {}]   ;;  %s2909_s8 = inlined_call_operand.vmem [shape: bf16[128,3], index: 8, kind: input, shape index: {}]   ;;  %s2910_s7 = inlined_call_operand.vmem [shape: bf16[48,48], index: 7, kind: input, shape index: {}]   ;;  %s2911_s6 = inlined_call_operand.vmem [shape: bf16[128,48], index: 6, kind: input, shape index: {}]   ;;  %s2912_s10 = inlined_call_operand.vmem [shape: f32[128,48], index: 10, kind: output, shape index: {0}]   ;;  %s2913_s11 = inlined_call_operand.vmem [shape: f32[128,16], index: 11, kind: output, shape index: {1}]   ;;  %s2914_s12 = inlined_call_operand.vmem [shape: f32[128,48], index: 12, kind: output, shape index: {2}]  }
   0x1   :  { %561 = vmatprep.subr.bf16.mxu1 %v2179_v0  ;;  %v2042_v1 = vld [vmem:[%s2902_s1 + $0x78] sm:$0xff]   ;;  %v2045_v4 = vld [vmem:[%s2902_s1 + $0x70] sm:$0xff]   ;;  %v2048_v7 = vld [vmem:[%s2902_s1 + $0x68] sm:$0xff]   ;;  %v854_v23 = vsel %vm852_vm0, 4294967295, %v2180_v22  ;;  %vm439_vm2 = vcmask 392192   ;;  %vm1372_vm3 = vcmask 1040384  }
   0x2   :  { %v2043_v2 = vld [vmem:[%s2902_s1 + $0xb8] sm:$0xff]   ;;  %1884 = vmatprep.subr.bf16.mxu0 %v2042_v1  ;;  %v2046_v5 = vld [vmem:[%s2902_s1 + $0xb0] sm:$0xff]   ;;  %v2049_v8 = vld [vmem:[%s2902_s1 + $0xa8] sm:$0xff]   ;;  %v855_v27 = vsel %vm853_vm1, %v854_v23, 0  ;;  %v1374_v49 = vsel %vm1372_vm3, 4294967295, %v2180_v22  ;;  %vm1373_vm4 = vcmask 1041408  }
   0x3   :  { %v2044_v3 = vld [vmem:[%s2902_s1 + $0x38] sm:$0xff]   ;;  %562 = vmatpush1.bf16.msra.mxu1 %v2043_v2  ;;  %v2047_v6 = vld [vmem:[%s2902_s1 + $0x30] sm:$0xff]   ;;  %v2050_v9 = vld [vmem:[%s2902_s1 + $0x28] sm:$0xff]   ;;  %v1375_v52 = vsel %vm1373_vm4, %v1374_v49, 0  ;;  %vm827_vm5 = vcmask 220160   ;;  %vm1082_vm6 = vcmask 130048  }
   0x4   :  { %1885 = vmatpush3.bf16.msra.mxu0 %v2044_v3  ;;  %563 = vmatprep.subr.bf16.mxu1 %v2179_v0  ;;  %v2051_v10 = vld [vmem:[%s2902_s1 + $0x60] sm:$0xff]   ;;  %v2054_v13 = vld [vmem:[%s2902_s1 + $0x58] sm:$0xff]   ;;  %v2057_v16 = vld [vmem:[%s2902_s1 + $0x50] sm:$0xff]   ;;  %vm1347_vm7 = vcmask 23552  }
   0x5   :  { %1886 = vmatprep.subr.bf16.mxu0 %v2045_v4  ;;  %v2052_v11 = vld [vmem:[%s2902_s1 + $0xa0] sm:$0xff]   ;;  %v2055_v14 = vld [vmem:[%s2902_s1 + $0x98] sm:$0xff]   ;;  %v2058_v17 = vld [vmem:[%s2902_s1 + $0x90] sm:$0xff]  }
   0x6   :  { %v2053_v12 = vld [vmem:[%s2902_s1 + $0x20] sm:$0xff]   ;;  %v2056_v15 = vld [vmem:[%s2902_s1 + $0x18] sm:$0xff]   ;;  %v2059_v18 = vld [vmem:[%s2902_s1 + $0x10] sm:$0xff]  }
   0x7   :  { %564 = vmatpush1.bf16.msra.mxu1 %v2046_v5  ;;  %v2060_v19 = vld [vmem:[%s2902_s1 + $0x48] sm:$0xff]   ;;  %v2063_v24 = vld [vmem:[%s2902_s1 + $0x40] sm:$0xff]   ;;  %v2069_v32 = vld [vmem:[%s2902_s1 + $0xd0] sm:$0xff]  }
   0x8   :  { %1887 = vmatpush3.bf16.msra.mxu0 %v2047_v6  ;;  %565 = vmatprep.subr.bf16.mxu1 %v2179_v0  ;;  %v2061_v20 = vld [vmem:[%s2902_s1 + $0x88] sm:$0xff]   ;;  %v2068_v25 = vld [vmem:[%s2903_s0 + $0x4] ss:$16 sps:$4 sm:$0xff]   ;;  %v2066_v31 = vld [vmem:[%s2903_s0] ss:$16 sps:$4 sm:$0xff]  }
   0x9   :  { %1888 = vmatprep.subr.bf16.mxu0 %v2048_v7  ;;  %v2062_v21 = vld [vmem:[%s2902_s1 + $0x8] sm:$0xff]   ;;  %v2064_v26 = vld [vmem:[%s2902_s1 + $0x80] sm:$0xff]   ;;  %496 = vmatprep.mubr.bf16.mxu0 %v2068_v25  ;;  %v2082_v41 = vld [vmem:[%s2905_s3 + $0x38] sm:$0xff]  }
   0xa   :  { %v2070_v28 = vld [vmem:[%s2904_s5 + $0x8] sm:$0x3f]   ;;  %v2065_v29 = vld [vmem:[%s2902_s1] sm:$0xff]   ;;  %v2089_v44 = vld [vmem:[%s2905_s3 + $0x30] sm:$0xff]  }
   0xb   :  { %566 = vmatpush1.bf16.msra.mxu1 %v2049_v8  ;;  %v857_v30 = vand.u32 %v2070_v28, %v855_v27  ;;  %v2078_v33 = vld [vmem:[%s2903_s0 + $0xc] ss:$16 sps:$4 sm:$0xff]   ;;  %v2072_v34 = vld [vmem:[%s2903_s0 + $0x24] ss:$16 sps:$4 sm:$0xff]   ;;  %v2074_v36 = vld [vmem:[%s2903_s0 + $0x20] ss:$16 sps:$4 sm:$0xff]  }
   0xc   :  { %1889 = vmatpush3.bf16.msra.mxu0 %v2050_v9  ;;  %567 = vmatprep.subr.bf16.mxu1 %v2179_v0  ;;  %v2071_v35 = vld [vmem:[%s2902_s1 + $0xc8] sm:$0xff]   ;;  %v2075_v37 = vld [vmem:[%s2902_s1 + $0xc0] sm:$0xff]   ;;  %v2108_v57 = vld [vmem:[%s2905_s3 + $0x18] sm:$0xff]  }
   0xd   :  { %1890 = vmatprep.subr.bf16.mxu0 %v2051_v10  ;;  %1790 = vmatprep.mubr.msk.bf16.mxu1 %vm439_vm2, %v2078_v33  ;;  %v2079_v38 = vld [vmem:[%s2903_s0 + $0x44] ss:$16 sps:$4 sm:$0xff]   ;;  %v2076_v40 = vld [vmem:[%s2903_s0 + $0x8] ss:$16 sps:$4 sm:$0xff]   ;;  %v2083_v42 = vld [vmem:[%s2903_s0 + $0x2c] ss:$16 sps:$4 sm:$0xff]  }
   0xe   :  { %v2096_v39 = vld [vmem:[%s2904_s5] sm:$0xff]   ;;  %v2085_v46 = vld [vmem:[%s2903_s0 + $0x28] ss:$16 sps:$4 sm:$0xff]   ;;  %v2090_v47 = vld [vmem:[%s2903_s0 + $0x4c] ss:$16 sps:$4 sm:$0xff]  }
   0xf   :  { %568 = vmatpush1.bf16.msra.mxu1 %v2052_v11  ;;  %v2081_v43 = vld [vmem:[%s2903_s0 + $0x40] ss:$16 sps:$4 sm:$0xff]   ;;  %v2086_v45 = vld [vmem:[%s2903_s0 + $0x64] ss:$16 sps:$4 sm:$0xff]   ;;  %v2097_v48 = vld [vmem:[%s2905_s3 + $0x28] sm:$0xff]  }
  0x10   :  { %1891 = vmatpush3.bf16.msra.mxu0 %v2053_v12  ;;  %569 = vmatprep.subr.bf16.mxu1 %v2179_v0  ;;  %v2088_v50 = vld [vmem:[%s2903_s0 + $0x60] ss:$16 sps:$4 sm:$0xff]   ;;  %v2093_v53 = vld [vmem:[%s2903_s0 + $0x84] ss:$16 sps:$4 sm:$0xff]   ;;  %v2092_v54 = vld [vmem:[%s2903_s0 + $0x48] ss:$16 sps:$4 sm:$0xff]  }
  0x11   :  { %1892 = vmatprep.subr.bf16.mxu0 %v2054_v13  ;;  %v2103_v51 = vld [vmem:[%s2905_s3 + $0x20] sm:$0xff]   ;;  %v2098_v56 = vld [vmem:[%s2903_s0 + $0x6c] ss:$16 sps:$4 sm:$0xff]   ;;  %v2115_v60 = vld [vmem:[%s2905_s3 + $0x10] sm:$0xff]  }
  0x12   :  { %v1306_v55 = vld [vmem:[%s2907_s9] sm:$0x3]  ;;  %v2101_v61 = vld [vmem:[%s2903_s0 + $0xa4] ss:$16 sps:$4 sm:$0xff]   ;;  %v2100_v62 = vld [vmem:[%s2903_s0 + $0x68] ss:$16 sps:$4 sm:$0xff]  }
  0x13   :  { %570 = vmatpush1.bf16.msra.mxu1 %v2055_v14  ;;  %v2419_v58 = vand.u32 %v1375_v52, %v1306_v55  ;;  %v2095_v59 = vld [vmem:[%s2903_s0 + $0x80] ss:$16 sps:$4 sm:$0xff]   ;;  %v2105_v63 = vld [vmem:[%s2903_s0 + $0x8c] ss:$16 sps:$4 sm:$0xff]   ;;  %v2109_v4 = vld [vmem:[%s2903_s0 + $0xc4] ss:$16 sps:$4 sm:$0xff]  }
  0x14   :  { %1893 = vmatpush3.bf16.msra.mxu0 %v2056_v15  ;;  %571 = vmatprep.subr.bf16.mxu1 %v2179_v0  ;;  %v2122_v1 = vld [vmem:[%s2905_s3 + $0x8] sm:$0xff]   ;;  %v2104_v2 = vld [vmem:[%s2903_s0 + $0xa0] ss:$16 sps:$4 sm:$0xff]   ;;  %v2116_v9 = vld [vmem:[%s2903_s0 + $0xe4] ss:$16 sps:$4 sm:$0xff]  }
  0x15   :  { %1894 = vmatprep.subr.bf16.mxu0 %v2057_v16  ;;  %v2128_v3 = vld [vmem:[%s2905_s3] sm:$0xff]   ;;  %v2107_v5 = vld [vmem:[%s2903_s0 + $0x88] ss:$16 sps:$4 sm:$0xff]   ;;  %v2112_v6 = vld [vmem:[%s2903_s0 + $0xac] ss:$16 sps:$4 sm:$0xff]  }
  0x16   :  { %v2131_v7 = vld [vmem:[%s2905_s3 + $0x40] sm:$0xff]   ;;  %v2114_v10 = vld [vmem:[%s2903_s0 + $0xa8] ss:$16 sps:$4 sm:$0xff]   ;;  %v2125_v14 = vld [vmem:[%s2903_s0 + $0xec] ss:$16 sps:$4 sm:$0xff]  }
  0x17   :  { %572 = vmatpush1.bf16.msra.mxu1 %v2058_v17  ;;  %v2111_v8 = vld [vmem:[%s2903_s0 + $0xc0] ss:$16 sps:$4 sm:$0xff]   ;;  %v2121_v13 = vld [vmem:[%s2903_s0 + $0xc8] ss:$16 sps:$4 sm:$0xff]   ;;  %v2137_v23 = vld [vmem:[%s2908_s2 + $0x14] ss:$8 sps:$4 sm:$0xff]  }
  0x18   :  { %1895 = vmatpush3.bf16.msra.mxu0 %v2059_v18  ;;  %573 = vmatprep.subr.bf16.mxu1 %v2179_v0  ;;  %v2118_v11 = vld [vmem:[%s2903_s0 + $0xe0] ss:$16 sps:$4 sm:$0xff]   ;;  %v2124_v15 = vld [vmem:[%s2906_s4 + $0x8] sm:$0xff]   ;;  %v2141_v28 = vld [vmem:[%s2906_s4 + $0x38] sm:$0xff]  }
  0x19   :  { %1896 = vmatprep.subr.bf16.mxu0 %v2060_v19  ;;  %v2123_v12 = vld [vmem:[%s2906_s4] sm:$0xff]   ;;  %v2129_v16 = vld [vmem:[%s2906_s4 + $0x10] sm:$0xff]   ;;  %v2127_v18 = vld [vmem:[%s2903_s0 + $0xe8] ss:$16 sps:$4 sm:$0xff]  }
  0x1a   :  { %v2147_v17 = vld [vmem:[%s2910_s7 + $0x10] sm:$0xff]   ;;  %v2134_v19 = vld [vmem:[%s2908_s2 + $0x4] ss:$8 sps:$4 sm:$0xff]   ;;  %v2132_v22 = vld [vmem:[%s2908_s2] ss:$8 sps:$4 sm:$0xff]  }
  0x1b   :  { %574 = vmatpush1.bf16.msra.mxu1 %v2061_v20  ;;  %v2130_v20 = vld [vmem:[%s2906_s4 + $0x18] sm:$0xff]   ;;  %v2140_v25 = vld [vmem:[%s2906_s4 + $0x30] sm:$0xff]   ;;  %v2142_v27 = vld [vmem:[%s2908_s2 + $0x24] ss:$8 sps:$4 sm:$0xff]  }
  0x1c   :  { %1897 = vmatpush3.bf16.msra.mxu0 %v2062_v21  ;;  %575 = vmatprep.subr.bf16.mxu1 %v2179_v0  ;;  %v2135_v21 = vld [vmem:[%s2906_s4 + $0x20] sm:$0xff]   ;;  %v2151_v33 = vld [vmem:[%s2909_s8 + $0x10] sm:$0xff]  }
  0x1d   :  { %1898 = vmatprep.subr.bf16.mxu0 %v2063_v24  ;;  %v2136_v24 = vld [vmem:[%s2906_s4 + $0x28] sm:$0xff]   ;;  %v2170_v49 = vld [vmem:[%s2908_s2 + $0x74] ss:$8 sps:$4 sm:$0xff]   ;;  %v2172_v52 = vld [vmem:[%s2908_s2 + $0x70] ss:$8 sps:$4 sm:$0xff]  }
  0x1e   :  { %v2177_v55 = vld [vmem:[%s2911_s6 + $0x30] sm:$0xff]  }
  0x1f   :  { %576 = vmatpush1.bf16.msra.mxu1 %v2064_v26  ;;  %v2139_v26 = vld [vmem:[%s2908_s2 + $0x10] ss:$8 sps:$4 sm:$0xff]  }
  0x20   :  { %1899 = vmatpush3.bf16.msra.mxu0 %v2065_v29  ;;  %587 = vmatprep.subr.bf16.mxu1 %v2179_v0  ;;  %v2145_v29 = vld [vmem:[%s2909_s8] sm:$0xff]  }
  0x21   :  { %1978 = vmatprep.subr.bf16.mxu0 %v857_v30 }
  0x23   :  { %497 = vmatmul.mubr.bf16.vlgmr.msra.gmra.mxu0 %v2066_v31  ;;  %588 = vmatpush2.bf16.msra.mxu1 %v2069_v32  ;;  %v2148_v31 = vld [vmem:[%s2908_s2 + $0x34] ss:$8 sps:$4 sm:$0xff]   ;;  %v2146_v32 = vld [vmem:[%s2909_s8 + $0x8] sm:$0xff]  }
  0x24   :  { %1979 = vmatpush3.bf16.msra.mxu0 %v857_v30  ;;  %589 = vmatprep.subr.bf16.mxu1 %v2179_v0  ;;  %v2144_v30 = vld [vmem:[%s2908_s2 + $0x20] ss:$8 sps:$4 sm:$0xff]  }
  0x25   :  { %504 = vmatprep.mubr.bf16.mxu0 %v2072_v34  ;;  %1980 = vmatprep.subr.bf16.mxu0 %v2096_v39  ;;  %v2153_v34 = vld [vmem:[%s2910_s7 + $0x8] sm:$0xff]  }
  0x27   :  { %590 = vmatpush2.bf16.msra.mxu1 %v2071_v35  ;;  %v2150_v35 = vld [vmem:[%s2908_s2 + $0x30] ss:$8 sps:$4 sm:$0xff]  }
  0x28   :  { %591 = vmatprep.subr.bf16.mxu1 %v2179_v0  ;;  %1981 = vmatpush3.bf16.msra.mxu0 %v2096_v39  ;;  %v2157_v39 = vld [vmem:[%s2909_s8 + $0x20] sm:$0xff]  }
  0x29   :  { %1998 = vmatprep.subr.bf16.mxu0 %v2419_v58 }
  0x2b   :  { %505 = vmatmul.mubr.bf16.gmra.mxu0 %v2074_v36  ;;  %592 = vmatpush2.bf16.msra.mxu1 %v2075_v37  ;;  %v2154_v36 = vld [vmem:[%s2908_s2 + $0x44] ss:$8 sps:$4 sm:$0xff]  }
  0x2c   :  { %512 = vmatprep.mubr.bf16.mxu0 %v2079_v38  ;;  %1107 = vmatprep.subr.bf16.mxu1 %v2179_v0  ;;  %v2159_v37 = vld [vmem:[%s2910_s7] sm:$0xff]   ;;  %v2152_v38 = vld [vmem:[%s2909_s8 + $0x18] sm:$0xff]  }
  0x2e   :  { %594 = vmatmul.mubr.bf16.vlgmr.msra.gmra.mxu1 %v2076_v40  ;;  %v2156_v40 = vld [vmem:[%s2908_s2 + $0x40] ss:$8 sps:$4 sm:$0xff]  }
  0x2f   :  { %1108 = vmatpush1.bf16.msra.mxu1 %v2082_v41  ;;  %1791 = vmatprep.mubr.msk.bf16.mxu1 %vm439_vm2, %v2083_v42  ;;  %v2160_v41 = vld [vmem:[%s2908_s2 + $0x54] ss:$8 sps:$4 sm:$0xff]   ;;  %v2158_v42 = vld [vmem:[%s2909_s8 + $0x28] sm:$0xff]  }
  0x30   :  { %1109 = vmatprep.subr.bf16.mxu1 %v2179_v0 }
  0x33   :  { %513 = vmatmul.mubr.bf16.gmra.mxu0 %v2081_v43  ;;  %1110 = vmatpush1.bf16.msra.mxu1 %v2089_v44  ;;  %v2163_v43 = vld [vmem:[%s2911_s6] sm:$0xff]   ;;  %v2162_v44 = vld [vmem:[%s2908_s2 + $0x50] ss:$8 sps:$4 sm:$0xff]  }
  0x34   :  { %520 = vmatprep.mubr.bf16.mxu0 %v2086_v45  ;;  %1111 = vmatprep.subr.bf16.mxu1 %v2179_v0  ;;  %v2165_v45 = vld [vmem:[%s2908_s2 + $0x64] ss:$8 sps:$4 sm:$0xff]  }
  0x36   :  { %602 = vmatmul.mubr.bf16.gmra.mxu1 %v2085_v46  ;;  %v2164_v46 = vld [vmem:[%s2911_s6 + $0x8] sm:$0xff]  }
  0x37   :  { %1792 = vmatprep.mubr.msk.bf16.mxu1 %vm439_vm2, %v2090_v47  ;;  %1112 = vmatpush1.bf16.msra.mxu1 %v2097_v48  ;;  %v2168_v47 = vld [vmem:[%s2911_s6 + $0x10] sm:$0xff]   ;;  %v2167_v48 = vld [vmem:[%s2908_s2 + $0x60] ss:$8 sps:$4 sm:$0xff]  }
  0x38   :  { %1113 = vmatprep.subr.bf16.mxu1 %v2179_v0 }
  0x3b   :  { %521 = vmatmul.mubr.bf16.gmra.mxu0 %v2088_v50  ;;  %1114 = vmatpush1.bf16.msra.mxu1 %v2103_v51  ;;  %v2169_v50 = vld [vmem:[%s2911_s6 + $0x18] sm:$0xff]   ;;  %v2173_v51 = vld [vmem:[%s2911_s6 + $0x20] sm:$0xff]  }
  0x3c   :  { %528 = vmatprep.mubr.bf16.mxu0 %v2093_v53  ;;  %1115 = vmatprep.subr.bf16.mxu1 %v2179_v0  ;;  %v2175_v53 = vld [vmem:[%s2909_s8 + $0x30] sm:$0xff]  }
  0x3e   :  { %610 = vmatmul.mubr.bf16.gmra.mxu1 %v2092_v54  ;;  %v2174_v54 = vld [vmem:[%s2911_s6 + $0x28] sm:$0xff]  }
  0x3f   :  { %1793 = vmatprep.mubr.msk.bf16.mxu1 %vm439_vm2, %v2098_v56  ;;  %1116 = vmatpush1.bf16.msra.mxu1 %v2108_v57  ;;  %v2176_v56 = vld [vmem:[%s2909_s8 + $0x38] sm:$0xff]  }
  0x40   :  { %1117 = vmatprep.subr.bf16.mxu1 %v2179_v0  ;;  %v2178_v57 = vld [vmem:[%s2911_s6 + $0x38] sm:$0xff]  }
  0x43   :  { %529 = vmatmul.mubr.bf16.gmra.mxu0 %v2095_v59  ;;  %1118 = vmatpush1.bf16.msra.mxu1 %v2115_v60 }
  0x44   :  { %536 = vmatprep.mubr.bf16.mxu0 %v2101_v61  ;;  %1119 = vmatprep.subr.bf16.mxu1 %v2179_v0 }
  0x46   :  { %618 = vmatmul.mubr.bf16.gmra.mxu1 %v2100_v62 }
  0x47   :  { %1794 = vmatprep.mubr.msk.bf16.mxu1 %vm439_vm2, %v2105_v63  ;;  %1120 = vmatpush1.bf16.msra.mxu1 %v2122_v1 }
  0x48   :  { %1121 = vmatprep.subr.bf16.mxu1 %v2179_v0 }
  0x4b   :  { %537 = vmatmul.mubr.bf16.gmra.mxu0 %v2104_v2  ;;  %1122 = vmatpush1.bf16.msra.mxu1 %v2128_v3 }
  0x4c   :  { %544 = vmatprep.mubr.bf16.mxu0 %v2109_v4  ;;  %1137 = vmatprep.subr.bf16.mxu1 %v2179_v0  ;;  %v2119_v0 = vld [vmem:[%s2903_s0 + $0xcc] ss:$16 sps:$4 sm:$0xff]  }
  0x4e   :  { %626 = vmatmul.mubr.bf16.gmra.mxu1 %v2107_v5 }
  0x4f   :  { %1795 = vmatprep.mubr.msk.bf16.mxu1 %vm439_vm2, %v2112_v6  ;;  %1138 = vmatpush2.bf16.msra.mxu1 %v2131_v7 }
  0x50   :  { %2038 = vmatprep.subr.bf16.mxu1 %v2419_v58 }
  0x53   :  { %545 = vmatmul.mubr.bf16.gmra.mxu0 %v2111_v8 }
  0x54   :  { %552 = vmatprep.mubr.bf16.mxu0 %v2116_v9 }
  0x56   :  { %634 = vmatmul.mubr.bf16.gmra.mxu1 %v2114_v10 }
  0x57   :  { %1796 = vmatprep.mubr.msk.bf16.mxu1 %vm439_vm2, %v2119_v0 }
  0x5b   :  { %553 = vmatmul.mubr.bf16.gmra.mxu0 %v2118_v11 }
  0x5c   :  { %1982 = vmatprep.mubr.msk.bf16.mxu0 %vm827_vm5, %v2123_v12 }
  0x5e   :  { %642 = vmatmul.mubr.bf16.gmra.mxu1 %v2121_v13 }
  0x5f   :  { %1797 = vmatprep.mubr.msk.bf16.mxu1 %vm439_vm2, %v2125_v14 }
  0x63   :  { %1983 = vmatmul.mubr.msk.bf16.vlgmr.msra.gmra.mxu0 %vm827_vm5, %v2124_v15 }
  0x64   :  { %1999 = vmatpush3.bf16.msra.mxu0 %v2419_v58  ;;  %1986 = vmatprep.mubr.msk.bf16.mxu0 %vm827_vm5, %v2129_v16 }
  0x65   :  { %2016 = vmatprep.subr.bf16.mxu0 %v2147_v17 }
  0x66   :  { %650 = vmatmul.mubr.bf16.gmra.mxu1 %v2127_v18 }
  0x67   :  { %1841 = vmatprep.mubr.msk.bf16.mxu1 %vm1082_vm6, %v2134_v19 }
  0x6b   :  { %1987 = vmatmul.mubr.msk.bf16.gmra.mxu0 %vm827_vm5, %v2130_v20 }
  0x6c   :  { %1990 = vmatprep.mubr.msk.bf16.mxu0 %vm827_vm5, %v2135_v21 }
  0x6e   :  { %1140 = vmatmul.mubr.bf16.vlgmr.msra.gmra.mxu1 %v2132_v22 }
  0x6f   :  { %2039 = vmatpush3.bf16.msra.mxu1 %v2419_v58  ;;  %1842 = vmatprep.mubr.msk.bf16.mxu1 %vm1082_vm6, %v2137_v23 }
  0x73   :  { %1991 = vmatmul.mubr.msk.bf16.gmra.mxu0 %vm827_vm5, %v2136_v24 }
  0x74   :  { %1994 = vmatprep.mubr.msk.bf16.mxu0 %vm827_vm5, %v2140_v25 }
  0x76   :  { %1148 = vmatmul.mubr.bf16.gmra.mxu1 %v2139_v26 }
  0x77   :  { %1843 = vmatprep.mubr.msk.bf16.mxu1 %vm1082_vm6, %v2142_v27 }
  0x7b   :  { %1995 = vmatmul.mubr.msk.bf16.gmra.mxu0 %vm827_vm5, %v2141_v28 }
  0x7c   :  { %2000 = vmatprep.mubr.msk.bf16.mxu0 %vm1347_vm7, %v2145_v29 }
  0x7e   :  { %1156 = vmatmul.mubr.bf16.gmra.mxu1 %v2144_v30 }
  0x7f   :  { %1844 = vmatprep.mubr.msk.bf16.mxu1 %vm1082_vm6, %v2148_v31 }
  0x83   :  { %2001 = vmatmul.mubr.msk.bf16.vlgmr.msra.gmra.mxu0 %vm1347_vm7, %v2146_v32 }
  0x84   :  { %2017 = vmatpush3.bf16.msra.mxu0 %v2147_v17  ;;  %2004 = vmatprep.mubr.msk.bf16.mxu0 %vm1347_vm7, %v2151_v33 }
  0x85   :  { %2018 = vmatprep.subr.bf16.mxu0 %v2153_v34 }
  0x86   :  { %1164 = vmatmul.mubr.bf16.gmra.mxu1 %v2150_v35 }
  0x87   :  { %1845 = vmatprep.mubr.msk.bf16.mxu1 %vm1082_vm6, %v2154_v36 }
  0x88   :  { %2019 = vmatpush3.bf16.msra.mxu0 %v2153_v34 }
  0x89   :  { %2020 = vmatprep.subr.bf16.mxu0 %v2159_v37 }
  0x8b   :  { %2005 = vmatmul.mubr.msk.bf16.gmra.mxu0 %vm1347_vm7, %v2152_v38 }
  0x8c   :  { %2008 = vmatprep.mubr.msk.bf16.mxu0 %vm1347_vm7, %v2157_v39  ;;  %2021 = vmatpush3.bf16.msra.mxu0 %v2159_v37 }
  0x8e   :  { %1172 = vmatmul.mubr.bf16.gmra.mxu1 %v2156_v40 }
  0x8f   :  { %1846 = vmatprep.mubr.msk.bf16.mxu1 %vm1082_vm6, %v2160_v41 }
  0x93   :  { %2009 = vmatmul.mubr.msk.bf16.gmra.mxu0 %vm1347_vm7, %v2158_v42 }
  0x94   :  { %2022 = vmatprep.mubr.msk.bf16.mxu0 %vm439_vm2, %v2163_v43 }
  0x96   :  { %1180 = vmatmul.mubr.bf16.gmra.mxu1 %v2162_v44 }
  0x97   :  { %1847 = vmatprep.mubr.msk.bf16.mxu1 %vm1082_vm6, %v2165_v45 }
  0x9b   :  { %2023 = vmatmul.mubr.msk.bf16.vlgmr.msra.gmra.mxu0 %vm439_vm2, %v2164_v46 }
  0x9c   :  { %2026 = vmatprep.mubr.msk.bf16.mxu0 %vm439_vm2, %v2168_v47 }
  0x9e   :  { %1188 = vmatmul.mubr.bf16.gmra.mxu1 %v2167_v48 }
  0x9f   :  { %1848 = vmatprep.mubr.msk.bf16.mxu1 %vm1082_vm6, %v2170_v49 }
  0xa3   :  { %2027 = vmatmul.mubr.msk.bf16.gmra.mxu0 %vm439_vm2, %v2169_v50 }
  0xa4   :  { %2030 = vmatprep.mubr.msk.bf16.mxu0 %vm439_vm2, %v2173_v51 }
  0xa6   :  { %1196 = vmatmul.mubr.bf16.gmra.mxu1 %v2172_v52 }
  0xa7   :  { %2012 = vmatprep.mubr.msk.bf16.mxu1 %vm1347_vm7, %v2175_v53 }
  0xab   :  { %2031 = vmatmul.mubr.msk.bf16.gmra.mxu0 %vm439_vm2, %v2174_v54 }
  0xac   :  { %2034 = vmatprep.mubr.msk.bf16.mxu0 %vm439_vm2, %v2177_v55 }
  0xae   :  { %2013 = vmatmul.mubr.msk.bf16.vlgmr.msra.gmra.mxu1 %vm1347_vm7, %v2176_v56 }
  0xb3   :  { %2035 = vmatmul.mubr.msk.bf16.gmra.mxu0 %vm439_vm2, %v2178_v57 }
  0xe3   :  { %v1900_v58 = vpop.f32.mrf.mxu0 }
  0xe5   :  { %v1901_v59 = vpop.f32.mrf.mxu0 }
  0xe6   :  { %v1902_v63 = vadd.f32 %v1901_v59, %v1900_v58 }
  0xe7   :  { %v1903_v60 = vpop.f32.mrf.mxu0 }
  0xe9   :  { %v1904_v61 = vpop.f32.mrf.mxu0 }
  0xea   :  { %v1905_v6 = vadd.f32 %v1904_v61, %v1903_v60 }
  0xeb   :  { %v1906_v62 = vpop.f32.mrf.mxu0 }
  0xed   :  { %v1907_v1 = vpop.f32.mrf.mxu0 }
  0xee   :  { %v595_v2 = vpop.f32.mrf.mxu1  ;;  %v1908_v13 = vadd.f32 %v1907_v1, %v1906_v62 }
  0xef   :  { %v596_v3 = vadd.f32 %v1902_v63, %v595_v2  ;;  %v1909_v4 = vpop.f32.mrf.mxu0 }
  0xf0   :  { %v597_v5 = vpop.f32.mrf.mxu1 }
  0xf1   :  { %vm658_vm8 = vcmp.ge.f32.partialorder %v596_v3, 0.0  ;;  %v674_v7 = vmul.f32 0.1, %v596_v3  ;;  %v1910_v8 = vpop.f32.mrf.mxu0 }
  0xf2   :  { %v598_v9 = vpop.f32.mrf.mxu1  ;;  %v1911_v21 = vadd.f32 %v1910_v8, %v1909_v4 }
  0xf3   :  { %v690_v10 = vsel %vm658_vm8, %v596_v3, %v674_v7  ;;  %v599_v0 = vadd.f32 %v1905_v6, %v598_v9  ;;  %v1912_v11 = vpop.f32.mrf.mxu0 }
  0xf4   :  { %706 = vst.msk [vmem:[%s2912_s10] sm:$0xff] %vm439_vm2, %v690_v10  ;;  %v600_v12 = vpop.f32.mrf.mxu1 }
  0xf5   :  { %vm659_vm9 = vcmp.ge.f32.partialorder %v599_v0, 0.0  ;;  %v675_v14 = vmul.f32 0.1, %v599_v0  ;;  %v1913_v15 = vpop.f32.mrf.mxu0 }
  0xf6   :  { %v603_v16 = vpop.f32.mrf.mxu1  ;;  %v1914_v29 = vadd.f32 %v1913_v15, %v1912_v11 }
  0xf7   :  { %v691_v17 = vsel %vm659_vm9, %v599_v0, %v675_v14  ;;  %v604_v18 = vadd.f32 %v1908_v13, %v603_v16  ;;  %v1915_v19 = vpop.f32.mrf.mxu0 }
  0xf8   :  { %707 = vst.msk [vmem:[%s2912_s10 + $0x8] sm:$0xff] %vm439_vm2, %v691_v17  ;;  %v605_v20 = vpop.f32.mrf.mxu1 }
  0xf9   :  { %vm660_vm10 = vcmp.ge.f32.partialorder %v604_v18, 0.0  ;;  %v676_v22 = vmul.f32 0.1, %v604_v18  ;;  %v1916_v23 = vpop.f32.mrf.mxu0 }
  0xfa   :  { %v606_v24 = vpop.f32.mrf.mxu1  ;;  %v1917_v37 = vadd.f32 %v1916_v23, %v1915_v19 }
  0xfb   :  { %v692_v25 = vsel %vm660_vm10, %v604_v18, %v676_v22  ;;  %v607_v26 = vadd.f32 %v1911_v21, %v606_v24  ;;  %v1918_v27 = vpop.f32.mrf.mxu0 }
  0xfc   :  { %708 = vst.msk [vmem:[%s2912_s10 + $0x10] sm:$0xff] %vm439_vm2, %v692_v25  ;;  %v608_v28 = vpop.f32.mrf.mxu1 }
  0xfd   :  { %vm661_vm11 = vcmp.ge.f32.partialorder %v607_v26, 0.0  ;;  %v677_v30 = vmul.f32 0.1, %v607_v26  ;;  %v1919_v31 = vpop.f32.mrf.mxu0 }
  0xfe   :  { %v611_v32 = vpop.f32.mrf.mxu1  ;;  %v1920_v45 = vadd.f32 %v1919_v31, %v1918_v27 }
  0xff   :  { %v693_v33 = vsel %vm661_vm11, %v607_v26, %v677_v30  ;;  %v612_v34 = vadd.f32 %v1914_v29, %v611_v32  ;;  %v1921_v35 = vpop.f32.mrf.mxu0 }
 0x100   :  { %709 = vst.msk [vmem:[%s2912_s10 + $0x18] sm:$0xff] %vm439_vm2, %v693_v33  ;;  %v613_v36 = vpop.f32.mrf.mxu1 }
 0x101   :  { %vm662_vm12 = vcmp.ge.f32.partialorder %v612_v34, 0.0  ;;  %v678_v38 = vmul.f32 0.1, %v612_v34  ;;  %v1922_v39 = vpop.f32.mrf.mxu0 }
 0x102   :  { %v614_v40 = vpop.f32.mrf.mxu1  ;;  %v1923_v53 = vadd.f32 %v1922_v39, %v1921_v35 }
 0x103   :  { %v694_v41 = vsel %vm662_vm12, %v612_v34, %v678_v38  ;;  %v615_v42 = vadd.f32 %v1917_v37, %v614_v40  ;;  %v1924_v43 = vpop.f32.mrf.mxu0 }
 0x104   :  { %710 = vst.msk [vmem:[%s2912_s10 + $0x20] sm:$0xff] %vm439_vm2, %v694_v41  ;;  %v616_v44 = vpop.f32.mrf.mxu1 }
 0x105   :  { %vm663_vm13 = vcmp.ge.f32.partialorder %v615_v42, 0.0  ;;  %v679_v46 = vmul.f32 0.1, %v615_v42  ;;  %v1925_v47 = vpop.f32.mrf.mxu0 }
 0x106   :  { %v619_v48 = vpop.f32.mrf.mxu1  ;;  %v1926_v61 = vadd.f32 %v1925_v47, %v1924_v43 }
 0x107   :  { %v695_v49 = vsel %vm663_vm13, %v615_v42, %v679_v46  ;;  %v620_v50 = vadd.f32 %v1920_v45, %v619_v48  ;;  %v1927_v51 = vpop.f32.mrf.mxu0 }
 0x108   :  { %711 = vst.msk [vmem:[%s2912_s10 + $0x28] sm:$0xff] %vm439_vm2, %v695_v49  ;;  %v621_v52 = vpop.f32.mrf.mxu1 }
 0x109   :  { %vm664_vm14 = vcmp.ge.f32.partialorder %v620_v50, 0.0  ;;  %v680_v54 = vmul.f32 0.1, %v620_v50  ;;  %v1928_v55 = vpop.f32.mrf.mxu0 }
 0x10a   :  { %v622_v56 = vpop.f32.mrf.mxu1  ;;  %v1929_v6 = vadd.f32 %v1928_v55, %v1927_v51 }
 0x10b   :  { %v696_v57 = vsel %vm664_vm14, %v620_v50, %v680_v54  ;;  %v623_v58 = vadd.f32 %v1923_v53, %v622_v56  ;;  %v1930_v59 = vpop.f32.mrf.mxu0 }
 0x10c   :  { %712 = vst.msk [vmem:[%s2912_s10 + $0x30] sm:$0xff] %vm439_vm2, %v696_v57  ;;  %v624_v60 = vpop.f32.mrf.mxu1 }
 0x10d   :  { %vm665_vm15 = vcmp.ge.f32.partialorder %v623_v58, 0.0  ;;  %v681_v62 = vmul.f32 0.1, %v623_v58  ;;  %v1931_v63 = vpop.f32.mrf.mxu0 }
 0x10e   :  { %v627_v1 = vpop.f32.mrf.mxu1  ;;  %v1932_v13 = vadd.f32 %v1931_v63, %v1930_v59 }
 0x10f   :  { %v697_v2 = vsel %vm665_vm15, %v623_v58, %v681_v62  ;;  %v628_v3 = vadd.f32 %v1926_v61, %v627_v1  ;;  %v1933_v4 = vpop.f32.mrf.mxu0 }
 0x110   :  { %713 = vst.msk [vmem:[%s2912_s10 + $0x38] sm:$0xff] %vm439_vm2, %v697_v2  ;;  %v629_v5 = vpop.f32.mrf.mxu1 }
 0x111   :  { %vm666_vm0 = vcmp.ge.f32.partialorder %v628_v3, 0.0  ;;  %v682_v7 = vmul.f32 0.1, %v628_v3  ;;  %v1934_v8 = vpop.f32.mrf.mxu0 }
 0x112   :  { %v630_v9 = vpop.f32.mrf.mxu1  ;;  %v1935_v21 = vadd.f32 %v1934_v8, %v1933_v4 }
 0x113   :  { %v698_v10 = vsel %vm666_vm0, %v628_v3, %v682_v7  ;;  %v631_v0 = vadd.f32 %v1929_v6, %v630_v9  ;;  %v1936_v11 = vpop.f32.mrf.mxu0 }
 0x114   :  { %714 = vst.msk [vmem:[%s2912_s10 + $0x40] sm:$0xff] %vm439_vm2, %v698_v10  ;;  %v632_v12 = vpop.f32.mrf.mxu1 }
 0x115   :  { %vm667_vm1 = vcmp.ge.f32.partialorder %v631_v0, 0.0  ;;  %v683_v14 = vmul.f32 0.1, %v631_v0  ;;  %v1937_v15 = vpop.f32.mrf.mxu0 }
 0x116   :  { %v635_v16 = vpop.f32.mrf.mxu1  ;;  %v1938_v29 = vadd.f32 %v1937_v15, %v1936_v11 }
 0x117   :  { %v699_v17 = vsel %vm667_vm1, %v631_v0, %v683_v14  ;;  %v636_v18 = vadd.f32 %v1932_v13, %v635_v16  ;;  %v1939_v19 = vpop.f32.mrf.mxu0 }
 0x118   :  { %715 = vst.msk [vmem:[%s2912_s10 + $0x48] sm:$0xff] %vm439_vm2, %v699_v17  ;;  %v637_v20 = vpop.f32.mrf.mxu1 }
 0x119   :  { %vm668_vm3 = vcmp.ge.f32.partialorder %v636_v18, 0.0  ;;  %v684_v22 = vmul.f32 0.1, %v636_v18  ;;  %v1940_v23 = vpop.f32.mrf.mxu0 }
 0x11a   :  { %v638_v24 = vpop.f32.mrf.mxu1  ;;  %v1941_v37 = vadd.f32 %v1940_v23, %v1939_v19 }
 0x11b   :  { %v700_v25 = vsel %vm668_vm3, %v636_v18, %v684_v22  ;;  %v639_v26 = vadd.f32 %v1935_v21, %v638_v24  ;;  %v1942_v27 = vpop.f32.mrf.mxu0 }
 0x11c   :  { %716 = vst.msk [vmem:[%s2912_s10 + $0x50] sm:$0xff] %vm439_vm2, %v700_v25  ;;  %v640_v28 = vpop.f32.mrf.mxu1 }
 0x11d   :  { %vm669_vm4 = vcmp.ge.f32.partialorder %v639_v26, 0.0  ;;  %v685_v30 = vmul.f32 0.1, %v639_v26  ;;  %v1943_v31 = vpop.f32.mrf.mxu0 }
 0x11e   :  { %v643_v32 = vpop.f32.mrf.mxu1  ;;  %v1944_v45 = vadd.f32 %v1943_v31, %v1942_v27 }
 0x11f   :  { %v701_v33 = vsel %vm669_vm4, %v639_v26, %v685_v30  ;;  %v644_v34 = vadd.f32 %v1938_v29, %v643_v32  ;;  %v1945_v35 = vpop.f32.mrf.mxu0 }
 0x120   :  { %717 = vst.msk [vmem:[%s2912_s10 + $0x58] sm:$0xff] %vm439_vm2, %v701_v33  ;;  %v645_v36 = vpop.f32.mrf.mxu1 }
 0x121   :  { %vm670_vm5 = vcmp.ge.f32.partialorder %v644_v34, 0.0  ;;  %v686_v38 = vmul.f32 0.1, %v644_v34  ;;  %v1946_v39 = vpop.f32.mrf.mxu0 }
 0x122   :  { %v646_v40 = vpop.f32.mrf.mxu1  ;;  %v1947_v53 = vadd.f32 %v1946_v39, %v1945_v35 }
 0x123   :  { %v702_v41 = vsel %vm670_vm5, %v644_v34, %v686_v38  ;;  %v647_v42 = vadd.f32 %v1941_v37, %v646_v40  ;;  %v1984_v43 = vpop.f32.mrf.mxu0 }
 0x124   :  { %718 = vst.msk [vmem:[%s2912_s10 + $0x60] sm:$0xff] %vm439_vm2, %v702_v41  ;;  %v648_v44 = vpop.f32.mrf.mxu1 }
 0x125   :  { %vm671_vm7 = vcmp.ge.f32.partialorder %v647_v42, 0.0  ;;  %v687_v46 = vmul.f32 0.1, %v647_v42  ;;  %v893_v47 = vpop.f32.mrf.mxu0 }
 0x126   :  { %v651_v48 = vpop.f32.mrf.mxu1 }
 0x127   :  { %v703_v49 = vsel %vm671_vm7, %v647_v42, %v687_v46  ;;  %v652_v50 = vadd.f32 %v1944_v45, %v651_v48  ;;  %v1985_v51 = vpop.f32.mrf.mxu0 }
 0x128   :  { %719 = vst.msk [vmem:[%s2912_s10 + $0x68] sm:$0xff] %vm439_vm2, %v703_v49  ;;  %v653_v52 = vpop.f32.mrf.mxu1 }
 0x129   :  { %vm672_vm8 = vcmp.ge.f32.partialorder %v652_v50, 0.0  ;;  %v688_v54 = vmul.f32 0.1, %v652_v50  ;;  %v896_v55 = vpop.f32.mrf.mxu0 }
 0x12a   :  { %v654_v56 = vpop.f32.mrf.mxu1 }
 0x12b   :  { %v704_v57 = vsel %vm672_vm8, %v652_v50, %v688_v54  ;;  %v655_v58 = vadd.f32 %v1947_v53, %v654_v56  ;;  %v2712_v59 = vpop.f32.mrf.mxu0 }
 0x12c   :  { %720 = vst.msk [vmem:[%s2912_s10 + $0x70] sm:$0xff] %vm439_vm2, %v704_v57  ;;  %v656_v60 = vpop.f32.mrf.mxu1 }
 0x12d   :  { %vm673_vm9 = vcmp.ge.f32.partialorder %v655_v58, 0.0  ;;  %v689_v61 = vmul.f32 0.1, %v655_v58  ;;  %v909_v62 = vpop.f32.mrf.mxu0 }
 0x12e   :  { %v1141_v63 = vpop.f32.mrf.mxu1 }
 0x12f   :  { %v705_v1 = vsel %vm673_vm9, %v655_v58, %v689_v61  ;;  %v1142_v2 = vadd.f32 %v1141_v63, %v893_v47  ;;  %v2718_v3 = vpop.f32.mrf.mxu0 }
 0x130   :  { %721 = vst.msk [vmem:[%s2912_s10 + $0x78] sm:$0xff] %vm439_vm2, %v705_v1  ;;  %v1143_v4 = vpop.f32.mrf.mxu1 }
 0x131   :  { %vm1204_vm10 = vcmp.ge.f32.partialorder %v1142_v2, 0.0  ;;  %v1220_v5 = vmul.f32 0.1, %v1142_v2  ;;  %v912_v6 = vpop.f32.mrf.mxu0 }
 0x132   :  { %v1144_v7 = vpop.f32.mrf.mxu1 }
 0x133   :  { %v1236_v8 = vsel %vm1204_vm10, %v1142_v2, %v1220_v5  ;;  %v1145_v9 = vadd.f32 %v1144_v7, %v896_v55  ;;  %v2724_v10 = vpop.f32.mrf.mxu0 }
 0x134   :  { %1252 = vst.msk [vmem:[%s2913_s11] sm:$0xff] %vm1082_vm6, %v1236_v8  ;;  %v1146_v0 = vpop.f32.mrf.mxu1 }
 0x135   :  { %vm1205_vm11 = vcmp.ge.f32.partialorder %v1145_v9, 0.0  ;;  %v1221_v11 = vmul.f32 0.1, %v1145_v9  ;;  %v925_v12 = vpop.f32.mrf.mxu0 }
 0x136   :  { %v1149_v13 = vpop.f32.mrf.mxu1 }
 0x137   :  { %v1237_v14 = vsel %vm1205_vm11, %v1145_v9, %v1221_v11  ;;  %v1150_v15 = vadd.f32 %v1984_v43, %v1149_v13  ;;  %v2730_v16 = vpop.f32.mrf.mxu0 }
 0x138   :  { %1253 = vst.msk [vmem:[%s2913_s11 + $0x8] sm:$0xff] %vm1082_vm6, %v1237_v14  ;;  %v1151_v17 = vpop.f32.mrf.mxu1 }
 0x139   :  { %vm1206_vm12 = vcmp.ge.f32.partialorder %v1150_v15, 0.0  ;;  %v1222_v18 = vmul.f32 0.1, %v1150_v15  ;;  %v928_v19 = vpop.f32.mrf.mxu0 }
 0x13a   :  { %v1152_v20 = vpop.f32.mrf.mxu1 }
 0x13b   :  { %v1238_v21 = vsel %vm1206_vm12, %v1150_v15, %v1222_v18  ;;  %v1153_v22 = vadd.f32 %v1985_v51, %v1152_v20  ;;  %v2736_v23 = vpop.f32.mrf.mxu0 }
 0x13c   :  { %1254 = vst.msk [vmem:[%s2913_s11 + $0x10] sm:$0xff] %vm1082_vm6, %v1238_v21  ;;  %v1154_v24 = vpop.f32.mrf.mxu1 }
 0x13d   :  { %vm1207_vm13 = vcmp.ge.f32.partialorder %v1153_v22, 0.0  ;;  %v1223_v25 = vmul.f32 0.1, %v1153_v22  ;;  %v2742_v26 = vpop.f32.mrf.mxu0 }
 0x13e   :  { %v1157_v27 = vpop.f32.mrf.mxu1 }
 0x13f   :  { %v1239_v28 = vsel %vm1207_vm13, %v1153_v22, %v1223_v25  ;;  %v1158_v29 = vadd.f32 %v1157_v27, %v909_v62  ;;  %v2744_v30 = vpop.f32.mrf.mxu0 }
 0x140   :  { %1255 = vst.msk [vmem:[%s2913_s11 + $0x18] sm:$0xff] %vm1082_vm6, %v1239_v28  ;;  %v1159_v31 = vpop.f32.mrf.mxu1 }
 0x141   :  { %vm1208_vm14 = vcmp.ge.f32.partialorder %v1158_v29, 0.0  ;;  %v1224_v32 = vmul.f32 0.1, %v1158_v29  ;;  %v2750_v33 = vpop.f32.mrf.mxu0 }
 0x142   :  { %v1160_v34 = vpop.f32.mrf.mxu1 }
 0x143   :  { %v1240_v35 = vsel %vm1208_vm14, %v1158_v29, %v1224_v32  ;;  %v1161_v36 = vadd.f32 %v1160_v34, %v912_v6  ;;  %v2002_v37 = vpop.f32.mrf.mxu0 }
 0x144   :  { %1256 = vst.msk [vmem:[%s2913_s11 + $0x20] sm:$0xff] %vm1082_vm6, %v1240_v35  ;;  %v1162_v38 = vpop.f32.mrf.mxu1 }
 0x145   :  { %vm1209_vm15 = vcmp.ge.f32.partialorder %v1161_v36, 0.0  ;;  %v1225_v39 = vmul.f32 0.1, %v1161_v36  ;;  %v1413_v40 = vpop.f32.mrf.mxu0 }
 0x146   :  { %v1165_v41 = vpop.f32.mrf.mxu1 }
 0x147   :  { %v1241_v42 = vsel %vm1209_vm15, %v1161_v36, %v1225_v39  ;;  %v1166_v43 = vadd.f32 %v2712_v59, %v1165_v41  ;;  %v2757_v44 = vpop.f32.mrf.mxu0 }
 0x148   :  { %1257 = vst.msk [vmem:[%s2913_s11 + $0x28] sm:$0xff] %vm1082_vm6, %v1241_v42  ;;  %v1167_v45 = vpop.f32.mrf.mxu1 }
 0x149   :  { %vm1210_vm0 = vcmp.ge.f32.partialorder %v1166_v43, 0.0  ;;  %v1226_v46 = vmul.f32 0.1, %v1166_v43  ;;  %v2763_v47 = vpop.f32.mrf.mxu0 }
 0x14a   :  { %v1168_v48 = vpop.f32.mrf.mxu1 }
 0x14b   :  { %v1242_v49 = vsel %vm1210_vm0, %v1166_v43, %v1226_v46  ;;  %v1169_v50 = vadd.f32 %v2718_v3, %v1168_v48  ;;  %v2766_v51 = vpop.f32.mrf.mxu0 }
 0x14c   :  { %1258 = vst.msk [vmem:[%s2913_s11 + $0x30] sm:$0xff] %vm1082_vm6, %v1242_v49  ;;  %v1170_v52 = vpop.f32.mrf.mxu1 }
 0x14d   :  { %vm1211_vm1 = vcmp.ge.f32.partialorder %v1169_v50, 0.0  ;;  %v1227_v53 = vmul.f32 0.1, %v1169_v50  ;;  %v2772_v54 = vpop.f32.mrf.mxu0 }
 0x14e   :  { %v1173_v55 = vpop.f32.mrf.mxu1 }
 0x14f   :  { %v1243_v56 = vsel %vm1211_vm1, %v1169_v50, %v1227_v53  ;;  %v1174_v57 = vadd.f32 %v1173_v55, %v925_v12  ;;  %v2774_v58 = vpop.f32.mrf.mxu0 }
 0x150   :  { %1259 = vst.msk [vmem:[%s2913_s11 + $0x38] sm:$0xff] %vm1082_vm6, %v1243_v56  ;;  %v1175_v59 = vpop.f32.mrf.mxu1 }
 0x151   :  { %vm1212_vm3 = vcmp.ge.f32.partialorder %v1174_v57, 0.0  ;;  %v1228_v60 = vmul.f32 0.1, %v1174_v57  ;;  %v2780_v61 = vpop.f32.mrf.mxu0 }
 0x152   :  { %v1176_v62 = vpop.f32.mrf.mxu1 }
 0x153   :  { %v1244_v63 = vsel %vm1212_vm3, %v1174_v57, %v1228_v60  ;;  %v1177_v1 = vadd.f32 %v1176_v62, %v928_v19  ;;  %v2782_v2 = vpop.f32.mrf.mxu0 }
 0x154   :  { %1260 = vst.msk [vmem:[%s2913_s11 + $0x40] sm:$0xff] %vm1082_vm6, %v1244_v63  ;;  %v1178_v3 = vpop.f32.mrf.mxu1 }
 0x155   :  { %vm1213_vm4 = vcmp.ge.f32.partialorder %v1177_v1, 0.0  ;;  %v1229_v4 = vmul.f32 0.1, %v1177_v1  ;;  %v2788_v5 = vpop.f32.mrf.mxu0 }
 0x156   :  { %v1181_v6 = vpop.f32.mrf.mxu1 }
 0x157   :  { %v1245_v7 = vsel %vm1213_vm4, %v1177_v1, %v1229_v4  ;;  %v1182_v8 = vadd.f32 %v2724_v10, %v1181_v6  ;;  %v2791_v9 = vpop.f32.mrf.mxu0 }
 0x158   :  { %1261 = vst.msk [vmem:[%s2913_s11 + $0x48] sm:$0xff] %vm1082_vm6, %v1245_v7  ;;  %v1183_v0 = vpop.f32.mrf.mxu1 }
 0x159   :  { %vm1214_vm5 = vcmp.ge.f32.partialorder %v1182_v8, 0.0  ;;  %v1230_v11 = vmul.f32 0.1, %v1182_v8  ;;  %v2797_v12 = vpop.f32.mrf.mxu0 }
 0x15a   :  { %v1184_v13 = vpop.f32.mrf.mxu1 }
 0x15b   :  { %v1246_v14 = vsel %vm1214_vm5, %v1182_v8, %v1230_v11  ;;  %v1185_v15 = vadd.f32 %v2730_v16, %v1184_v13  ;;  %v2024_v17 = vpop.f32.mrf.mxu0 }
 0x15c   :  { %1262 = vst.msk [vmem:[%s2913_s11 + $0x50] sm:$0xff] %vm1082_vm6, %v1246_v14  ;;  %v1601_v10 = vadd.f32 %v2024_v17, %v2002_v37  ;;  %v1186_v18 = vpop.f32.mrf.mxu1 }
 0x15d   :  { %vm1215_vm7 = vcmp.ge.f32.partialorder %v1185_v15, 0.0  ;;  %v1231_v19 = vmul.f32 0.1, %v1185_v15  ;;  %v1592_v20 = vpop.f32.mrf.mxu0 }
 0x15e   :  { %vm1657_vm8 = vcmp.ge.f32.partialorder %v1601_v10, 0.0  ;;  %v1673_v21 = vmul.f32 0.1, %v1601_v10  ;;  %v1593_v22 = vadd.f32 %v1592_v20, %v1413_v40  ;;  %v1189_v24 = vpop.f32.mrf.mxu1 }
 0x15f   :  { %v1247_v25 = vsel %vm1215_vm7, %v1185_v15, %v1231_v19  ;;  %v1190_v27 = vadd.f32 %v1189_v24, %v2742_v26  ;;  %v2025_v28 = vpop.f32.mrf.mxu0 }
 0x160   :  { %1263 = vst.msk [vmem:[%s2913_s11 + $0x58] sm:$0xff] %vm1082_vm6, %v1247_v25  ;;  %v1689_v16 = vsel %vm1657_vm8, %v1601_v10, %v1673_v21  ;;  %vm1655_vm9 = vcmp.ge.f32.partialorder %v1593_v22, 0.0  ;;  %v1671_v29 = vmul.f32 0.1, %v1593_v22  ;;  %v1604_v31 = vadd.f32 %v2025_v28, %v2757_v44  ;;  %v1191_v32 = vpop.f32.mrf.mxu1 }
 0x161   :  { %1705 = vst.msk [vmem:[%s2914_s12 + $0x10] sm:$0xff] %vm439_vm2, %v1689_v16  ;;  %vm1216_vm10 = vcmp.ge.f32.partialorder %v1190_v27, 0.0  ;;  %v1232_v34 = vmul.f32 0.1, %v1190_v27  ;;  %v1595_v26 = vpop.f32.mrf.mxu0 }
 0x162   :  { %v1687_v35 = vsel %vm1655_vm9, %v1593_v22, %v1671_v29  ;;  %vm1658_vm11 = vcmp.ge.f32.partialorder %v1604_v31, 0.0  ;;  %v1674_v36 = vmul.f32 0.1, %v1604_v31  ;;  %v1596_v37 = vadd.f32 %v1595_v26, %v2763_v47  ;;  %v1192_v38 = vpop.f32.mrf.mxu1 }
 0x163   :  { %1703 = vst.msk [vmem:[%s2914_s12] sm:$0xff] %vm439_vm2, %v1687_v35  ;;  %v1248_v39 = vsel %vm1216_vm10, %v1190_v27, %v1232_v34  ;;  %v1193_v40 = vadd.f32 %v1192_v38, %v2750_v33  ;;  %v2028_v41 = vpop.f32.mrf.mxu0 }
 0x164   :  { %1264 = vst.msk [vmem:[%s2913_s11 + $0x60] sm:$0xff] %vm1082_vm6, %v1248_v39  ;;  %v1690_v42 = vsel %vm1658_vm11, %v1604_v31, %v1674_v36  ;;  %vm1656_vm12 = vcmp.ge.f32.partialorder %v1596_v37, 0.0  ;;  %v1672_v43 = vmul.f32 0.1, %v1596_v37  ;;  %v1617_v44 = vadd.f32 %v2028_v41, %v2766_v51  ;;  %v1194_v45 = vpop.f32.mrf.mxu1 }
 0x165   :  { %1706 = vst.msk [vmem:[%s2914_s12 + $0x18] sm:$0xff] %vm439_vm2, %v1690_v42  ;;  %vm1217_vm13 = vcmp.ge.f32.partialorder %v1193_v40, 0.0  ;;  %v1233_v46 = vmul.f32 0.1, %v1193_v40  ;;  %v1608_v33 = vpop.f32.mrf.mxu0 }
 0x166   :  { %v1688_v47 = vsel %vm1656_vm12, %v1596_v37, %v1672_v43  ;;  %vm1661_vm14 = vcmp.ge.f32.partialorder %v1617_v44, 0.0  ;;  %v1677_v48 = vmul.f32 0.1, %v1617_v44  ;;  %v1609_v49 = vadd.f32 %v1608_v33, %v2772_v54  ;;  %v1197_v50 = vpop.f32.mrf.mxu1 }
 0x167   :  { %1704 = vst.msk [vmem:[%s2914_s12 + $0x8] sm:$0xff] %vm439_vm2, %v1688_v47  ;;  %v1249_v51 = vsel %vm1217_vm13, %v1193_v40, %v1233_v46  ;;  %v1198_v52 = vadd.f32 %v2736_v23, %v1197_v50  ;;  %v2029_v53 = vpop.f32.mrf.mxu0 }
 0x168   :  { %1265 = vst.msk [vmem:[%s2913_s11 + $0x68] sm:$0xff] %vm1082_vm6, %v1249_v51  ;;  %v1693_v55 = vsel %vm1661_vm14, %v1617_v44, %v1677_v48  ;;  %vm1659_vm15 = vcmp.ge.f32.partialorder %v1609_v49, 0.0  ;;  %v1675_v56 = vmul.f32 0.1, %v1609_v49  ;;  %v1620_v54 = vadd.f32 %v2029_v53, %v2774_v58  ;;  %v1199_v57 = vpop.f32.mrf.mxu1 }
 0x169   :  { %1709 = vst.msk [vmem:[%s2914_s12 + $0x30] sm:$0xff] %vm439_vm2, %v1693_v55  ;;  %vm1218_vm0 = vcmp.ge.f32.partialorder %v1198_v52, 0.0  ;;  %v1234_v59 = vmul.f32 0.1, %v1198_v52  ;;  %v1611_v23 = vpop.f32.mrf.mxu0 }
 0x16a   :  { %v1691_v60 = vsel %vm1659_vm15, %v1609_v49, %v1675_v56  ;;  %vm1662_vm1 = vcmp.ge.f32.partialorder %v1620_v54, 0.0  ;;  %v1678_v62 = vmul.f32 0.1, %v1620_v54  ;;  %v1612_v63 = vadd.f32 %v1611_v23, %v2780_v61  ;;  %v1200_v1 = vpop.f32.mrf.mxu1 }
 0x16b   :  { %1707 = vst.msk [vmem:[%s2914_s12 + $0x20] sm:$0xff] %vm439_vm2, %v1691_v60  ;;  %v1250_v58 = vsel %vm1218_vm0, %v1198_v52, %v1234_v59  ;;  %v1201_v3 = vadd.f32 %v2744_v30, %v1200_v1  ;;  %v2032_v4 = vpop.f32.mrf.mxu0 }
 0x16c   :  { %1266 = vst.msk [vmem:[%s2913_s11 + $0x70] sm:$0xff] %vm1082_vm6, %v1250_v58  ;;  %v1694_v6 = vsel %vm1662_vm1, %v1620_v54, %v1678_v62  ;;  %vm1660_vm3 = vcmp.ge.f32.partialorder %v1612_v63, 0.0  ;;  %v1676_v7 = vmul.f32 0.1, %v1612_v63  ;;  %v1633_v61 = vadd.f32 %v2032_v4, %v2782_v2  ;;  %v1202_v8 = vpop.f32.mrf.mxu1 }
 0x16d   :  { %1710 = vst.msk [vmem:[%s2914_s12 + $0x38] sm:$0xff] %vm439_vm2, %v1694_v6  ;;  %vm1219_vm4 = vcmp.ge.f32.partialorder %v1201_v3, 0.0  ;;  %v1235_v0 = vmul.f32 0.1, %v1201_v3  ;;  %v1624_v30 = vpop.f32.mrf.mxu0 }
 0x16e   :  { %v1692_v11 = vsel %vm1660_vm3, %v1612_v63, %v1676_v7  ;;  %vm1665_vm5 = vcmp.ge.f32.partialorder %v1633_v61, 0.0  ;;  %v1681_v13 = vmul.f32 0.1, %v1633_v61  ;;  %v1625_v14 = vadd.f32 %v1624_v30, %v2788_v5  ;;  %v2014_v15 = vpop.f32.mrf.mxu1 }
 0x16f   :  { %1708 = vst.msk [vmem:[%s2914_s12 + $0x28] sm:$0xff] %vm439_vm2, %v1692_v11  ;;  %v1251_v2 = vsel %vm1219_vm4, %v1201_v3, %v1235_v0  ;;  %v2033_v17 = vpop.f32.mrf.mxu0 }
 0x170   :  { %1267 = vst.msk [vmem:[%s2913_s11 + $0x78] sm:$0xff] %vm1082_vm6, %v1251_v2  ;;  %v1697_v10 = vsel %vm1665_vm5, %v1633_v61, %v1681_v13  ;;  %vm1663_vm7 = vcmp.ge.f32.partialorder %v1625_v14, 0.0  ;;  %v1679_v18 = vmul.f32 0.1, %v1625_v14  ;;  %v1636_v19 = vadd.f32 %v2033_v17, %v2791_v9  ;;  %v1461_v5 = vpop.f32.mrf.mxu1 }
 0x171   :  { %1713 = vst.msk [vmem:[%s2914_s12 + $0x50] sm:$0xff] %vm439_vm2, %v1697_v10  ;;  %v1627_v20 = vpop.f32.mrf.mxu0 }
 0x172   :  { %v1695_v21 = vsel %vm1663_vm7, %v1625_v14, %v1679_v18  ;;  %vm1666_vm8 = vcmp.ge.f32.partialorder %v1636_v19, 0.0  ;;  %v1682_v22 = vmul.f32 0.1, %v1636_v19  ;;  %v1628_v24 = vadd.f32 %v1627_v20, %v2797_v12  ;;  %v2015_v16 = vpop.f32.mrf.mxu1 }
 0x173   :  { %1711 = vst.msk [vmem:[%s2914_s12 + $0x40] sm:$0xff] %vm439_vm2, %v1695_v21  ;;  %v2036_v25 = vpop.f32.mrf.mxu0 }
 0x174   :  { %v1698_v27 = vsel %vm1666_vm8, %v1636_v19, %v1682_v22  ;;  %vm1664_vm6 = vcmp.ge.f32.partialorder %v1628_v24, 0.0  ;;  %v1680_v9 = vmul.f32 0.1, %v1628_v24  ;;  %v1649_v28 = vadd.f32 %v2036_v25, %v2014_v15  ;;  %v1464_v37 = vpop.f32.mrf.mxu1 }
 0x175   :  { %1714 = vst.msk [vmem:[%s2914_s12 + $0x58] sm:$0xff] %vm439_vm2, %v1698_v27  ;;  %v1640_v29 = vpop.f32.mrf.mxu0 }
 0x176   :  { %v1696_v31 = vsel %vm1664_vm6, %v1628_v24, %v1680_v9  ;;  %vm1669_vm9 = vcmp.ge.f32.partialorder %v1649_v28, 0.0  ;;  %v1685_v12 = vmul.f32 0.1, %v1649_v28  ;;  %v1641_v32 = vadd.f32 %v1640_v29, %v1461_v5 }
 0x177   :  { %1712 = vst.msk [vmem:[%s2914_s12 + $0x48] sm:$0xff] %vm439_vm2, %v1696_v31  ;;  %v2037_v34 = vpop.f32.mrf.mxu0 }
 0x178   :  { %v1701_v26 = vsel %vm1669_vm9, %v1649_v28, %v1685_v12  ;;  %vm1667_vm10 = vcmp.ge.f32.partialorder %v1641_v32, 0.0  ;;  %v1683_v35 = vmul.f32 0.1, %v1641_v32  ;;  %v1652_v36 = vadd.f32 %v2037_v34, %v2015_v16 }
 0x179   :  { %1717 = vst.msk [vmem:[%s2914_s12 + $0x70] sm:$0xff] %vm439_vm2, %v1701_v26  ;;  %v1643_v38 = vpop.f32.mrf.mxu0 }
 0x17a   :  { %v1699_v39 = vsel %vm1667_vm10, %v1641_v32, %v1683_v35  ;;  %vm1670_vm11 = vcmp.ge.f32.partialorder %v1652_v36, 0.0  ;;  %v1686_v40 = vmul.f32 0.1, %v1652_v36  ;;  %v1644_v41 = vadd.f32 %v1643_v38, %v1464_v37 }
 0x17b   :  { %1715 = vst.msk [vmem:[%s2914_s12 + $0x60] sm:$0xff] %vm439_vm2, %v1699_v39 }
 0x17c   :  { %v1702_v42 = vsel %vm1670_vm11, %v1652_v36, %v1686_v40  ;;  %vm1668_vm12 = vcmp.ge.f32.partialorder %v1644_v41, 0.0  ;;  %v1684_v43 = vmul.f32 0.1, %v1644_v41 }
 0x17d   :  { %1718 = vst.msk [vmem:[%s2914_s12 + $0x78] sm:$0xff] %vm439_vm2, %v1702_v42 }
 0x17e   :  { %v1700_v44 = vsel %vm1668_vm12, %v1644_v41, %v1684_v43 }
 0x17f   :  { %1716 = vst.msk [vmem:[%s2914_s12 + $0x68] sm:$0xff] %vm439_vm2, %v1700_v44 }

// kernel: mul.29
= control target key start
LH: loop header
LB: loop body
LE: loop exit
PB: predicated region body
PF: predicated region fallthrough
CT: control target
= control target key end

     0   :  { %s75_s8 = smov 116   ;;  %vm8_vm0 = vcmask 31744   ;;  %s76_s9 = smov 120   ;;  %s108_s0 = inlined_call_operand.vmem [shape: f32[32], index: 0, kind: input, shape index: {}]   ;;  %s109_s1 = inlined_call_operand.vmem [shape: f32[2,4,4], index: 1, kind: output, shape index: {}]  }
   0x1   :  { %v5_v0 = vld [vmem:[%s108_s0] sm:$0x1]  ;;  %s74_s0 = smov 124   ;;  %s77_s10 = smov 112  }
   0x2   :  { %6 = vst [vmem:[#allocation1] sm:$0x1] %v5_v0  ;;  %s78_s11 = smov 108   ;;  %s79_s12 = smov 104  }
   0x3   :  { %s80_s13 = smov 100  }
   0x9   :  { %v10_v1 = vld [vmem:[#allocation1] sm:$0x1]  }
   0xa   :  { %v22_v2 = vld [vmem:[#allocation1] sm:$0x1]   ;;  %11 = vrot.lane.b32.xlu0 %v10_v1, %s74_s0 }
   0xb   :  { %23 = vrot.lane.b32.xlu1 %v22_v2, %s75_s8  ;;  %v16_v3 = vld [vmem:[#allocation1] sm:$0x1]  }
   0xc   :  { %v28_v4 = vld [vmem:[#allocation1] sm:$0x1]  }
   0xd   :  { %v7_v5 = vld [vmem:[#allocation1] sm:$0x1]  }
   0xe   :  { %9 = vst.msk [vmem:[#allocation0] sm:$0x1] %vm8_vm0, %v7_v5   ;;  %17 = vrot.lane.b32.xlu0 %v16_v3, %s76_s9  ;;  %v34_v6 = vld [vmem:[#allocation1] sm:$0x1]  }
   0xf   :  { %29 = vrot.lane.b32.xlu1 %v28_v4, %s77_s10  ;;  %v40_v7 = vld [vmem:[#allocation1] sm:$0x1]  }
  0x10   :  { %v46_v8 = vld [vmem:[#allocation1] sm:$0x1]  }
  0x12   :  { %35 = vrot.lane.b32.xlu0 %v34_v6, %s78_s11 }
  0x13   :  { %41 = vrot.lane.b32.xlu1 %v40_v7, %s79_s12 }
  0x16   :  { %47 = vrot.lane.b32.xlu0 %v46_v8, %s80_s13 }
  0x7c   :  { %v12_v9 = vpop.permute.xlu0 %11  }
  0x7d   :  { %v24_v10 = vpop.permute.xlu1 %23   ;;  %15 = vst.msk [vmem:[#allocation0 + $0x1] sm:$0x1] %vm8_vm0, %v12_v9  }
  0x7e   :  { %27 = vst.msk [vmem:[#allocation0 + $0x3] sm:$0x1] %vm8_vm0, %v24_v10  }
  0x80   :  { %v18_v11 = vpop.permute.xlu0 %17  }
  0x81   :  { %v30_v12 = vpop.permute.xlu1 %29   ;;  %21 = vst.msk [vmem:[#allocation0 + $0x2] sm:$0x1] %vm8_vm0, %v18_v11  }
  0x82   :  { %33 = vst.msk [vmem:[#allocation0 + $0x8] sm:$0x1] %vm8_vm0, %v30_v12  }
  0x84   :  { %v36_v13 = vpop.permute.xlu0 %35  }
  0x85   :  { %v42_v14 = vpop.permute.xlu1 %41   ;;  %39 = vst.msk [vmem:[#allocation0 + $0x9] sm:$0x1] %vm8_vm0, %v36_v13  }
  0x86   :  { %45 = vst.msk [vmem:[#allocation0 + $0xa] sm:$0x1] %vm8_vm0, %v42_v14  }
  0x88   :  { %v56_v15 = vld [vmem:[#allocation0] sm:$0xf]  ;;  %v48_v16 = vpop.permute.xlu0 %47  }
  0x89   :  { %59 = vst [vmem:[%s109_s1] sm:$0xf] %v56_v15  ;;  %51 = vst.msk [vmem:[#allocation0 + $0xb] sm:$0x1] %vm8_vm0, %v48_v16  }
  0x90   :  { %v61_v17 = vld [vmem:[#allocation0 + $0x8] sm:$0xf] }
  0x91   :  { %66 = vst [vmem:[%s109_s1 + $0x4] sm:$0xf] %v61_v17 }

// kernel: kbnet_encoder_forward.14
= control target key start
LH: loop header
LB: loop body
LE: loop exit
PB: predicated region body
PF: predicated region fallthrough
CT: control target
= control target key end

     0   :  { %vm42_vm0 = vcmask 261120   ;;  %s179_s1 = inlined_call_operand.vmem [shape: bf16[32,128], index: 1, kind: input, shape index: {}]   ;;  %s180_s0 = inlined_call_operand.vmem [shape: bf16[32,32], index: 0, kind: input, shape index: {}]   ;;  %s181_s2 = inlined_call_operand.vmem [shape: f32[32,128], index: 2, kind: output, shape index: {}]  }
   0x1   :  { %v136_v0 = vld [vmem:[%s179_s1 + $0x8] sm:$0xff]   ;;  %v137_v1 = vld [vmem:[%s179_s1] sm:$0xff]  }
   0x2   :  { %128 = vmatprep.subr.bf16.mxu0 %v136_v0  ;;  %v138_v2 = vld [vmem:[%s180_s0] sm:$0xff]   ;;  %v139_v3 = vld [vmem:[%s180_s0 + $0x8] sm:$0xff]  }
   0x3   :  { %129 = vmatpush3.bf16.msra.mxu0 %v136_v0  ;;  %132 = vmatprep.mubr.msk.bf16.mxu0 %vm42_vm0, %v138_v2 }
   0x4   :  { %130 = vmatprep.subr.bf16.mxu0 %v137_v1 }
   0x7   :  { %131 = vmatpush3.bf16.msra.mxu0 %v137_v1 }
   0xa   :  { %133 = vmatmul.mubr.msk.bf16.vlgmr.msra.gmra.mxu0 %vm42_vm0, %v139_v3 }
  0xca   :  { %v134_v4 = vpop.f32.mrf.mxu0 }
  0xcb   :  { %vm100_vm1 = vcmp.ge.f32.partialorder %v134_v4, 0.0  ;;  %v104_v5 = vmul.f32 0.1, %v134_v4 }
  0xcc   :  { %v83_v6 = vpop.f32.mrf.mxu0 }
  0xcd   :  { %v108_v7 = vsel %vm100_vm1, %v134_v4, %v104_v5  ;;  %vm98_vm2 = vcmp.ge.f32.partialorder %v83_v6, 0.0  ;;  %v102_v8 = vmul.f32 0.1, %v83_v6 }
  0xce   :  { %112 = vst [vmem:[%s181_s2 + $0x10] sm:$0xff] %v108_v7  ;;  %v135_v9 = vpop.f32.mrf.mxu0 }
  0xcf   :  { %v106_v10 = vsel %vm98_vm2, %v83_v6, %v102_v8  ;;  %vm101_vm3 = vcmp.ge.f32.partialorder %v135_v9, 0.0  ;;  %v105_v11 = vmul.f32 0.1, %v135_v9 }
  0xd0   :  { %110 = vst [vmem:[%s181_s2] sm:$0xff] %v106_v10  ;;  %v86_v12 = vpop.f32.mrf.mxu0 }
  0xd1   :  { %v109_v13 = vsel %vm101_vm3, %v135_v9, %v105_v11  ;;  %vm99_vm4 = vcmp.ge.f32.partialorder %v86_v12, 0.0  ;;  %v103_v14 = vmul.f32 0.1, %v86_v12 }
  0xd2   :  { %113 = vst [vmem:[%s181_s2 + $0x18] sm:$0xff] %v109_v13 }
  0xd3   :  { %v107_v15 = vsel %vm99_vm4, %v86_v12, %v103_v14 }
  0xd4   :  { %111 = vst [vmem:[%s181_s2 + $0x8] sm:$0xff] %v107_v15 }

// kernel: kbnet_encoder_forward.13
= control target key start
LH: loop header
LB: loop body
LE: loop exit
PB: predicated region body
PF: predicated region fallthrough
CT: control target
= control target key end

     0   :  { %v1211_v0 = vmov 0   ;;  %vm487_vm0 = vcmask 1044480   ;;  %vm488_vm1 = vcmask 1045504   ;;  %v1212_v23 = vmov 65535   ;;  %s1570_s1 = inlined_call_operand.vmem [shape: bf16[432,96], index: 1, kind: input, shape index: {}]   ;;  %s1571_s0 = inlined_call_operand.vmem [shape: bf16[32,432], index: 0, kind: input, shape index: {}]   ;;  %s1572_s5 = inlined_call_operand.vmem [shape: bf16[27,32], index: 5, kind: input, shape index: {}]   ;;  %s1573_s3 = inlined_call_operand.vmem [shape: bf16[144,32], index: 3, kind: input, shape index: {}]   ;;  %s1574_s4 = inlined_call_operand.vmem [shape: bf16[32,27], index: 4, kind: input, shape index: {}]   ;;  %s1575_s9 = inlined_call_operand.vmem [shape: bf16[3,96], index: 9, kind: input, shape index: {}]   ;;  %s1576_s8 = inlined_call_operand.vmem [shape: bf16[32,3], index: 8, kind: input, shape index: {}]   ;;  %s1577_s7 = inlined_call_operand.vmem [shape: bf16[48,96], index: 7, kind: input, shape index: {}]   ;;  %s1578_s6 = inlined_call_operand.vmem [shape: bf16[32,48], index: 6, kind: input, shape index: {}]   ;;  %s1579_s11 = inlined_call_operand.vmem [shape: bf16[48,96], index: 11, kind: input, shape index: {}]   ;;  %s1580_s2 = inlined_call_operand.vmem [shape: bf16[32,144], index: 2, kind: input, shape index: {}]   ;;  %s1581_s10 = inlined_call_operand.vmem [shape: bf16[32,48], index: 10, kind: input, shape index: {}]   ;;  %s1582_s12 = inlined_call_operand.vmem [shape: f32[32,96], index: 12, kind: output, shape index: {0}]   ;;  %s1583_s13 = inlined_call_operand.vmem [shape: f32[32,32], index: 13, kind: output, shape index: {1}]   ;;  %s1584_s14 = inlined_call_operand.vmem [shape: f32[32,96], index: 14, kind: output, shape index: {2}]  }
   0x1   :  { %363 = vmatprep.subr.bf16.mxu1 %v1211_v0  ;;  %v1141_v1 = vld [vmem:[%s1570_s1 + $0x78] sm:$0xff]   ;;  %v1144_v4 = vld [vmem:[%s1570_s1 + $0x70] sm:$0xff]   ;;  %v1147_v7 = vld [vmem:[%s1570_s1 + $0x68] sm:$0xff]   ;;  %v489_v24 = vsel %vm487_vm0, 4294967295, %v1212_v23  ;;  %vm307_vm2 = vcmask 392192   ;;  %vm720_vm3 = vcmask 1040384  }
   0x2   :  { %v1142_v2 = vld [vmem:[%s1570_s1 + $0xb8] sm:$0xff]   ;;  %1060 = vmatprep.subr.bf16.mxu0 %v1141_v1  ;;  %v1145_v5 = vld [vmem:[%s1570_s1 + $0xb0] sm:$0xff]   ;;  %v1148_v8 = vld [vmem:[%s1570_s1 + $0xa8] sm:$0xff]   ;;  %v490_v28 = vsel %vm488_vm1, %v489_v24, 0  ;;  %vm721_vm4 = vcmask 1041408   ;;  %v722_v36 = vsel %vm720_vm3, 4294967295, %v1212_v23 }
   0x3   :  { %v1143_v3 = vld [vmem:[%s1570_s1 + $0x38] sm:$0xff]   ;;  %364 = vmatpush1.bf16.msra.mxu1 %v1142_v2  ;;  %v1146_v6 = vld [vmem:[%s1570_s1 + $0x30] sm:$0xff]   ;;  %v1149_v9 = vld [vmem:[%s1570_s1 + $0x28] sm:$0xff]   ;;  %v723_v38 = vsel %vm721_vm4, %v722_v36, 0  ;;  %vm480_vm5 = vcmask 220160   ;;  %vm713_vm6 = vcmask 23552  }
   0x4   :  { %1061 = vmatpush3.bf16.msra.mxu0 %v1143_v3  ;;  %365 = vmatprep.subr.bf16.mxu1 %v1211_v0  ;;  %v1150_v10 = vld [vmem:[%s1570_s1 + $0x60] sm:$0xff]   ;;  %v1153_v13 = vld [vmem:[%s1570_s1 + $0x58] sm:$0xff]   ;;  %v1156_v16 = vld [vmem:[%s1570_s1 + $0x50] sm:$0xff]   ;;  %vm615_vm7 = vcmask 130048   ;;  %vm424_vm9 = vcmask 785408   ;;  %vm683_vm14 = vcmask 261120  }
   0x5   :  { %1062 = vmatprep.subr.bf16.mxu0 %v1144_v4  ;;  %v1151_v11 = vld [vmem:[%s1570_s1 + $0xa0] sm:$0xff]   ;;  %v1154_v14 = vld [vmem:[%s1570_s1 + $0x98] sm:$0xff]   ;;  %v1157_v17 = vld [vmem:[%s1570_s1 + $0x90] sm:$0xff]  }
   0x6   :  { %v1152_v12 = vld [vmem:[%s1570_s1 + $0x20] sm:$0xff]   ;;  %v1155_v15 = vld [vmem:[%s1570_s1 + $0x18] sm:$0xff]   ;;  %v1158_v18 = vld [vmem:[%s1570_s1 + $0x10] sm:$0xff]  }
   0x7   :  { %366 = vmatpush1.bf16.msra.mxu1 %v1145_v5  ;;  %v1159_v19 = vld [vmem:[%s1570_s1 + $0x48] sm:$0xff]   ;;  %v1162_v22 = vld [vmem:[%s1570_s1 + $0x40] sm:$0xff]   ;;  %v1168_v32 = vld [vmem:[%s1570_s1 + $0xd0] sm:$0xff]  }
   0x8   :  { %1063 = vmatpush3.bf16.msra.mxu0 %v1146_v6  ;;  %367 = vmatprep.subr.bf16.mxu1 %v1211_v0  ;;  %v1160_v20 = vld [vmem:[%s1570_s1 + $0x88] sm:$0xff]   ;;  %v1167_v25 = vld [vmem:[%s1571_s0 + $0x4] ss:$16 sps:$4 sm:$0xff]   ;;  %v1165_v30 = vld [vmem:[%s1571_s0] ss:$16 sps:$4 sm:$0xff]  }
   0x9   :  { %1064 = vmatprep.subr.bf16.mxu0 %v1147_v7  ;;  %v1161_v21 = vld [vmem:[%s1570_s1 + $0x8] sm:$0xff]   ;;  %v1163_v26 = vld [vmem:[%s1570_s1 + $0x80] sm:$0xff]   ;;  %346 = vmatprep.mubr.bf16.mxu0 %v1167_v25  ;;  %v1179_v45 = vld [vmem:[%s1573_s3 + $0x38] sm:$0xff]  }
   0xa   :  { %v1164_v27 = vld [vmem:[%s1570_s1] sm:$0xff]   ;;  %v1170_v29 = vld [vmem:[%s1572_s5 + $0x8] sm:$0x3f]   ;;  %v1182_v48 = vld [vmem:[%s1573_s3 + $0x30] sm:$0xff]  }
   0xb   :  { %368 = vmatpush1.bf16.msra.mxu1 %v1148_v8  ;;  %v492_v31 = vand.u32 %v1170_v29, %v490_v28  ;;  %v1177_v33 = vld [vmem:[%s1571_s0 + $0xc] ss:$16 sps:$4 sm:$0xff]   ;;  %v1171_v34 = vld [vmem:[%s1571_s0 + $0x24] ss:$16 sps:$4 sm:$0xff]   ;;  %v1173_v39 = vld [vmem:[%s1571_s0 + $0x20] ss:$16 sps:$4 sm:$0xff]  }
   0xc   :  { %1065 = vmatpush3.bf16.msra.mxu0 %v1149_v9  ;;  %369 = vmatprep.subr.bf16.mxu1 %v1211_v0  ;;  %v1178_v35 = vld [vmem:[%s1572_s5] sm:$0xff]   ;;  %v1169_v37 = vld [vmem:[%s1570_s1 + $0xc8] sm:$0xff]   ;;  %v1188_v50 = vld [vmem:[%s1577_s7 + $0x10] sm:$0xff]  }
   0xd   :  { %1066 = vmatprep.subr.bf16.mxu0 %v1150_v10  ;;  %1019 = vmatprep.mubr.msk.bf16.mxu1 %vm307_vm2, %v1177_v33  ;;  %v702_v40 = vld [vmem:[%s1575_s9] sm:$0x3]  ;;  %v1175_v44 = vld [vmem:[%s1571_s0 + $0x8] ss:$16 sps:$4 sm:$0xff]   ;;  %v1183_v46 = vld [vmem:[%s1571_s0 + $0x2c] ss:$16 sps:$4 sm:$0xff]  }
   0xe   :  { %v1174_v41 = vld [vmem:[%s1570_s1 + $0xc0] sm:$0xff]   ;;  %v725_v42 = vand.u32 %v723_v38, %v702_v40  ;;  %v1181_v47 = vld [vmem:[%s1574_s4 + $0x8] sm:$0xff]   ;;  %v1192_v58 = vld [vmem:[%s1573_s3 + $0x18] sm:$0xff]  }
   0xf   :  { %370 = vmatpush1.bf16.msra.mxu1 %v1151_v11  ;;  %v1180_v43 = vld [vmem:[%s1574_s4] sm:$0xff]   ;;  %v1185_v51 = vld [vmem:[%s1571_s0 + $0x28] ss:$16 sps:$4 sm:$0xff]   ;;  %v1194_v60 = vld [vmem:[%s1573_s3 + $0x10] sm:$0xff]  }
  0x10   :  { %1067 = vmatpush3.bf16.msra.mxu0 %v1152_v12  ;;  %371 = vmatprep.subr.bf16.mxu1 %v1211_v0  ;;  %v1187_v49 = vld [vmem:[%s1576_s8] sm:$0xff]   ;;  %v1186_v52 = vld [vmem:[%s1573_s3 + $0x28] sm:$0xff]   ;;  %v1197_v61 = vld [vmem:[%s1579_s11 + $0x10] sm:$0xff]  }
  0x11   :  { %1068 = vmatprep.subr.bf16.mxu0 %v1153_v13  ;;  %v1189_v53 = vld [vmem:[%s1573_s3 + $0x20] sm:$0xff]   ;;  %v1190_v54 = vld [vmem:[%s1576_s8 + $0x8] sm:$0xff]   ;;  %v1208_v8 = vld [vmem:[%s1580_s2 + $0x14] ss:$8 sps:$4 sm:$0xff]  }
  0x12   :  { %v1191_v55 = vld [vmem:[%s1577_s7 + $0x8] sm:$0xff]   ;;  %v1195_v57 = vld [vmem:[%s1578_s6] sm:$0xff]  }
  0x13   :  { %372 = vmatpush1.bf16.msra.mxu1 %v1154_v14  ;;  %v1205_v56 = vld [vmem:[%s1580_s2 + $0x4] ss:$8 sps:$4 sm:$0xff]   ;;  %v1203_v6 = vld [vmem:[%s1580_s2] ss:$8 sps:$4 sm:$0xff]  }
  0x14   :  { %1069 = vmatpush3.bf16.msra.mxu0 %v1155_v15  ;;  %373 = vmatprep.subr.bf16.mxu1 %v1211_v0  ;;  %v1193_v59 = vld [vmem:[%s1577_s7] sm:$0xff]   ;;  %v1196_v62 = vld [vmem:[%s1578_s6 + $0x8] sm:$0xff]  }
  0x15   :  { %1070 = vmatprep.subr.bf16.mxu0 %v1156_v16  ;;  %v1198_v63 = vld [vmem:[%s1573_s3 + $0x8] sm:$0xff]   ;;  %v1206_v2 = vld [vmem:[%s1581_s10] sm:$0xff]  }
  0x16   :  { %v1199_v1 = vld [vmem:[%s1579_s11 + $0x8] sm:$0xff]   ;;  %v1200_v3 = vld [vmem:[%s1573_s3] sm:$0xff]  }
  0x17   :  { %374 = vmatpush1.bf16.msra.mxu1 %v1157_v17  ;;  %v1201_v4 = vld [vmem:[%s1579_s11] sm:$0xff]   ;;  %v1207_v7 = vld [vmem:[%s1581_s10 + $0x8] sm:$0xff]  }
  0x18   :  { %1071 = vmatpush3.bf16.msra.mxu0 %v1158_v18  ;;  %375 = vmatprep.subr.bf16.mxu1 %v1211_v0  ;;  %v1202_v5 = vld [vmem:[%s1573_s3 + $0x40] sm:$0xff]  }
  0x19   :  { %1072 = vmatprep.subr.bf16.mxu0 %v1159_v19 }
  0x1b   :  { %376 = vmatpush1.bf16.msra.mxu1 %v1160_v20 }
  0x1c   :  { %1073 = vmatpush3.bf16.msra.mxu0 %v1161_v21  ;;  %377 = vmatprep.subr.bf16.mxu1 %v1211_v0 }
  0x1d   :  { %1074 = vmatprep.subr.bf16.mxu0 %v1162_v22 }
  0x1f   :  { %378 = vmatpush1.bf16.msra.mxu1 %v1163_v26 }
  0x20   :  { %1075 = vmatpush3.bf16.msra.mxu0 %v1164_v27  ;;  %389 = vmatprep.subr.bf16.mxu1 %v1211_v0 }
  0x21   :  { %1105 = vmatprep.subr.bf16.mxu0 %v492_v31 }
  0x23   :  { %347 = vmatmul.mubr.bf16.vlgmr.msra.gmra.mxu0 %v1165_v30  ;;  %390 = vmatpush2.bf16.msra.mxu1 %v1168_v32 }
  0x24   :  { %391 = vmatprep.subr.bf16.mxu1 %v1211_v0  ;;  %1106 = vmatpush3.bf16.msra.mxu0 %v492_v31 }
  0x25   :  { %354 = vmatprep.mubr.bf16.mxu0 %v1171_v34  ;;  %1107 = vmatprep.subr.bf16.mxu0 %v1178_v35 }
  0x27   :  { %392 = vmatpush2.bf16.msra.mxu1 %v1169_v37 }
  0x28   :  { %393 = vmatprep.subr.bf16.mxu1 %v1211_v0  ;;  %1108 = vmatpush3.bf16.msra.mxu0 %v1178_v35 }
  0x29   :  { %1113 = vmatprep.subr.bf16.mxu0 %v725_v42 }
  0x2b   :  { %355 = vmatmul.mubr.bf16.gmra.mxu0 %v1173_v39  ;;  %394 = vmatpush2.bf16.msra.mxu1 %v1174_v41 }
  0x2c   :  { %622 = vmatprep.subr.bf16.mxu1 %v1211_v0  ;;  %1109 = vmatprep.mubr.msk.bf16.mxu0 %vm480_vm5, %v1180_v43 }
  0x2e   :  { %396 = vmatmul.mubr.bf16.vlgmr.msra.gmra.mxu1 %v1175_v44 }
  0x2f   :  { %623 = vmatpush1.bf16.msra.mxu1 %v1179_v45  ;;  %1020 = vmatprep.mubr.msk.bf16.mxu1 %vm307_vm2, %v1183_v46 }
  0x30   :  { %624 = vmatprep.subr.bf16.mxu1 %v1211_v0 }
  0x33   :  { %1110 = vmatmul.mubr.msk.bf16.vlgmr.msra.gmra.mxu0 %vm480_vm5, %v1181_v47  ;;  %625 = vmatpush1.bf16.msra.mxu1 %v1182_v48 }
  0x34   :  { %626 = vmatprep.subr.bf16.mxu1 %v1211_v0  ;;  %1114 = vmatpush3.bf16.msra.mxu0 %v725_v42 }
  0x35   :  { %1115 = vmatprep.mubr.msk.bf16.mxu0 %vm713_vm6, %v1187_v49  ;;  %1119 = vmatprep.subr.bf16.mxu0 %v1188_v50 }
  0x36   :  { %404 = vmatmul.mubr.bf16.gmra.mxu1 %v1185_v51 }
  0x37   :  { %627 = vmatpush1.bf16.msra.mxu1 %v1186_v52  ;;  %1040 = vmatprep.mubr.msk.bf16.mxu1 %vm615_vm7, %v1205_v56 }
  0x38   :  { %628 = vmatprep.subr.bf16.mxu1 %v1211_v0 }
  0x3b   :  { %629 = vmatpush1.bf16.msra.mxu1 %v1189_v53  ;;  %1116 = vmatmul.mubr.msk.bf16.vlgmr.msra.gmra.mxu0 %vm713_vm6, %v1190_v54 }
  0x3c   :  { %1120 = vmatpush3.bf16.msra.mxu0 %v1188_v50  ;;  %630 = vmatprep.subr.bf16.mxu1 %v1211_v0 }
  0x3d   :  { %1121 = vmatprep.subr.bf16.mxu0 %v1191_v55  ;;  %1125 = vmatprep.mubr.msk.bf16.mxu0 %vm307_vm2, %v1195_v57 }
  0x3f   :  { %631 = vmatpush1.bf16.msra.mxu1 %v1192_v58 }
  0x40   :  { %1122 = vmatpush3.bf16.msra.mxu0 %v1191_v55  ;;  %632 = vmatprep.subr.bf16.mxu1 %v1211_v0 }
  0x41   :  { %1123 = vmatprep.subr.bf16.mxu0 %v1193_v59 }
  0x43   :  { %633 = vmatpush1.bf16.msra.mxu1 %v1194_v60 }
  0x44   :  { %1124 = vmatpush3.bf16.msra.mxu0 %v1193_v59  ;;  %634 = vmatprep.subr.bf16.mxu1 %v1211_v0 }
  0x45   :  { %1129 = vmatprep.subr.bf16.mxu0 %v1197_v61 }
  0x47   :  { %1126 = vmatmul.mubr.msk.bf16.vlgmr.msra.gmra.mxu0 %vm307_vm2, %v1196_v62  ;;  %635 = vmatpush1.bf16.msra.mxu1 %v1198_v63 }
  0x48   :  { %1130 = vmatpush3.bf16.msra.mxu0 %v1197_v61  ;;  %636 = vmatprep.subr.bf16.mxu1 %v1211_v0 }
  0x49   :  { %1131 = vmatprep.subr.bf16.mxu0 %v1199_v1  ;;  %1135 = vmatprep.mubr.msk.bf16.mxu0 %vm307_vm2, %v1206_v2 }
  0x4b   :  { %637 = vmatpush1.bf16.msra.mxu1 %v1200_v3 }
  0x4c   :  { %1132 = vmatpush3.bf16.msra.mxu0 %v1199_v1  ;;  %652 = vmatprep.subr.bf16.mxu1 %v1211_v0  ;;  %v1210_v0 = vld [vmem:[%s1580_s2 + $0x10] ss:$8 sps:$4 sm:$0xff]  }
  0x4d   :  { %1133 = vmatprep.subr.bf16.mxu0 %v1201_v4 }
  0x4f   :  { %653 = vmatpush2.bf16.msra.mxu1 %v1202_v5 }
  0x50   :  { %1134 = vmatpush3.bf16.msra.mxu0 %v1201_v4 }
  0x52   :  { %655 = vmatmul.mubr.bf16.vlgmr.msra.gmra.mxu1 %v1203_v6 }
  0x53   :  { %1136 = vmatmul.mubr.msk.bf16.vlgmr.msra.gmra.mxu0 %vm307_vm2, %v1207_v7  ;;  %1041 = vmatprep.mubr.msk.bf16.mxu1 %vm615_vm7, %v1208_v8 }
  0x5a   :  { %663 = vmatmul.mubr.bf16.gmra.mxu1 %v1210_v0 }
  0xe3   :  { %v1076_v9 = vpop.f32.mrf.mxu0 }
  0xe5   :  { %v1077_v10 = vpop.f32.mrf.mxu0 }
  0xe6   :  { %v1078_v14 = vadd.f32 %v1077_v10, %v1076_v9 }
  0xe7   :  { %v1079_v11 = vpop.f32.mrf.mxu0 }
  0xe9   :  { %v1080_v12 = vpop.f32.mrf.mxu0 }
  0xea   :  { %v1081_v20 = vadd.f32 %v1080_v12, %v1079_v11 }
  0xeb   :  { %v1082_v13 = vpop.f32.mrf.mxu0 }
  0xed   :  { %v1083_v15 = vpop.f32.mrf.mxu0 }
  0xee   :  { %v397_v16 = vpop.f32.mrf.mxu1  ;;  %v1084_v28 = vadd.f32 %v1083_v15, %v1082_v13 }
  0xef   :  { %v398_v17 = vadd.f32 %v1078_v14, %v397_v16  ;;  %v1085_v18 = vpop.f32.mrf.mxu0 }
  0xf0   :  { %v399_v19 = vpop.f32.mrf.mxu1 }
  0xf1   :  { %vm412_vm8 = vcmp.ge.f32.partialorder %v398_v17, 0.0  ;;  %v416_v21 = vmul.f32 0.1, %v398_v17  ;;  %v1086_v22 = vpop.f32.mrf.mxu0 }
  0xf2   :  { %v400_v23 = vpop.f32.mrf.mxu1  ;;  %v1087_v36 = vadd.f32 %v1086_v22, %v1085_v18 }
  0xf3   :  { %v420_v24 = vsel %vm412_vm8, %v398_v17, %v416_v21  ;;  %v401_v25 = vadd.f32 %v1081_v20, %v400_v23  ;;  %v1516_v26 = vpop.f32.mrf.mxu0 }
  0xf4   :  { %425 = vst.msk [vmem:[%s1582_s12] sm:$0xff] %vm424_vm9, %v420_v24  ;;  %v402_v27 = vpop.f32.mrf.mxu1 }
  0xf5   :  { %vm413_vm10 = vcmp.ge.f32.partialorder %v401_v25, 0.0  ;;  %v417_v29 = vmul.f32 0.1, %v401_v25  ;;  %v528_v30 = vpop.f32.mrf.mxu0 }
  0xf6   :  { %v405_v31 = vpop.f32.mrf.mxu1 }
  0xf7   :  { %v421_v32 = vsel %vm413_vm10, %v401_v25, %v417_v29  ;;  %v406_v33 = vadd.f32 %v1084_v28, %v405_v31  ;;  %v1522_v34 = vpop.f32.mrf.mxu0 }
  0xf8   :  { %426 = vst.msk [vmem:[%s1582_s12 + $0x8] sm:$0xff] %vm424_vm9, %v421_v32  ;;  %v407_v35 = vpop.f32.mrf.mxu1 }
  0xf9   :  { %vm414_vm11 = vcmp.ge.f32.partialorder %v406_v33, 0.0  ;;  %v418_v37 = vmul.f32 0.1, %v406_v33  ;;  %v531_v38 = vpop.f32.mrf.mxu0 }
  0xfa   :  { %v408_v39 = vpop.f32.mrf.mxu1 }
  0xfb   :  { %v422_v40 = vsel %vm414_vm11, %v406_v33, %v418_v37  ;;  %v409_v41 = vadd.f32 %v1087_v36, %v408_v39  ;;  %v1117_v42 = vpop.f32.mrf.mxu0 }
  0xfc   :  { %427 = vst.msk [vmem:[%s1582_s12 + $0x10] sm:$0xff] %vm424_vm9, %v422_v40  ;;  %v410_v43 = vpop.f32.mrf.mxu1 }
  0xfd   :  { %vm415_vm12 = vcmp.ge.f32.partialorder %v409_v41, 0.0  ;;  %v419_v44 = vmul.f32 0.1, %v409_v41  ;;  %v761_v45 = vpop.f32.mrf.mxu0 }
  0xff   :  { %v423_v46 = vsel %vm415_vm12, %v409_v41, %v419_v44  ;;  %v1118_v47 = vpop.f32.mrf.mxu0 }
 0x100   :  { %428 = vst.msk [vmem:[%s1582_s12 + $0x18] sm:$0xff] %vm424_vm9, %v423_v46 }
 0x101   :  { %v764_v48 = vpop.f32.mrf.mxu0 }
 0x107   :  { %v1127_v49 = vpop.f32.mrf.mxu0 }
 0x108   :  { %v853_v53 = vadd.f32 %v1127_v49, %v1117_v42 }
 0x109   :  { %v844_v50 = vpop.f32.mrf.mxu0 }
 0x10a   :  { %v845_v57 = vadd.f32 %v844_v50, %v761_v45 }
 0x10b   :  { %v1128_v51 = vpop.f32.mrf.mxu0 }
 0x10c   :  { %v856_v62 = vadd.f32 %v1128_v51, %v1118_v47 }
 0x10d   :  { %v847_v52 = vpop.f32.mrf.mxu0 }
 0x10e   :  { %v848_v3 = vadd.f32 %v847_v52, %v764_v48 }
 0x112   :  { %v656_v54 = vpop.f32.mrf.mxu1 }
 0x113   :  { %v657_v55 = vadd.f32 %v656_v54, %v528_v30  ;;  %v1137_v56 = vpop.f32.mrf.mxu0 }
 0x114   :  { %v954_v58 = vadd.f32 %v1137_v56, %v853_v53  ;;  %v658_v59 = vpop.f32.mrf.mxu1 }
 0x115   :  { %vm671_vm13 = vcmp.ge.f32.partialorder %v657_v55, 0.0  ;;  %v675_v60 = vmul.f32 0.1, %v657_v55  ;;  %v937_v61 = vpop.f32.mrf.mxu0 }
 0x116   :  { %vm958_vm15 = vcmp.ge.f32.partialorder %v954_v58, 0.0  ;;  %v962_v63 = vmul.f32 0.1, %v954_v58  ;;  %v952_v1 = vadd.f32 %v937_v61, %v845_v57  ;;  %v659_v2 = vpop.f32.mrf.mxu1 }
 0x117   :  { %v679_v4 = vsel %vm671_vm13, %v657_v55, %v675_v60  ;;  %v660_v5 = vadd.f32 %v659_v2, %v531_v38  ;;  %v1138_v6 = vpop.f32.mrf.mxu0 }
 0x118   :  { %684 = vst.msk [vmem:[%s1583_s13] sm:$0xff] %vm683_vm14, %v679_v4  ;;  %v966_v7 = vsel %vm958_vm15, %v954_v58, %v962_v63  ;;  %vm956_vm0 = vcmp.ge.f32.partialorder %v952_v1, 0.0  ;;  %v960_v8 = vmul.f32 0.1, %v952_v1  ;;  %v955_v0 = vadd.f32 %v1138_v6, %v856_v62  ;;  %v661_v9 = vpop.f32.mrf.mxu1 }
 0x119   :  { %970 = vst.msk [vmem:[%s1584_s14 + $0x10] sm:$0xff] %vm424_vm9, %v966_v7  ;;  %vm672_vm1 = vcmp.ge.f32.partialorder %v660_v5, 0.0  ;;  %v676_v10 = vmul.f32 0.1, %v660_v5  ;;  %v940_v11 = vpop.f32.mrf.mxu0 }
 0x11a   :  { %v964_v12 = vsel %vm956_vm0, %v952_v1, %v960_v8  ;;  %vm959_vm2 = vcmp.ge.f32.partialorder %v955_v0, 0.0  ;;  %v963_v13 = vmul.f32 0.1, %v955_v0  ;;  %v953_v14 = vadd.f32 %v940_v11, %v848_v3  ;;  %v664_v15 = vpop.f32.mrf.mxu1 }
 0x11b   :  { %968 = vst.msk [vmem:[%s1584_s14] sm:$0xff] %vm424_vm9, %v964_v12  ;;  %v680_v16 = vsel %vm672_vm1, %v660_v5, %v676_v10  ;;  %v665_v17 = vadd.f32 %v1516_v26, %v664_v15 }
 0x11c   :  { %685 = vst.msk [vmem:[%s1583_s13 + $0x8] sm:$0xff] %vm683_vm14, %v680_v16  ;;  %v967_v18 = vsel %vm959_vm2, %v955_v0, %v963_v13  ;;  %vm957_vm3 = vcmp.ge.f32.partialorder %v953_v14, 0.0  ;;  %v961_v19 = vmul.f32 0.1, %v953_v14  ;;  %v666_v20 = vpop.f32.mrf.mxu1 }
 0x11d   :  { %971 = vst.msk [vmem:[%s1584_s14 + $0x18] sm:$0xff] %vm424_vm9, %v967_v18  ;;  %vm673_vm4 = vcmp.ge.f32.partialorder %v665_v17, 0.0  ;;  %v677_v21 = vmul.f32 0.1, %v665_v17 }
 0x11e   :  { %v965_v22 = vsel %vm957_vm3, %v953_v14, %v961_v19  ;;  %v667_v23 = vpop.f32.mrf.mxu1 }
 0x11f   :  { %969 = vst.msk [vmem:[%s1584_s14 + $0x8] sm:$0xff] %vm424_vm9, %v965_v22  ;;  %v681_v24 = vsel %vm673_vm4, %v665_v17, %v677_v21  ;;  %v668_v25 = vadd.f32 %v1522_v34, %v667_v23 }
 0x120   :  { %686 = vst.msk [vmem:[%s1583_s13 + $0x10] sm:$0xff] %vm683_vm14, %v681_v24  ;;  %v669_v26 = vpop.f32.mrf.mxu1 }
 0x121   :  { %vm674_vm5 = vcmp.ge.f32.partialorder %v668_v25, 0.0  ;;  %v678_v27 = vmul.f32 0.1, %v668_v25 }
 0x123   :  { %v682_v28 = vsel %vm674_vm5, %v668_v25, %v678_v27 }
 0x124   :  { %687 = vst.msk [vmem:[%s1583_s13 + $0x18] sm:$0xff] %vm683_vm14, %v682_v28 }

// kernel: kbnet_encoder_forward.15
= control target key start
LH: loop header
LB: loop body
LE: loop exit
PB: predicated region body
PF: predicated region fallthrough
CT: control target
= control target key end

     0   :  { %vm957_vm0 = vcmask 1044480   ;;  %vm958_vm1 = vcmask 1045504   ;;  %vm722_vm2 = vcmask 785408   ;;  %vm2013_vm3 = vmmov 0   ;;  %s2623_s0 = inlined_call_operand.vmem [shape: bf16[8,864], index: 0, kind: input, shape index: {}]   ;;  %s2624_s1 = inlined_call_operand.vmem [shape: bf16[864,192], index: 1, kind: input, shape index: {}]   ;;  %s2625_s2 = inlined_call_operand.vmem [shape: bf16[8,288], index: 2, kind: input, shape index: {}]   ;;  %s2626_s3 = inlined_call_operand.vmem [shape: bf16[288,64], index: 3, kind: input, shape index: {}]   ;;  %s2627_s4 = inlined_call_operand.vmem [shape: bf16[8,27], index: 4, kind: input, shape index: {}]   ;;  %s2628_s5 = inlined_call_operand.vmem [shape: bf16[27,64], index: 5, kind: input, shape index: {}]   ;;  %s2629_s6 = inlined_call_operand.vmem [shape: bf16[8,96], index: 6, kind: input, shape index: {}]   ;;  %s2630_s7 = inlined_call_operand.vmem [shape: bf16[96,192], index: 7, kind: input, shape index: {}]   ;;  %s2631_s8 = inlined_call_operand.vmem [shape: bf16[8,3], index: 8, kind: input, shape index: {}]   ;;  %s2632_s9 = inlined_call_operand.vmem [shape: bf16[3,192], index: 9, kind: input, shape index: {}]   ;;  %s2633_s10 = inlined_call_operand.vmem [shape: bf16[8,96], index: 10, kind: input, shape index: {}]   ;;  %s2634_s11 = inlined_call_operand.vmem [shape: bf16[96,192], index: 11, kind: input, shape index: {}]   ;;  %s2635_s12 = inlined_call_operand.hbm [shape: f32[8,192], index: 12, kind: output, shape index: {0}]   ;;  %s2636_s13 = inlined_call_operand.vmem [shape: f32[8,64], index: 13, kind: output, shape index: {1}]   ;;  %s2637_s14 = inlined_call_operand.vmem [shape: f32[8,192], index: 14, kind: output, shape index: {2}]  }
   0x1   :  { %v1760_v0 = vld [vmem:[%s2624_s1 + $0x74] ss:$8 sps:$4 sm:$0xff]   ;;  %v1764_v2 = vld [vmem:[%s2624_s1 + $0x70] ss:$8 sps:$4 sm:$0xff]   ;;  %v1766_v4 = vld [vmem:[%s2624_s1 + $0x64] ss:$8 sps:$4 sm:$0xff]  }
   0x2   :  { %v1762_v1 = vld [vmem:[%s2624_s1 + $0x174] ss:$8 sps:$4 sm:$0xff]   ;;  %726 = vmatprep.subr.bf16.mxu0 %v1760_v0  ;;  %v1765_v3 = vld [vmem:[%s2624_s1 + $0x170] ss:$8 sps:$4 sm:$0xff]   ;;  %v1768_v5 = vld [vmem:[%s2624_s1 + $0x164] ss:$8 sps:$4 sm:$0xff]  }
   0x3   :  { %767 = vmatprep.subr.bf16.mxu1 %v1762_v1  ;;  %727 = vmatpush1.bf16.msra.mxu0 %v1764_v2  ;;  %v1770_v6 = vld [vmem:[%s2624_s1 + $0x60] ss:$8 sps:$4 sm:$0xff]   ;;  %v1772_v8 = vld [vmem:[%s2624_s1 + $0x54] ss:$8 sps:$4 sm:$0xff]   ;;  %v1776_v10 = vld [vmem:[%s2624_s1 + $0x50] ss:$8 sps:$4 sm:$0xff]  }
   0x4   :  { %768 = vmatpush1.bf16.msra.mxu1 %v1765_v3  ;;  %728 = vmatprep.subr.bf16.mxu0 %v1766_v4  ;;  %v1771_v7 = vld [vmem:[%s2624_s1 + $0x160] ss:$8 sps:$4 sm:$0xff]   ;;  %v1774_v9 = vld [vmem:[%s2624_s1 + $0x154] ss:$8 sps:$4 sm:$0xff]   ;;  %v1777_v11 = vld [vmem:[%s2624_s1 + $0x150] ss:$8 sps:$4 sm:$0xff]  }
   0x5   :  { %769 = vmatprep.subr.bf16.mxu1 %v1768_v5  ;;  %v1778_v12 = vld [vmem:[%s2624_s1 + $0x44] ss:$8 sps:$4 sm:$0xff]   ;;  %v1782_v14 = vld [vmem:[%s2624_s1 + $0x40] ss:$8 sps:$4 sm:$0xff]   ;;  %v1784_v16 = vld [vmem:[%s2624_s1 + $0x34] ss:$8 sps:$4 sm:$0xff]  }
   0x6   :  { %v1780_v13 = vld [vmem:[%s2624_s1 + $0x144] ss:$8 sps:$4 sm:$0xff]   ;;  %v1783_v15 = vld [vmem:[%s2624_s1 + $0x140] ss:$8 sps:$4 sm:$0xff]   ;;  %v1786_v17 = vld [vmem:[%s2624_s1 + $0x134] ss:$8 sps:$4 sm:$0xff]  }
   0x7   :  { %729 = vmatpush1.bf16.msra.mxu0 %v1770_v6  ;;  %v1788_v18 = vld [vmem:[%s2624_s1 + $0x30] ss:$8 sps:$4 sm:$0xff]   ;;  %v1790_v20 = vld [vmem:[%s2624_s1 + $0x24] ss:$8 sps:$4 sm:$0xff]   ;;  %v1794_v22 = vld [vmem:[%s2624_s1 + $0x20] ss:$8 sps:$4 sm:$0xff]  }
   0x8   :  { %770 = vmatpush1.bf16.msra.mxu1 %v1771_v7  ;;  %730 = vmatprep.subr.bf16.mxu0 %v1772_v8  ;;  %v1789_v19 = vld [vmem:[%s2624_s1 + $0x130] ss:$8 sps:$4 sm:$0xff]   ;;  %v1792_v21 = vld [vmem:[%s2624_s1 + $0x124] ss:$8 sps:$4 sm:$0xff]   ;;  %v1795_v23 = vld [vmem:[%s2624_s1 + $0x120] ss:$8 sps:$4 sm:$0xff]  }
   0x9   :  { %771 = vmatprep.subr.bf16.mxu1 %v1774_v9  ;;  %v1796_v24 = vld [vmem:[%s2624_s1 + $0x14] ss:$8 sps:$4 sm:$0xff]   ;;  %v1800_v26 = vld [vmem:[%s2624_s1 + $0x10] ss:$8 sps:$4 sm:$0xff]   ;;  %v1802_v28 = vld [vmem:[%s2624_s1 + $0x4] ss:$8 sps:$4 sm:$0xff]  }
   0xa   :  { %v1798_v25 = vld [vmem:[%s2624_s1 + $0x114] ss:$8 sps:$4 sm:$0xff]   ;;  %v1801_v27 = vld [vmem:[%s2624_s1 + $0x110] ss:$8 sps:$4 sm:$0xff]   ;;  %v1804_v29 = vld [vmem:[%s2624_s1 + $0x104] ss:$8 sps:$4 sm:$0xff]  }
   0xb   :  { %731 = vmatpush1.bf16.msra.mxu0 %v1776_v10  ;;  %v1806_v30 = vld [vmem:[%s2624_s1] ss:$8 sps:$4 sm:$0xff]   ;;  %v1808_v32 = vld [vmem:[%s2624_s1 + $0xf4] ss:$8 sps:$4 sm:$0xff]   ;;  %v1812_v34 = vld [vmem:[%s2624_s1 + $0xf0] ss:$8 sps:$4 sm:$0xff]  }
   0xc   :  { %772 = vmatpush1.bf16.msra.mxu1 %v1777_v11  ;;  %732 = vmatprep.subr.bf16.mxu0 %v1778_v12  ;;  %v1807_v31 = vld [vmem:[%s2624_s1 + $0x100] ss:$8 sps:$4 sm:$0xff]   ;;  %v1810_v33 = vld [vmem:[%s2624_s1 + $0x1f4] ss:$8 sps:$4 sm:$0xff]   ;;  %v1813_v35 = vld [vmem:[%s2624_s1 + $0x1f0] ss:$8 sps:$4 sm:$0xff]  }
   0xd   :  { %773 = vmatprep.subr.bf16.mxu1 %v1780_v13  ;;  %v1814_v36 = vld [vmem:[%s2624_s1 + $0xe4] ss:$8 sps:$4 sm:$0xff]   ;;  %v1818_v38 = vld [vmem:[%s2624_s1 + $0xe0] ss:$8 sps:$4 sm:$0xff]   ;;  %v1820_v40 = vld [vmem:[%s2624_s1 + $0xd4] ss:$8 sps:$4 sm:$0xff]  }
   0xe   :  { %v1816_v37 = vld [vmem:[%s2624_s1 + $0x1e4] ss:$8 sps:$4 sm:$0xff]   ;;  %v1819_v39 = vld [vmem:[%s2624_s1 + $0x1e0] ss:$8 sps:$4 sm:$0xff]   ;;  %v1822_v41 = vld [vmem:[%s2624_s1 + $0x1d4] ss:$8 sps:$4 sm:$0xff]  }
   0xf   :  { %733 = vmatpush1.bf16.msra.mxu0 %v1782_v14  ;;  %v1824_v42 = vld [vmem:[%s2624_s1 + $0xd0] ss:$8 sps:$4 sm:$0xff]   ;;  %v1826_v44 = vld [vmem:[%s2624_s1 + $0xc4] ss:$8 sps:$4 sm:$0xff]   ;;  %v1830_v49 = vld [vmem:[%s2624_s1 + $0xc0] ss:$8 sps:$4 sm:$0xff]  }
  0x10   :  { %774 = vmatpush1.bf16.msra.mxu1 %v1783_v15  ;;  %734 = vmatprep.subr.bf16.mxu0 %v1784_v16  ;;  %v1825_v43 = vld [vmem:[%s2624_s1 + $0x1d0] ss:$8 sps:$4 sm:$0xff]   ;;  %v1828_v45 = vld [vmem:[%s2624_s1 + $0x1c4] ss:$8 sps:$4 sm:$0xff]   ;;  %v1831_v50 = vld [vmem:[%s2624_s1 + $0x1c0] ss:$8 sps:$4 sm:$0xff]  }
  0x11   :  { %775 = vmatprep.subr.bf16.mxu1 %v1786_v17  ;;  %v46_v46 = vld [vmem:[%s2623_s0] sm:$0xff]  ;;  %v47_v48 = vld [vmem:[%s2623_s0 + $0x8] sm:$0xff]  ;;  %v1832_v52 = vld [vmem:[%s2624_s1 + $0xb4] ss:$8 sps:$4 sm:$0xff]   ;;  %v2010_v16 = vmov 0   ;;  %vm953_vm4 = vcmask 220160  }
  0x12   :  { %v1543_v47 = vcombine.high %v46_v46, %v46_v46  ;;  %v1545_v51 = vcombine.high %v47_v48, %v47_v48  ;;  %v1834_v53 = vld [vmem:[%s2624_s1 + $0x1b4] ss:$8 sps:$4 sm:$0xff]   ;;  %v1836_v54 = vld [vmem:[%s2624_s1 + $0xb0] ss:$8 sps:$4 sm:$0xff]   ;;  %v1838_v56 = vld [vmem:[%s2624_s1 + $0xa4] ss:$8 sps:$4 sm:$0xff]   ;;  %v1542_v6 = vcombine.low %v46_v46, %v46_v46  ;;  %v1544_v7 = vcombine.low %v47_v48, %v47_v48 }
  0x13   :  { %735 = vmatpush1.bf16.msra.mxu0 %v1788_v18  ;;  %v1837_v55 = vld [vmem:[%s2624_s1 + $0x1b0] ss:$8 sps:$4 sm:$0xff]   ;;  %v1840_v57 = vld [vmem:[%s2624_s1 + $0x1a4] ss:$8 sps:$4 sm:$0xff]   ;;  %v1842_v58 = vld [vmem:[%s2624_s1 + $0xa0] ss:$8 sps:$4 sm:$0xff]  }
  0x14   :  { %776 = vmatpush1.bf16.msra.mxu1 %v1789_v19  ;;  %736 = vmatprep.subr.bf16.mxu0 %v1790_v20  ;;  %v1843_v59 = vld [vmem:[%s2624_s1 + $0x1a0] ss:$8 sps:$4 sm:$0xff]   ;;  %v1844_v60 = vld [vmem:[%s2624_s1 + $0x94] ss:$8 sps:$4 sm:$0xff]   ;;  %v1848_v62 = vld [vmem:[%s2624_s1 + $0x90] ss:$8 sps:$4 sm:$0xff]  }
  0x15   :  { %777 = vmatprep.subr.bf16.mxu1 %v1792_v21  ;;  %758 = vmatprep.mubr.bf16.mxu0 %v1543_v47  ;;  %v1846_v61 = vld [vmem:[%s2624_s1 + $0x194] ss:$8 sps:$4 sm:$0xff]   ;;  %v1849_v63 = vld [vmem:[%s2624_s1 + $0x190] ss:$8 sps:$4 sm:$0xff]   ;;  %v1850_v0 = vld [vmem:[%s2624_s1 + $0x84] ss:$8 sps:$4 sm:$0xff]  }
  0x16   :  { %799 = vmatprep.mubr.bf16.mxu1 %v1545_v51  ;;  %v1852_v1 = vld [vmem:[%s2624_s1 + $0x184] ss:$8 sps:$4 sm:$0xff]   ;;  %v1854_v2 = vld [vmem:[%s2624_s1 + $0x80] ss:$8 sps:$4 sm:$0xff]   ;;  %v1862_v4 = vld [vmem:[%s2624_s1 + $0x274] ss:$8 sps:$4 sm:$0xff]  }
  0x17   :  { %737 = vmatpush1.bf16.msra.mxu0 %v1794_v22  ;;  %v1855_v3 = vld [vmem:[%s2624_s1 + $0x180] ss:$8 sps:$4 sm:$0xff]   ;;  %v1865_v5 = vld [vmem:[%s2624_s1 + $0x354] ss:$8 sps:$4 sm:$0xff]   ;;  %v1860_v8 = vld [vmem:[%s2624_s1 + $0x270] ss:$8 sps:$4 sm:$0xff]  }
  0x18   :  { %778 = vmatpush1.bf16.msra.mxu1 %v1795_v23  ;;  %738 = vmatprep.subr.bf16.mxu0 %v1796_v24  ;;  %v1863_v9 = vld [vmem:[%s2624_s1 + $0x350] ss:$8 sps:$4 sm:$0xff]   ;;  %v1868_v10 = vld [vmem:[%s2624_s1 + $0x264] ss:$8 sps:$4 sm:$0xff]   ;;  %v1866_v12 = vld [vmem:[%s2624_s1 + $0x260] ss:$8 sps:$4 sm:$0xff]  }
  0x19   :  { %779 = vmatprep.subr.bf16.mxu1 %v1798_v25  ;;  %v1871_v11 = vld [vmem:[%s2624_s1 + $0x344] ss:$8 sps:$4 sm:$0xff]   ;;  %v1869_v13 = vld [vmem:[%s2624_s1 + $0x340] ss:$8 sps:$4 sm:$0xff]   ;;  %v1874_v14 = vld [vmem:[%s2624_s1 + $0x254] ss:$8 sps:$4 sm:$0xff]  }
  0x1a   :  { %v1877_v15 = vld [vmem:[%s2624_s1 + $0x334] ss:$8 sps:$4 sm:$0xff]   ;;  %v1872_v17 = vld [vmem:[%s2624_s1 + $0x250] ss:$8 sps:$4 sm:$0xff]   ;;  %v1880_v19 = vld [vmem:[%s2624_s1 + $0x244] ss:$8 sps:$4 sm:$0xff]  }
  0x1b   :  { %739 = vmatpush1.bf16.msra.mxu0 %v1800_v26  ;;  %v1875_v18 = vld [vmem:[%s2624_s1 + $0x330] ss:$8 sps:$4 sm:$0xff]   ;;  %v1883_v20 = vld [vmem:[%s2624_s1 + $0x324] ss:$8 sps:$4 sm:$0xff]   ;;  %v1878_v21 = vld [vmem:[%s2624_s1 + $0x240] ss:$8 sps:$4 sm:$0xff]  }
  0x1c   :  { %780 = vmatpush1.bf16.msra.mxu1 %v1801_v27  ;;  %740 = vmatprep.subr.bf16.mxu0 %v1802_v28  ;;  %v1881_v22 = vld [vmem:[%s2624_s1 + $0x320] ss:$8 sps:$4 sm:$0xff]   ;;  %v1886_v23 = vld [vmem:[%s2624_s1 + $0x234] ss:$8 sps:$4 sm:$0xff]   ;;  %v1884_v25 = vld [vmem:[%s2624_s1 + $0x230] ss:$8 sps:$4 sm:$0xff]  }
  0x1d   :  { %781 = vmatprep.subr.bf16.mxu1 %v1804_v29  ;;  %v1889_v24 = vld [vmem:[%s2624_s1 + $0x314] ss:$8 sps:$4 sm:$0xff]   ;;  %v1887_v26 = vld [vmem:[%s2624_s1 + $0x310] ss:$8 sps:$4 sm:$0xff]   ;;  %v1892_v27 = vld [vmem:[%s2624_s1 + $0x224] ss:$8 sps:$4 sm:$0xff]  }
  0x1e   :  { %v1895_v28 = vld [vmem:[%s2624_s1 + $0x304] ss:$8 sps:$4 sm:$0xff]   ;;  %v1890_v29 = vld [vmem:[%s2624_s1 + $0x220] ss:$8 sps:$4 sm:$0xff]   ;;  %v1908_v46 = vld [vmem:[%s2626_s3 + $0x78] sm:$0xff]  }
  0x1f   :  { %741 = vmatpush1.bf16.msra.mxu0 %v1806_v30  ;;  %v2011_v30 = vmov 65535   ;;  %v1905_v47 = vld [vmem:[%s2624_s1 + $0x2f0] ss:$8 sps:$4 sm:$0xff]   ;;  %v937_v48 = vld [vmem:[%s2627_s4] sm:$0xf] }
  0x20   :  { %782 = vmatpush1.bf16.msra.mxu1 %v1807_v31  ;;  %742 = vmatprep.subr.bf16.mxu0 %v1808_v32  ;;  %v959_v31 = vsel %vm957_vm0, 4294967295, %v2011_v30  ;;  %v1893_v32 = vld [vmem:[%s2624_s1 + $0x300] ss:$8 sps:$4 sm:$0xff]   ;;  %v1912_v51 = vld [vmem:[%s2624_s1 + $0x2e4] ss:$8 sps:$4 sm:$0xff]  }
  0x21   :  { %783 = vmatprep.subr.bf16.mxu1 %v1810_v33  ;;  %v1900_v33 = vld [vmem:[%s2628_s5 + $0x8] sm:$0x3f]  }
  0x23   :  { %743 = vmatpush2.bf16.msra.mxu0 %v1812_v34  ;;  %v1898_v34 = vld [vmem:[%s2624_s1 + $0x214] ss:$8 sps:$4 sm:$0xff]  }
  0x24   :  { %784 = vmatpush2.bf16.msra.mxu1 %v1813_v35  ;;  %744 = vmatprep.subr.bf16.mxu0 %v1814_v36  ;;  %v960_v35 = vsel %vm958_vm1, %v959_v31, 0  ;;  %v1899_v36 = vld [vmem:[%s2623_s0 + $0x18] ss:$0 sps:$4 sm:$0xff]  }
  0x25   :  { %785 = vmatprep.subr.bf16.mxu1 %v1816_v37  ;;  %v1896_v37 = vld [vmem:[%s2624_s1 + $0x210] ss:$8 sps:$4 sm:$0xff]  }
  0x27   :  { %745 = vmatpush2.bf16.msra.mxu0 %v1818_v38  ;;  %v962_v38 = vand.u32 %v1900_v33, %v960_v35 }
  0x28   :  { %786 = vmatpush2.bf16.msra.mxu1 %v1819_v39  ;;  %746 = vmatprep.subr.bf16.mxu0 %v1820_v40  ;;  %v2012_v39 = vmov 0.0   ;;  %v1903_v40 = vld [vmem:[%s2624_s1 + $0x204] ss:$8 sps:$4 sm:$0xff]  }
  0x29   :  { %787 = vmatprep.subr.bf16.mxu1 %v1822_v41  ;;  %v1901_v41 = vld [vmem:[%s2624_s1 + $0x200] ss:$8 sps:$4 sm:$0xff]  }
  0x2b   :  { %747 = vmatpush2.bf16.msra.mxu0 %v1824_v42  ;;  %v2385_v42 = vld [vmem:[%s2623_s0 + $0x10] sm:$0xff] }
  0x2c   :  { %788 = vmatpush2.bf16.msra.mxu1 %v1825_v43  ;;  %748 = vmatprep.subr.bf16.mxu0 %v1826_v44  ;;  %v1904_v43 = vld [vmem:[%s2628_s5] sm:$0xff]   ;;  %v1547_v44 = vcombine.high %v2385_v42, %v2385_v42 }
  0x2d   :  { %789 = vmatprep.subr.bf16.mxu1 %v1828_v45  ;;  %v1907_v45 = vld [vmem:[%s2624_s1 + $0x2f4] ss:$8 sps:$4 sm:$0xff]  }
  0x2f   :  { %749 = vmatpush2.bf16.msra.mxu0 %v1830_v49  ;;  %v2410_v49 = vld [vmem:[%s2625_s2] sm:$0xff] }
  0x30   :  { %790 = vmatpush2.bf16.msra.mxu1 %v1831_v50  ;;  %750 = vmatprep.subr.bf16.mxu0 %v1832_v52  ;;  %v1909_v50 = vld [vmem:[%s2626_s3 + $0x38] sm:$0xff]   ;;  %v1913_v52 = vld [vmem:[%s2626_s3 + $0x70] sm:$0xff]  }
  0x31   :  { %791 = vmatprep.subr.bf16.mxu1 %v1834_v53  ;;  %v1662_v53 = vcombine.high %v2410_v49, %v2410_v49 }
  0x33   :  { %751 = vmatpush2.bf16.msra.mxu0 %v1836_v54  ;;  %v1910_v54 = vld [vmem:[%s2624_s1 + $0x2e0] ss:$8 sps:$4 sm:$0xff]  }
  0x34   :  { %792 = vmatpush2.bf16.msra.mxu1 %v1837_v55  ;;  %752 = vmatprep.subr.bf16.mxu0 %v1838_v56  ;;  %v1914_v55 = vld [vmem:[%s2626_s3 + $0x30] sm:$0xff]  }
  0x35   :  { %793 = vmatprep.subr.bf16.mxu1 %v1840_v57  ;;  %v1917_v56 = vld [vmem:[%s2624_s1 + $0x2d4] ss:$8 sps:$4 sm:$0xff]   ;;  %v1918_v57 = vld [vmem:[%s2626_s3 + $0x68] sm:$0xff]  }
  0x37   :  { %753 = vmatpush2.bf16.msra.mxu0 %v1842_v58  ;;  %v1915_v58 = vld [vmem:[%s2624_s1 + $0x2d0] ss:$8 sps:$4 sm:$0xff]  }
  0x38   :  { %794 = vmatpush2.bf16.msra.mxu1 %v1843_v59  ;;  %754 = vmatprep.subr.bf16.mxu0 %v1844_v60  ;;  %v1919_v59 = vld [vmem:[%s2626_s3 + $0x28] sm:$0xff]  }
  0x39   :  { %795 = vmatprep.subr.bf16.mxu1 %v1846_v61  ;;  %v1922_v60 = vld [vmem:[%s2624_s1 + $0x2c4] ss:$8 sps:$4 sm:$0xff]  }
  0x3a   :  { %v1923_v61 = vld [vmem:[%s2626_s3 + $0x60] sm:$0xff]  }
  0x3b   :  { %755 = vmatpush2.bf16.msra.mxu0 %v1848_v62  ;;  %v1920_v62 = vld [vmem:[%s2624_s1 + $0x2c0] ss:$8 sps:$4 sm:$0xff]  }
  0x3c   :  { %796 = vmatpush2.bf16.msra.mxu1 %v1849_v63  ;;  %756 = vmatprep.subr.bf16.mxu0 %v1850_v0  ;;  %v1924_v63 = vld [vmem:[%s2626_s3 + $0x20] sm:$0xff]   ;;  %v1927_v0 = vld [vmem:[%s2624_s1 + $0x2b4] ss:$8 sps:$4 sm:$0xff]  }
  0x3d   :  { %797 = vmatprep.subr.bf16.mxu1 %v1852_v1  ;;  %v1928_v1 = vld [vmem:[%s2626_s3 + $0x58] sm:$0xff]  }
  0x3f   :  { %757 = vmatpush2.bf16.msra.mxu0 %v1854_v2  ;;  %v1925_v2 = vld [vmem:[%s2624_s1 + $0x2b0] ss:$8 sps:$4 sm:$0xff]  }
  0x40   :  { %798 = vmatpush2.bf16.msra.mxu1 %v1855_v3  ;;  %808 = vmatprep.subr.bf16.mxu0 %v1862_v4  ;;  %v1929_v3 = vld [vmem:[%s2626_s3 + $0x18] sm:$0xff]  }
  0x41   :  { %853 = vmatprep.subr.bf16.mxu1 %v1865_v5 }
  0x42   :  { %759 = vmatmul.mubr.bf16.vlgmr.msra.gmra.mxu0 %v1542_v6 }
  0x43   :  { %800 = vmatmul.mubr.bf16.vlgmr.msra.gmra.mxu1 %v1544_v7  ;;  %809 = vmatpush1.bf16.msra.mxu0 %v1860_v8 }
  0x44   :  { %854 = vmatpush1.bf16.msra.mxu1 %v1863_v9  ;;  %810 = vmatprep.subr.bf16.mxu0 %v1868_v10 }
  0x45   :  { %855 = vmatprep.subr.bf16.mxu1 %v1871_v11  ;;  %881 = vmatprep.mubr.bf16.mxu1 %v2010_v16 }
  0x46   :  { %840 = vmatprep.mubr.bf16.mxu0 %v1547_v44 }
  0x47   :  { %811 = vmatpush1.bf16.msra.mxu0 %v1866_v12 }
  0x48   :  { %856 = vmatpush1.bf16.msra.mxu1 %v1869_v13  ;;  %812 = vmatprep.subr.bf16.mxu0 %v1874_v14 }
  0x49   :  { %857 = vmatprep.subr.bf16.mxu1 %v1877_v15 }
  0x4b   :  { %813 = vmatpush1.bf16.msra.mxu0 %v1872_v17 }
  0x4c   :  { %858 = vmatpush1.bf16.msra.mxu1 %v1875_v18  ;;  %814 = vmatprep.subr.bf16.mxu0 %v1880_v19 }
  0x4d   :  { %859 = vmatprep.subr.bf16.mxu1 %v1883_v20 }
  0x4f   :  { %815 = vmatpush1.bf16.msra.mxu0 %v1878_v21 }
  0x50   :  { %860 = vmatpush1.bf16.msra.mxu1 %v1881_v22  ;;  %816 = vmatprep.subr.bf16.mxu0 %v1886_v23 }
  0x51   :  { %861 = vmatprep.subr.bf16.mxu1 %v1889_v24 }
  0x53   :  { %817 = vmatpush1.bf16.msra.mxu0 %v1884_v25 }
  0x54   :  { %862 = vmatpush1.bf16.msra.mxu1 %v1887_v26  ;;  %818 = vmatprep.subr.bf16.mxu0 %v1892_v27 }
  0x55   :  { %863 = vmatprep.subr.bf16.mxu1 %v1895_v28 }
  0x57   :  { %819 = vmatpush1.bf16.msra.mxu0 %v1890_v29 }
  0x58   :  { %864 = vmatpush1.bf16.msra.mxu1 %v1893_v32  ;;  %820 = vmatprep.subr.bf16.mxu0 %v1898_v34 }
  0x59   :  { %1739 = vmatprep.subr.bf16.mxu1 %v2012_v39 }
  0x5b   :  { %1657 = vmatmul.mubr.msk.bf16.vlgmr.msra.gmra.mxu1 %vm722_vm2, %v1899_v36  ;;  %821 = vmatpush1.bf16.msra.mxu0 %v1896_v37 }
  0x5c   :  { %1740 = vmatpush3.bf16.msra.mxu1 %v962_v38  ;;  %822 = vmatprep.subr.bf16.mxu0 %v1903_v40 }
  0x5d   :  { %1741 = vmatprep.subr.bf16.mxu1 %v2012_v39  ;;  %1743 = vmatprep.mubr.msk.bf16.mxu1 %vm2013_vm3, %v2012_v39 }
  0x5f   :  { %823 = vmatpush1.bf16.msra.mxu0 %v1901_v41 }
  0x60   :  { %1742 = vmatpush3.bf16.msra.mxu1 %v1904_v43  ;;  %824 = vmatprep.subr.bf16.mxu0 %v1907_v45 }
  0x61   :  { %1714 = vmatprep.subr.bf16.mxu1 %v1908_v46 }
  0x63   :  { %1744 = vmatmul.mubr.msk.bf16.vlgmr.msra.gmra.mxu1 %vm953_vm4, %v937_v48  ;;  %825 = vmatpush2.bf16.msra.mxu0 %v1905_v47 }
  0x64   :  { %1715 = vmatpush3.bf16.msra.mxu1 %v1909_v50  ;;  %826 = vmatprep.subr.bf16.mxu0 %v1912_v51 }
  0x65   :  { %1716 = vmatprep.subr.bf16.mxu1 %v1913_v52  ;;  %1158 = vmatprep.mubr.bf16.mxu1 %v1662_v53 }
  0x67   :  { %827 = vmatpush2.bf16.msra.mxu0 %v1910_v54 }
  0x68   :  { %1717 = vmatpush3.bf16.msra.mxu1 %v1914_v55  ;;  %828 = vmatprep.subr.bf16.mxu0 %v1917_v56 }
  0x69   :  { %1718 = vmatprep.subr.bf16.mxu1 %v1918_v57 }
  0x6b   :  { %829 = vmatpush2.bf16.msra.mxu0 %v1915_v58 }
  0x6c   :  { %1719 = vmatpush3.bf16.msra.mxu1 %v1919_v59  ;;  %830 = vmatprep.subr.bf16.mxu0 %v1922_v60 }
  0x6d   :  { %1720 = vmatprep.subr.bf16.mxu1 %v1923_v61 }
  0x6f   :  { %831 = vmatpush2.bf16.msra.mxu0 %v1920_v62 }
  0x70   :  { %1721 = vmatpush3.bf16.msra.mxu1 %v1924_v63 }
  0x71   :  { %20 = vsyncpa [#allocation3], 0  ;;  %832 = vmatprep.subr.bf16.mxu0 %v1927_v0  ;;  %1722 = vmatprep.subr.bf16.mxu1 %v1928_v1  ;;  %v1932_v4 = vld [vmem:[%s2624_s1 + $0x2a4] ss:$8 sps:$4 sm:$0xff]   ;;  %v1933_v5 = vld [vmem:[%s2626_s3 + $0x50] sm:$0xff]   ;;  %vm1238_vm5 = vcmask 1040384   ;;  %v1546_v22 = vcombine.low %v2385_v42, %v2385_v42  ;;  %v1661_v23 = vcombine.low %v2410_v49, %v2410_v49 }
  0x72   :  { %v1930_v6 = vld [vmem:[%s2624_s1 + $0x2a0] ss:$8 sps:$4 sm:$0xff]   ;;  %v1934_v7 = vld [vmem:[%s2626_s3 + $0x10] sm:$0xff]   ;;  %vm1239_vm6 = vcmask 1041408   ;;  %v1240_v11 = vsel %vm1238_vm5, 4294967295, %v2011_v30  ;;  %vm1122_vm7 = vcmask 261120  }
  0x73   :  { %833 = vmatpush2.bf16.msra.mxu0 %v1925_v2  ;;  %v1937_v8 = vld [vmem:[%s2624_s1 + $0x294] ss:$8 sps:$4 sm:$0xff]   ;;  %v1938_v9 = vld [vmem:[%s2626_s3 + $0x48] sm:$0xff]   ;;  %v1935_v12 = vld [vmem:[%s2624_s1 + $0x290] ss:$8 sps:$4 sm:$0xff]   ;;  %v1241_v18 = vsel %vm1239_vm6, %v1240_v11, 0 }
  0x74   :  { %1723 = vmatpush3.bf16.msra.mxu1 %v1929_v3  ;;  %834 = vmatprep.subr.bf16.mxu0 %v1932_v4  ;;  %v1683_v10 = vld.sshfl [vmem:[%s2632_s9] sm:$0x33 pattern:$0x76325410]  ;;  %v1939_v13 = vld [vmem:[%s2626_s3 + $0x8] sm:$0xff]   ;;  %vm1234_vm8 = vcmask 23552  }
  0x75   :  { %1724 = vmatprep.subr.bf16.mxu1 %v1933_v5  ;;  %v1942_v14 = vld [vmem:[%s2624_s1 + $0x284] ss:$8 sps:$4 sm:$0xff]   ;;  %v1233_v17 = vcombine.high %v1683_v10, %v1683_v10  ;;  %v1940_v19 = vld [vmem:[%s2624_s1 + $0x280] ss:$8 sps:$4 sm:$0xff]   ;;  %v1243_v25 = vand.u32 %v1683_v10, %v1241_v18  ;;  %v1953_v26 = vld [vmem:[%s2634_s11 + $0x54] ss:$8 sps:$4 sm:$0xff]  }
  0x76   :  { %v1943_v15 = vld [vmem:[%s2626_s3 + $0x40] sm:$0xff]   ;;  %v1949_v24 = vld [vmem:[%s2626_s3 + $0x88] sm:$0xff]   ;;  %v1957_v28 = vld [vmem:[%s2630_s7 + $0x54] ss:$8 sps:$4 sm:$0xff]   ;;  %vm897_vm10 = vcmask 523264  }
  0x77   :  { %835 = vmatpush2.bf16.msra.mxu0 %v1930_v6  ;;  %v1944_v20 = vld [vmem:[%s2626_s3] sm:$0xff]   ;;  %v1246_v21 = vand.u32 %v1241_v18, %v1233_v17  ;;  %v1954_v29 = vld [vmem:[%s2625_s2 + $0x8] ss:$0 sps:$4 sm:$0xff]   ;;  %v1951_v30 = vld [vmem:[%s2634_s11 + $0x50] ss:$8 sps:$4 sm:$0xff]  }
  0x78   :  { %1725 = vmatpush3.bf16.msra.mxu1 %v1934_v7  ;;  %836 = vmatprep.subr.bf16.mxu0 %v1937_v8  ;;  %v1950_v27 = vld [vmem:[%s2626_s3 + $0x80] sm:$0xff]   ;;  %v1955_v32 = vld [vmem:[%s2630_s7 + $0x50] ss:$8 sps:$4 sm:$0xff]   ;;  %v1966_v37 = vld [vmem:[%s2634_s11 + $0x34] ss:$8 sps:$4 sm:$0xff]  }
  0x79   :  { %1726 = vmatprep.subr.bf16.mxu1 %v1938_v9  ;;  %v1223_v31 = vld [vmem:[%s2631_s8] sm:$0xf]  ;;  %v1960_v33 = vld [vmem:[%s2634_s11 + $0x44] ss:$8 sps:$4 sm:$0xff]   ;;  %v1969_v38 = vld [vmem:[%s2630_s7 + $0x34] ss:$8 sps:$4 sm:$0xff]  }
  0x7a   :  { %v1963_v34 = vld [vmem:[%s2630_s7 + $0x44] ss:$8 sps:$4 sm:$0xff]   ;;  %v1958_v35 = vld [vmem:[%s2634_s11 + $0x40] ss:$8 sps:$4 sm:$0xff]   ;;  %v1967_v40 = vld [vmem:[%s2630_s7 + $0x30] ss:$8 sps:$4 sm:$0xff]  }
  0x7b   :  { %837 = vmatpush2.bf16.msra.mxu0 %v1935_v12  ;;  %v1961_v36 = vld [vmem:[%s2630_s7 + $0x40] ss:$8 sps:$4 sm:$0xff]   ;;  %v1972_v41 = vld [vmem:[%s2634_s11 + $0x24] ss:$8 sps:$4 sm:$0xff]   ;;  %v1978_v44 = vld [vmem:[%s2634_s11 + $0x14] ss:$8 sps:$4 sm:$0xff]  }
  0x7c   :  { %1727 = vmatpush3.bf16.msra.mxu1 %v1939_v13  ;;  %838 = vmatprep.subr.bf16.mxu0 %v1942_v14  ;;  %v1970_v42 = vld [vmem:[%s2634_s11 + $0x20] ss:$8 sps:$4 sm:$0xff]   ;;  %v1981_v45 = vld [vmem:[%s2630_s7 + $0x14] ss:$8 sps:$4 sm:$0xff]   ;;  %v1976_v46 = vld [vmem:[%s2634_s11 + $0x10] ss:$8 sps:$4 sm:$0xff]  }
  0x7d   :  { %1728 = vmatprep.subr.bf16.mxu1 %v1943_v15  ;;  %v1973_v43 = vld [vmem:[%s2630_s7 + $0x20] ss:$8 sps:$4 sm:$0xff]   ;;  %v1979_v47 = vld [vmem:[%s2630_s7 + $0x10] ss:$8 sps:$4 sm:$0xff]   ;;  %v1984_v48 = vld [vmem:[%s2634_s11 + $0x4] ss:$8 sps:$4 sm:$0xff]  }
  0x7e   :  { %v1987_v49 = vld [vmem:[%s2630_s7 + $0x4] ss:$8 sps:$4 sm:$0xff]   ;;  %v1982_v50 = vld [vmem:[%s2634_s11] ss:$8 sps:$4 sm:$0xff]  }
  0x7f   :  { %839 = vmatpush2.bf16.msra.mxu0 %v1940_v19  ;;  %v1985_v51 = vld [vmem:[%s2630_s7] ss:$8 sps:$4 sm:$0xff]  }
  0x80   :  { %1729 = vmatpush3.bf16.msra.mxu1 %v1944_v20  ;;  %1747 = vmatprep.subr.bf16.mxu0 %v2012_v39  ;;  %v1393_v52 = vld [vmem:[%s2633_s10] sm:$0xf] }
  0x81   :  { %1262 = vmatprep.subr.bf16.mxu1 %v1246_v21  ;;  %v1210_v53 = vld [vmem:[%s2629_s6] sm:$0xf]  ;;  %s2014_s6 = smov [#allocation2]  }
  0x82   :  { %841 = vmatmul.mubr.bf16.vlgmr.msra.gmra.mxu0 %v1546_v22 }
  0x83   :  { %1159 = vmatmul.mubr.bf16.vlgmr.msra.gmra.mxu1 %v1661_v23  ;;  %1748 = vmatpush3.bf16.msra.mxu0 %v1949_v24 }
  0x84   :  { %1263 = vmatpush1.bf16.msra.mxu1 %v1243_v25  ;;  %1749 = vmatprep.subr.bf16.mxu0 %v2012_v39 }
  0x85   :  { %1751 = vmatprep.mubr.msk.bf16.mxu0 %vm2013_vm3, %v2012_v39  ;;  %1280 = vmatprep.mubr.bf16.mxu1 %v2010_v16  ;;  %v1964_v39 = vld [vmem:[%s2634_s11 + $0x30] ss:$8 sps:$4 sm:$0xff]  }
  0x86   :  { %1473 = vmatprep.subr.bf16.mxu1 %v1953_v26 }
  0x87   :  { %1750 = vmatpush3.bf16.msra.mxu0 %v1950_v27 }
  0x88   :  { %1356 = vmatprep.subr.bf16.mxu0 %v1957_v28 }
  0x8a   :  { %1752 = vmatmul.mubr.msk.bf16.vlgmr.msra.gmra.mxu0 %vm1122_vm7, %v1954_v29 }
  0x8b   :  { %1684 = vmatmul.mubr.msk.bf16.vlgmr.msra.gmra.mxu1 %vm1234_vm8, %v1223_v31  ;;  %1357 = vmatpush1.bf16.msra.mxu0 %v1955_v32 }
  0x8c   :  { %1474 = vmatpush1.bf16.msra.mxu1 %v1951_v30  ;;  %1358 = vmatprep.subr.bf16.mxu0 %v1963_v34 }
  0x8d   :  { %1475 = vmatprep.subr.bf16.mxu1 %v1960_v33  ;;  %1501 = vmatprep.mubr.bf16.mxu1 %v2010_v16 }
  0x8e   :  { %1384 = vmatprep.mubr.bf16.mxu0 %v2010_v16  ;;  %v1975_v16 = vld [vmem:[%s2630_s7 + $0x24] ss:$8 sps:$4 sm:$0xff]   ;;  %s1526_s7 = sshll.u32 %s2014_s6, 4  ;;  %s1527_s7 = int_to_ptr.vmem [resolvable:$true] %s1526_s7 }
  0x8f   :  { %1359 = vmatpush1.bf16.msra.mxu0 %v1961_v36  ;;  %s1988_s10 = scalar_lea.vmem %s1527_s7, 256  ;;  %p1993_p1 = scmp.lt.s32.totalorder %s1527_s7, %s1527_s7 }
  0x90   :  { %1476 = vmatpush1.bf16.msra.mxu1 %v1958_v35  ;;  %1360 = vmatprep.subr.bf16.mxu0 %v1969_v38  ;;  %p1989_p0 = scmp.ne.s32.totalorder %s1527_s7, %s1988_s10  ;;  %p1994_p2 = scmp.lt.s32.totalorder %s1988_s10, %s1988_s10 }
  0x91   :  { %1477 = vmatprep.subr.bf16.mxu1 %v1966_v37 }
  0x92   :  { %p1995_p3 = por %p1994_p2, %p1993_p1 }
  0x93   :  { %1361 = vmatpush1.bf16.msra.mxu0 %v1967_v40 }
  0x94   :  { %1478 = vmatpush1.bf16.msra.mxu1 %v1964_v39  ;;  %1362 = vmatprep.subr.bf16.mxu0 %v1975_v16  ;;  %p1996_p4 = pnand %p1995_p3, %p1989_p0 }
  0x95   :  { %1479 = vmatprep.subr.bf16.mxu1 %v1972_v41 }
  0x97   :  { %1363 = vmatpush1.bf16.msra.mxu0 %v1973_v43 }
  0x98   :  { %1480 = vmatpush1.bf16.msra.mxu1 %v1970_v42  ;;  %1364 = vmatprep.subr.bf16.mxu0 %v1981_v45 }
  0x99   :  { %1481 = vmatprep.subr.bf16.mxu1 %v1978_v44 }
  0x9b   :  { %1365 = vmatpush1.bf16.msra.mxu0 %v1979_v47 }
  0x9c   :  { %1482 = vmatpush1.bf16.msra.mxu1 %v1976_v46  ;;  %1366 = vmatprep.subr.bf16.mxu0 %v1987_v49 }
  0x9d   :  { %1483 = vmatprep.subr.bf16.mxu1 %v1984_v48 }
  0x9f   :  { %1367 = vmatpush1.bf16.msra.mxu0 %v1985_v51 }
  0xa0   :  { %1484 = vmatpush1.bf16.msra.mxu1 %v1982_v50 }
  0xa2   :  { %1697 = vmatmul.mubr.msk.bf16.vlgmr.msra.gmra.mxu0 %vm722_vm2, %v1210_v53 }
  0xa3   :  { %1710 = vmatmul.mubr.msk.bf16.vlgmr.msra.gmra.mxu1 %vm722_vm2, %v1393_v52 }
 0x102   :  { %v760_v54 = vpop.f32.mrf.mxu0 }
 0x103   :  { %v801_v55 = vpop.f32.mrf.mxu1 }
 0x104   :  { %v762_v56 = vpop.f32.mrf.mxu0  ;;  %v802_v6 = vadd.f32 %v801_v55, %v760_v54 }
 0x105   :  { %v803_v57 = vpop.f32.mrf.mxu1 }
 0x106   :  { %v764_v58 = vpop.f32.mrf.mxu0  ;;  %v804_v9 = vadd.f32 %v803_v57, %v762_v56 }
 0x107   :  { %v805_v59 = vpop.f32.mrf.mxu1 }
 0x108   :  { %v765_v60 = vpop.f32.mrf.mxu0 }
 0x109   :  { %v806_v61 = vpop.f32.mrf.mxu1 }
 0x11b   :  { %v883_v62 = vpop.f32.mrf.mxu1 }
 0x11d   :  { %v885_v63 = vpop.f32.mrf.mxu1 }
 0x11f   :  { %v887_v0 = vpop.f32.mrf.mxu1 }
 0x121   :  { %v888_v1 = vpop.f32.mrf.mxu1 }
 0x123   :  { %v998_v2 = vpop.f32.mrf.mxu1 }
 0x125   :  { %v1745_v3 = vpop.f32.mrf.mxu1 }
 0x127   :  { %v1001_v4 = vpop.f32.mrf.mxu1 }
 0x129   :  { %v1746_v5 = vpop.f32.mrf.mxu1 }
 0x142   :  { %v842_v7 = vpop.f32.mrf.mxu0 }
 0x143   :  { %v1730_v8 = vpop.f32.mrf.mxu1  ;;  %v843_v10 = vadd.f32 %v842_v7, %v802_v6 }
 0x144   :  { %v844_v11 = vpop.f32.mrf.mxu0 }
 0x145   :  { %v1731_v12 = vpop.f32.mrf.mxu1  ;;  %v884_v13 = vadd.f32 %v883_v62, %v843_v10  ;;  %v845_v14 = vadd.f32 %v844_v11, %v804_v9 }
 0x146   :  { %v1732_v15 = vadd.f32 %v1731_v12, %v1730_v8  ;;  %v846_v17 = vpop.f32.mrf.mxu0 }
 0x147   :  { %v1733_v18 = vpop.f32.mrf.mxu1  ;;  %v892_v19 = vmul.f32 0.1, %v884_v13  ;;  %v886_v20 = vadd.f32 %v885_v63, %v845_v14  ;;  %vm890_vm9 = vcmp.ge.f32.partialorder %v884_v13, 0.0 }
 0x148   :  { %v847_v21 = vpop.f32.mrf.mxu0  ;;  %v1161_v24 = vadd.f32 %v1732_v15, %v998_v2 }
 0x149   :  { %v1734_v22 = vpop.f32.mrf.mxu1  ;;  %v893_v23 = vmul.f32 0.1, %v886_v20  ;;  %vm891_vm11 = vcmp.ge.f32.partialorder %v886_v20, 0.0  ;;  %v894_v25 = vsel %vm890_vm9, %v884_v13, %v892_v19 }
 0x14a   :  { %v1200_v26 = vpop.f32.mrf.mxu0  ;;  %896 = vst [vmem:[#allocation2] sm:$0xff] %v894_v25 }
 0x14b   :  { %v1282_v27 = vpop.f32.mrf.mxu1  ;;  %v1201_v28 = vadd.f32 %v1200_v26, %v1161_v24  ;;  %v895_v29 = vsel %vm891_vm11, %v886_v20, %v893_v23 }
 0x14c   :  { %v1753_v30 = vpop.f32.mrf.mxu0  ;;  %898 = vst.msk [vmem:[#allocation2 + $0x8] sm:$0xff] %vm897_vm10, %v895_v29 }
 0x14d   :  { %v1284_v31 = vpop.f32.mrf.mxu1  ;;  %vm1206_vm12 = vcmp.ge.f32.partialorder %v1201_v28, 0.0  ;;  %v1207_v32 = vmul.f32 0.1, %v1201_v28 }
 0x14e   :  { %1999 = shalt.err (!%p1996_p4)
}
 0x14f   :  { %1529 = dma.vmem_to_hbm [thread:$0]  %s1527_s7, 256, %s2635_s12, [#allocation3]   ;;  %v1203_v33 = vpop.f32.mrf.mxu0  ;;  %v1286_v34 = vpop.f32.mrf.mxu1  ;;  %v1208_v35 = vsel %vm1206_vm12, %v1201_v28, %v1207_v32 }
 0x150   :  { %1209 = vst.msk [vmem:[%s2636_s13] sm:$0xff] %vm897_vm10, %v1208_v35 }
 0x151   :  { %v1754_v36 = vpop.f32.mrf.mxu0  ;;  %v1287_v37 = vpop.f32.mrf.mxu1 }
 0x162   :  { %v1386_v39 = vpop.f32.mrf.mxu0 }
 0x163   :  { %v1503_v38 = vpop.f32.mrf.mxu1  ;;  %v1387_v40 = vadd.f32 %v1386_v39, %v1282_v27 }
 0x164   :  { %v1388_v16 = vpop.f32.mrf.mxu0 }
 0x165   :  { %v1505_v41 = vpop.f32.mrf.mxu1  ;;  %v1510_v42 = vadd.f32 %v1503_v38, %v1387_v40  ;;  %v1389_v43 = vadd.f32 %v1388_v16, %v1284_v31 }
 0x166   :  { %v1390_v45 = vpop.f32.mrf.mxu0 }
 0x167   :  { %v1507_v44 = vpop.f32.mrf.mxu1  ;;  %vm1512_vm13 = vcmp.ge.f32.partialorder %v1510_v42, 0.0  ;;  %v1514_v46 = vmul.f32 0.1, %v1510_v42  ;;  %v1511_v47 = vadd.f32 %v1505_v41, %v1389_v43 }
 0x168   :  { %v1391_v49 = vpop.f32.mrf.mxu0 }
 0x169   :  { %v1508_v48 = vpop.f32.mrf.mxu1  ;;  %v1516_v50 = vsel %vm1512_vm13, %v1510_v42, %v1514_v46  ;;  %vm1513_vm14 = vcmp.ge.f32.partialorder %v1511_v47, 0.0  ;;  %v1515_v51 = vmul.f32 0.1, %v1511_v47 }
 0x16a   :  { %1518 = vst [vmem:[%s2637_s14] sm:$0xff] %v1516_v50 }
 0x16b   :  { %v1517_v52 = vsel %vm1513_vm14, %v1511_v47, %v1515_v51 }
 0x16c   :  { %1519 = vst.msk [vmem:[%s2637_s14 + $0x8] sm:$0xff] %vm897_vm10, %v1517_v52 }
 0x16d   :  { %2008 = dma.done.wait [#allocation3], 256  }
 0x16e   :  { %2009 = vsyncadd [#allocation3], 4294967040 }
 0x16f   :  { %1541 = vsyncpa [#allocation3], 1 }

// kernel: kbnet_encoder_forward.16
= control target key start
LH: loop header
LB: loop body
LE: loop exit
PB: predicated region body
PF: predicated region fallthrough
CT: control target
= control target key end

     0   :  { %v4394_v36 = vmov 1966171168   ;;  %v460_v38 = vlaneseq  ;;  %vm2293_vm0 = vcmask 523264   ;;  %vm4397_vm1 = vmmov 0   ;;  %s5677_s1 = inlined_call_operand.vmem [shape: bf16[1728,384], index: 1, kind: input, shape index: {}]   ;;  %s5678_s0 = inlined_call_operand.vmem [shape: bf16[2,1728], index: 0, kind: input, shape index: {}]   ;;  %s5679_s3 = inlined_call_operand.vmem [shape: bf16[576,128], index: 3, kind: input, shape index: {}]   ;;  %s5680_s2 = inlined_call_operand.vmem [shape: bf16[2,576], index: 2, kind: input, shape index: {}]   ;;  %s5681_s4 = inlined_call_operand.vmem [shape: f32[2,384], index: 4, kind: output, shape index: {0}]   ;;  %s5682_s5 = inlined_call_operand.vmem [shape: f32[2,128], index: 5, kind: output, shape index: {1}]  }
   0x1   :  { %v3923_v0 = vld [vmem:[%s5677_s1 + $0xac] ss:$12 sps:$4 sm:$0xff]   ;;  %v3927_v2 = vld [vmem:[%s5677_s1 + $0xa8] ss:$12 sps:$4 sm:$0xff]   ;;  %v3933_v6 = vld [vmem:[%s5677_s1 + $0x90] ss:$12 sps:$4 sm:$0xff]   ;;  %v458_v37 = vunpack.c.l.s4 %v4394_v36 }
   0x2   :  { %v3925_v1 = vld [vmem:[%s5677_s1 + $0x22c] ss:$12 sps:$4 sm:$0xff]   ;;  %2297 = vmatprep.subr.bf16.mxu0 %v3923_v0  ;;  %v3928_v3 = vld [vmem:[%s5677_s1 + $0x228] ss:$12 sps:$4 sm:$0xff]   ;;  %v3934_v7 = vld [vmem:[%s5677_s1 + $0x210] ss:$12 sps:$4 sm:$0xff]  }
   0x3   :  { %2338 = vmatprep.subr.bf16.mxu1 %v3925_v1  ;;  %v3929_v4 = vld [vmem:[%s5677_s1 + $0x94] ss:$12 sps:$4 sm:$0xff]   ;;  %2298 = vmatpush1.bf16.msra.mxu0 %v3927_v2  ;;  %v3935_v8 = vld [vmem:[%s5677_s1 + $0x7c] ss:$12 sps:$4 sm:$0xff]   ;;  %v3939_v10 = vld [vmem:[%s5677_s1 + $0x78] ss:$12 sps:$4 sm:$0xff]   ;;  %v459_v42 = vunpack.c.0.s8 %v458_v37 }
   0x4   :  { %2339 = vmatpush1.bf16.msra.mxu1 %v3928_v3  ;;  %v3931_v5 = vld [vmem:[%s5677_s1 + $0x214] ss:$12 sps:$4 sm:$0xff]   ;;  %2299 = vmatprep.subr.bf16.mxu0 %v3929_v4  ;;  %v3937_v9 = vld [vmem:[%s5677_s1 + $0x1fc] ss:$12 sps:$4 sm:$0xff]   ;;  %v3940_v11 = vld [vmem:[%s5677_s1 + $0x1f8] ss:$12 sps:$4 sm:$0xff]  }
   0x5   :  { %2340 = vmatprep.subr.bf16.mxu1 %v3931_v5  ;;  %v3941_v12 = vld [vmem:[%s5677_s1 + $0x64] ss:$12 sps:$4 sm:$0xff]   ;;  %v3945_v14 = vld [vmem:[%s5677_s1 + $0x60] ss:$12 sps:$4 sm:$0xff]   ;;  %v3951_v18 = vld [vmem:[%s5677_s1 + $0x48] ss:$12 sps:$4 sm:$0xff]  }
   0x6   :  { %v3943_v13 = vld [vmem:[%s5677_s1 + $0x1e4] ss:$12 sps:$4 sm:$0xff]   ;;  %v3946_v15 = vld [vmem:[%s5677_s1 + $0x1e0] ss:$12 sps:$4 sm:$0xff]   ;;  %v3952_v19 = vld [vmem:[%s5677_s1 + $0x1c8] ss:$12 sps:$4 sm:$0xff]  }
   0x7   :  { %2300 = vmatpush1.bf16.msra.mxu0 %v3933_v6  ;;  %v3947_v16 = vld [vmem:[%s5677_s1 + $0x4c] ss:$12 sps:$4 sm:$0xff]   ;;  %v3953_v20 = vld [vmem:[%s5677_s1 + $0x34] ss:$12 sps:$4 sm:$0xff]   ;;  %v3957_v22 = vld [vmem:[%s5677_s1 + $0x30] ss:$12 sps:$4 sm:$0xff]  }
   0x8   :  { %2341 = vmatpush1.bf16.msra.mxu1 %v3934_v7  ;;  %2301 = vmatprep.subr.bf16.mxu0 %v3935_v8  ;;  %v3949_v17 = vld [vmem:[%s5677_s1 + $0x1cc] ss:$12 sps:$4 sm:$0xff]   ;;  %v3955_v21 = vld [vmem:[%s5677_s1 + $0x1b4] ss:$12 sps:$4 sm:$0xff]   ;;  %v3958_v23 = vld [vmem:[%s5677_s1 + $0x1b0] ss:$12 sps:$4 sm:$0xff]  }
   0x9   :  { %2342 = vmatprep.subr.bf16.mxu1 %v3937_v9  ;;  %v3959_v24 = vld [vmem:[%s5677_s1 + $0x1c] ss:$12 sps:$4 sm:$0xff]   ;;  %v3963_v26 = vld [vmem:[%s5677_s1 + $0x18] ss:$12 sps:$4 sm:$0xff]   ;;  %v3969_v30 = vld [vmem:[%s5677_s1] ss:$12 sps:$4 sm:$0xff]  }
   0xa   :  { %v3961_v25 = vld [vmem:[%s5677_s1 + $0x19c] ss:$12 sps:$4 sm:$0xff]   ;;  %v3964_v27 = vld [vmem:[%s5677_s1 + $0x198] ss:$12 sps:$4 sm:$0xff]   ;;  %v3970_v31 = vld [vmem:[%s5677_s1 + $0x180] ss:$12 sps:$4 sm:$0xff]  }
   0xb   :  { %2302 = vmatpush1.bf16.msra.mxu0 %v3939_v10  ;;  %v3965_v28 = vld [vmem:[%s5677_s1 + $0x4] ss:$12 sps:$4 sm:$0xff]   ;;  %v3971_v32 = vld [vmem:[%s5677_s1 + $0x16c] ss:$12 sps:$4 sm:$0xff]   ;;  %v3975_v34 = vld [vmem:[%s5677_s1 + $0x168] ss:$12 sps:$4 sm:$0xff]  }
   0xc   :  { %2343 = vmatpush1.bf16.msra.mxu1 %v3940_v11  ;;  %2303 = vmatprep.subr.bf16.mxu0 %v3941_v12  ;;  %v3967_v29 = vld [vmem:[%s5677_s1 + $0x184] ss:$12 sps:$4 sm:$0xff]   ;;  %v3973_v33 = vld [vmem:[%s5677_s1 + $0x2ec] ss:$12 sps:$4 sm:$0xff]   ;;  %v3976_v35 = vld [vmem:[%s5677_s1 + $0x2e8] ss:$12 sps:$4 sm:$0xff]  }
   0xd   :  { %2344 = vmatprep.subr.bf16.mxu1 %v3943_v13  ;;  %v3977_v39 = vld [vmem:[%s5677_s1 + $0x154] ss:$12 sps:$4 sm:$0xff]   ;;  %v3981_v41 = vld [vmem:[%s5677_s1 + $0x150] ss:$12 sps:$4 sm:$0xff]   ;;  %v4546_v43 = vshrl.u32 %v460_v38, 7 }
   0xe   :  { %v3979_v40 = vld [vmem:[%s5677_s1 + $0x2d4] ss:$12 sps:$4 sm:$0xff]   ;;  %v3982_v44 = vld [vmem:[%s5677_s1 + $0x2d0] ss:$12 sps:$4 sm:$0xff]   ;;  %v3987_v47 = vld [vmem:[%s5677_s1 + $0x138] ss:$12 sps:$4 sm:$0xff]  }
   0xf   :  { %2304 = vmatpush1.bf16.msra.mxu0 %v3945_v14  ;;  %v3983_v45 = vld [vmem:[%s5677_s1 + $0x13c] ss:$12 sps:$4 sm:$0xff]   ;;  %v3988_v48 = vld [vmem:[%s5677_s1 + $0x2b8] ss:$12 sps:$4 sm:$0xff]   ;;  %v4564_v49 = vsub.s32 %v459_v42, %v4546_v43  ;;  %v3993_v53 = vld [vmem:[%s5677_s1 + $0x120] ss:$12 sps:$4 sm:$0xff]  }
  0x10   :  { %2345 = vmatpush1.bf16.msra.mxu1 %v3946_v15  ;;  %2305 = vmatprep.subr.bf16.mxu0 %v3947_v16  ;;  %v3985_v46 = vld [vmem:[%s5677_s1 + $0x2bc] ss:$12 sps:$4 sm:$0xff]   ;;  %v3989_v50 = vld [vmem:[%s5677_s1 + $0x124] ss:$12 sps:$4 sm:$0xff]   ;;  %v3994_v55 = vld [vmem:[%s5677_s1 + $0x2a0] ss:$12 sps:$4 sm:$0xff]  }
  0x11   :  { %2346 = vmatprep.subr.bf16.mxu1 %v3949_v17  ;;  %v3991_v51 = vld [vmem:[%s5677_s1 + $0x2a4] ss:$12 sps:$4 sm:$0xff]   ;;  %v3995_v56 = vld [vmem:[%s5677_s1 + $0x10c] ss:$12 sps:$4 sm:$0xff]   ;;  %v3999_v59 = vld [vmem:[%s5677_s1 + $0x108] ss:$12 sps:$4 sm:$0xff]  }
  0x12   :  { %v20_v52 = vld [vmem:[%s5678_s0] sm:$0xff]  ;;  %v3997_v57 = vld [vmem:[%s5677_s1 + $0x28c] ss:$12 sps:$4 sm:$0xff]   ;;  %v4000_v61 = vld [vmem:[%s5677_s1 + $0x288] ss:$12 sps:$4 sm:$0xff]  }
  0x13   :  { %2306 = vmatpush1.bf16.msra.mxu0 %v3951_v18  ;;  %v463_v54 = vrot.slane %v20_v52, %v4564_v49  ;;  %v4001_v62 = vld [vmem:[%s5677_s1 + $0xf4] ss:$12 sps:$4 sm:$0xff]   ;;  %v456_v1 = vcombine.high %v20_v52, %v20_v52  ;;  %v4005_v2 = vld [vmem:[%s5677_s1 + $0xf0] ss:$12 sps:$4 sm:$0xff]   ;;  %v4011_v7 = vld [vmem:[%s5677_s1 + $0xd8] ss:$12 sps:$4 sm:$0xff]  }
  0x14   :  { %2347 = vmatpush1.bf16.msra.mxu1 %v3952_v19  ;;  %2307 = vmatprep.subr.bf16.mxu0 %v3953_v20  ;;  %v4003_v63 = vld [vmem:[%s5677_s1 + $0x274] ss:$12 sps:$4 sm:$0xff]   ;;  %v4006_v3 = vld [vmem:[%s5677_s1 + $0x270] ss:$12 sps:$4 sm:$0xff]   ;;  %v4012_v8 = vld [vmem:[%s5677_s1 + $0x258] ss:$12 sps:$4 sm:$0xff]  }
  0x15   :  { %2348 = vmatprep.subr.bf16.mxu1 %v3955_v21  ;;  %v471_v58 = vcombine.high %v463_v54, %v463_v54  ;;  %v4007_v4 = vld [vmem:[%s5677_s1 + $0xdc] ss:$12 sps:$4 sm:$0xff]   ;;  %v4622_v6 = vrot.slane %v456_v1, %v4564_v49  ;;  %v4013_v9 = vld [vmem:[%s5677_s1 + $0xc4] ss:$12 sps:$4 sm:$0xff]   ;;  %v4017_v12 = vld [vmem:[%s5677_s1 + $0xc0] ss:$12 sps:$4 sm:$0xff]   ;;  %v4642_v13 = vrot.slane %v463_v54, %v4564_v49 }
  0x16   :  { %v4009_v5 = vld [vmem:[%s5677_s1 + $0x25c] ss:$12 sps:$4 sm:$0xff]   ;;  %v4015_v10 = vld [vmem:[%s5677_s1 + $0x244] ss:$12 sps:$4 sm:$0xff]   ;;  %v4018_v14 = vld [vmem:[%s5677_s1 + $0x240] ss:$12 sps:$4 sm:$0xff]  }
  0x17   :  { %2308 = vmatpush1.bf16.msra.mxu0 %v3957_v22  ;;  %v4592_v60 = vrot.slane %v471_v58, %v4564_v49  ;;  %v472_v11 = vcombine.high %v4622_v6, %v4622_v6  ;;  %v4021_v15 = vld [vmem:[%s5677_s1 + $0x3ac] ss:$12 sps:$4 sm:$0xff]   ;;  %v4658_v18 = vcombine.high %v4642_v13, %v4642_v13  ;;  %v4019_v19 = vld [vmem:[%s5677_s1 + $0x3a8] ss:$12 sps:$4 sm:$0xff]   ;;  %v4073_v58 = vld [vmem:[%s5677_s1 + $0x450] ss:$12 sps:$4 sm:$0xff]  }
  0x18   :  { %2349 = vmatpush1.bf16.msra.mxu1 %v3958_v23  ;;  %2309 = vmatprep.subr.bf16.mxu0 %v3959_v24  ;;  %v4024_v16 = vld [vmem:[%s5677_s1 + $0x52c] ss:$12 sps:$4 sm:$0xff]   ;;  %v4022_v20 = vld [vmem:[%s5677_s1 + $0x528] ss:$12 sps:$4 sm:$0xff]   ;;  %v4025_v24 = vld [vmem:[%s5677_s1 + $0x390] ss:$12 sps:$4 sm:$0xff]  }
  0x19   :  { %2350 = vmatprep.subr.bf16.mxu1 %v3961_v25  ;;  %v4605_v0 = vcombine.high %v4592_v60, %v4592_v60  ;;  %2329 = vmatprep.mubr.bf16.mxu0 %v4592_v60  ;;  %v4654_v17 = vrot.slane %v472_v11, %v4564_v49  ;;  %v4027_v21 = vld [vmem:[%s5677_s1 + $0x394] ss:$12 sps:$4 sm:$0xff]   ;;  %v4028_v25 = vld [vmem:[%s5677_s1 + $0x510] ss:$12 sps:$4 sm:$0xff]   ;;  %v4069_v52 = vld [vmem:[%s5677_s1 + $0x46c] ss:$12 sps:$4 sm:$0xff]  }
  0x1a   :  { %v4030_v22 = vld [vmem:[%s5677_s1 + $0x514] ss:$12 sps:$4 sm:$0xff]   ;;  %v4057_v42 = vld [vmem:[%s5677_s1 + $0x31c] ss:$12 sps:$4 sm:$0xff]   ;;  %v4082_v1 = vld [vmem:[%s5677_s1 + $0x5b8] ss:$12 sps:$4 sm:$0xff]  }
  0x1b   :  { %2310 = vmatpush1.bf16.msra.mxu0 %v3963_v26  ;;  %2370 = vmatprep.mubr.bf16.mxu1 %v4605_v0  ;;  %v4674_v23 = vcombine.high %v4654_v17, %v4654_v17  ;;  %v4033_v26 = vld [vmem:[%s5677_s1 + $0x37c] ss:$12 sps:$4 sm:$0xff]   ;;  %v4051_v38 = vld [vmem:[%s5677_s1 + $0x334] ss:$12 sps:$4 sm:$0xff]  }
  0x1c   :  { %2351 = vmatpush1.bf16.msra.mxu1 %v3964_v27  ;;  %2311 = vmatprep.subr.bf16.mxu0 %v3965_v28  ;;  %v4036_v27 = vld [vmem:[%s5677_s1 + $0x4fc] ss:$12 sps:$4 sm:$0xff]   ;;  %v4031_v28 = vld [vmem:[%s5677_s1 + $0x378] ss:$12 sps:$4 sm:$0xff]   ;;  %v4099_v11 = vld [vmem:[%s5677_s1 + $0x3f4] ss:$12 sps:$4 sm:$0xff]  }
  0x1d   :  { %2352 = vmatprep.subr.bf16.mxu1 %v3967_v29  ;;  %v4034_v29 = vld [vmem:[%s5677_s1 + $0x4f8] ss:$12 sps:$4 sm:$0xff]   ;;  %v4043_v36 = vld [vmem:[%s5677_s1 + $0x348] ss:$12 sps:$4 sm:$0xff]  }
  0x1e   :  { %v4046_v37 = vld [vmem:[%s5677_s1 + $0x4c8] ss:$12 sps:$4 sm:$0xff]  }
  0x1f   :  { %2312 = vmatpush1.bf16.msra.mxu0 %v3969_v30  ;;  %v4039_v30 = vld [vmem:[%s5677_s1 + $0x364] ss:$12 sps:$4 sm:$0xff]   ;;  %v4067_v54 = vld [vmem:[%s5677_s1 + $0x468] ss:$12 sps:$4 sm:$0xff]  }
  0x20   :  { %2353 = vmatpush1.bf16.msra.mxu1 %v3970_v31  ;;  %2313 = vmatprep.subr.bf16.mxu0 %v3971_v32  ;;  %v4042_v31 = vld [vmem:[%s5677_s1 + $0x4e4] ss:$12 sps:$4 sm:$0xff]   ;;  %v4037_v32 = vld [vmem:[%s5677_s1 + $0x360] ss:$12 sps:$4 sm:$0xff]  }
  0x21   :  { %2354 = vmatprep.subr.bf16.mxu1 %v3973_v33  ;;  %v4040_v33 = vld [vmem:[%s5677_s1 + $0x4e0] ss:$12 sps:$4 sm:$0xff]  }
  0x23   :  { %2314 = vmatpush2.bf16.msra.mxu0 %v3975_v34  ;;  %v4045_v34 = vld [vmem:[%s5677_s1 + $0x34c] ss:$12 sps:$4 sm:$0xff]  }
  0x24   :  { %2355 = vmatpush2.bf16.msra.mxu1 %v3976_v35  ;;  %2315 = vmatprep.subr.bf16.mxu0 %v3977_v39  ;;  %v4048_v35 = vld [vmem:[%s5677_s1 + $0x4cc] ss:$12 sps:$4 sm:$0xff]   ;;  %v4054_v39 = vld [vmem:[%s5677_s1 + $0x4b4] ss:$12 sps:$4 sm:$0xff]  }
  0x25   :  { %2356 = vmatprep.subr.bf16.mxu1 %v3979_v40  ;;  %v4049_v40 = vld [vmem:[%s5677_s1 + $0x330] ss:$12 sps:$4 sm:$0xff]  }
  0x27   :  { %2316 = vmatpush2.bf16.msra.mxu0 %v3981_v41  ;;  %v4052_v41 = vld [vmem:[%s5677_s1 + $0x4b0] ss:$12 sps:$4 sm:$0xff]  }
  0x28   :  { %2357 = vmatpush2.bf16.msra.mxu1 %v3982_v44  ;;  %2317 = vmatprep.subr.bf16.mxu0 %v3983_v45  ;;  %v4060_v44 = vld [vmem:[%s5677_s1 + $0x49c] ss:$12 sps:$4 sm:$0xff]   ;;  %v4055_v45 = vld [vmem:[%s5677_s1 + $0x318] ss:$12 sps:$4 sm:$0xff]  }
  0x29   :  { %2358 = vmatprep.subr.bf16.mxu1 %v3985_v46  ;;  %v4058_v46 = vld [vmem:[%s5677_s1 + $0x498] ss:$12 sps:$4 sm:$0xff]  }
  0x2b   :  { %2318 = vmatpush2.bf16.msra.mxu0 %v3987_v47  ;;  %v4063_v47 = vld [vmem:[%s5677_s1 + $0x304] ss:$12 sps:$4 sm:$0xff]  }
  0x2c   :  { %2359 = vmatpush2.bf16.msra.mxu1 %v3988_v48  ;;  %2319 = vmatprep.subr.bf16.mxu0 %v3989_v50  ;;  %v4066_v48 = vld [vmem:[%s5677_s1 + $0x484] ss:$12 sps:$4 sm:$0xff]   ;;  %v4061_v50 = vld [vmem:[%s5677_s1 + $0x300] ss:$12 sps:$4 sm:$0xff]  }
  0x2d   :  { %2360 = vmatprep.subr.bf16.mxu1 %v3991_v51  ;;  %v4064_v51 = vld [vmem:[%s5677_s1 + $0x480] ss:$12 sps:$4 sm:$0xff]  }
  0x2f   :  { %2320 = vmatpush2.bf16.msra.mxu0 %v3993_v53  ;;  %v4072_v53 = vld [vmem:[%s5677_s1 + $0x5ec] ss:$12 sps:$4 sm:$0xff]  }
  0x30   :  { %2361 = vmatpush2.bf16.msra.mxu1 %v3994_v55  ;;  %2321 = vmatprep.subr.bf16.mxu0 %v3995_v56  ;;  %v4070_v55 = vld [vmem:[%s5677_s1 + $0x5e8] ss:$12 sps:$4 sm:$0xff]  }
  0x31   :  { %2362 = vmatprep.subr.bf16.mxu1 %v3997_v57  ;;  %v4075_v56 = vld [vmem:[%s5677_s1 + $0x454] ss:$12 sps:$4 sm:$0xff]  }
  0x32   :  { %v4078_v57 = vld [vmem:[%s5677_s1 + $0x5d4] ss:$12 sps:$4 sm:$0xff]  }
  0x33   :  { %2322 = vmatpush2.bf16.msra.mxu0 %v3999_v59  ;;  %v4076_v59 = vld [vmem:[%s5677_s1 + $0x5d0] ss:$12 sps:$4 sm:$0xff]  }
  0x34   :  { %2363 = vmatpush2.bf16.msra.mxu1 %v4000_v61  ;;  %2323 = vmatprep.subr.bf16.mxu0 %v4001_v62  ;;  %v4081_v61 = vld [vmem:[%s5677_s1 + $0x43c] ss:$12 sps:$4 sm:$0xff]  }
  0x35   :  { %2364 = vmatprep.subr.bf16.mxu1 %v4003_v63  ;;  %v4084_v62 = vld [vmem:[%s5677_s1 + $0x5bc] ss:$12 sps:$4 sm:$0xff]   ;;  %v4079_v63 = vld [vmem:[%s5677_s1 + $0x438] ss:$12 sps:$4 sm:$0xff]  }
  0x37   :  { %2324 = vmatpush2.bf16.msra.mxu0 %v4005_v2  ;;  %v4087_v2 = vld [vmem:[%s5677_s1 + $0x424] ss:$12 sps:$4 sm:$0xff]  }
  0x38   :  { %2365 = vmatpush2.bf16.msra.mxu1 %v4006_v3  ;;  %2325 = vmatprep.subr.bf16.mxu0 %v4007_v4  ;;  %v4090_v3 = vld [vmem:[%s5677_s1 + $0x5a4] ss:$12 sps:$4 sm:$0xff]   ;;  %v4085_v4 = vld [vmem:[%s5677_s1 + $0x420] ss:$12 sps:$4 sm:$0xff]  }
  0x39   :  { %2366 = vmatprep.subr.bf16.mxu1 %v4009_v5  ;;  %v4088_v5 = vld [vmem:[%s5677_s1 + $0x5a0] ss:$12 sps:$4 sm:$0xff]  }
  0x3b   :  { %2326 = vmatpush2.bf16.msra.mxu0 %v4011_v7  ;;  %v4093_v7 = vld [vmem:[%s5677_s1 + $0x40c] ss:$12 sps:$4 sm:$0xff]  }
  0x3c   :  { %2367 = vmatpush2.bf16.msra.mxu1 %v4012_v8  ;;  %2327 = vmatprep.subr.bf16.mxu0 %v4013_v9  ;;  %v4096_v8 = vld [vmem:[%s5677_s1 + $0x58c] ss:$12 sps:$4 sm:$0xff]   ;;  %v4091_v9 = vld [vmem:[%s5677_s1 + $0x408] ss:$12 sps:$4 sm:$0xff]  }
  0x3d   :  { %2368 = vmatprep.subr.bf16.mxu1 %v4015_v10  ;;  %v4094_v10 = vld [vmem:[%s5677_s1 + $0x588] ss:$12 sps:$4 sm:$0xff]  }
  0x3f   :  { %2328 = vmatpush2.bf16.msra.mxu0 %v4017_v12  ;;  %v4102_v12 = vld [vmem:[%s5677_s1 + $0x574] ss:$12 sps:$4 sm:$0xff]  }
  0x40   :  { %2369 = vmatpush2.bf16.msra.mxu1 %v4018_v14  ;;  %2379 = vmatprep.subr.bf16.mxu0 %v4021_v15  ;;  %v4097_v14 = vld [vmem:[%s5677_s1 + $0x3f0] ss:$12 sps:$4 sm:$0xff]  }
  0x41   :  { %2420 = vmatprep.subr.bf16.mxu1 %v4024_v16  ;;  %v4100_v15 = vld [vmem:[%s5677_s1 + $0x570] ss:$12 sps:$4 sm:$0xff]  }
  0x42   :  { %2330 = vmatmul.mubr.bf16.vlgmr.msra.gmra.mxu0 %v4642_v13  ;;  %v4105_v16 = vld [vmem:[%s5677_s1 + $0x3dc] ss:$12 sps:$4 sm:$0xff]  }
  0x43   :  { %2371 = vmatmul.mubr.bf16.vlgmr.msra.gmra.mxu1 %v4658_v18  ;;  %2380 = vmatpush1.bf16.msra.mxu0 %v4019_v19  ;;  %v4108_v19 = vld [vmem:[%s5677_s1 + $0x55c] ss:$12 sps:$4 sm:$0xff]  }
  0x44   :  { %2421 = vmatpush1.bf16.msra.mxu1 %v4022_v20  ;;  %2381 = vmatprep.subr.bf16.mxu0 %v4027_v21  ;;  %v4103_v20 = vld [vmem:[%s5677_s1 + $0x3d8] ss:$12 sps:$4 sm:$0xff]  }
  0x45   :  { %2422 = vmatprep.subr.bf16.mxu1 %v4030_v22  ;;  %2411 = vmatprep.mubr.bf16.mxu0 %v4654_v17  ;;  %v4106_v21 = vld [vmem:[%s5677_s1 + $0x558] ss:$12 sps:$4 sm:$0xff]  }
  0x46   :  { %2452 = vmatprep.mubr.bf16.mxu1 %v4674_v23  ;;  %v4111_v22 = vld [vmem:[%s5677_s1 + $0x3c4] ss:$12 sps:$4 sm:$0xff]  }
  0x47   :  { %2382 = vmatpush1.bf16.msra.mxu0 %v4025_v24  ;;  %v4114_v24 = vld [vmem:[%s5677_s1 + $0x544] ss:$12 sps:$4 sm:$0xff]  }
  0x48   :  { %2423 = vmatpush1.bf16.msra.mxu1 %v4028_v25  ;;  %2383 = vmatprep.subr.bf16.mxu0 %v4033_v26  ;;  %v4109_v25 = vld [vmem:[%s5677_s1 + $0x3c0] ss:$12 sps:$4 sm:$0xff]   ;;  %v4853_v26 = vrot.slane %v4622_v6, %v4564_v49  ;;  %v4116_v6 = vld [vmem:[%s5677_s1 + $0x6a8] ss:$12 sps:$4 sm:$0xff]  }
  0x49   :  { %2424 = vmatprep.subr.bf16.mxu1 %v4036_v27  ;;  %v4112_v27 = vld [vmem:[%s5677_s1 + $0x540] ss:$12 sps:$4 sm:$0xff]  }
  0x4b   :  { %2384 = vmatpush1.bf16.msra.mxu0 %v4031_v28  ;;  %v4118_v28 = vld [vmem:[%s5677_s1 + $0x6ac] ss:$12 sps:$4 sm:$0xff]  }
  0x4c   :  { %2425 = vmatpush1.bf16.msra.mxu1 %v4034_v29  ;;  %2385 = vmatprep.subr.bf16.mxu0 %v4039_v30  ;;  %v4121_v29 = vld [vmem:[%s5677_s1 + $0x82c] ss:$12 sps:$4 sm:$0xff]   ;;  %v4869_v30 = vcombine.high %v4853_v26, %v4853_v26 }
  0x4d   :  { %2426 = vmatprep.subr.bf16.mxu1 %v4042_v31  ;;  %v4119_v31 = vld [vmem:[%s5677_s1 + $0x828] ss:$12 sps:$4 sm:$0xff]  }
  0x4f   :  { %2386 = vmatpush1.bf16.msra.mxu0 %v4037_v32  ;;  %v4877_v32 = vld [vmem:[%s5678_s0 + $0x8] sm:$0x3f] }
  0x50   :  { %2427 = vmatpush1.bf16.msra.mxu1 %v4040_v33  ;;  %2387 = vmatprep.subr.bf16.mxu0 %v4045_v34  ;;  %v4124_v33 = vld [vmem:[%s5677_s1 + $0x694] ss:$12 sps:$4 sm:$0xff]  }
  0x51   :  { %2428 = vmatprep.subr.bf16.mxu1 %v4048_v35  ;;  %v4127_v34 = vld [vmem:[%s5677_s1 + $0x814] ss:$12 sps:$4 sm:$0xff]   ;;  %v4887_v35 = vrot.slane %v4877_v32, %v4564_v49 }
  0x53   :  { %2388 = vmatpush1.bf16.msra.mxu0 %v4043_v36  ;;  %v4122_v36 = vld [vmem:[%s5677_s1 + $0x690] ss:$12 sps:$4 sm:$0xff]  }
  0x54   :  { %2429 = vmatpush1.bf16.msra.mxu1 %v4046_v37  ;;  %2389 = vmatprep.subr.bf16.mxu0 %v4051_v38  ;;  %v4125_v37 = vld [vmem:[%s5677_s1 + $0x810] ss:$12 sps:$4 sm:$0xff]   ;;  %v520_v38 = vcombine.high %v4887_v35, %v4887_v35 }
  0x55   :  { %2430 = vmatprep.subr.bf16.mxu1 %v4054_v39  ;;  %v4130_v39 = vld [vmem:[%s5677_s1 + $0x67c] ss:$12 sps:$4 sm:$0xff]  }
  0x57   :  { %2390 = vmatpush1.bf16.msra.mxu0 %v4049_v40  ;;  %v4133_v40 = vld [vmem:[%s5677_s1 + $0x7fc] ss:$12 sps:$4 sm:$0xff]  }
  0x58   :  { %2431 = vmatpush1.bf16.msra.mxu1 %v4052_v41  ;;  %2391 = vmatprep.subr.bf16.mxu0 %v4057_v42  ;;  %v4906_v41 = vrot.slane %v520_v38, %v4564_v49  ;;  %v4128_v42 = vld [vmem:[%s5677_s1 + $0x678] ss:$12 sps:$4 sm:$0xff]   ;;  %v4205_v38 = vld [vmem:[%s5677_s1 + $0x85c] ss:$12 sps:$4 sm:$0xff]  }
  0x59   :  { %2432 = vmatprep.subr.bf16.mxu1 %v4060_v44 }
  0x5a   :  { %v4914_v44 = vcombine.high %v4906_v41, %v4906_v41 }
  0x5b   :  { %2392 = vmatpush1.bf16.msra.mxu0 %v4055_v45  ;;  %v4131_v45 = vld [vmem:[%s5677_s1 + $0x7f8] ss:$12 sps:$4 sm:$0xff]  }
  0x5c   :  { %2433 = vmatpush1.bf16.msra.mxu1 %v4058_v46  ;;  %2393 = vmatprep.subr.bf16.mxu0 %v4063_v47  ;;  %v4136_v46 = vld [vmem:[%s5677_s1 + $0x664] ss:$12 sps:$4 sm:$0xff]  }
  0x5d   :  { %2434 = vmatprep.subr.bf16.mxu1 %v4066_v48  ;;  %v4139_v47 = vld [vmem:[%s5677_s1 + $0x7e4] ss:$12 sps:$4 sm:$0xff]   ;;  %v4134_v48 = vld [vmem:[%s5677_s1 + $0x660] ss:$12 sps:$4 sm:$0xff]  }
  0x5f   :  { %2394 = vmatpush1.bf16.msra.mxu0 %v4061_v50  ;;  %v4137_v50 = vld [vmem:[%s5677_s1 + $0x7e0] ss:$12 sps:$4 sm:$0xff]  }
  0x60   :  { %2435 = vmatpush1.bf16.msra.mxu1 %v4064_v51  ;;  %2395 = vmatprep.subr.bf16.mxu0 %v4069_v52  ;;  %v4142_v51 = vld [vmem:[%s5677_s1 + $0x64c] ss:$12 sps:$4 sm:$0xff]  }
  0x61   :  { %2436 = vmatprep.subr.bf16.mxu1 %v4072_v53  ;;  %v4145_v52 = vld [vmem:[%s5677_s1 + $0x7cc] ss:$12 sps:$4 sm:$0xff]   ;;  %v4140_v53 = vld [vmem:[%s5677_s1 + $0x648] ss:$12 sps:$4 sm:$0xff]  }
  0x63   :  { %2396 = vmatpush2.bf16.msra.mxu0 %v4067_v54  ;;  %v4143_v54 = vld [vmem:[%s5677_s1 + $0x7c8] ss:$12 sps:$4 sm:$0xff]  }
  0x64   :  { %2437 = vmatpush2.bf16.msra.mxu1 %v4070_v55  ;;  %2397 = vmatprep.subr.bf16.mxu0 %v4075_v56  ;;  %v4148_v55 = vld [vmem:[%s5677_s1 + $0x634] ss:$12 sps:$4 sm:$0xff]  }
  0x65   :  { %2438 = vmatprep.subr.bf16.mxu1 %v4078_v57  ;;  %v4151_v56 = vld [vmem:[%s5677_s1 + $0x7b4] ss:$12 sps:$4 sm:$0xff]   ;;  %v4146_v57 = vld [vmem:[%s5677_s1 + $0x630] ss:$12 sps:$4 sm:$0xff]  }
  0x67   :  { %2398 = vmatpush2.bf16.msra.mxu0 %v4073_v58  ;;  %v4149_v58 = vld [vmem:[%s5677_s1 + $0x7b0] ss:$12 sps:$4 sm:$0xff]  }
  0x68   :  { %2439 = vmatpush2.bf16.msra.mxu1 %v4076_v59  ;;  %2399 = vmatprep.subr.bf16.mxu0 %v4081_v61  ;;  %v4154_v59 = vld [vmem:[%s5677_s1 + $0x61c] ss:$12 sps:$4 sm:$0xff]  }
  0x69   :  { %2440 = vmatprep.subr.bf16.mxu1 %v4084_v62  ;;  %v4157_v61 = vld [vmem:[%s5677_s1 + $0x79c] ss:$12 sps:$4 sm:$0xff]   ;;  %v4152_v62 = vld [vmem:[%s5677_s1 + $0x618] ss:$12 sps:$4 sm:$0xff]  }
  0x6b   :  { %2400 = vmatpush2.bf16.msra.mxu0 %v4079_v63  ;;  %v4155_v63 = vld [vmem:[%s5677_s1 + $0x798] ss:$12 sps:$4 sm:$0xff]  }
  0x6c   :  { %2441 = vmatpush2.bf16.msra.mxu1 %v4082_v1  ;;  %2401 = vmatprep.subr.bf16.mxu0 %v4087_v2  ;;  %v4160_v1 = vld [vmem:[%s5677_s1 + $0x604] ss:$12 sps:$4 sm:$0xff]  }
  0x6d   :  { %2442 = vmatprep.subr.bf16.mxu1 %v4090_v3  ;;  %v4163_v2 = vld [vmem:[%s5677_s1 + $0x784] ss:$12 sps:$4 sm:$0xff]   ;;  %v4158_v3 = vld [vmem:[%s5677_s1 + $0x600] ss:$12 sps:$4 sm:$0xff]  }
  0x6f   :  { %2402 = vmatpush2.bf16.msra.mxu0 %v4085_v4  ;;  %v4161_v4 = vld [vmem:[%s5677_s1 + $0x780] ss:$12 sps:$4 sm:$0xff]  }
  0x70   :  { %2443 = vmatpush2.bf16.msra.mxu1 %v4088_v5  ;;  %2403 = vmatprep.subr.bf16.mxu0 %v4093_v7  ;;  %v4166_v5 = vld [vmem:[%s5677_s1 + $0x76c] ss:$12 sps:$4 sm:$0xff]  }
  0x71   :  { %2444 = vmatprep.subr.bf16.mxu1 %v4096_v8  ;;  %v4169_v7 = vld [vmem:[%s5677_s1 + $0x8ec] ss:$12 sps:$4 sm:$0xff]   ;;  %v4164_v8 = vld [vmem:[%s5677_s1 + $0x768] ss:$12 sps:$4 sm:$0xff]  }
  0x73   :  { %2404 = vmatpush2.bf16.msra.mxu0 %v4091_v9  ;;  %v4167_v9 = vld [vmem:[%s5677_s1 + $0x8e8] ss:$12 sps:$4 sm:$0xff]  }
  0x74   :  { %2445 = vmatpush2.bf16.msra.mxu1 %v4094_v10  ;;  %2405 = vmatprep.subr.bf16.mxu0 %v4099_v11  ;;  %v4172_v10 = vld [vmem:[%s5677_s1 + $0x754] ss:$12 sps:$4 sm:$0xff]  }
  0x75   :  { %2446 = vmatprep.subr.bf16.mxu1 %v4102_v12  ;;  %v4175_v11 = vld [vmem:[%s5677_s1 + $0x8d4] ss:$12 sps:$4 sm:$0xff]   ;;  %v4170_v12 = vld [vmem:[%s5677_s1 + $0x750] ss:$12 sps:$4 sm:$0xff]  }
  0x77   :  { %2406 = vmatpush2.bf16.msra.mxu0 %v4097_v14  ;;  %v4173_v14 = vld [vmem:[%s5677_s1 + $0x8d0] ss:$12 sps:$4 sm:$0xff]  }
  0x78   :  { %2447 = vmatpush2.bf16.msra.mxu1 %v4100_v15  ;;  %2407 = vmatprep.subr.bf16.mxu0 %v4105_v16  ;;  %v4178_v15 = vld [vmem:[%s5677_s1 + $0x73c] ss:$12 sps:$4 sm:$0xff]  }
  0x79   :  { %2448 = vmatprep.subr.bf16.mxu1 %v4108_v19  ;;  %v4181_v16 = vld [vmem:[%s5677_s1 + $0x8bc] ss:$12 sps:$4 sm:$0xff]   ;;  %v4176_v19 = vld [vmem:[%s5677_s1 + $0x738] ss:$12 sps:$4 sm:$0xff]  }
  0x7b   :  { %2408 = vmatpush2.bf16.msra.mxu0 %v4103_v20  ;;  %v4179_v20 = vld [vmem:[%s5677_s1 + $0x8b8] ss:$12 sps:$4 sm:$0xff]  }
  0x7c   :  { %2449 = vmatpush2.bf16.msra.mxu1 %v4106_v21  ;;  %2409 = vmatprep.subr.bf16.mxu0 %v4111_v22  ;;  %v4184_v21 = vld [vmem:[%s5677_s1 + $0x724] ss:$12 sps:$4 sm:$0xff]  }
  0x7d   :  { %2450 = vmatprep.subr.bf16.mxu1 %v4114_v24  ;;  %v4187_v22 = vld [vmem:[%s5677_s1 + $0x8a4] ss:$12 sps:$4 sm:$0xff]   ;;  %v4182_v24 = vld [vmem:[%s5677_s1 + $0x720] ss:$12 sps:$4 sm:$0xff]  }
  0x7f   :  { %2410 = vmatpush2.bf16.msra.mxu0 %v4109_v25  ;;  %v4185_v25 = vld [vmem:[%s5677_s1 + $0x8a0] ss:$12 sps:$4 sm:$0xff]  }
  0x80   :  { %2451 = vmatpush2.bf16.msra.mxu1 %v4112_v27  ;;  %2461 = vmatprep.subr.bf16.mxu0 %v4118_v28  ;;  %v4190_v27 = vld [vmem:[%s5677_s1 + $0x70c] ss:$12 sps:$4 sm:$0xff]  }
  0x81   :  { %2502 = vmatprep.subr.bf16.mxu1 %v4121_v29  ;;  %v4193_v28 = vld [vmem:[%s5677_s1 + $0x88c] ss:$12 sps:$4 sm:$0xff]   ;;  %v4188_v29 = vld [vmem:[%s5677_s1 + $0x708] ss:$12 sps:$4 sm:$0xff]  }
  0x82   :  { %2412 = vmatmul.mubr.bf16.vlgmr.msra.gmra.mxu0 %v4853_v26 }
  0x83   :  { %2453 = vmatmul.mubr.bf16.vlgmr.msra.gmra.mxu1 %v4869_v30  ;;  %2462 = vmatpush1.bf16.msra.mxu0 %v4116_v6  ;;  %v4191_v6 = vld [vmem:[%s5677_s1 + $0x888] ss:$12 sps:$4 sm:$0xff]  }
  0x84   :  { %2503 = vmatpush1.bf16.msra.mxu1 %v4119_v31  ;;  %2463 = vmatprep.subr.bf16.mxu0 %v4124_v33  ;;  %v4196_v31 = vld [vmem:[%s5677_s1 + $0x6f4] ss:$12 sps:$4 sm:$0xff]  }
  0x85   :  { %2504 = vmatprep.subr.bf16.mxu1 %v4127_v34  ;;  %2493 = vmatprep.mubr.bf16.mxu0 %v4906_v41  ;;  %v4199_v33 = vld [vmem:[%s5677_s1 + $0x874] ss:$12 sps:$4 sm:$0xff]   ;;  %v4194_v34 = vld [vmem:[%s5677_s1 + $0x6f0] ss:$12 sps:$4 sm:$0xff]  }
  0x86   :  { %2534 = vmatprep.mubr.bf16.mxu1 %v4914_v44 }
  0x87   :  { %2464 = vmatpush1.bf16.msra.mxu0 %v4122_v36  ;;  %v4197_v36 = vld [vmem:[%s5677_s1 + $0x870] ss:$12 sps:$4 sm:$0xff]  }
  0x88   :  { %2505 = vmatpush1.bf16.msra.mxu1 %v4125_v37  ;;  %2465 = vmatprep.subr.bf16.mxu0 %v4130_v39  ;;  %v4202_v37 = vld [vmem:[%s5677_s1 + $0x6dc] ss:$12 sps:$4 sm:$0xff]   ;;  %v4200_v39 = vld [vmem:[%s5677_s1 + $0x6d8] ss:$12 sps:$4 sm:$0xff]  }
  0x89   :  { %2506 = vmatprep.subr.bf16.mxu1 %v4133_v40  ;;  %v505_v40 = vcombine.high %v4877_v32, %v4877_v32  ;;  %v4206_v32 = vld [vmem:[%s5677_s1 + $0x6c0] ss:$12 sps:$4 sm:$0xff]  }
  0x8b   :  { %2466 = vmatpush1.bf16.msra.mxu0 %v4128_v42  ;;  %v4203_v42 = vld [vmem:[%s5677_s1 + $0x858] ss:$12 sps:$4 sm:$0xff]  }
  0x8c   :  { %2507 = vmatpush1.bf16.msra.mxu1 %v4131_v45  ;;  %2467 = vmatprep.subr.bf16.mxu0 %v4136_v46  ;;  %v4208_v45 = vld [vmem:[%s5677_s1 + $0x6c4] ss:$12 sps:$4 sm:$0xff]  }
  0x8d   :  { %2508 = vmatprep.subr.bf16.mxu1 %v4139_v47  ;;  %v4211_v46 = vld [vmem:[%s5677_s1 + $0x844] ss:$12 sps:$4 sm:$0xff]   ;;  %v5076_v47 = vrot.slane %v505_v40, %v4564_v49  ;;  %v4267_v40 = vld [vmem:[%s5677_s1 + $0x200] ss:$12 sps:$4 sm:$0xff]  }
  0x8f   :  { %2468 = vmatpush1.bf16.msra.mxu0 %v4134_v48  ;;  %v4209_v48 = vld [vmem:[%s5677_s1 + $0x840] ss:$12 sps:$4 sm:$0xff]  }
  0x90   :  { %2509 = vmatpush1.bf16.msra.mxu1 %v4137_v50  ;;  %2469 = vmatprep.subr.bf16.mxu0 %v4142_v51  ;;  %v5083_v50 = vrot.slane %v4887_v35, %v4564_v49  ;;  %v4215_v51 = vld [vmem:[%s5677_s1 + $0x9ac] ss:$12 sps:$4 sm:$0xff]   ;;  %v521_v35 = vcombine.high %v5076_v47, %v5076_v47 }
  0x91   :  { %2510 = vmatprep.subr.bf16.mxu1 %v4145_v52  ;;  %v4216_v52 = vld [vmem:[%s5677_s1 + $0x170] ss:$12 sps:$4 sm:$0xff]  }
  0x93   :  { %2470 = vmatpush1.bf16.msra.mxu0 %v4140_v53  ;;  %v4213_v53 = vld [vmem:[%s5677_s1 + $0x9a8] ss:$12 sps:$4 sm:$0xff]  }
  0x94   :  { %2511 = vmatpush1.bf16.msra.mxu1 %v4143_v54  ;;  %2471 = vmatprep.subr.bf16.mxu0 %v4148_v55  ;;  %v5098_v54 = vcombine.high %v5083_v50, %v5083_v50  ;;  %v4217_v55 = vld [vmem:[%s5677_s1 + $0xb0] ss:$12 sps:$4 sm:$0xff]  }
  0x95   :  { %2512 = vmatprep.subr.bf16.mxu1 %v4151_v56  ;;  %v4220_v56 = vld [vmem:[%s5677_s1 + $0x994] ss:$12 sps:$4 sm:$0xff]  }
  0x97   :  { %2472 = vmatpush1.bf16.msra.mxu0 %v4146_v57  ;;  %v4221_v57 = vld [vmem:[%s5677_s1 + $0x158] ss:$12 sps:$4 sm:$0xff]  }
  0x98   :  { %2513 = vmatpush1.bf16.msra.mxu1 %v4149_v58  ;;  %2473 = vmatprep.subr.bf16.mxu0 %v4154_v59  ;;  %v4218_v58 = vld [vmem:[%s5677_s1 + $0x990] ss:$12 sps:$4 sm:$0xff]   ;;  %v5113_v59 = vrot.slane %v521_v35, %v4564_v49  ;;  %v4277_v35 = vld [vmem:[%s5677_s1 + $0x278] ss:$12 sps:$4 sm:$0xff]  }
  0x99   :  { %2514 = vmatprep.subr.bf16.mxu1 %v4157_v61  ;;  %v4222_v61 = vld [vmem:[%s5677_s1 + $0x98] ss:$12 sps:$4 sm:$0xff]  }
  0x9b   :  { %2474 = vmatpush1.bf16.msra.mxu0 %v4152_v62  ;;  %v4225_v62 = vld [vmem:[%s5677_s1 + $0x97c] ss:$12 sps:$4 sm:$0xff]  }
  0x9c   :  { %2515 = vmatpush1.bf16.msra.mxu1 %v4155_v63  ;;  %2475 = vmatprep.subr.bf16.mxu0 %v4160_v1  ;;  %v4226_v63 = vld [vmem:[%s5677_s1 + $0x140] ss:$12 sps:$4 sm:$0xff]   ;;  %v4223_v1 = vld [vmem:[%s5677_s1 + $0x978] ss:$12 sps:$4 sm:$0xff]  }
  0x9d   :  { %2516 = vmatprep.subr.bf16.mxu1 %v4163_v2  ;;  %v4227_v2 = vld [vmem:[%s5677_s1 + $0x80] ss:$12 sps:$4 sm:$0xff]  }
  0x9f   :  { %2476 = vmatpush1.bf16.msra.mxu0 %v4158_v3  ;;  %v4230_v3 = vld [vmem:[%s5677_s1 + $0x964] ss:$12 sps:$4 sm:$0xff]  }
  0xa0   :  { %2517 = vmatpush1.bf16.msra.mxu1 %v4161_v4  ;;  %2477 = vmatprep.subr.bf16.mxu0 %v4166_v5  ;;  %v4231_v4 = vld [vmem:[%s5677_s1 + $0x128] ss:$12 sps:$4 sm:$0xff]  }
  0xa1   :  { %2518 = vmatprep.subr.bf16.mxu1 %v4169_v7  ;;  %v4232_v5 = vld [vmem:[%s5677_s1 + $0x68] ss:$12 sps:$4 sm:$0xff]   ;;  %v4235_v7 = vld [vmem:[%s5677_s1 + $0x94c] ss:$12 sps:$4 sm:$0xff]  }
  0xa3   :  { %2478 = vmatpush2.bf16.msra.mxu0 %v4164_v8  ;;  %v4236_v8 = vld [vmem:[%s5677_s1 + $0x110] ss:$12 sps:$4 sm:$0xff]  }
  0xa4   :  { %2519 = vmatpush2.bf16.msra.mxu1 %v4167_v9  ;;  %2479 = vmatprep.subr.bf16.mxu0 %v4172_v10  ;;  %v4233_v9 = vld [vmem:[%s5677_s1 + $0x948] ss:$12 sps:$4 sm:$0xff]   ;;  %v4237_v10 = vld [vmem:[%s5677_s1 + $0x50] ss:$12 sps:$4 sm:$0xff]  }
  0xa5   :  { %2520 = vmatprep.subr.bf16.mxu1 %v4175_v11  ;;  %v4240_v11 = vld [vmem:[%s5677_s1 + $0x934] ss:$12 sps:$4 sm:$0xff]  }
  0xa7   :  { %2480 = vmatpush2.bf16.msra.mxu0 %v4170_v12  ;;  %v4241_v12 = vld [vmem:[%s5677_s1 + $0xf8] ss:$12 sps:$4 sm:$0xff]  }
  0xa8   :  { %2521 = vmatpush2.bf16.msra.mxu1 %v4173_v14  ;;  %2481 = vmatprep.subr.bf16.mxu0 %v4178_v15  ;;  %v4238_v14 = vld [vmem:[%s5677_s1 + $0x930] ss:$12 sps:$4 sm:$0xff]   ;;  %v4242_v15 = vld [vmem:[%s5677_s1 + $0x38] ss:$12 sps:$4 sm:$0xff]  }
  0xa9   :  { %2522 = vmatprep.subr.bf16.mxu1 %v4181_v16  ;;  %v4245_v16 = vld [vmem:[%s5677_s1 + $0x91c] ss:$12 sps:$4 sm:$0xff]  }
  0xab   :  { %2482 = vmatpush2.bf16.msra.mxu0 %v4176_v19  ;;  %v4246_v19 = vld [vmem:[%s5677_s1 + $0xe0] ss:$12 sps:$4 sm:$0xff]  }
  0xac   :  { %2523 = vmatpush2.bf16.msra.mxu1 %v4179_v20  ;;  %2483 = vmatprep.subr.bf16.mxu0 %v4184_v21  ;;  %v4243_v20 = vld [vmem:[%s5677_s1 + $0x918] ss:$12 sps:$4 sm:$0xff]   ;;  %v4247_v21 = vld [vmem:[%s5677_s1 + $0x20] ss:$12 sps:$4 sm:$0xff]  }
  0xad   :  { %2524 = vmatprep.subr.bf16.mxu1 %v4187_v22  ;;  %v4250_v22 = vld [vmem:[%s5677_s1 + $0x904] ss:$12 sps:$4 sm:$0xff]  }
  0xaf   :  { %2484 = vmatpush2.bf16.msra.mxu0 %v4182_v24  ;;  %v4251_v24 = vld [vmem:[%s5677_s1 + $0xc8] ss:$12 sps:$4 sm:$0xff]  }
  0xb0   :  { %2525 = vmatpush2.bf16.msra.mxu1 %v4185_v25  ;;  %2485 = vmatprep.subr.bf16.mxu0 %v4190_v27  ;;  %v4248_v25 = vld [vmem:[%s5677_s1 + $0x900] ss:$12 sps:$4 sm:$0xff]   ;;  %v4252_v27 = vld [vmem:[%s5677_s1 + $0x8] ss:$12 sps:$4 sm:$0xff]  }
  0xb1   :  { %2526 = vmatprep.subr.bf16.mxu1 %v4193_v28  ;;  %v4255_v28 = vld [vmem:[%s5677_s1 + $0xa0c] ss:$12 sps:$4 sm:$0xff]  }
  0xb3   :  { %2486 = vmatpush2.bf16.msra.mxu0 %v4188_v29  ;;  %v4256_v29 = vld [vmem:[%s5677_s1 + $0x2f0] ss:$12 sps:$4 sm:$0xff]  }
  0xb4   :  { %2527 = vmatpush2.bf16.msra.mxu1 %v4191_v6  ;;  %2487 = vmatprep.subr.bf16.mxu0 %v4196_v31  ;;  %v4253_v6 = vld [vmem:[%s5677_s1 + $0xa08] ss:$12 sps:$4 sm:$0xff]   ;;  %v4257_v31 = vld [vmem:[%s5677_s1 + $0x230] ss:$12 sps:$4 sm:$0xff]  }
  0xb5   :  { %2528 = vmatprep.subr.bf16.mxu1 %v4199_v33  ;;  %v4260_v33 = vld [vmem:[%s5677_s1 + $0x9f4] ss:$12 sps:$4 sm:$0xff]  }
  0xb7   :  { %2488 = vmatpush2.bf16.msra.mxu0 %v4194_v34  ;;  %v4261_v34 = vld [vmem:[%s5677_s1 + $0x2d8] ss:$12 sps:$4 sm:$0xff]  }
  0xb8   :  { %2529 = vmatpush2.bf16.msra.mxu1 %v4197_v36  ;;  %2489 = vmatprep.subr.bf16.mxu0 %v4202_v37  ;;  %v4258_v36 = vld [vmem:[%s5677_s1 + $0x9f0] ss:$12 sps:$4 sm:$0xff]   ;;  %v4262_v37 = vld [vmem:[%s5677_s1 + $0x218] ss:$12 sps:$4 sm:$0xff]  }
  0xb9   :  { %2530 = vmatprep.subr.bf16.mxu1 %v4205_v38  ;;  %v4265_v38 = vld [vmem:[%s5677_s1 + $0x9dc] ss:$12 sps:$4 sm:$0xff]  }
  0xbb   :  { %2490 = vmatpush2.bf16.msra.mxu0 %v4200_v39  ;;  %v4266_v39 = vld [vmem:[%s5677_s1 + $0x2c0] ss:$12 sps:$4 sm:$0xff]  }
  0xbc   :  { %2531 = vmatpush2.bf16.msra.mxu1 %v4203_v42  ;;  %2491 = vmatprep.subr.bf16.mxu0 %v4208_v45  ;;  %v4270_v42 = vld [vmem:[%s5677_s1 + $0x9c4] ss:$12 sps:$4 sm:$0xff]   ;;  %v4268_v45 = vld [vmem:[%s5677_s1 + $0x9c0] ss:$12 sps:$4 sm:$0xff]  }
  0xbd   :  { %2532 = vmatprep.subr.bf16.mxu1 %v4211_v46  ;;  %v4272_v46 = vld [vmem:[%s5677_s1 + $0x1e8] ss:$12 sps:$4 sm:$0xff]  }
  0xbf   :  { %2492 = vmatpush2.bf16.msra.mxu0 %v4206_v32  ;;  %v4273_v32 = vld [vmem:[%s5677_s1 + $0x290] ss:$12 sps:$4 sm:$0xff]  }
  0xc0   :  { %2533 = vmatpush2.bf16.msra.mxu1 %v4209_v48  ;;  %2543 = vmatprep.subr.bf16.mxu0 %v4215_v51  ;;  %v4274_v48 = vld [vmem:[%s5677_s1 + $0x470] ss:$12 sps:$4 sm:$0xff]  }
  0xc1   :  { %3725 = vmatprep.subr.bf16.mxu1 %v4216_v52  ;;  %v4275_v51 = vld [vmem:[%s5677_s1 + $0x1d0] ss:$12 sps:$4 sm:$0xff]   ;;  %v5256_v52 = vrot.slane %v5076_v47, %v4564_v49  ;;  %v4279_v47 = vld [vmem:[%s5677_s1 + $0x1b8] ss:$12 sps:$4 sm:$0xff]  }
  0xc2   :  { %2494 = vmatmul.mubr.bf16.vlgmr.msra.gmra.mxu0 %v5083_v50 }
  0xc3   :  { %2535 = vmatmul.mubr.bf16.vlgmr.msra.gmra.mxu1 %v5098_v54  ;;  %2544 = vmatpush1.bf16.msra.mxu0 %v4213_v53  ;;  %v4276_v53 = vld [vmem:[%s5677_s1 + $0x3b0] ss:$12 sps:$4 sm:$0xff]  }
  0xc4   :  { %3726 = vmatpush3.bf16.msra.mxu1 %v4217_v55  ;;  %2545 = vmatprep.subr.bf16.mxu0 %v4220_v56  ;;  %v4278_v55 = vld [vmem:[%s5677_s1 + $0x458] ss:$12 sps:$4 sm:$0xff]  }
  0xc5   :  { %3727 = vmatprep.subr.bf16.mxu1 %v4221_v57  ;;  %2616 = vmatprep.mubr.bf16.mxu1 %v4592_v60  ;;  %v4228_v60 = vld [vmem:[%s5677_s1 + $0x960] ss:$12 sps:$4 sm:$0xff]   ;;  %v4280_v56 = vld [vmem:[%s5677_s1 + $0x398] ss:$12 sps:$4 sm:$0xff]  }
  0xc6   :  { %3686 = vmatprep.mubr.msk.bf16.mxu0 %vm2293_vm0, %v5113_v59  ;;  %v4281_v57 = vld [vmem:[%s5677_s1 + $0x260] ss:$12 sps:$4 sm:$0xff]  }
  0xc7   :  { %2546 = vmatpush1.bf16.msra.mxu0 %v4218_v58  ;;  %v4282_v58 = vld [vmem:[%s5677_s1 + $0x440] ss:$12 sps:$4 sm:$0xff]  }
  0xc8   :  { %3728 = vmatpush3.bf16.msra.mxu1 %v4222_v61  ;;  %2547 = vmatprep.subr.bf16.mxu0 %v4225_v62  ;;  %v4283_v61 = vld [vmem:[%s5677_s1 + $0x1a0] ss:$12 sps:$4 sm:$0xff]  }
  0xc9   :  { %3729 = vmatprep.subr.bf16.mxu1 %v4226_v63  ;;  %v4284_v62 = vld [vmem:[%s5677_s1 + $0x380] ss:$12 sps:$4 sm:$0xff]   ;;  %v4285_v63 = vld [vmem:[%s5677_s1 + $0x248] ss:$12 sps:$4 sm:$0xff]  }
  0xcb   :  { %2548 = vmatpush1.bf16.msra.mxu0 %v4223_v1  ;;  %v4286_v1 = vld [vmem:[%s5677_s1 + $0x428] ss:$12 sps:$4 sm:$0xff]  }
  0xcc   :  { %3730 = vmatpush3.bf16.msra.mxu1 %v4227_v2  ;;  %2549 = vmatprep.subr.bf16.mxu0 %v4230_v3  ;;  %v4287_v2 = vld [vmem:[%s5677_s1 + $0x188] ss:$12 sps:$4 sm:$0xff]   ;;  %v4289_v3 = vld [vmem:[%s5677_s1 + $0x410] ss:$12 sps:$4 sm:$0xff]  }
  0xcd   :  { %3731 = vmatprep.subr.bf16.mxu1 %v4231_v4  ;;  %v4290_v4 = vld [vmem:[%s5677_s1 + $0x5f0] ss:$12 sps:$4 sm:$0xff]  }
  0xcf   :  { %2550 = vmatpush1.bf16.msra.mxu0 %v4228_v60  ;;  %v4291_v60 = vld [vmem:[%s5677_s1 + $0x350] ss:$12 sps:$4 sm:$0xff]  }
  0xd0   :  { %3732 = vmatpush3.bf16.msra.mxu1 %v4232_v5  ;;  %2551 = vmatprep.subr.bf16.mxu0 %v4235_v7  ;;  %v4292_v5 = vld [vmem:[%s5677_s1 + $0x530] ss:$12 sps:$4 sm:$0xff]   ;;  %v4293_v7 = vld [vmem:[%s5677_s1 + $0x3f8] ss:$12 sps:$4 sm:$0xff]  }
  0xd1   :  { %3733 = vmatprep.subr.bf16.mxu1 %v4236_v8  ;;  %v4294_v8 = vld [vmem:[%s5677_s1 + $0x5d8] ss:$12 sps:$4 sm:$0xff]  }
  0xd3   :  { %2552 = vmatpush1.bf16.msra.mxu0 %v4233_v9  ;;  %v4295_v9 = vld [vmem:[%s5677_s1 + $0x338] ss:$12 sps:$4 sm:$0xff]  }
  0xd4   :  { %3734 = vmatpush3.bf16.msra.mxu1 %v4237_v10  ;;  %2553 = vmatprep.subr.bf16.mxu0 %v4240_v11 }
  0xd5   :  { %3735 = vmatprep.subr.bf16.mxu1 %v4241_v12  ;;  %v4296_v12 = vld [vmem:[%s5677_s1 + $0x518] ss:$12 sps:$4 sm:$0xff]  }
  0xd7   :  { %2554 = vmatpush1.bf16.msra.mxu0 %v4238_v14 }
  0xd8   :  { %3736 = vmatpush3.bf16.msra.mxu1 %v4242_v15  ;;  %2555 = vmatprep.subr.bf16.mxu0 %v4245_v16  ;;  %v4297_v15 = vld [vmem:[%s5677_s1 + $0x3e0] ss:$12 sps:$4 sm:$0xff]  }
  0xd9   :  { %3737 = vmatprep.subr.bf16.mxu1 %v4246_v19 }
  0xdb   :  { %2556 = vmatpush1.bf16.msra.mxu0 %v4243_v20 }
  0xdc   :  { %3738 = vmatpush3.bf16.msra.mxu1 %v4247_v21  ;;  %2557 = vmatprep.subr.bf16.mxu0 %v4250_v22  ;;  %v4299_v21 = vld [vmem:[%s5677_s1 + $0x320] ss:$12 sps:$4 sm:$0xff]  }
  0xdd   :  { %3739 = vmatprep.subr.bf16.mxu1 %v4251_v24  ;;  %v4300_v24 = vld [vmem:[%s5677_s1 + $0x500] ss:$12 sps:$4 sm:$0xff]  }
  0xdf   :  { %2558 = vmatpush1.bf16.msra.mxu0 %v4248_v25 }
  0xe0   :  { %3740 = vmatpush3.bf16.msra.mxu1 %v4252_v27  ;;  %2567 = vmatprep.subr.bf16.mxu0 %v4255_v28  ;;  %v4301_v27 = vld [vmem:[%s5677_s1 + $0x3c8] ss:$12 sps:$4 sm:$0xff]  }
  0xe1   :  { %3747 = vmatprep.subr.bf16.mxu1 %v4256_v29  ;;  %v4302_v29 = vld [vmem:[%s5677_s1 + $0x5a8] ss:$12 sps:$4 sm:$0xff]  }
  0xe3   :  { %2617 = vmatmul.mubr.bf16.vlgmr.msra.gmra.mxu1 %v4642_v13  ;;  %2568 = vmatpush2.bf16.msra.mxu0 %v4253_v6  ;;  %v4263_v13 = vld [vmem:[%s5677_s1 + $0x9d8] ss:$12 sps:$4 sm:$0xff]   ;;  %v4303_v6 = vld [vmem:[%s5677_s1 + $0x308] ss:$12 sps:$4 sm:$0xff]  }
  0xe4   :  { %3748 = vmatpush3.bf16.msra.mxu1 %v4257_v31  ;;  %2569 = vmatprep.subr.bf16.mxu0 %v4260_v33  ;;  %v4304_v31 = vld [vmem:[%s5677_s1 + $0x4e8] ss:$12 sps:$4 sm:$0xff]   ;;  %v4305_v33 = vld [vmem:[%s5677_s1 + $0x590] ss:$12 sps:$4 sm:$0xff]  }
  0xe5   :  { %3749 = vmatprep.subr.bf16.mxu1 %v4261_v34  ;;  %2656 = vmatprep.mubr.bf16.mxu1 %v4605_v0  ;;  %v4271_v0 = vld [vmem:[%s5677_s1 + $0x2a8] ss:$12 sps:$4 sm:$0xff]   ;;  %v4306_v34 = vld [vmem:[%s5677_s1 + $0x770] ss:$12 sps:$4 sm:$0xff]  }
  0xe7   :  { %2570 = vmatpush2.bf16.msra.mxu0 %v4258_v36  ;;  %v4307_v36 = vld [vmem:[%s5677_s1 + $0x4d0] ss:$12 sps:$4 sm:$0xff]  }
  0xe8   :  { %3750 = vmatpush3.bf16.msra.mxu1 %v4262_v37  ;;  %2571 = vmatprep.subr.bf16.mxu0 %v4265_v38  ;;  %v4308_v37 = vld [vmem:[%s5677_s1 + $0x6b0] ss:$12 sps:$4 sm:$0xff]   ;;  %v4309_v38 = vld [vmem:[%s5677_s1 + $0x578] ss:$12 sps:$4 sm:$0xff]  }
  0xe9   :  { %3751 = vmatprep.subr.bf16.mxu1 %v4266_v39  ;;  %v4310_v39 = vld [vmem:[%s5677_s1 + $0x758] ss:$12 sps:$4 sm:$0xff]  }
  0xeb   :  { %2572 = vmatpush2.bf16.msra.mxu0 %v4263_v13  ;;  %v4311_v13 = vld [vmem:[%s5677_s1 + $0x4b8] ss:$12 sps:$4 sm:$0xff]  }
  0xec   :  { %3752 = vmatpush3.bf16.msra.mxu1 %v4267_v40  ;;  %2573 = vmatprep.subr.bf16.mxu0 %v4270_v42  ;;  %v4312_v40 = vld [vmem:[%s5677_s1 + $0x698] ss:$12 sps:$4 sm:$0xff]   ;;  %v4313_v42 = vld [vmem:[%s5677_s1 + $0x560] ss:$12 sps:$4 sm:$0xff]  }
  0xed   :  { %3753 = vmatprep.subr.bf16.mxu1 %v4271_v0  ;;  %v4315_v0 = vld [vmem:[%s5677_s1 + $0x4a0] ss:$12 sps:$4 sm:$0xff]  }
  0xef   :  { %2574 = vmatpush2.bf16.msra.mxu0 %v4268_v45  ;;  %v4316_v45 = vld [vmem:[%s5677_s1 + $0x680] ss:$12 sps:$4 sm:$0xff]  }
  0xf0   :  { %3754 = vmatpush3.bf16.msra.mxu1 %v4272_v46  ;;  %3769 = vmatprep.subr.bf16.mxu0 %v4274_v48  ;;  %v4317_v46 = vld [vmem:[%s5677_s1 + $0x548] ss:$12 sps:$4 sm:$0xff]  }
  0xf1   :  { %3755 = vmatprep.subr.bf16.mxu1 %v4273_v32  ;;  %v4318_v32 = vld [vmem:[%s5677_s1 + $0x728] ss:$12 sps:$4 sm:$0xff]  }
  0xf2   :  { %2576 = vmatmul.mubr.bf16.vlgmr.msra.gmra.mxu0 %v5256_v52  ;;  %v4320_v48 = vld [vmem:[%s5677_s1 + $0x668] ss:$12 sps:$4 sm:$0xff]  }
  0xf3   :  { %3770 = vmatpush3.bf16.msra.mxu0 %v4276_v53  ;;  %2696 = vmatprep.mubr.bf16.mxu0 %v4654_v17  ;;  %v4288_v17 = vld [vmem:[%s5677_s1 + $0x368] ss:$12 sps:$4 sm:$0xff]   ;;  %v4322_v53 = vld [vmem:[%s5677_s1 + $0x8f0] ss:$12 sps:$4 sm:$0xff]  }
  0xf4   :  { %3756 = vmatpush3.bf16.msra.mxu1 %v4275_v51  ;;  %3771 = vmatprep.subr.bf16.mxu0 %v4278_v55  ;;  %v4321_v51 = vld [vmem:[%s5677_s1 + $0x710] ss:$12 sps:$4 sm:$0xff]  }
  0xf5   :  { %3757 = vmatprep.subr.bf16.mxu1 %v4277_v35  ;;  %v4323_v35 = vld [vmem:[%s5677_s1 + $0x650] ss:$12 sps:$4 sm:$0xff]  }
  0xf6   :  { %v4324_v55 = vld [vmem:[%s5677_s1 + $0x830] ss:$12 sps:$4 sm:$0xff]  }
  0xf7   :  { %3772 = vmatpush3.bf16.msra.mxu0 %v4280_v56  ;;  %v4326_v56 = vld [vmem:[%s5677_s1 + $0x8d8] ss:$12 sps:$4 sm:$0xff]  }
  0xf8   :  { %3758 = vmatpush3.bf16.msra.mxu1 %v4279_v47  ;;  %3773 = vmatprep.subr.bf16.mxu0 %v4282_v58  ;;  %v4325_v47 = vld [vmem:[%s5677_s1 + $0x6f8] ss:$12 sps:$4 sm:$0xff]  }
  0xf9   :  { %3759 = vmatprep.subr.bf16.mxu1 %v4281_v57  ;;  %v4327_v57 = vld [vmem:[%s5677_s1 + $0x638] ss:$12 sps:$4 sm:$0xff]  }
  0xfa   :  { %v4328_v58 = vld [vmem:[%s5677_s1 + $0x818] ss:$12 sps:$4 sm:$0xff]  }
  0xfb   :  { %3774 = vmatpush3.bf16.msra.mxu0 %v4284_v62  ;;  %v4331_v62 = vld [vmem:[%s5677_s1 + $0x620] ss:$12 sps:$4 sm:$0xff]  }
  0xfc   :  { %3760 = vmatpush3.bf16.msra.mxu1 %v4283_v61  ;;  %3775 = vmatprep.subr.bf16.mxu0 %v4286_v1  ;;  %v4329_v61 = vld [vmem:[%s5677_s1 + $0x6e0] ss:$12 sps:$4 sm:$0xff]   ;;  %v4333_v1 = vld [vmem:[%s5677_s1 + $0x6c8] ss:$12 sps:$4 sm:$0xff]  }
  0xfd   :  { %3761 = vmatprep.subr.bf16.mxu1 %v4285_v63  ;;  %v4332_v63 = vld [vmem:[%s5677_s1 + $0x800] ss:$12 sps:$4 sm:$0xff]  }
  0xff   :  { %3776 = vmatpush3.bf16.msra.mxu0 %v4288_v17  ;;  %v4336_v17 = vld [vmem:[%s5677_s1 + $0x7e8] ss:$12 sps:$4 sm:$0xff]  }
 0x100   :  { %3762 = vmatpush3.bf16.msra.mxu1 %v4287_v2  ;;  %3777 = vmatprep.subr.bf16.mxu0 %v4289_v3  ;;  %v4335_v2 = vld [vmem:[%s5677_s1 + $0x608] ss:$12 sps:$4 sm:$0xff]   ;;  %v4337_v3 = vld [vmem:[%s5677_s1 + $0x890] ss:$12 sps:$4 sm:$0xff]  }
 0x101   :  { %3791 = vmatprep.subr.bf16.mxu1 %v4290_v4  ;;  %v4338_v4 = vld [vmem:[%s5677_s1 + $0x7d0] ss:$12 sps:$4 sm:$0xff]  }
 0x102   :  { %v2331_v10 = vpop.f32.mrf.mxu0 }
 0x103   :  { %v2372_v11 = vpop.f32.mrf.mxu1  ;;  %2657 = vmatmul.mubr.bf16.vlgmr.msra.gmra.mxu1 %v4658_v18  ;;  %3778 = vmatpush3.bf16.msra.mxu0 %v4291_v60  ;;  %v4298_v18 = vld [vmem:[%s5677_s1 + $0x5c0] ss:$12 sps:$4 sm:$0xff]   ;;  %v4339_v60 = vld [vmem:[%s5677_s1 + $0x9b0] ss:$12 sps:$4 sm:$0xff]  }
 0x104   :  { %v5324_v14 = vadd.f32 %v2372_v11, %v2331_v10  ;;  %3792 = vmatpush3.bf16.msra.mxu1 %v4292_v5  ;;  %v2333_v16 = vpop.f32.mrf.mxu0  ;;  %3779 = vmatprep.subr.bf16.mxu0 %v4293_v7  ;;  %v4395_v5 = vmov 0   ;;  %v4340_v7 = vld [vmem:[%s5677_s1 + $0x878] ss:$12 sps:$4 sm:$0xff]   ;;  %v4343_v10 = vld [vmem:[%s5677_s1 + $0x860] ss:$12 sps:$4 sm:$0xff]  }
 0x105   :  { %v2374_v19 = vpop.f32.mrf.mxu1  ;;  %3793 = vmatprep.subr.bf16.mxu1 %v4294_v8  ;;  %2736 = vmatprep.mubr.bf16.mxu1 %v4674_v23  ;;  %v4341_v8 = vld [vmem:[%s5677_s1 + $0x7b8] ss:$12 sps:$4 sm:$0xff]   ;;  %v4344_v11 = vld [vmem:[%s5677_s1 + $0x7a0] ss:$12 sps:$4 sm:$0xff]  }
 0x106   :  { %v5332_v20 = vadd.f32 %v2374_v19, %v2333_v16  ;;  %v2335_v22 = vpop.f32.mrf.mxu0  ;;  %v4347_v16 = vld [vmem:[%s5677_s1 + $0x788] ss:$12 sps:$4 sm:$0xff]  }
 0x107   :  { %v2376_v25 = vpop.f32.mrf.mxu1  ;;  %3780 = vmatpush3.bf16.msra.mxu0 %v4295_v9  ;;  %v4342_v9 = vld [vmem:[%s5677_s1 + $0x998] ss:$12 sps:$4 sm:$0xff]   ;;  %v4348_v19 = vld [vmem:[%s5677_s1 + $0x968] ss:$12 sps:$4 sm:$0xff]   ;;  %v4349_v22 = vld [vmem:[%s5677_s1 + $0x950] ss:$12 sps:$4 sm:$0xff]  }
 0x108   :  { %3794 = vmatpush3.bf16.msra.mxu1 %v4296_v12  ;;  %v2336_v28 = vpop.f32.mrf.mxu0  ;;  %3781 = vmatprep.subr.bf16.mxu0 %v4297_v15  ;;  %v4345_v12 = vld [vmem:[%s5677_s1 + $0x980] ss:$12 sps:$4 sm:$0xff]   ;;  %v4356_v25 = vld [vmem:[%s5679_s3 + $0x70] sm:$0xff]  }
 0x109   :  { %3795 = vmatprep.subr.bf16.mxu1 %v4298_v18  ;;  %v2377_v23 = vpop.f32.mrf.mxu1  ;;  %v4353_v18 = vld [vmem:[%s5679_s3 + $0x78] sm:$0xff]  }
 0x10b   :  { %3782 = vmatpush3.bf16.msra.mxu0 %v4299_v21 }
 0x10c   :  { %3796 = vmatpush3.bf16.msra.mxu1 %v4300_v24  ;;  %3783 = vmatprep.subr.bf16.mxu0 %v4301_v27  ;;  %v4355_v24 = vld [vmem:[%s5679_s3 + $0x38] sm:$0xff]  }
 0x10d   :  { %3797 = vmatprep.subr.bf16.mxu1 %v4302_v29 }
 0x10f   :  { %3784 = vmatpush3.bf16.msra.mxu0 %v4303_v6  ;;  %v4350_v6 = vld [vmem:[%s5677_s1 + $0x938] ss:$12 sps:$4 sm:$0xff]  }
 0x110   :  { %3798 = vmatpush3.bf16.msra.mxu1 %v4304_v31  ;;  %3813 = vmatprep.subr.bf16.mxu0 %v4306_v34  ;;  %v4358_v31 = vld [vmem:[%s5679_s3 + $0x30] sm:$0xff]  }
 0x111   :  { %3799 = vmatprep.subr.bf16.mxu1 %v4305_v33 }
 0x112   :  { %2697 = vmatmul.mubr.bf16.vlgmr.msra.gmra.mxu0 %v4853_v26  ;;  %v4314_v26 = vld [vmem:[%s5677_s1 + $0x740] ss:$12 sps:$4 sm:$0xff]  }
 0x113   :  { %3814 = vmatpush3.bf16.msra.mxu0 %v4308_v37  ;;  %2776 = vmatprep.mubr.bf16.mxu0 %v4906_v41  ;;  %v4319_v41 = vld [vmem:[%s5677_s1 + $0x488] ss:$12 sps:$4 sm:$0xff]  }
 0x114   :  { %3800 = vmatpush3.bf16.msra.mxu1 %v4307_v36  ;;  %3815 = vmatprep.subr.bf16.mxu0 %v4310_v39 }
 0x115   :  { %3801 = vmatprep.subr.bf16.mxu1 %v4309_v38 }
 0x117   :  { %3816 = vmatpush3.bf16.msra.mxu0 %v4312_v40  ;;  %v4361_v40 = vld [vmem:[%s5679_s3 + $0x28] sm:$0xff]  }
 0x118   :  { %3802 = vmatpush3.bf16.msra.mxu1 %v4311_v13  ;;  %3817 = vmatprep.subr.bf16.mxu0 %v4314_v26  ;;  %v4351_v13 = vld [vmem:[%s5677_s1 + $0x920] ss:$12 sps:$4 sm:$0xff]  }
 0x119   :  { %3803 = vmatprep.subr.bf16.mxu1 %v4313_v42  ;;  %v4362_v26 = vld [vmem:[%s5679_s3 + $0x60] sm:$0xff]  }
 0x11b   :  { %3818 = vmatpush3.bf16.msra.mxu0 %v4316_v45  ;;  %v4364_v45 = vld [vmem:[%s5679_s3 + $0x20] sm:$0xff]  }
 0x11c   :  { %3804 = vmatpush3.bf16.msra.mxu1 %v4315_v0  ;;  %3819 = vmatprep.subr.bf16.mxu0 %v4318_v32  ;;  %v4352_v0 = vld [vmem:[%s5677_s1 + $0x908] ss:$12 sps:$4 sm:$0xff]   ;;  %v4354_v32 = vld [vmem:[%s5677_s1 + $0xa10] ss:$12 sps:$4 sm:$0xff]  }
 0x11d   :  { %3805 = vmatprep.subr.bf16.mxu1 %v4317_v46  ;;  %v4365_v46 = vld [vmem:[%s5679_s3 + $0x58] sm:$0xff]  }
 0x11f   :  { %3820 = vmatpush3.bf16.msra.mxu0 %v4320_v48  ;;  %v4369_v48 = vld [vmem:[%s5679_s3 + $0x50] sm:$0xff]  }
 0x120   :  { %3806 = vmatpush3.bf16.msra.mxu1 %v4319_v41  ;;  %3821 = vmatprep.subr.bf16.mxu0 %v4321_v51  ;;  %v4367_v41 = vld [vmem:[%s5679_s3 + $0x18] sm:$0xff]  }
 0x121   :  { %3835 = vmatprep.subr.bf16.mxu1 %v4322_v53  ;;  %v4357_v51 = vld [vmem:[%s5677_s1 + $0x9f8] ss:$12 sps:$4 sm:$0xff]   ;;  %v4371_v53 = vld [vmem:[%s5679_s3 + $0x10] sm:$0xff]  }
 0x123   :  { %2737 = vmatmul.mubr.bf16.vlgmr.msra.gmra.mxu1 %v4869_v30  ;;  %3822 = vmatpush3.bf16.msra.mxu0 %v4323_v35  ;;  %v4330_v30 = vld [vmem:[%s5677_s1 + $0x8c0] ss:$12 sps:$4 sm:$0xff]  }
 0x124   :  { %3836 = vmatpush3.bf16.msra.mxu1 %v4324_v55  ;;  %3823 = vmatprep.subr.bf16.mxu0 %v4325_v47  ;;  %v4373_v35 = vld [vmem:[%s5679_s3 + $0x48] sm:$0xff]  }
 0x125   :  { %3837 = vmatprep.subr.bf16.mxu1 %v4326_v56  ;;  %2816 = vmatprep.mubr.bf16.mxu1 %v4914_v44  ;;  %v4334_v44 = vld [vmem:[%s5677_s1 + $0x8a8] ss:$12 sps:$4 sm:$0xff]   ;;  %v4360_v55 = vld [vmem:[%s5677_s1 + $0x9e0] ss:$12 sps:$4 sm:$0xff]  }
 0x126   :  { %v4375_v47 = vld [vmem:[%s5679_s3 + $0x8] sm:$0xff]   ;;  %v4377_v56 = vld [vmem:[%s5679_s3 + $0x40] sm:$0xff]  }
 0x127   :  { %3824 = vmatpush3.bf16.msra.mxu0 %v4327_v57  ;;  %v4363_v57 = vld [vmem:[%s5677_s1 + $0x9c8] ss:$12 sps:$4 sm:$0xff]  }
 0x128   :  { %3838 = vmatpush3.bf16.msra.mxu1 %v4328_v58  ;;  %3825 = vmatprep.subr.bf16.mxu0 %v4329_v61  ;;  %v4379_v58 = vld [vmem:[%s5679_s3] sm:$0xff]   ;;  %v4366_v61 = vld [vmem:[%s5679_s3 + $0xf8] sm:$0xff]  }
 0x129   :  { %3839 = vmatprep.subr.bf16.mxu1 %v4330_v30 }
 0x12b   :  { %3826 = vmatpush3.bf16.msra.mxu0 %v4331_v62  ;;  %v4368_v62 = vld [vmem:[%s5679_s3 + $0xb8] sm:$0xff]  }
 0x12c   :  { %3840 = vmatpush3.bf16.msra.mxu1 %v4332_v63  ;;  %3827 = vmatprep.subr.bf16.mxu0 %v4333_v1  ;;  %v4384_v63 = vld [vmem:[%s5679_s3 + $0x118] sm:$0xff]   ;;  %v4370_v1 = vld [vmem:[%s5679_s3 + $0xf0] sm:$0xff]  }
 0x12d   :  { %3841 = vmatprep.subr.bf16.mxu1 %v4334_v44  ;;  %v4396_v44 = vmov 0.0  }
 0x12f   :  { %3828 = vmatpush3.bf16.msra.mxu0 %v4335_v2 }
 0x130   :  { %3842 = vmatpush3.bf16.msra.mxu1 %v4336_v17  ;;  %2824 = vmatprep.subr.bf16.mxu0 %v4395_v5  ;;  %v4372_v17 = vld [vmem:[%s5679_s3 + $0xb0] sm:$0xff]  }
 0x131   :  { %3843 = vmatprep.subr.bf16.mxu1 %v4337_v3  ;;  %v4387_v3 = vld [vmem:[%s5679_s3 + $0x110] sm:$0xff]  }
 0x132   :  { %2777 = vmatmul.mubr.bf16.vlgmr.msra.gmra.mxu0 %v5083_v50  ;;  %v5482_v50 = vld [vmem:[%s5680_s2] sm:$0x1f] }
 0x133   :  { %2825 = vmatpush1.bf16.msra.mxu0 %v4339_v60  ;;  %3687 = vmatprep.mubr.msk.bf16.mxu0 %vm2293_vm0, %v5113_v59  ;;  %v4346_v59 = vld [vmem:[%s5677_s1 + $0x848] ss:$12 sps:$4 sm:$0xff]   ;;  %v5496_v15 = vrot.slane %v5482_v50, %v4564_v49 }
 0x134   :  { %3844 = vmatpush3.bf16.msra.mxu1 %v4338_v4  ;;  %2826 = vmatprep.subr.bf16.mxu0 %v4395_v5  ;;  %v4374_v4 = vld [vmem:[%s5679_s3 + $0xe8] sm:$0xff]  }
 0x135   :  { %3845 = vmatprep.subr.bf16.mxu1 %v4340_v7  ;;  %v2983_v21 = vcombine.high %v5496_v15, %v5496_v15  ;;  %v2990_v30 = vrot.slane %v5496_v15, %v4564_v49  ;;  %v4376_v60 = vld [vmem:[%s5679_s3 + $0xa8] sm:$0xff]   ;;  %v4378_v7 = vld [vmem:[%s5679_s3 + $0xe0] sm:$0xff]   ;;  %v4386_v15 = vld [vmem:[%s5679_s3 + $0x90] sm:$0xff]  }
 0x137   :  { %2827 = vmatpush1.bf16.msra.mxu0 %v4342_v9  ;;  %v5521_v27 = vrot.slane %v2983_v21, %v4564_v49  ;;  %v4380_v9 = vld [vmem:[%s5679_s3 + $0xa0] sm:$0xff]   ;;  %v3005_v21 = vcombine.high %v2990_v30, %v2990_v30 }
 0x138   :  { %3846 = vmatpush3.bf16.msra.mxu1 %v4341_v8  ;;  %2828 = vmatprep.subr.bf16.mxu0 %v4395_v5 }
 0x139   :  { %3847 = vmatprep.subr.bf16.mxu1 %v4343_v10  ;;  %v3006_v2 = vcombine.high %v5521_v27, %v5521_v27  ;;  %v4393_v10 = vld [vmem:[%s5679_s3 + $0x100] sm:$0xff]  }
 0x13b   :  { %2829 = vmatpush1.bf16.msra.mxu0 %v4345_v12  ;;  %v4383_v12 = vld [vmem:[%s5679_s3 + $0x98] sm:$0xff]  }
 0x13c   :  { %3848 = vmatpush3.bf16.msra.mxu1 %v4344_v11  ;;  %2830 = vmatprep.subr.bf16.mxu0 %v4395_v5 }
 0x13d   :  { %3849 = vmatprep.subr.bf16.mxu1 %v4346_v59  ;;  %v4385_v59 = vld [vmem:[%s5679_s3 + $0xd0] sm:$0xff]  }
 0x13f   :  { %2831 = vmatpush1.bf16.msra.mxu0 %v4348_v19  ;;  %v4391_v19 = vld [vmem:[%s5679_s3 + $0xc0] sm:$0xff]  }
 0x140   :  { %3850 = vmatpush3.bf16.msra.mxu1 %v4347_v16  ;;  %2832 = vmatprep.subr.bf16.mxu0 %v4395_v5  ;;  %v4389_v16 = vld [vmem:[%s5679_s3 + $0x88] sm:$0xff]  }
 0x141   :  { %3857 = vmatprep.subr.bf16.mxu1 %v4353_v18  ;;  %v4392_v18 = vld [vmem:[%s5679_s3 + $0x80] sm:$0xff]  }
 0x142   :  { %v2413_v28 = vpop.f32.mrf.mxu0 }
 0x143   :  { %2817 = vmatmul.mubr.bf16.vlgmr.msra.gmra.mxu1 %v5098_v54  ;;  %v2454_v29 = vpop.f32.mrf.mxu1  ;;  %v2414_v23 = vadd.f32 %v2413_v28, %v5324_v14  ;;  %2833 = vmatpush1.bf16.msra.mxu0 %v4349_v22  ;;  %v4359_v54 = vld [vmem:[%s5679_s3 + $0x68] sm:$0xff]  }
 0x144   :  { %3858 = vmatpush3.bf16.msra.mxu1 %v4355_v24  ;;  %v2415_v33 = vpop.f32.mrf.mxu0  ;;  %2834 = vmatprep.subr.bf16.mxu0 %v4395_v5 }
 0x145   :  { %v2456_v34 = vpop.f32.mrf.mxu1  ;;  %3859 = vmatprep.subr.bf16.mxu1 %v4356_v25  ;;  %v2416_v14 = vadd.f32 %v2415_v33, %v5332_v20  ;;  %v5536_v36 = vadd.f32 %v2454_v29, %v2414_v23  ;;  %3262 = vmatprep.mubr.bf16.mxu1 %v5521_v27 }
 0x146   :  { %v2417_v37 = vpop.f32.mrf.mxu0 }
 0x147   :  { %v2458_v38 = vpop.f32.mrf.mxu1  ;;  %v5539_v39 = vadd.f32 %v2456_v34, %v2416_v14  ;;  %2835 = vmatpush1.bf16.msra.mxu0 %v4350_v6 }
 0x148   :  { %3860 = vmatpush3.bf16.msra.mxu1 %v4358_v31  ;;  %v2418_v42 = vpop.f32.mrf.mxu0  ;;  %2836 = vmatprep.subr.bf16.mxu0 %v4395_v5 }
 0x149   :  { %v2459_v20 = vpop.f32.mrf.mxu1  ;;  %3861 = vmatprep.subr.bf16.mxu1 %v4359_v54 }
 0x14b   :  { %2837 = vmatpush1.bf16.msra.mxu0 %v4351_v13 }
 0x14c   :  { %3862 = vmatpush3.bf16.msra.mxu1 %v4361_v40  ;;  %2838 = vmatprep.subr.bf16.mxu0 %v4395_v5 }
 0x14d   :  { %3863 = vmatprep.subr.bf16.mxu1 %v4362_v26 }
 0x14f   :  { %2839 = vmatpush1.bf16.msra.mxu0 %v4352_v0 }
 0x150   :  { %3864 = vmatpush3.bf16.msra.mxu1 %v4364_v45  ;;  %2848 = vmatprep.subr.bf16.mxu0 %v4395_v5 }
 0x151   :  { %3865 = vmatprep.subr.bf16.mxu1 %v4365_v46 }
 0x153   :  { %2849 = vmatpush2.bf16.msra.mxu0 %v4354_v32 }
 0x154   :  { %3866 = vmatpush3.bf16.msra.mxu1 %v4367_v41  ;;  %2850 = vmatprep.subr.bf16.mxu0 %v4395_v5 }
 0x155   :  { %3867 = vmatprep.subr.bf16.mxu1 %v4369_v48 }
 0x157   :  { %2851 = vmatpush2.bf16.msra.mxu0 %v4357_v51 }
 0x158   :  { %3868 = vmatpush3.bf16.msra.mxu1 %v4371_v53  ;;  %2852 = vmatprep.subr.bf16.mxu0 %v4395_v5 }
 0x159   :  { %3869 = vmatprep.subr.bf16.mxu1 %v4373_v35 }
 0x15b   :  { %2853 = vmatpush2.bf16.msra.mxu0 %v4360_v55 }
 0x15c   :  { %3870 = vmatpush3.bf16.msra.mxu1 %v4375_v47  ;;  %2854 = vmatprep.subr.bf16.mxu0 %v4395_v5  ;;  %v4390_v5 = vld [vmem:[%s5679_s3 + $0x108] sm:$0xff]  }
 0x15d   :  { %3871 = vmatprep.subr.bf16.mxu1 %v4377_v56 }
 0x15f   :  { %2855 = vmatpush2.bf16.msra.mxu0 %v4363_v57 }
 0x160   :  { %3872 = vmatpush3.bf16.msra.mxu1 %v4379_v58  ;;  %3879 = vmatprep.subr.bf16.mxu0 %v4366_v61 }
 0x161   :  { %3906 = vmatprep.subr.bf16.mxu1 %v4396_v44 }
 0x162   :  { %2857 = vmatmul.mubr.bf16.vlgmr.msra.gmra.mxu0 %v5256_v52  ;;  %v2968_v52 = vcombine.high %v5482_v50, %v5482_v50  ;;  %v4382_v50 = vld [vmem:[%s5679_s3 + $0xd8] sm:$0xff]  }
 0x163   :  { %3263 = vmatmul.mubr.bf16.vlgmr.msra.gmra.mxu1 %v2990_v30  ;;  %3880 = vmatpush3.bf16.msra.mxu0 %v4368_v62 }
 0x164   :  { %3907 = vmatpush3.bf16.msra.mxu1 %v4384_v63  ;;  %3881 = vmatprep.subr.bf16.mxu0 %v4370_v1  ;;  %v2982_v8 = vrot.slane %v2968_v52, %v4564_v49 }
 0x165   :  { %3908 = vmatprep.subr.bf16.mxu1 %v4396_v44  ;;  %3302 = vmatprep.mubr.bf16.mxu0 %v3006_v2 }
 0x166   :  { %3914 = vmatprep.mubr.msk.bf16.mxu1 %vm4397_vm1, %v4396_v44  ;;  %v2997_v11 = vrot.slane %v2982_v8, %v4564_v49  ;;  %v4388_v49 = vld [vmem:[%s5679_s3 + $0xc8] sm:$0xff]  }
 0x167   :  { %3882 = vmatpush3.bf16.msra.mxu0 %v4372_v17 }
 0x168   :  { %3909 = vmatpush3.bf16.msra.mxu1 %v4387_v3  ;;  %3883 = vmatprep.subr.bf16.mxu0 %v4374_v4 }
 0x169   :  { %3910 = vmatprep.subr.bf16.mxu1 %v4396_v44 }
 0x16b   :  { %3884 = vmatpush3.bf16.msra.mxu0 %v4376_v60 }
 0x16c   :  { %3911 = vmatpush3.bf16.msra.mxu1 %v4390_v5  ;;  %3885 = vmatprep.subr.bf16.mxu0 %v4378_v7 }
 0x16d   :  { %3912 = vmatprep.subr.bf16.mxu1 %v4396_v44 }
 0x16f   :  { %3886 = vmatpush3.bf16.msra.mxu0 %v4380_v9 }
 0x170   :  { %3913 = vmatpush3.bf16.msra.mxu1 %v4393_v10  ;;  %3887 = vmatprep.subr.bf16.mxu0 %v4382_v50 }
 0x173   :  { %3915 = vmatmul.mubr.msk.bf16.vlgmr.msra.gmra.mxu1 %vm2293_vm0, %v2997_v11  ;;  %3888 = vmatpush3.bf16.msra.mxu0 %v4383_v12  ;;  %v4398_v11 = vmov 1983009808  }
 0x174   :  { %3889 = vmatprep.subr.bf16.mxu0 %v4385_v59  ;;  %v2878_v12 = vunpack.c.l.s4 %v4398_v11 }
 0x177   :  { %3890 = vmatpush3.bf16.msra.mxu0 %v4386_v15 }
 0x178   :  { %3891 = vmatprep.subr.bf16.mxu0 %v4388_v49 }
 0x17b   :  { %3892 = vmatpush3.bf16.msra.mxu0 %v4389_v16  ;;  %v2879_v16 = vunpack.c.0.s8 %v2878_v12 }
 0x17c   :  { %3893 = vmatprep.subr.bf16.mxu0 %v4391_v19 }
 0x17f   :  { %3894 = vmatpush3.bf16.msra.mxu0 %v4392_v18 }
 0x182   :  { %v2495_v22 = vpop.f32.mrf.mxu0  ;;  %3303 = vmatmul.mubr.bf16.vlgmr.msra.gmra.mxu0 %v3005_v21 }
 0x183   :  { %v2536_v24 = vpop.f32.mrf.mxu1  ;;  %v2496_v25 = vadd.f32 %v2495_v22, %v5536_v36 }
 0x184   :  { %v2497_v27 = vpop.f32.mrf.mxu0 }
 0x185   :  { %v2538_v28 = vpop.f32.mrf.mxu1  ;;  %v2498_v29 = vadd.f32 %v2497_v27, %v5539_v39  ;;  %v2537_v23 = vadd.f32 %v2536_v24, %v2496_v25  ;;  %v2882_v24 = vsub.s32 %v2879_v16, %v4546_v43 }
 0x186   :  { %v2499_v6 = vpop.f32.mrf.mxu0 }
 0x187   :  { %v2540_v31 = vpop.f32.mrf.mxu1  ;;  %v2539_v33 = vadd.f32 %v2538_v28, %v2498_v29 }
 0x188   :  { %v2500_v34 = vpop.f32.mrf.mxu0 }
 0x189   :  { %v2541_v54 = vpop.f32.mrf.mxu1 }
 0x1a3   :  { %v3741_v14 = vpop.f32.mrf.mxu1 }
 0x1a5   :  { %v3742_v37 = vpop.f32.mrf.mxu1 }
 0x1a6   :  { %v3743_v38 = vadd.f32 %v3742_v37, %v3741_v14 }
 0x1a7   :  { %v3744_v13 = vpop.f32.mrf.mxu1 }
 0x1a9   :  { %v3745_v40 = vpop.f32.mrf.mxu1 }
 0x1b2   :  { %v2577_v42 = vpop.f32.mrf.mxu0 }
 0x1b3   :  { %v2578_v20 = vadd.f32 %v2577_v42, %v2537_v23 }
 0x1b4   :  { %v2579_v26 = vpop.f32.mrf.mxu0 }
 0x1b5   :  { %v2867_v0 = vmul.f32 0.1, %v2578_v20  ;;  %v2580_v36 = vadd.f32 %v2579_v26, %v2539_v33  ;;  %vm2864_vm2 = vcmp.ge.f32.partialorder %v2578_v20, 0.0 }
 0x1b6   :  { %v2581_v45 = vpop.f32.mrf.mxu0 }
 0x1b7   :  { %vm2865_vm3 = vcmp.ge.f32.partialorder %v2580_v36, 0.0  ;;  %v2868_v39 = vmul.f32 0.1, %v2580_v36  ;;  %v2870_v32 = vsel %vm2864_vm2, %v2578_v20, %v2867_v0 }
 0x1b8   :  { %v2582_v46 = vpop.f32.mrf.mxu0 }
 0x1b9   :  { %v2871_v41 = vsel %vm2865_vm3, %v2580_v36, %v2868_v39 }
 0x1ba   :  { %v2876_v48 = vcombine.low %v2870_v32, %v2871_v41 }
 0x1bc   :  { %v2883_v31 = vrot.slane %v2876_v48, %v2882_v24 }
 0x1c3   :  { %v3763_v51 = vpop.f32.mrf.mxu1 }
 0x1c5   :  { %v3764_v53 = vpop.f32.mrf.mxu1 }
 0x1c6   :  { %v3765_v35 = vadd.f32 %v3764_v53, %v3763_v51 }
 0x1c7   :  { %v3766_v55 = vpop.f32.mrf.mxu1 }
 0x1c8   :  { %v2659_v47 = vadd.f32 %v3765_v35, %v3743_v38 }
 0x1c9   :  { %v3767_v56 = vpop.f32.mrf.mxu1 }
 0x1d2   :  { %v3785_v57 = vpop.f32.mrf.mxu0 }
 0x1d4   :  { %v3786_v58 = vpop.f32.mrf.mxu0 }
 0x1d5   :  { %v3787_v61 = vadd.f32 %v3786_v58, %v3785_v57 }
 0x1d6   :  { %v3788_v30 = vpop.f32.mrf.mxu0 }
 0x1d7   :  { %v2699_v62 = vadd.f32 %v3787_v61, %v2659_v47 }
 0x1d8   :  { %v3789_v63 = vpop.f32.mrf.mxu0 }
 0x1e3   :  { %v3807_v1 = vpop.f32.mrf.mxu1 }
 0x1e5   :  { %v3808_v44 = vpop.f32.mrf.mxu1 }
 0x1e6   :  { %v3809_v10 = vadd.f32 %v3808_v44, %v3807_v1 }
 0x1e7   :  { %v3810_v2 = vpop.f32.mrf.mxu1 }
 0x1e8   :  { %v2739_v59 = vadd.f32 %v3809_v10, %v2699_v62 }
 0x1e9   :  { %v3811_v17 = vpop.f32.mrf.mxu1 }
 0x1f2   :  { %v3829_v3 = vpop.f32.mrf.mxu0 }
 0x1f4   :  { %v3830_v4 = vpop.f32.mrf.mxu0 }
 0x1f5   :  { %v3831_v50 = vadd.f32 %v3830_v4, %v3829_v3 }
 0x1f6   :  { %v3832_v52 = vpop.f32.mrf.mxu0 }
 0x1f7   :  { %v2779_v49 = vadd.f32 %v3831_v50, %v2739_v59 }
 0x1f8   :  { %v3833_v60 = vpop.f32.mrf.mxu0 }
 0x203   :  { %v3851_v5 = vpop.f32.mrf.mxu1 }
 0x205   :  { %v3852_v7 = vpop.f32.mrf.mxu1 }
 0x206   :  { %v3853_v15 = vadd.f32 %v3852_v7, %v3851_v5 }
 0x207   :  { %v3854_v8 = vpop.f32.mrf.mxu1 }
 0x208   :  { %v2819_v19 = vadd.f32 %v3853_v15, %v2779_v49 }
 0x209   :  { %v3855_v9 = vpop.f32.mrf.mxu1 }
 0x222   :  { %v2858_v18 = vpop.f32.mrf.mxu0 }
 0x223   :  { %v3873_v21 = vpop.f32.mrf.mxu1  ;;  %v2859_v22 = vadd.f32 %v2858_v18, %v2819_v19 }
 0x224   :  { %v2860_v25 = vpop.f32.mrf.mxu0 }
 0x225   :  { %v3874_v27 = vpop.f32.mrf.mxu1  ;;  %vm2866_vm4 = vcmp.ge.f32.partialorder %v2859_v22, 0.0  ;;  %v2869_v28 = vmul.f32 0.1, %v2859_v22 }
 0x226   :  { %v2861_v29 = vpop.f32.mrf.mxu0  ;;  %v3875_v20 = vadd.f32 %v3874_v27, %v3873_v21 }
 0x227   :  { %v3876_v23 = vpop.f32.mrf.mxu1  ;;  %v2872_v6 = vsel %vm2866_vm4, %v2859_v22, %v2869_v28 }
 0x228   :  { %v2890_v33 = vrot.slane %v2872_v6, %v2882_v24  ;;  %v2862_v34 = vpop.f32.mrf.mxu0 }
 0x229   :  { %v3877_v54 = vpop.f32.mrf.mxu1 }
 0x22a   :  { %v2891_v14 = vcombine.low %v2883_v31, %v2890_v33 }
 0x22c   :  { %2893 = vst [vmem:[%s5681_s4] sm:$0x3f] %v2891_v14 }
 0x233   :  { %v3344_v37 = vpop.f32.mrf.mxu1 }
 0x235   :  { %v3916_v38 = vpop.f32.mrf.mxu1 }
 0x237   :  { %v3347_v13 = vpop.f32.mrf.mxu1 }
 0x239   :  { %v3917_v43 = vpop.f32.mrf.mxu1 }
 0x242   :  { %v3895_v40 = vpop.f32.mrf.mxu0 }
 0x244   :  { %v3896_v42 = vpop.f32.mrf.mxu0 }
 0x245   :  { %v3897_v26 = vadd.f32 %v3896_v42, %v3895_v40 }
 0x246   :  { %v3898_v0 = vpop.f32.mrf.mxu0 }
 0x247   :  { %v3305_v36 = vadd.f32 %v3897_v26, %v3875_v20 }
 0x248   :  { %v3899_v45 = vpop.f32.mrf.mxu0 }
 0x249   :  { %v3345_v39 = vadd.f32 %v3344_v37, %v3305_v36 }
 0x24b   :  { %vm3350_vm5 = vcmp.ge.f32.partialorder %v3345_v39, 0.0  ;;  %v3351_v46 = vmul.f32 0.1, %v3345_v39 }
 0x24d   :  { %v3352_v32 = vsel %vm3350_vm5, %v3345_v39, %v3351_v46 }
 0x24e   :  { %3353 = vst [vmem:[%s5682_s5] sm:$0x3] %v3352_v32 }

// kernel: kbnet_encoder_forward.17
= control target key start
LH: loop header
LB: loop body
LE: loop exit
PB: predicated region body
PF: predicated region fallthrough
CT: control target
= control target key end

     0   :  { %v8672_v36 = vmov 1966171168   ;;  %v896_v38 = vlaneseq  ;;  %vm8675_vm0 = vmmov 0   ;;  %s11210_s1 = inlined_call_operand.vmem [shape: bf16[3456,384], index: 1, kind: input, shape index: {}]   ;;  %s11211_s0 = inlined_call_operand.vmem [shape: bf16[2,3456], index: 0, kind: input, shape index: {}]   ;;  %s11212_s3 = inlined_call_operand.vmem [shape: bf16[1152,128], index: 3, kind: input, shape index: {}]   ;;  %s11213_s2 = inlined_call_operand.vmem [shape: bf16[2,1152], index: 2, kind: input, shape index: {}]   ;;  %s11214_s4 = inlined_call_operand.vmem [shape: f32[2,384], index: 4, kind: output, shape index: {0}]   ;;  %s11215_s5 = inlined_call_operand.vmem [shape: f32[2,128], index: 5, kind: output, shape index: {1}]  }
   0x1   :  { %v7732_v0 = vld [vmem:[%s11210_s1 + $0xac] ss:$12 sps:$4 sm:$0xff]   ;;  %v7736_v2 = vld [vmem:[%s11210_s1 + $0xa8] ss:$12 sps:$4 sm:$0xff]   ;;  %v7742_v6 = vld [vmem:[%s11210_s1 + $0x90] ss:$12 sps:$4 sm:$0xff]   ;;  %v894_v37 = vunpack.c.l.s4 %v8672_v36 }
   0x2   :  { %v7734_v1 = vld [vmem:[%s11210_s1 + $0x22c] ss:$12 sps:$4 sm:$0xff]   ;;  %4545 = vmatprep.subr.bf16.mxu0 %v7732_v0  ;;  %v7737_v3 = vld [vmem:[%s11210_s1 + $0x228] ss:$12 sps:$4 sm:$0xff]   ;;  %v7743_v7 = vld [vmem:[%s11210_s1 + $0x210] ss:$12 sps:$4 sm:$0xff]  }
   0x3   :  { %4586 = vmatprep.subr.bf16.mxu1 %v7734_v1  ;;  %v7738_v4 = vld [vmem:[%s11210_s1 + $0x94] ss:$12 sps:$4 sm:$0xff]   ;;  %4546 = vmatpush1.bf16.msra.mxu0 %v7736_v2  ;;  %v7744_v8 = vld [vmem:[%s11210_s1 + $0x7c] ss:$12 sps:$4 sm:$0xff]   ;;  %v7748_v10 = vld [vmem:[%s11210_s1 + $0x78] ss:$12 sps:$4 sm:$0xff]   ;;  %v895_v42 = vunpack.c.0.s8 %v894_v37 }
   0x4   :  { %4587 = vmatpush1.bf16.msra.mxu1 %v7737_v3  ;;  %v7740_v5 = vld [vmem:[%s11210_s1 + $0x214] ss:$12 sps:$4 sm:$0xff]   ;;  %4547 = vmatprep.subr.bf16.mxu0 %v7738_v4  ;;  %v7746_v9 = vld [vmem:[%s11210_s1 + $0x1fc] ss:$12 sps:$4 sm:$0xff]   ;;  %v7749_v11 = vld [vmem:[%s11210_s1 + $0x1f8] ss:$12 sps:$4 sm:$0xff]  }
   0x5   :  { %4588 = vmatprep.subr.bf16.mxu1 %v7740_v5  ;;  %v7750_v12 = vld [vmem:[%s11210_s1 + $0x64] ss:$12 sps:$4 sm:$0xff]   ;;  %v7754_v14 = vld [vmem:[%s11210_s1 + $0x60] ss:$12 sps:$4 sm:$0xff]   ;;  %v7760_v18 = vld [vmem:[%s11210_s1 + $0x48] ss:$12 sps:$4 sm:$0xff]  }
   0x6   :  { %v7752_v13 = vld [vmem:[%s11210_s1 + $0x1e4] ss:$12 sps:$4 sm:$0xff]   ;;  %v7755_v15 = vld [vmem:[%s11210_s1 + $0x1e0] ss:$12 sps:$4 sm:$0xff]   ;;  %v7761_v19 = vld [vmem:[%s11210_s1 + $0x1c8] ss:$12 sps:$4 sm:$0xff]  }
   0x7   :  { %4548 = vmatpush1.bf16.msra.mxu0 %v7742_v6  ;;  %v7756_v16 = vld [vmem:[%s11210_s1 + $0x4c] ss:$12 sps:$4 sm:$0xff]   ;;  %v7762_v20 = vld [vmem:[%s11210_s1 + $0x34] ss:$12 sps:$4 sm:$0xff]   ;;  %v7766_v22 = vld [vmem:[%s11210_s1 + $0x30] ss:$12 sps:$4 sm:$0xff]  }
   0x8   :  { %4589 = vmatpush1.bf16.msra.mxu1 %v7743_v7  ;;  %4549 = vmatprep.subr.bf16.mxu0 %v7744_v8  ;;  %v7758_v17 = vld [vmem:[%s11210_s1 + $0x1cc] ss:$12 sps:$4 sm:$0xff]   ;;  %v7764_v21 = vld [vmem:[%s11210_s1 + $0x1b4] ss:$12 sps:$4 sm:$0xff]   ;;  %v7767_v23 = vld [vmem:[%s11210_s1 + $0x1b0] ss:$12 sps:$4 sm:$0xff]  }
   0x9   :  { %4590 = vmatprep.subr.bf16.mxu1 %v7746_v9  ;;  %v7768_v24 = vld [vmem:[%s11210_s1 + $0x1c] ss:$12 sps:$4 sm:$0xff]   ;;  %v7772_v26 = vld [vmem:[%s11210_s1 + $0x18] ss:$12 sps:$4 sm:$0xff]   ;;  %v7778_v30 = vld [vmem:[%s11210_s1] ss:$12 sps:$4 sm:$0xff]  }
   0xa   :  { %v7770_v25 = vld [vmem:[%s11210_s1 + $0x19c] ss:$12 sps:$4 sm:$0xff]   ;;  %v7773_v27 = vld [vmem:[%s11210_s1 + $0x198] ss:$12 sps:$4 sm:$0xff]   ;;  %v7779_v31 = vld [vmem:[%s11210_s1 + $0x180] ss:$12 sps:$4 sm:$0xff]  }
   0xb   :  { %4550 = vmatpush1.bf16.msra.mxu0 %v7748_v10  ;;  %v7774_v28 = vld [vmem:[%s11210_s1 + $0x4] ss:$12 sps:$4 sm:$0xff]   ;;  %v7780_v32 = vld [vmem:[%s11210_s1 + $0x16c] ss:$12 sps:$4 sm:$0xff]   ;;  %v7784_v34 = vld [vmem:[%s11210_s1 + $0x168] ss:$12 sps:$4 sm:$0xff]  }
   0xc   :  { %4591 = vmatpush1.bf16.msra.mxu1 %v7749_v11  ;;  %4551 = vmatprep.subr.bf16.mxu0 %v7750_v12  ;;  %v7776_v29 = vld [vmem:[%s11210_s1 + $0x184] ss:$12 sps:$4 sm:$0xff]   ;;  %v7782_v33 = vld [vmem:[%s11210_s1 + $0x2ec] ss:$12 sps:$4 sm:$0xff]   ;;  %v7785_v35 = vld [vmem:[%s11210_s1 + $0x2e8] ss:$12 sps:$4 sm:$0xff]  }
   0xd   :  { %4592 = vmatprep.subr.bf16.mxu1 %v7752_v13  ;;  %v7786_v39 = vld [vmem:[%s11210_s1 + $0x154] ss:$12 sps:$4 sm:$0xff]   ;;  %v7790_v41 = vld [vmem:[%s11210_s1 + $0x150] ss:$12 sps:$4 sm:$0xff]   ;;  %v8824_v43 = vshrl.u32 %v896_v38, 7 }
   0xe   :  { %v7788_v40 = vld [vmem:[%s11210_s1 + $0x2d4] ss:$12 sps:$4 sm:$0xff]   ;;  %v7791_v44 = vld [vmem:[%s11210_s1 + $0x2d0] ss:$12 sps:$4 sm:$0xff]   ;;  %v7796_v47 = vld [vmem:[%s11210_s1 + $0x138] ss:$12 sps:$4 sm:$0xff]  }
   0xf   :  { %4552 = vmatpush1.bf16.msra.mxu0 %v7754_v14  ;;  %v7792_v45 = vld [vmem:[%s11210_s1 + $0x13c] ss:$12 sps:$4 sm:$0xff]   ;;  %v7797_v48 = vld [vmem:[%s11210_s1 + $0x2b8] ss:$12 sps:$4 sm:$0xff]   ;;  %v8842_v49 = vsub.s32 %v895_v42, %v8824_v43  ;;  %v7802_v53 = vld [vmem:[%s11210_s1 + $0x120] ss:$12 sps:$4 sm:$0xff]  }
  0x10   :  { %4593 = vmatpush1.bf16.msra.mxu1 %v7755_v15  ;;  %4553 = vmatprep.subr.bf16.mxu0 %v7756_v16  ;;  %v7794_v46 = vld [vmem:[%s11210_s1 + $0x2bc] ss:$12 sps:$4 sm:$0xff]   ;;  %v7798_v50 = vld [vmem:[%s11210_s1 + $0x124] ss:$12 sps:$4 sm:$0xff]   ;;  %v7803_v55 = vld [vmem:[%s11210_s1 + $0x2a0] ss:$12 sps:$4 sm:$0xff]  }
  0x11   :  { %4594 = vmatprep.subr.bf16.mxu1 %v7758_v17  ;;  %v7800_v51 = vld [vmem:[%s11210_s1 + $0x2a4] ss:$12 sps:$4 sm:$0xff]   ;;  %v7804_v56 = vld [vmem:[%s11210_s1 + $0x10c] ss:$12 sps:$4 sm:$0xff]   ;;  %v7808_v59 = vld [vmem:[%s11210_s1 + $0x108] ss:$12 sps:$4 sm:$0xff]  }
  0x12   :  { %v20_v52 = vld [vmem:[%s11211_s0] sm:$0xff]  ;;  %v7806_v57 = vld [vmem:[%s11210_s1 + $0x28c] ss:$12 sps:$4 sm:$0xff]   ;;  %v7809_v61 = vld [vmem:[%s11210_s1 + $0x288] ss:$12 sps:$4 sm:$0xff]  }
  0x13   :  { %4554 = vmatpush1.bf16.msra.mxu0 %v7760_v18  ;;  %v899_v54 = vrot.slane %v20_v52, %v8842_v49  ;;  %v7810_v62 = vld [vmem:[%s11210_s1 + $0xf4] ss:$12 sps:$4 sm:$0xff]   ;;  %v892_v1 = vcombine.high %v20_v52, %v20_v52  ;;  %v7814_v2 = vld [vmem:[%s11210_s1 + $0xf0] ss:$12 sps:$4 sm:$0xff]   ;;  %v7820_v7 = vld [vmem:[%s11210_s1 + $0xd8] ss:$12 sps:$4 sm:$0xff]  }
  0x14   :  { %4595 = vmatpush1.bf16.msra.mxu1 %v7761_v19  ;;  %4555 = vmatprep.subr.bf16.mxu0 %v7762_v20  ;;  %v7812_v63 = vld [vmem:[%s11210_s1 + $0x274] ss:$12 sps:$4 sm:$0xff]   ;;  %v7815_v3 = vld [vmem:[%s11210_s1 + $0x270] ss:$12 sps:$4 sm:$0xff]   ;;  %v7821_v8 = vld [vmem:[%s11210_s1 + $0x258] ss:$12 sps:$4 sm:$0xff]  }
  0x15   :  { %4596 = vmatprep.subr.bf16.mxu1 %v7764_v21  ;;  %v907_v58 = vcombine.high %v899_v54, %v899_v54  ;;  %v7816_v4 = vld [vmem:[%s11210_s1 + $0xdc] ss:$12 sps:$4 sm:$0xff]   ;;  %v8900_v6 = vrot.slane %v892_v1, %v8842_v49  ;;  %v7822_v9 = vld [vmem:[%s11210_s1 + $0xc4] ss:$12 sps:$4 sm:$0xff]   ;;  %v7826_v12 = vld [vmem:[%s11210_s1 + $0xc0] ss:$12 sps:$4 sm:$0xff]   ;;  %v8920_v13 = vrot.slane %v899_v54, %v8842_v49 }
  0x16   :  { %v7818_v5 = vld [vmem:[%s11210_s1 + $0x25c] ss:$12 sps:$4 sm:$0xff]   ;;  %v7824_v10 = vld [vmem:[%s11210_s1 + $0x244] ss:$12 sps:$4 sm:$0xff]   ;;  %v7827_v14 = vld [vmem:[%s11210_s1 + $0x240] ss:$12 sps:$4 sm:$0xff]  }
  0x17   :  { %4556 = vmatpush1.bf16.msra.mxu0 %v7766_v22  ;;  %v8870_v60 = vrot.slane %v907_v58, %v8842_v49  ;;  %v908_v11 = vcombine.high %v8900_v6, %v8900_v6  ;;  %v7830_v15 = vld [vmem:[%s11210_s1 + $0x3ac] ss:$12 sps:$4 sm:$0xff]   ;;  %v8936_v18 = vcombine.high %v8920_v13, %v8920_v13  ;;  %v7828_v19 = vld [vmem:[%s11210_s1 + $0x3a8] ss:$12 sps:$4 sm:$0xff]   ;;  %v7882_v58 = vld [vmem:[%s11210_s1 + $0x450] ss:$12 sps:$4 sm:$0xff]  }
  0x18   :  { %4597 = vmatpush1.bf16.msra.mxu1 %v7767_v23  ;;  %4557 = vmatprep.subr.bf16.mxu0 %v7768_v24  ;;  %v7833_v16 = vld [vmem:[%s11210_s1 + $0x52c] ss:$12 sps:$4 sm:$0xff]   ;;  %v7831_v20 = vld [vmem:[%s11210_s1 + $0x528] ss:$12 sps:$4 sm:$0xff]   ;;  %v7834_v24 = vld [vmem:[%s11210_s1 + $0x390] ss:$12 sps:$4 sm:$0xff]  }
  0x19   :  { %4598 = vmatprep.subr.bf16.mxu1 %v7770_v25  ;;  %v8883_v0 = vcombine.high %v8870_v60, %v8870_v60  ;;  %4577 = vmatprep.mubr.bf16.mxu0 %v8870_v60  ;;  %v8932_v17 = vrot.slane %v908_v11, %v8842_v49  ;;  %v7836_v21 = vld [vmem:[%s11210_s1 + $0x394] ss:$12 sps:$4 sm:$0xff]   ;;  %v7837_v25 = vld [vmem:[%s11210_s1 + $0x510] ss:$12 sps:$4 sm:$0xff]   ;;  %v7878_v52 = vld [vmem:[%s11210_s1 + $0x46c] ss:$12 sps:$4 sm:$0xff]  }
  0x1a   :  { %v7839_v22 = vld [vmem:[%s11210_s1 + $0x514] ss:$12 sps:$4 sm:$0xff]   ;;  %v7866_v42 = vld [vmem:[%s11210_s1 + $0x31c] ss:$12 sps:$4 sm:$0xff]   ;;  %v7891_v1 = vld [vmem:[%s11210_s1 + $0x5b8] ss:$12 sps:$4 sm:$0xff]  }
  0x1b   :  { %4558 = vmatpush1.bf16.msra.mxu0 %v7772_v26  ;;  %4618 = vmatprep.mubr.bf16.mxu1 %v8883_v0  ;;  %v8952_v23 = vcombine.high %v8932_v17, %v8932_v17  ;;  %v7842_v26 = vld [vmem:[%s11210_s1 + $0x37c] ss:$12 sps:$4 sm:$0xff]   ;;  %v7860_v38 = vld [vmem:[%s11210_s1 + $0x334] ss:$12 sps:$4 sm:$0xff]  }
  0x1c   :  { %4599 = vmatpush1.bf16.msra.mxu1 %v7773_v27  ;;  %4559 = vmatprep.subr.bf16.mxu0 %v7774_v28  ;;  %v7845_v27 = vld [vmem:[%s11210_s1 + $0x4fc] ss:$12 sps:$4 sm:$0xff]   ;;  %v7840_v28 = vld [vmem:[%s11210_s1 + $0x378] ss:$12 sps:$4 sm:$0xff]   ;;  %v7908_v11 = vld [vmem:[%s11210_s1 + $0x3f4] ss:$12 sps:$4 sm:$0xff]  }
  0x1d   :  { %4600 = vmatprep.subr.bf16.mxu1 %v7776_v29  ;;  %v7843_v29 = vld [vmem:[%s11210_s1 + $0x4f8] ss:$12 sps:$4 sm:$0xff]   ;;  %v7852_v36 = vld [vmem:[%s11210_s1 + $0x348] ss:$12 sps:$4 sm:$0xff]  }
  0x1e   :  { %v7855_v37 = vld [vmem:[%s11210_s1 + $0x4c8] ss:$12 sps:$4 sm:$0xff]  }
  0x1f   :  { %4560 = vmatpush1.bf16.msra.mxu0 %v7778_v30  ;;  %v7848_v30 = vld [vmem:[%s11210_s1 + $0x364] ss:$12 sps:$4 sm:$0xff]   ;;  %v7876_v54 = vld [vmem:[%s11210_s1 + $0x468] ss:$12 sps:$4 sm:$0xff]  }
  0x20   :  { %4601 = vmatpush1.bf16.msra.mxu1 %v7779_v31  ;;  %4561 = vmatprep.subr.bf16.mxu0 %v7780_v32  ;;  %v7851_v31 = vld [vmem:[%s11210_s1 + $0x4e4] ss:$12 sps:$4 sm:$0xff]   ;;  %v7846_v32 = vld [vmem:[%s11210_s1 + $0x360] ss:$12 sps:$4 sm:$0xff]  }
  0x21   :  { %4602 = vmatprep.subr.bf16.mxu1 %v7782_v33  ;;  %v7849_v33 = vld [vmem:[%s11210_s1 + $0x4e0] ss:$12 sps:$4 sm:$0xff]  }
  0x23   :  { %4562 = vmatpush2.bf16.msra.mxu0 %v7784_v34  ;;  %v7854_v34 = vld [vmem:[%s11210_s1 + $0x34c] ss:$12 sps:$4 sm:$0xff]  }
  0x24   :  { %4603 = vmatpush2.bf16.msra.mxu1 %v7785_v35  ;;  %4563 = vmatprep.subr.bf16.mxu0 %v7786_v39  ;;  %v7857_v35 = vld [vmem:[%s11210_s1 + $0x4cc] ss:$12 sps:$4 sm:$0xff]   ;;  %v7863_v39 = vld [vmem:[%s11210_s1 + $0x4b4] ss:$12 sps:$4 sm:$0xff]  }
  0x25   :  { %4604 = vmatprep.subr.bf16.mxu1 %v7788_v40  ;;  %v7858_v40 = vld [vmem:[%s11210_s1 + $0x330] ss:$12 sps:$4 sm:$0xff]  }
  0x27   :  { %4564 = vmatpush2.bf16.msra.mxu0 %v7790_v41  ;;  %v7861_v41 = vld [vmem:[%s11210_s1 + $0x4b0] ss:$12 sps:$4 sm:$0xff]  }
  0x28   :  { %4605 = vmatpush2.bf16.msra.mxu1 %v7791_v44  ;;  %4565 = vmatprep.subr.bf16.mxu0 %v7792_v45  ;;  %v7869_v44 = vld [vmem:[%s11210_s1 + $0x49c] ss:$12 sps:$4 sm:$0xff]   ;;  %v7864_v45 = vld [vmem:[%s11210_s1 + $0x318] ss:$12 sps:$4 sm:$0xff]  }
  0x29   :  { %4606 = vmatprep.subr.bf16.mxu1 %v7794_v46  ;;  %v7867_v46 = vld [vmem:[%s11210_s1 + $0x498] ss:$12 sps:$4 sm:$0xff]  }
  0x2b   :  { %4566 = vmatpush2.bf16.msra.mxu0 %v7796_v47  ;;  %v7872_v47 = vld [vmem:[%s11210_s1 + $0x304] ss:$12 sps:$4 sm:$0xff]  }
  0x2c   :  { %4607 = vmatpush2.bf16.msra.mxu1 %v7797_v48  ;;  %4567 = vmatprep.subr.bf16.mxu0 %v7798_v50  ;;  %v7875_v48 = vld [vmem:[%s11210_s1 + $0x484] ss:$12 sps:$4 sm:$0xff]   ;;  %v7870_v50 = vld [vmem:[%s11210_s1 + $0x300] ss:$12 sps:$4 sm:$0xff]  }
  0x2d   :  { %4608 = vmatprep.subr.bf16.mxu1 %v7800_v51  ;;  %v7873_v51 = vld [vmem:[%s11210_s1 + $0x480] ss:$12 sps:$4 sm:$0xff]  }
  0x2f   :  { %4568 = vmatpush2.bf16.msra.mxu0 %v7802_v53  ;;  %v7881_v53 = vld [vmem:[%s11210_s1 + $0x5ec] ss:$12 sps:$4 sm:$0xff]  }
  0x30   :  { %4609 = vmatpush2.bf16.msra.mxu1 %v7803_v55  ;;  %4569 = vmatprep.subr.bf16.mxu0 %v7804_v56  ;;  %v7879_v55 = vld [vmem:[%s11210_s1 + $0x5e8] ss:$12 sps:$4 sm:$0xff]  }
  0x31   :  { %4610 = vmatprep.subr.bf16.mxu1 %v7806_v57  ;;  %v7884_v56 = vld [vmem:[%s11210_s1 + $0x454] ss:$12 sps:$4 sm:$0xff]  }
  0x32   :  { %v7887_v57 = vld [vmem:[%s11210_s1 + $0x5d4] ss:$12 sps:$4 sm:$0xff]  }
  0x33   :  { %4570 = vmatpush2.bf16.msra.mxu0 %v7808_v59  ;;  %v7885_v59 = vld [vmem:[%s11210_s1 + $0x5d0] ss:$12 sps:$4 sm:$0xff]  }
  0x34   :  { %4611 = vmatpush2.bf16.msra.mxu1 %v7809_v61  ;;  %4571 = vmatprep.subr.bf16.mxu0 %v7810_v62  ;;  %v7890_v61 = vld [vmem:[%s11210_s1 + $0x43c] ss:$12 sps:$4 sm:$0xff]  }
  0x35   :  { %4612 = vmatprep.subr.bf16.mxu1 %v7812_v63  ;;  %v7893_v62 = vld [vmem:[%s11210_s1 + $0x5bc] ss:$12 sps:$4 sm:$0xff]   ;;  %v7888_v63 = vld [vmem:[%s11210_s1 + $0x438] ss:$12 sps:$4 sm:$0xff]  }
  0x37   :  { %4572 = vmatpush2.bf16.msra.mxu0 %v7814_v2  ;;  %v7896_v2 = vld [vmem:[%s11210_s1 + $0x424] ss:$12 sps:$4 sm:$0xff]  }
  0x38   :  { %4613 = vmatpush2.bf16.msra.mxu1 %v7815_v3  ;;  %4573 = vmatprep.subr.bf16.mxu0 %v7816_v4  ;;  %v7899_v3 = vld [vmem:[%s11210_s1 + $0x5a4] ss:$12 sps:$4 sm:$0xff]   ;;  %v7894_v4 = vld [vmem:[%s11210_s1 + $0x420] ss:$12 sps:$4 sm:$0xff]  }
  0x39   :  { %4614 = vmatprep.subr.bf16.mxu1 %v7818_v5  ;;  %v7897_v5 = vld [vmem:[%s11210_s1 + $0x5a0] ss:$12 sps:$4 sm:$0xff]  }
  0x3b   :  { %4574 = vmatpush2.bf16.msra.mxu0 %v7820_v7  ;;  %v7902_v7 = vld [vmem:[%s11210_s1 + $0x40c] ss:$12 sps:$4 sm:$0xff]  }
  0x3c   :  { %4615 = vmatpush2.bf16.msra.mxu1 %v7821_v8  ;;  %4575 = vmatprep.subr.bf16.mxu0 %v7822_v9  ;;  %v7905_v8 = vld [vmem:[%s11210_s1 + $0x58c] ss:$12 sps:$4 sm:$0xff]   ;;  %v7900_v9 = vld [vmem:[%s11210_s1 + $0x408] ss:$12 sps:$4 sm:$0xff]  }
  0x3d   :  { %4616 = vmatprep.subr.bf16.mxu1 %v7824_v10  ;;  %v7903_v10 = vld [vmem:[%s11210_s1 + $0x588] ss:$12 sps:$4 sm:$0xff]  }
  0x3f   :  { %4576 = vmatpush2.bf16.msra.mxu0 %v7826_v12  ;;  %v7911_v12 = vld [vmem:[%s11210_s1 + $0x574] ss:$12 sps:$4 sm:$0xff]  }
  0x40   :  { %4617 = vmatpush2.bf16.msra.mxu1 %v7827_v14  ;;  %4627 = vmatprep.subr.bf16.mxu0 %v7830_v15  ;;  %v7906_v14 = vld [vmem:[%s11210_s1 + $0x3f0] ss:$12 sps:$4 sm:$0xff]  }
  0x41   :  { %4668 = vmatprep.subr.bf16.mxu1 %v7833_v16  ;;  %v7909_v15 = vld [vmem:[%s11210_s1 + $0x570] ss:$12 sps:$4 sm:$0xff]  }
  0x42   :  { %4578 = vmatmul.mubr.bf16.vlgmr.msra.gmra.mxu0 %v8920_v13  ;;  %v7914_v16 = vld [vmem:[%s11210_s1 + $0x3dc] ss:$12 sps:$4 sm:$0xff]  }
  0x43   :  { %4619 = vmatmul.mubr.bf16.vlgmr.msra.gmra.mxu1 %v8936_v18  ;;  %4628 = vmatpush1.bf16.msra.mxu0 %v7828_v19  ;;  %v7917_v19 = vld [vmem:[%s11210_s1 + $0x55c] ss:$12 sps:$4 sm:$0xff]  }
  0x44   :  { %4669 = vmatpush1.bf16.msra.mxu1 %v7831_v20  ;;  %4629 = vmatprep.subr.bf16.mxu0 %v7836_v21  ;;  %v7912_v20 = vld [vmem:[%s11210_s1 + $0x3d8] ss:$12 sps:$4 sm:$0xff]  }
  0x45   :  { %4670 = vmatprep.subr.bf16.mxu1 %v7839_v22  ;;  %4659 = vmatprep.mubr.bf16.mxu0 %v8932_v17  ;;  %v7915_v21 = vld [vmem:[%s11210_s1 + $0x558] ss:$12 sps:$4 sm:$0xff]  }
  0x46   :  { %4700 = vmatprep.mubr.bf16.mxu1 %v8952_v23  ;;  %v7920_v22 = vld [vmem:[%s11210_s1 + $0x3c4] ss:$12 sps:$4 sm:$0xff]  }
  0x47   :  { %4630 = vmatpush1.bf16.msra.mxu0 %v7834_v24  ;;  %v7923_v24 = vld [vmem:[%s11210_s1 + $0x544] ss:$12 sps:$4 sm:$0xff]  }
  0x48   :  { %4671 = vmatpush1.bf16.msra.mxu1 %v7837_v25  ;;  %4631 = vmatprep.subr.bf16.mxu0 %v7842_v26  ;;  %v7918_v25 = vld [vmem:[%s11210_s1 + $0x3c0] ss:$12 sps:$4 sm:$0xff]   ;;  %v9131_v26 = vrot.slane %v8900_v6, %v8842_v49  ;;  %v7925_v6 = vld [vmem:[%s11210_s1 + $0x6a8] ss:$12 sps:$4 sm:$0xff]  }
  0x49   :  { %4672 = vmatprep.subr.bf16.mxu1 %v7845_v27  ;;  %v7921_v27 = vld [vmem:[%s11210_s1 + $0x540] ss:$12 sps:$4 sm:$0xff]  }
  0x4b   :  { %4632 = vmatpush1.bf16.msra.mxu0 %v7840_v28  ;;  %v7927_v28 = vld [vmem:[%s11210_s1 + $0x6ac] ss:$12 sps:$4 sm:$0xff]  }
  0x4c   :  { %4673 = vmatpush1.bf16.msra.mxu1 %v7843_v29  ;;  %4633 = vmatprep.subr.bf16.mxu0 %v7848_v30  ;;  %v7930_v29 = vld [vmem:[%s11210_s1 + $0x82c] ss:$12 sps:$4 sm:$0xff]   ;;  %v9147_v30 = vcombine.high %v9131_v26, %v9131_v26 }
  0x4d   :  { %4674 = vmatprep.subr.bf16.mxu1 %v7851_v31  ;;  %v7928_v31 = vld [vmem:[%s11210_s1 + $0x828] ss:$12 sps:$4 sm:$0xff]  }
  0x4f   :  { %4634 = vmatpush1.bf16.msra.mxu0 %v7846_v32  ;;  %v9155_v32 = vld [vmem:[%s11211_s0 + $0x8] sm:$0xff] }
  0x50   :  { %4675 = vmatpush1.bf16.msra.mxu1 %v7849_v33  ;;  %4635 = vmatprep.subr.bf16.mxu0 %v7854_v34  ;;  %v7933_v33 = vld [vmem:[%s11210_s1 + $0x694] ss:$12 sps:$4 sm:$0xff]  }
  0x51   :  { %4676 = vmatprep.subr.bf16.mxu1 %v7857_v35  ;;  %v7936_v34 = vld [vmem:[%s11210_s1 + $0x814] ss:$12 sps:$4 sm:$0xff]   ;;  %v9165_v35 = vrot.slane %v9155_v32, %v8842_v49 }
  0x53   :  { %4636 = vmatpush1.bf16.msra.mxu0 %v7852_v36  ;;  %v956_v36 = vcombine.high %v9165_v35, %v9165_v35 }
  0x54   :  { %4677 = vmatpush1.bf16.msra.mxu1 %v7855_v37  ;;  %4637 = vmatprep.subr.bf16.mxu0 %v7860_v38  ;;  %v7931_v37 = vld [vmem:[%s11210_s1 + $0x690] ss:$12 sps:$4 sm:$0xff]  }
  0x55   :  { %4678 = vmatprep.subr.bf16.mxu1 %v7863_v39  ;;  %v7934_v38 = vld [vmem:[%s11210_s1 + $0x810] ss:$12 sps:$4 sm:$0xff]  }
  0x56   :  { %v7939_v39 = vld [vmem:[%s11210_s1 + $0x67c] ss:$12 sps:$4 sm:$0xff]  }
  0x57   :  { %4638 = vmatpush1.bf16.msra.mxu0 %v7858_v40  ;;  %v7942_v40 = vld [vmem:[%s11210_s1 + $0x7fc] ss:$12 sps:$4 sm:$0xff]  }
  0x58   :  { %4679 = vmatpush1.bf16.msra.mxu1 %v7861_v41  ;;  %4639 = vmatprep.subr.bf16.mxu0 %v7866_v42  ;;  %v9184_v41 = vrot.slane %v956_v36, %v8842_v49  ;;  %v8003_v36 = vld [vmem:[%s11210_s1 + $0x6f0] ss:$12 sps:$4 sm:$0xff]  }
  0x59   :  { %4680 = vmatprep.subr.bf16.mxu1 %v7869_v44  ;;  %v7937_v44 = vld [vmem:[%s11210_s1 + $0x678] ss:$12 sps:$4 sm:$0xff]  }
  0x5a   :  { %v9189_v42 = vcombine.high %v9184_v41, %v9184_v41 }
  0x5b   :  { %4640 = vmatpush1.bf16.msra.mxu0 %v7864_v45  ;;  %v7940_v45 = vld [vmem:[%s11210_s1 + $0x7f8] ss:$12 sps:$4 sm:$0xff]  }
  0x5c   :  { %4681 = vmatpush1.bf16.msra.mxu1 %v7867_v46  ;;  %4641 = vmatprep.subr.bf16.mxu0 %v7872_v47  ;;  %v7945_v46 = vld [vmem:[%s11210_s1 + $0x664] ss:$12 sps:$4 sm:$0xff]  }
  0x5d   :  { %4682 = vmatprep.subr.bf16.mxu1 %v7875_v48  ;;  %v7948_v47 = vld [vmem:[%s11210_s1 + $0x7e4] ss:$12 sps:$4 sm:$0xff]   ;;  %v7943_v48 = vld [vmem:[%s11210_s1 + $0x660] ss:$12 sps:$4 sm:$0xff]  }
  0x5f   :  { %4642 = vmatpush1.bf16.msra.mxu0 %v7870_v50  ;;  %v7946_v50 = vld [vmem:[%s11210_s1 + $0x7e0] ss:$12 sps:$4 sm:$0xff]  }
  0x60   :  { %4683 = vmatpush1.bf16.msra.mxu1 %v7873_v51  ;;  %4643 = vmatprep.subr.bf16.mxu0 %v7878_v52  ;;  %v7951_v51 = vld [vmem:[%s11210_s1 + $0x64c] ss:$12 sps:$4 sm:$0xff]  }
  0x61   :  { %4684 = vmatprep.subr.bf16.mxu1 %v7881_v53  ;;  %v7954_v52 = vld [vmem:[%s11210_s1 + $0x7cc] ss:$12 sps:$4 sm:$0xff]   ;;  %v7949_v53 = vld [vmem:[%s11210_s1 + $0x648] ss:$12 sps:$4 sm:$0xff]  }
  0x63   :  { %4644 = vmatpush2.bf16.msra.mxu0 %v7876_v54  ;;  %v7952_v54 = vld [vmem:[%s11210_s1 + $0x7c8] ss:$12 sps:$4 sm:$0xff]  }
  0x64   :  { %4685 = vmatpush2.bf16.msra.mxu1 %v7879_v55  ;;  %4645 = vmatprep.subr.bf16.mxu0 %v7884_v56  ;;  %v7957_v55 = vld [vmem:[%s11210_s1 + $0x634] ss:$12 sps:$4 sm:$0xff]  }
  0x65   :  { %4686 = vmatprep.subr.bf16.mxu1 %v7887_v57  ;;  %v7960_v56 = vld [vmem:[%s11210_s1 + $0x7b4] ss:$12 sps:$4 sm:$0xff]   ;;  %v7955_v57 = vld [vmem:[%s11210_s1 + $0x630] ss:$12 sps:$4 sm:$0xff]  }
  0x67   :  { %4646 = vmatpush2.bf16.msra.mxu0 %v7882_v58  ;;  %v7958_v58 = vld [vmem:[%s11210_s1 + $0x7b0] ss:$12 sps:$4 sm:$0xff]  }
  0x68   :  { %4687 = vmatpush2.bf16.msra.mxu1 %v7885_v59  ;;  %4647 = vmatprep.subr.bf16.mxu0 %v7890_v61  ;;  %v7963_v59 = vld [vmem:[%s11210_s1 + $0x61c] ss:$12 sps:$4 sm:$0xff]  }
  0x69   :  { %4688 = vmatprep.subr.bf16.mxu1 %v7893_v62  ;;  %v7966_v61 = vld [vmem:[%s11210_s1 + $0x79c] ss:$12 sps:$4 sm:$0xff]   ;;  %v7961_v62 = vld [vmem:[%s11210_s1 + $0x618] ss:$12 sps:$4 sm:$0xff]  }
  0x6b   :  { %4648 = vmatpush2.bf16.msra.mxu0 %v7888_v63  ;;  %v7964_v63 = vld [vmem:[%s11210_s1 + $0x798] ss:$12 sps:$4 sm:$0xff]  }
  0x6c   :  { %4689 = vmatpush2.bf16.msra.mxu1 %v7891_v1  ;;  %4649 = vmatprep.subr.bf16.mxu0 %v7896_v2  ;;  %v7969_v1 = vld [vmem:[%s11210_s1 + $0x604] ss:$12 sps:$4 sm:$0xff]  }
  0x6d   :  { %4690 = vmatprep.subr.bf16.mxu1 %v7899_v3  ;;  %v7972_v2 = vld [vmem:[%s11210_s1 + $0x784] ss:$12 sps:$4 sm:$0xff]   ;;  %v7967_v3 = vld [vmem:[%s11210_s1 + $0x600] ss:$12 sps:$4 sm:$0xff]  }
  0x6f   :  { %4650 = vmatpush2.bf16.msra.mxu0 %v7894_v4  ;;  %v7970_v4 = vld [vmem:[%s11210_s1 + $0x780] ss:$12 sps:$4 sm:$0xff]  }
  0x70   :  { %4691 = vmatpush2.bf16.msra.mxu1 %v7897_v5  ;;  %4651 = vmatprep.subr.bf16.mxu0 %v7902_v7  ;;  %v7975_v5 = vld [vmem:[%s11210_s1 + $0x76c] ss:$12 sps:$4 sm:$0xff]  }
  0x71   :  { %4692 = vmatprep.subr.bf16.mxu1 %v7905_v8  ;;  %v7978_v7 = vld [vmem:[%s11210_s1 + $0x8ec] ss:$12 sps:$4 sm:$0xff]   ;;  %v7973_v8 = vld [vmem:[%s11210_s1 + $0x768] ss:$12 sps:$4 sm:$0xff]  }
  0x73   :  { %4652 = vmatpush2.bf16.msra.mxu0 %v7900_v9  ;;  %v7976_v9 = vld [vmem:[%s11210_s1 + $0x8e8] ss:$12 sps:$4 sm:$0xff]  }
  0x74   :  { %4693 = vmatpush2.bf16.msra.mxu1 %v7903_v10  ;;  %4653 = vmatprep.subr.bf16.mxu0 %v7908_v11  ;;  %v7981_v10 = vld [vmem:[%s11210_s1 + $0x754] ss:$12 sps:$4 sm:$0xff]  }
  0x75   :  { %4694 = vmatprep.subr.bf16.mxu1 %v7911_v12  ;;  %v7984_v11 = vld [vmem:[%s11210_s1 + $0x8d4] ss:$12 sps:$4 sm:$0xff]   ;;  %v7979_v12 = vld [vmem:[%s11210_s1 + $0x750] ss:$12 sps:$4 sm:$0xff]  }
  0x77   :  { %4654 = vmatpush2.bf16.msra.mxu0 %v7906_v14  ;;  %v7982_v14 = vld [vmem:[%s11210_s1 + $0x8d0] ss:$12 sps:$4 sm:$0xff]  }
  0x78   :  { %4695 = vmatpush2.bf16.msra.mxu1 %v7909_v15  ;;  %4655 = vmatprep.subr.bf16.mxu0 %v7914_v16  ;;  %v7987_v15 = vld [vmem:[%s11210_s1 + $0x73c] ss:$12 sps:$4 sm:$0xff]  }
  0x79   :  { %4696 = vmatprep.subr.bf16.mxu1 %v7917_v19  ;;  %v7990_v16 = vld [vmem:[%s11210_s1 + $0x8bc] ss:$12 sps:$4 sm:$0xff]   ;;  %v7985_v19 = vld [vmem:[%s11210_s1 + $0x738] ss:$12 sps:$4 sm:$0xff]  }
  0x7b   :  { %4656 = vmatpush2.bf16.msra.mxu0 %v7912_v20  ;;  %v7988_v20 = vld [vmem:[%s11210_s1 + $0x8b8] ss:$12 sps:$4 sm:$0xff]  }
  0x7c   :  { %4697 = vmatpush2.bf16.msra.mxu1 %v7915_v21  ;;  %4657 = vmatprep.subr.bf16.mxu0 %v7920_v22  ;;  %v7993_v21 = vld [vmem:[%s11210_s1 + $0x724] ss:$12 sps:$4 sm:$0xff]  }
  0x7d   :  { %4698 = vmatprep.subr.bf16.mxu1 %v7923_v24  ;;  %v7996_v22 = vld [vmem:[%s11210_s1 + $0x8a4] ss:$12 sps:$4 sm:$0xff]   ;;  %v7991_v24 = vld [vmem:[%s11210_s1 + $0x720] ss:$12 sps:$4 sm:$0xff]  }
  0x7f   :  { %4658 = vmatpush2.bf16.msra.mxu0 %v7918_v25  ;;  %v7994_v25 = vld [vmem:[%s11210_s1 + $0x8a0] ss:$12 sps:$4 sm:$0xff]  }
  0x80   :  { %4699 = vmatpush2.bf16.msra.mxu1 %v7921_v27  ;;  %4709 = vmatprep.subr.bf16.mxu0 %v7927_v28  ;;  %v7999_v27 = vld [vmem:[%s11210_s1 + $0x70c] ss:$12 sps:$4 sm:$0xff]  }
  0x81   :  { %4750 = vmatprep.subr.bf16.mxu1 %v7930_v29  ;;  %v8002_v28 = vld [vmem:[%s11210_s1 + $0x88c] ss:$12 sps:$4 sm:$0xff]   ;;  %v7997_v29 = vld [vmem:[%s11210_s1 + $0x708] ss:$12 sps:$4 sm:$0xff]  }
  0x82   :  { %4660 = vmatmul.mubr.bf16.vlgmr.msra.gmra.mxu0 %v9131_v26 }
  0x83   :  { %4701 = vmatmul.mubr.bf16.vlgmr.msra.gmra.mxu1 %v9147_v30  ;;  %4710 = vmatpush1.bf16.msra.mxu0 %v7925_v6  ;;  %v8000_v6 = vld [vmem:[%s11210_s1 + $0x888] ss:$12 sps:$4 sm:$0xff]  }
  0x84   :  { %4751 = vmatpush1.bf16.msra.mxu1 %v7928_v31  ;;  %4711 = vmatprep.subr.bf16.mxu0 %v7933_v33  ;;  %v8005_v31 = vld [vmem:[%s11210_s1 + $0x6f4] ss:$12 sps:$4 sm:$0xff]  }
  0x85   :  { %4752 = vmatprep.subr.bf16.mxu1 %v7936_v34  ;;  %4741 = vmatprep.mubr.bf16.mxu0 %v9184_v41  ;;  %v8008_v33 = vld [vmem:[%s11210_s1 + $0x874] ss:$12 sps:$4 sm:$0xff]   ;;  %v941_v34 = vcombine.high %v9155_v32, %v9155_v32  ;;  %v8014_v32 = vld [vmem:[%s11210_s1 + $0x85c] ss:$12 sps:$4 sm:$0xff]  }
  0x86   :  { %4782 = vmatprep.mubr.bf16.mxu1 %v9189_v42 }
  0x87   :  { %4712 = vmatpush1.bf16.msra.mxu0 %v7931_v37  ;;  %v8006_v37 = vld [vmem:[%s11210_s1 + $0x870] ss:$12 sps:$4 sm:$0xff]  }
  0x88   :  { %4753 = vmatpush1.bf16.msra.mxu1 %v7934_v38  ;;  %4713 = vmatprep.subr.bf16.mxu0 %v7939_v39  ;;  %v8011_v38 = vld [vmem:[%s11210_s1 + $0x6dc] ss:$12 sps:$4 sm:$0xff]   ;;  %v9339_v39 = vrot.slane %v941_v34, %v8842_v49 }
  0x89   :  { %4754 = vmatprep.subr.bf16.mxu1 %v7942_v40  ;;  %v8009_v40 = vld [vmem:[%s11210_s1 + $0x6d8] ss:$12 sps:$4 sm:$0xff]   ;;  %v8072_v34 = vld [vmem:[%s11210_s1 + $0xbe8] ss:$12 sps:$4 sm:$0xff]  }
  0x8b   :  { %4714 = vmatpush1.bf16.msra.mxu0 %v7937_v44  ;;  %v8012_v44 = vld [vmem:[%s11210_s1 + $0x858] ss:$12 sps:$4 sm:$0xff]  }
  0x8c   :  { %4755 = vmatpush1.bf16.msra.mxu1 %v7940_v45  ;;  %4715 = vmatprep.subr.bf16.mxu0 %v7945_v46  ;;  %v8017_v45 = vld [vmem:[%s11210_s1 + $0x6c4] ss:$12 sps:$4 sm:$0xff]  }
  0x8d   :  { %4756 = vmatprep.subr.bf16.mxu1 %v7948_v47  ;;  %v8020_v46 = vld [vmem:[%s11210_s1 + $0x844] ss:$12 sps:$4 sm:$0xff]   ;;  %v957_v47 = vcombine.high %v9339_v39, %v9339_v39 }
  0x8f   :  { %4716 = vmatpush1.bf16.msra.mxu0 %v7943_v48  ;;  %v9357_v48 = vrot.slane %v9165_v35, %v8842_v49  ;;  %v8026_v35 = vld [vmem:[%s11210_s1 + $0xb2c] ss:$12 sps:$4 sm:$0xff]  }
  0x90   :  { %4757 = vmatpush1.bf16.msra.mxu1 %v7946_v50  ;;  %4717 = vmatprep.subr.bf16.mxu0 %v7951_v51  ;;  %v8015_v50 = vld [vmem:[%s11210_s1 + $0x6c0] ss:$12 sps:$4 sm:$0xff]  }
  0x91   :  { %4758 = vmatprep.subr.bf16.mxu1 %v7954_v52  ;;  %v8018_v51 = vld [vmem:[%s11210_s1 + $0x840] ss:$12 sps:$4 sm:$0xff]  }
  0x92   :  { %v8023_v52 = vld [vmem:[%s11210_s1 + $0x9ac] ss:$12 sps:$4 sm:$0xff]  }
  0x93   :  { %4718 = vmatpush1.bf16.msra.mxu0 %v7949_v53  ;;  %v9372_v53 = vrot.slane %v957_v47, %v8842_v49  ;;  %v8089_v47 = vld [vmem:[%s11210_s1 + $0xa24] ss:$12 sps:$4 sm:$0xff]  }
  0x94   :  { %4759 = vmatpush1.bf16.msra.mxu1 %v7952_v54  ;;  %4719 = vmatprep.subr.bf16.mxu0 %v7957_v55  ;;  %v9376_v54 = vcombine.high %v9357_v48, %v9357_v48  ;;  %v8021_v55 = vld [vmem:[%s11210_s1 + $0x9a8] ss:$12 sps:$4 sm:$0xff]  }
  0x95   :  { %4760 = vmatprep.subr.bf16.mxu1 %v7960_v56  ;;  %v8024_v56 = vld [vmem:[%s11210_s1 + $0xb28] ss:$12 sps:$4 sm:$0xff]  }
  0x97   :  { %4720 = vmatpush1.bf16.msra.mxu0 %v7955_v57  ;;  %v8029_v57 = vld [vmem:[%s11210_s1 + $0x994] ss:$12 sps:$4 sm:$0xff]  }
  0x98   :  { %4761 = vmatpush1.bf16.msra.mxu1 %v7958_v58  ;;  %4721 = vmatprep.subr.bf16.mxu0 %v7963_v59  ;;  %v8032_v58 = vld [vmem:[%s11210_s1 + $0xb14] ss:$12 sps:$4 sm:$0xff]   ;;  %v9392_v59 = vcombine.high %v9372_v53, %v9372_v53 }
  0x99   :  { %4762 = vmatprep.subr.bf16.mxu1 %v7966_v61  ;;  %v8027_v61 = vld [vmem:[%s11210_s1 + $0x990] ss:$12 sps:$4 sm:$0xff]  }
  0x9b   :  { %4722 = vmatpush1.bf16.msra.mxu0 %v7961_v62  ;;  %v8030_v62 = vld [vmem:[%s11210_s1 + $0xb10] ss:$12 sps:$4 sm:$0xff]  }
  0x9c   :  { %4763 = vmatpush1.bf16.msra.mxu1 %v7964_v63  ;;  %4723 = vmatprep.subr.bf16.mxu0 %v7969_v1  ;;  %v8035_v63 = vld [vmem:[%s11210_s1 + $0x97c] ss:$12 sps:$4 sm:$0xff]  }
  0x9d   :  { %4764 = vmatprep.subr.bf16.mxu1 %v7972_v2  ;;  %v8038_v1 = vld [vmem:[%s11210_s1 + $0xafc] ss:$12 sps:$4 sm:$0xff]   ;;  %v8033_v2 = vld [vmem:[%s11210_s1 + $0x978] ss:$12 sps:$4 sm:$0xff]  }
  0x9f   :  { %4724 = vmatpush1.bf16.msra.mxu0 %v7967_v3  ;;  %v8036_v3 = vld [vmem:[%s11210_s1 + $0xaf8] ss:$12 sps:$4 sm:$0xff]  }
  0xa0   :  { %4765 = vmatpush1.bf16.msra.mxu1 %v7970_v4  ;;  %4725 = vmatprep.subr.bf16.mxu0 %v7975_v5  ;;  %v8041_v4 = vld [vmem:[%s11210_s1 + $0x964] ss:$12 sps:$4 sm:$0xff]  }
  0xa1   :  { %4766 = vmatprep.subr.bf16.mxu1 %v7978_v7  ;;  %v8044_v5 = vld [vmem:[%s11210_s1 + $0xae4] ss:$12 sps:$4 sm:$0xff]   ;;  %v8039_v7 = vld [vmem:[%s11210_s1 + $0x960] ss:$12 sps:$4 sm:$0xff]  }
  0xa3   :  { %4726 = vmatpush2.bf16.msra.mxu0 %v7973_v8  ;;  %v8042_v8 = vld [vmem:[%s11210_s1 + $0xae0] ss:$12 sps:$4 sm:$0xff]  }
  0xa4   :  { %4767 = vmatpush2.bf16.msra.mxu1 %v7976_v9  ;;  %4727 = vmatprep.subr.bf16.mxu0 %v7981_v10  ;;  %v8047_v9 = vld [vmem:[%s11210_s1 + $0x94c] ss:$12 sps:$4 sm:$0xff]  }
  0xa5   :  { %4768 = vmatprep.subr.bf16.mxu1 %v7984_v11  ;;  %v8050_v10 = vld [vmem:[%s11210_s1 + $0xacc] ss:$12 sps:$4 sm:$0xff]   ;;  %v8045_v11 = vld [vmem:[%s11210_s1 + $0x948] ss:$12 sps:$4 sm:$0xff]  }
  0xa7   :  { %4728 = vmatpush2.bf16.msra.mxu0 %v7979_v12  ;;  %v8048_v12 = vld [vmem:[%s11210_s1 + $0xac8] ss:$12 sps:$4 sm:$0xff]  }
  0xa8   :  { %4769 = vmatpush2.bf16.msra.mxu1 %v7982_v14  ;;  %4729 = vmatprep.subr.bf16.mxu0 %v7987_v15  ;;  %v8053_v14 = vld [vmem:[%s11210_s1 + $0x934] ss:$12 sps:$4 sm:$0xff]  }
  0xa9   :  { %4770 = vmatprep.subr.bf16.mxu1 %v7990_v16  ;;  %v8056_v15 = vld [vmem:[%s11210_s1 + $0xab4] ss:$12 sps:$4 sm:$0xff]   ;;  %v8051_v16 = vld [vmem:[%s11210_s1 + $0x930] ss:$12 sps:$4 sm:$0xff]  }
  0xab   :  { %4730 = vmatpush2.bf16.msra.mxu0 %v7985_v19  ;;  %v8054_v19 = vld [vmem:[%s11210_s1 + $0xab0] ss:$12 sps:$4 sm:$0xff]  }
  0xac   :  { %4771 = vmatpush2.bf16.msra.mxu1 %v7988_v20  ;;  %4731 = vmatprep.subr.bf16.mxu0 %v7993_v21  ;;  %v8059_v20 = vld [vmem:[%s11210_s1 + $0x91c] ss:$12 sps:$4 sm:$0xff]  }
  0xad   :  { %4772 = vmatprep.subr.bf16.mxu1 %v7996_v22  ;;  %v8062_v21 = vld [vmem:[%s11210_s1 + $0xa9c] ss:$12 sps:$4 sm:$0xff]   ;;  %v8057_v22 = vld [vmem:[%s11210_s1 + $0x918] ss:$12 sps:$4 sm:$0xff]  }
  0xaf   :  { %4732 = vmatpush2.bf16.msra.mxu0 %v7991_v24  ;;  %v8060_v24 = vld [vmem:[%s11210_s1 + $0xa98] ss:$12 sps:$4 sm:$0xff]  }
  0xb0   :  { %4773 = vmatpush2.bf16.msra.mxu1 %v7994_v25  ;;  %4733 = vmatprep.subr.bf16.mxu0 %v7999_v27  ;;  %v8065_v25 = vld [vmem:[%s11210_s1 + $0x904] ss:$12 sps:$4 sm:$0xff]  }
  0xb1   :  { %4774 = vmatprep.subr.bf16.mxu1 %v8002_v28  ;;  %v8068_v27 = vld [vmem:[%s11210_s1 + $0xa84] ss:$12 sps:$4 sm:$0xff]   ;;  %v8063_v28 = vld [vmem:[%s11210_s1 + $0x900] ss:$12 sps:$4 sm:$0xff]  }
  0xb3   :  { %4734 = vmatpush2.bf16.msra.mxu0 %v7997_v29  ;;  %v8066_v29 = vld [vmem:[%s11210_s1 + $0xa80] ss:$12 sps:$4 sm:$0xff]  }
  0xb4   :  { %4775 = vmatpush2.bf16.msra.mxu1 %v8000_v6  ;;  %4735 = vmatprep.subr.bf16.mxu0 %v8005_v31  ;;  %v8071_v6 = vld [vmem:[%s11210_s1 + $0xa6c] ss:$12 sps:$4 sm:$0xff]  }
  0xb5   :  { %4776 = vmatprep.subr.bf16.mxu1 %v8008_v33  ;;  %v8074_v31 = vld [vmem:[%s11210_s1 + $0xbec] ss:$12 sps:$4 sm:$0xff]   ;;  %v8069_v33 = vld [vmem:[%s11210_s1 + $0xa68] ss:$12 sps:$4 sm:$0xff]  }
  0xb7   :  { %4736 = vmatpush2.bf16.msra.mxu0 %v8003_v36  ;;  %v8077_v36 = vld [vmem:[%s11210_s1 + $0xa54] ss:$12 sps:$4 sm:$0xff]  }
  0xb8   :  { %4777 = vmatpush2.bf16.msra.mxu1 %v8006_v37  ;;  %4737 = vmatprep.subr.bf16.mxu0 %v8011_v38  ;;  %v8080_v37 = vld [vmem:[%s11210_s1 + $0xbd4] ss:$12 sps:$4 sm:$0xff]   ;;  %v8075_v38 = vld [vmem:[%s11210_s1 + $0xa50] ss:$12 sps:$4 sm:$0xff]  }
  0xb9   :  { %4778 = vmatprep.subr.bf16.mxu1 %v8014_v32  ;;  %v8078_v32 = vld [vmem:[%s11210_s1 + $0xbd0] ss:$12 sps:$4 sm:$0xff]  }
  0xbb   :  { %4738 = vmatpush2.bf16.msra.mxu0 %v8009_v40  ;;  %v8083_v40 = vld [vmem:[%s11210_s1 + $0xa3c] ss:$12 sps:$4 sm:$0xff]  }
  0xbc   :  { %4779 = vmatpush2.bf16.msra.mxu1 %v8012_v44  ;;  %4739 = vmatprep.subr.bf16.mxu0 %v8017_v45  ;;  %v8086_v44 = vld [vmem:[%s11210_s1 + $0xbbc] ss:$12 sps:$4 sm:$0xff]   ;;  %v8081_v45 = vld [vmem:[%s11210_s1 + $0xa38] ss:$12 sps:$4 sm:$0xff]  }
  0xbd   :  { %4780 = vmatprep.subr.bf16.mxu1 %v8020_v46  ;;  %v8084_v46 = vld [vmem:[%s11210_s1 + $0xbb8] ss:$12 sps:$4 sm:$0xff]  }
  0xbf   :  { %4740 = vmatpush2.bf16.msra.mxu0 %v8015_v50  ;;  %v8092_v50 = vld [vmem:[%s11210_s1 + $0xba4] ss:$12 sps:$4 sm:$0xff]  }
  0xc0   :  { %4781 = vmatpush2.bf16.msra.mxu1 %v8018_v51  ;;  %4791 = vmatprep.subr.bf16.mxu0 %v8023_v52  ;;  %v8087_v51 = vld [vmem:[%s11210_s1 + $0xa20] ss:$12 sps:$4 sm:$0xff]  }
  0xc1   :  { %4832 = vmatprep.subr.bf16.mxu1 %v8026_v35  ;;  %v8090_v52 = vld [vmem:[%s11210_s1 + $0xba0] ss:$12 sps:$4 sm:$0xff]  }
  0xc2   :  { %4742 = vmatmul.mubr.bf16.vlgmr.msra.gmra.mxu0 %v9357_v48  ;;  %v8095_v35 = vld [vmem:[%s11210_s1 + $0xa0c] ss:$12 sps:$4 sm:$0xff]  }
  0xc3   :  { %4783 = vmatmul.mubr.bf16.vlgmr.msra.gmra.mxu1 %v9376_v54  ;;  %4792 = vmatpush1.bf16.msra.mxu0 %v8021_v55  ;;  %v8098_v55 = vld [vmem:[%s11210_s1 + $0xb8c] ss:$12 sps:$4 sm:$0xff]  }
  0xc4   :  { %4833 = vmatpush1.bf16.msra.mxu1 %v8024_v56  ;;  %4793 = vmatprep.subr.bf16.mxu0 %v8029_v57  ;;  %v8093_v56 = vld [vmem:[%s11210_s1 + $0xa08] ss:$12 sps:$4 sm:$0xff]  }
  0xc5   :  { %4834 = vmatprep.subr.bf16.mxu1 %v8032_v58  ;;  %4823 = vmatprep.mubr.bf16.mxu0 %v9372_v53  ;;  %v8096_v57 = vld [vmem:[%s11210_s1 + $0xb88] ss:$12 sps:$4 sm:$0xff]  }
  0xc6   :  { %4864 = vmatprep.mubr.bf16.mxu1 %v9392_v59  ;;  %v8101_v58 = vld [vmem:[%s11210_s1 + $0x9f4] ss:$12 sps:$4 sm:$0xff]  }
  0xc7   :  { %4794 = vmatpush1.bf16.msra.mxu0 %v8027_v61  ;;  %v8104_v61 = vld [vmem:[%s11210_s1 + $0xb74] ss:$12 sps:$4 sm:$0xff]  }
  0xc8   :  { %4835 = vmatpush1.bf16.msra.mxu1 %v8030_v62  ;;  %4795 = vmatprep.subr.bf16.mxu0 %v8035_v63  ;;  %v8099_v62 = vld [vmem:[%s11210_s1 + $0x9f0] ss:$12 sps:$4 sm:$0xff]  }
  0xc9   :  { %4836 = vmatprep.subr.bf16.mxu1 %v8038_v1  ;;  %v9548_v63 = vld [vmem:[%s11211_s0 + $0x10] sm:$0xff] }
  0xca   :  { %v8102_v1 = vld [vmem:[%s11210_s1 + $0xb70] ss:$12 sps:$4 sm:$0xff]  }
  0xcb   :  { %4796 = vmatpush1.bf16.msra.mxu0 %v8033_v2  ;;  %v8107_v2 = vld [vmem:[%s11210_s1 + $0x9dc] ss:$12 sps:$4 sm:$0xff]  }
  0xcc   :  { %4837 = vmatpush1.bf16.msra.mxu1 %v8036_v3  ;;  %4797 = vmatprep.subr.bf16.mxu0 %v8041_v4  ;;  %v8110_v3 = vld [vmem:[%s11210_s1 + $0xb5c] ss:$12 sps:$4 sm:$0xff]   ;;  %v9561_v4 = vrot.slane %v9548_v63, %v8842_v49 }
  0xcd   :  { %4838 = vmatprep.subr.bf16.mxu1 %v8044_v5  ;;  %v8105_v5 = vld [vmem:[%s11210_s1 + $0x9d8] ss:$12 sps:$4 sm:$0xff]  }
  0xcf   :  { %4798 = vmatpush1.bf16.msra.mxu0 %v8039_v7  ;;  %v8108_v7 = vld [vmem:[%s11210_s1 + $0xb58] ss:$12 sps:$4 sm:$0xff]  }
  0xd0   :  { %4839 = vmatpush1.bf16.msra.mxu1 %v8042_v8  ;;  %4799 = vmatprep.subr.bf16.mxu0 %v8047_v9  ;;  %v8113_v8 = vld [vmem:[%s11210_s1 + $0x9c4] ss:$12 sps:$4 sm:$0xff]  }
  0xd1   :  { %4840 = vmatprep.subr.bf16.mxu1 %v8050_v10  ;;  %v8116_v9 = vld [vmem:[%s11210_s1 + $0xb44] ss:$12 sps:$4 sm:$0xff]   ;;  %v1005_v10 = vcombine.high %v9561_v4, %v9561_v4 }
  0xd3   :  { %4800 = vmatpush1.bf16.msra.mxu0 %v8045_v11  ;;  %v8111_v11 = vld [vmem:[%s11210_s1 + $0x9c0] ss:$12 sps:$4 sm:$0xff]  }
  0xd4   :  { %4841 = vmatpush1.bf16.msra.mxu1 %v8048_v12  ;;  %4801 = vmatprep.subr.bf16.mxu0 %v8053_v14  ;;  %v9582_v12 = vrot.slane %v9339_v39, %v8842_v49  ;;  %v8114_v14 = vld [vmem:[%s11210_s1 + $0xb40] ss:$12 sps:$4 sm:$0xff]   ;;  %v8118_v39 = vld [vmem:[%s11210_s1 + $0xca8] ss:$12 sps:$4 sm:$0xff]  }
  0xd5   :  { %4842 = vmatprep.subr.bf16.mxu1 %v8056_v15  ;;  %v8120_v15 = vld [vmem:[%s11210_s1 + $0xcac] ss:$12 sps:$4 sm:$0xff]  }
  0xd7   :  { %4802 = vmatpush1.bf16.msra.mxu0 %v8051_v16  ;;  %v8123_v16 = vld [vmem:[%s11210_s1 + $0xe2c] ss:$12 sps:$4 sm:$0xff]  }
  0xd8   :  { %4843 = vmatpush1.bf16.msra.mxu1 %v8054_v19  ;;  %4803 = vmatprep.subr.bf16.mxu0 %v8059_v20  ;;  %v9594_v19 = vrot.slane %v1005_v10, %v8842_v49  ;;  %v9601_v20 = vcombine.high %v9582_v12, %v9582_v12  ;;  %v8165_v10 = vld [vmem:[%s11210_s1 + $0xd84] ss:$12 sps:$4 sm:$0xff]  }
  0xd9   :  { %4844 = vmatprep.subr.bf16.mxu1 %v8062_v21  ;;  %v8121_v21 = vld [vmem:[%s11210_s1 + $0xe28] ss:$12 sps:$4 sm:$0xff]  }
  0xdb   :  { %4804 = vmatpush1.bf16.msra.mxu0 %v8057_v22  ;;  %v8126_v22 = vld [vmem:[%s11210_s1 + $0xc94] ss:$12 sps:$4 sm:$0xff]  }
  0xdc   :  { %4845 = vmatpush1.bf16.msra.mxu1 %v8060_v24  ;;  %4805 = vmatprep.subr.bf16.mxu0 %v8065_v25  ;;  %v8129_v24 = vld [vmem:[%s11210_s1 + $0xe14] ss:$12 sps:$4 sm:$0xff]   ;;  %v9614_v25 = vcombine.high %v9594_v19, %v9594_v19 }
  0xdd   :  { %4846 = vmatprep.subr.bf16.mxu1 %v8068_v27 }
  0xdf   :  { %4806 = vmatpush1.bf16.msra.mxu0 %v8063_v28 }
  0xe0   :  { %4847 = vmatpush1.bf16.msra.mxu1 %v8066_v29  ;;  %4807 = vmatprep.subr.bf16.mxu0 %v8071_v6  ;;  %v8124_v29 = vld [vmem:[%s11210_s1 + $0xc90] ss:$12 sps:$4 sm:$0xff]  }
  0xe1   :  { %4848 = vmatprep.subr.bf16.mxu1 %v8074_v31  ;;  %v8127_v6 = vld [vmem:[%s11210_s1 + $0xe10] ss:$12 sps:$4 sm:$0xff]  }
  0xe3   :  { %4808 = vmatpush2.bf16.msra.mxu0 %v8069_v33 }
  0xe4   :  { %4849 = vmatpush2.bf16.msra.mxu1 %v8072_v34  ;;  %4809 = vmatprep.subr.bf16.mxu0 %v8077_v36  ;;  %v8132_v36 = vld [vmem:[%s11210_s1 + $0xc7c] ss:$12 sps:$4 sm:$0xff]  }
  0xe5   :  { %4850 = vmatprep.subr.bf16.mxu1 %v8080_v37  ;;  %v8135_v37 = vld [vmem:[%s11210_s1 + $0xdfc] ss:$12 sps:$4 sm:$0xff]  }
  0xe7   :  { %4810 = vmatpush2.bf16.msra.mxu0 %v8075_v38 }
  0xe8   :  { %4851 = vmatpush2.bf16.msra.mxu1 %v8078_v32  ;;  %4811 = vmatprep.subr.bf16.mxu0 %v8083_v40  ;;  %v8130_v32 = vld [vmem:[%s11210_s1 + $0xc78] ss:$12 sps:$4 sm:$0xff]  }
  0xe9   :  { %4852 = vmatprep.subr.bf16.mxu1 %v8086_v44  ;;  %v8133_v40 = vld [vmem:[%s11210_s1 + $0xdf8] ss:$12 sps:$4 sm:$0xff]  }
  0xeb   :  { %4812 = vmatpush2.bf16.msra.mxu0 %v8081_v45 }
  0xec   :  { %4853 = vmatpush2.bf16.msra.mxu1 %v8084_v46  ;;  %4813 = vmatprep.subr.bf16.mxu0 %v8089_v47 }
  0xed   :  { %4854 = vmatprep.subr.bf16.mxu1 %v8092_v50  ;;  %v8138_v50 = vld [vmem:[%s11210_s1 + $0xc64] ss:$12 sps:$4 sm:$0xff]  }
  0xef   :  { %4814 = vmatpush2.bf16.msra.mxu0 %v8087_v51  ;;  %v8141_v51 = vld [vmem:[%s11210_s1 + $0xde4] ss:$12 sps:$4 sm:$0xff]  }
  0xf0   :  { %4855 = vmatpush2.bf16.msra.mxu1 %v8090_v52  ;;  %4815 = vmatprep.subr.bf16.mxu0 %v8095_v35  ;;  %v8136_v52 = vld [vmem:[%s11210_s1 + $0xc60] ss:$12 sps:$4 sm:$0xff]  }
  0xf1   :  { %4856 = vmatprep.subr.bf16.mxu1 %v8098_v55  ;;  %v8139_v35 = vld [vmem:[%s11210_s1 + $0xde0] ss:$12 sps:$4 sm:$0xff]  }
  0xf2   :  { %v8144_v55 = vld [vmem:[%s11210_s1 + $0xc4c] ss:$12 sps:$4 sm:$0xff]  }
  0xf3   :  { %4816 = vmatpush2.bf16.msra.mxu0 %v8093_v56  ;;  %v8147_v56 = vld [vmem:[%s11210_s1 + $0xdcc] ss:$12 sps:$4 sm:$0xff]  }
  0xf4   :  { %4857 = vmatpush2.bf16.msra.mxu1 %v8096_v57  ;;  %4817 = vmatprep.subr.bf16.mxu0 %v8101_v58  ;;  %v8142_v57 = vld [vmem:[%s11210_s1 + $0xc48] ss:$12 sps:$4 sm:$0xff]  }
  0xf5   :  { %4858 = vmatprep.subr.bf16.mxu1 %v8104_v61  ;;  %v8145_v58 = vld [vmem:[%s11210_s1 + $0xdc8] ss:$12 sps:$4 sm:$0xff]  }
  0xf6   :  { %v8150_v61 = vld [vmem:[%s11210_s1 + $0xc34] ss:$12 sps:$4 sm:$0xff]  }
  0xf7   :  { %4818 = vmatpush2.bf16.msra.mxu0 %v8099_v62  ;;  %v8153_v62 = vld [vmem:[%s11210_s1 + $0xdb4] ss:$12 sps:$4 sm:$0xff]  }
  0xf8   :  { %4859 = vmatpush2.bf16.msra.mxu1 %v8102_v1  ;;  %4819 = vmatprep.subr.bf16.mxu0 %v8107_v2  ;;  %v8148_v1 = vld [vmem:[%s11210_s1 + $0xc30] ss:$12 sps:$4 sm:$0xff]  }
  0xf9   :  { %4860 = vmatprep.subr.bf16.mxu1 %v8110_v3  ;;  %v8151_v2 = vld [vmem:[%s11210_s1 + $0xdb0] ss:$12 sps:$4 sm:$0xff]  }
  0xfa   :  { %v8156_v3 = vld [vmem:[%s11210_s1 + $0xc1c] ss:$12 sps:$4 sm:$0xff]  }
  0xfb   :  { %4820 = vmatpush2.bf16.msra.mxu0 %v8105_v5  ;;  %v8159_v5 = vld [vmem:[%s11210_s1 + $0xd9c] ss:$12 sps:$4 sm:$0xff]  }
  0xfc   :  { %4861 = vmatpush2.bf16.msra.mxu1 %v8108_v7  ;;  %4821 = vmatprep.subr.bf16.mxu0 %v8113_v8  ;;  %v8154_v7 = vld [vmem:[%s11210_s1 + $0xc18] ss:$12 sps:$4 sm:$0xff]  }
  0xfd   :  { %4862 = vmatprep.subr.bf16.mxu1 %v8116_v9  ;;  %v8157_v8 = vld [vmem:[%s11210_s1 + $0xd98] ss:$12 sps:$4 sm:$0xff]  }
  0xfe   :  { %v8162_v9 = vld [vmem:[%s11210_s1 + $0xc04] ss:$12 sps:$4 sm:$0xff]  }
  0xff   :  { %4822 = vmatpush2.bf16.msra.mxu0 %v8111_v11  ;;  %v8160_v11 = vld [vmem:[%s11210_s1 + $0xc00] ss:$12 sps:$4 sm:$0xff]  }
 0x100   :  { %4863 = vmatpush2.bf16.msra.mxu1 %v8114_v14  ;;  %4873 = vmatprep.subr.bf16.mxu0 %v8120_v15  ;;  %v8163_v14 = vld [vmem:[%s11210_s1 + $0xd80] ss:$12 sps:$4 sm:$0xff]  }
 0x101   :  { %4914 = vmatprep.subr.bf16.mxu1 %v8123_v16  ;;  %v8168_v15 = vld [vmem:[%s11210_s1 + $0xd6c] ss:$12 sps:$4 sm:$0xff]  }
 0x102   :  { %v4579_v27 = vpop.f32.mrf.mxu0  ;;  %4824 = vmatmul.mubr.bf16.vlgmr.msra.gmra.mxu0 %v9582_v12  ;;  %v8171_v16 = vld [vmem:[%s11210_s1 + $0xeec] ss:$12 sps:$4 sm:$0xff]  }
 0x103   :  { %v4620_v28 = vpop.f32.mrf.mxu1  ;;  %4865 = vmatmul.mubr.bf16.vlgmr.msra.gmra.mxu1 %v9601_v20  ;;  %4874 = vmatpush1.bf16.msra.mxu0 %v8118_v39  ;;  %v8166_v39 = vld [vmem:[%s11210_s1 + $0xd68] ss:$12 sps:$4 sm:$0xff]  }
 0x104   :  { %v9624_v31 = vadd.f32 %v4620_v28, %v4579_v27  ;;  %4915 = vmatpush1.bf16.msra.mxu1 %v8121_v21  ;;  %v4581_v33 = vpop.f32.mrf.mxu0  ;;  %4875 = vmatprep.subr.bf16.mxu0 %v8126_v22  ;;  %v8169_v21 = vld [vmem:[%s11210_s1 + $0xee8] ss:$12 sps:$4 sm:$0xff]   ;;  %v8172_v27 = vld [vmem:[%s11210_s1 + $0xd50] ss:$12 sps:$4 sm:$0xff]  }
 0x105   :  { %v4622_v34 = vpop.f32.mrf.mxu1  ;;  %4916 = vmatprep.subr.bf16.mxu1 %v8129_v24  ;;  %4905 = vmatprep.mubr.bf16.mxu0 %v9594_v19  ;;  %v8174_v22 = vld [vmem:[%s11210_s1 + $0xd54] ss:$12 sps:$4 sm:$0xff]   ;;  %v8175_v28 = vld [vmem:[%s11210_s1 + $0xed0] ss:$12 sps:$4 sm:$0xff]  }
 0x106   :  { %v9632_v38 = vadd.f32 %v4622_v34, %v4581_v33  ;;  %4946 = vmatprep.mubr.bf16.mxu1 %v9614_v25  ;;  %v4583_v44 = vpop.f32.mrf.mxu0  ;;  %v8177_v24 = vld [vmem:[%s11210_s1 + $0xed4] ss:$12 sps:$4 sm:$0xff]   ;;  %v8178_v33 = vld [vmem:[%s11210_s1 + $0xd38] ss:$12 sps:$4 sm:$0xff]  }
 0x107   :  { %v4624_v45 = vpop.f32.mrf.mxu1  ;;  %4876 = vmatpush1.bf16.msra.mxu0 %v8124_v29  ;;  %v8180_v29 = vld [vmem:[%s11210_s1 + $0xd3c] ss:$12 sps:$4 sm:$0xff]   ;;  %v8181_v34 = vld [vmem:[%s11210_s1 + $0xeb8] ss:$12 sps:$4 sm:$0xff]  }
 0x108   :  { %4917 = vmatpush1.bf16.msra.mxu1 %v8127_v6  ;;  %v4584_v46 = vpop.f32.mrf.mxu0  ;;  %4877 = vmatprep.subr.bf16.mxu0 %v8132_v36  ;;  %v8183_v6 = vld [vmem:[%s11210_s1 + $0xebc] ss:$12 sps:$4 sm:$0xff]   ;;  %v8186_v36 = vld [vmem:[%s11210_s1 + $0xd24] ss:$12 sps:$4 sm:$0xff]   ;;  %v8192_v44 = vld [vmem:[%s11210_s1 + $0xd0c] ss:$12 sps:$4 sm:$0xff]  }
 0x109   :  { %v4625_v47 = vpop.f32.mrf.mxu1  ;;  %4918 = vmatprep.subr.bf16.mxu1 %v8135_v37  ;;  %v8189_v37 = vld [vmem:[%s11210_s1 + $0xea4] ss:$12 sps:$4 sm:$0xff]   ;;  %v8195_v45 = vld [vmem:[%s11210_s1 + $0xe8c] ss:$12 sps:$4 sm:$0xff]   ;;  %v8190_v46 = vld [vmem:[%s11210_s1 + $0xd08] ss:$12 sps:$4 sm:$0xff]  }
 0x10a   :  { %v8193_v47 = vld [vmem:[%s11210_s1 + $0xe88] ss:$12 sps:$4 sm:$0xff]  }
 0x10b   :  { %4878 = vmatpush1.bf16.msra.mxu0 %v8130_v32  ;;  %v8184_v32 = vld [vmem:[%s11210_s1 + $0xd20] ss:$12 sps:$4 sm:$0xff]  }
 0x10c   :  { %4919 = vmatpush1.bf16.msra.mxu1 %v8133_v40  ;;  %4879 = vmatprep.subr.bf16.mxu0 %v8138_v50  ;;  %v8187_v40 = vld [vmem:[%s11210_s1 + $0xea0] ss:$12 sps:$4 sm:$0xff]  }
 0x10d   :  { %4920 = vmatprep.subr.bf16.mxu1 %v8141_v51  ;;  %v8198_v50 = vld [vmem:[%s11210_s1 + $0xcf4] ss:$12 sps:$4 sm:$0xff]  }
 0x10e   :  { %v8201_v51 = vld [vmem:[%s11210_s1 + $0xe74] ss:$12 sps:$4 sm:$0xff]  }
 0x10f   :  { %4880 = vmatpush1.bf16.msra.mxu0 %v8136_v52  ;;  %v8196_v52 = vld [vmem:[%s11210_s1 + $0xcf0] ss:$12 sps:$4 sm:$0xff]  }
 0x110   :  { %4921 = vmatpush1.bf16.msra.mxu1 %v8139_v35  ;;  %4881 = vmatprep.subr.bf16.mxu0 %v8144_v55  ;;  %v990_v35 = vcombine.high %v9548_v63, %v9548_v63  ;;  %v8199_v55 = vld [vmem:[%s11210_s1 + $0xe70] ss:$12 sps:$4 sm:$0xff]   ;;  %v8202_v63 = vld [vmem:[%s11210_s1 + $0xcd8] ss:$12 sps:$4 sm:$0xff]  }
 0x111   :  { %4922 = vmatprep.subr.bf16.mxu1 %v8147_v56  ;;  %v8204_v56 = vld [vmem:[%s11210_s1 + $0xcdc] ss:$12 sps:$4 sm:$0xff]  }
 0x113   :  { %4882 = vmatpush1.bf16.msra.mxu0 %v8142_v57  ;;  %v8207_v57 = vld [vmem:[%s11210_s1 + $0xe5c] ss:$12 sps:$4 sm:$0xff]  }
 0x114   :  { %4923 = vmatpush1.bf16.msra.mxu1 %v8145_v58  ;;  %4883 = vmatprep.subr.bf16.mxu0 %v8150_v61  ;;  %v9786_v58 = vrot.slane %v990_v35, %v8842_v49  ;;  %v8205_v61 = vld [vmem:[%s11210_s1 + $0xe58] ss:$12 sps:$4 sm:$0xff]  }
 0x115   :  { %4924 = vmatprep.subr.bf16.mxu1 %v8153_v62  ;;  %v8210_v62 = vld [vmem:[%s11210_s1 + $0xcc4] ss:$12 sps:$4 sm:$0xff]   ;;  %v8240_v35 = vld [vmem:[%s11210_s1 + $0xf4c] ss:$12 sps:$4 sm:$0xff]  }
 0x117   :  { %4884 = vmatpush1.bf16.msra.mxu0 %v8148_v1  ;;  %v8213_v1 = vld [vmem:[%s11210_s1 + $0xe44] ss:$12 sps:$4 sm:$0xff]  }
 0x118   :  { %4925 = vmatpush1.bf16.msra.mxu1 %v8151_v2  ;;  %4885 = vmatprep.subr.bf16.mxu0 %v8156_v3  ;;  %v8208_v2 = vld [vmem:[%s11210_s1 + $0xcc0] ss:$12 sps:$4 sm:$0xff]   ;;  %v1006_v3 = vcombine.high %v9786_v58, %v9786_v58 }
 0x119   :  { %4926 = vmatprep.subr.bf16.mxu1 %v8159_v5  ;;  %v9804_v5 = vrot.slane %v9561_v4, %v8842_v49  ;;  %v8214_v4 = vld [vmem:[%s11210_s1 + $0xfa8] ss:$12 sps:$4 sm:$0xff]  }
 0x11b   :  { %4886 = vmatpush1.bf16.msra.mxu0 %v8154_v7  ;;  %v8211_v7 = vld [vmem:[%s11210_s1 + $0xe40] ss:$12 sps:$4 sm:$0xff]  }
 0x11c   :  { %4927 = vmatpush1.bf16.msra.mxu1 %v8157_v8  ;;  %4887 = vmatprep.subr.bf16.mxu0 %v8162_v9  ;;  %v8216_v8 = vld [vmem:[%s11210_s1 + $0xfac] ss:$12 sps:$4 sm:$0xff]  }
 0x11d   :  { %4928 = vmatprep.subr.bf16.mxu1 %v8165_v10  ;;  %v8219_v9 = vld [vmem:[%s11210_s1 + $0x112c] ss:$12 sps:$4 sm:$0xff]   ;;  %v8217_v10 = vld [vmem:[%s11210_s1 + $0x1128] ss:$12 sps:$4 sm:$0xff]  }
 0x11f   :  { %4888 = vmatpush1.bf16.msra.mxu0 %v8160_v11  ;;  %v9822_v11 = vrot.slane %v1006_v3, %v8842_v49  ;;  %v8255_v3 = vld [vmem:[%s11210_s1 + $0x109c] ss:$12 sps:$4 sm:$0xff]  }
 0x120   :  { %4929 = vmatpush1.bf16.msra.mxu1 %v8163_v14  ;;  %4889 = vmatprep.subr.bf16.mxu0 %v8168_v15  ;;  %v9826_v14 = vcombine.high %v9804_v5, %v9804_v5  ;;  %v8222_v15 = vld [vmem:[%s11210_s1 + $0xf94] ss:$12 sps:$4 sm:$0xff]  }
 0x121   :  { %4930 = vmatprep.subr.bf16.mxu1 %v8171_v16  ;;  %v8225_v16 = vld [vmem:[%s11210_s1 + $0x1114] ss:$12 sps:$4 sm:$0xff]  }
 0x123   :  { %4890 = vmatpush2.bf16.msra.mxu0 %v8166_v39  ;;  %v8220_v39 = vld [vmem:[%s11210_s1 + $0xf90] ss:$12 sps:$4 sm:$0xff]  }
 0x124   :  { %4931 = vmatpush2.bf16.msra.mxu1 %v8169_v21  ;;  %4891 = vmatprep.subr.bf16.mxu0 %v8174_v22  ;;  %v8223_v21 = vld [vmem:[%s11210_s1 + $0x1110] ss:$12 sps:$4 sm:$0xff]   ;;  %v9842_v22 = vcombine.high %v9822_v11, %v9822_v11 }
 0x125   :  { %4932 = vmatprep.subr.bf16.mxu1 %v8177_v24 }
 0x127   :  { %4892 = vmatpush2.bf16.msra.mxu0 %v8172_v27 }
 0x128   :  { %4933 = vmatpush2.bf16.msra.mxu1 %v8175_v28  ;;  %4893 = vmatprep.subr.bf16.mxu0 %v8180_v29 }
 0x129   :  { %4934 = vmatprep.subr.bf16.mxu1 %v8183_v6 }
 0x12b   :  { %4894 = vmatpush2.bf16.msra.mxu0 %v8178_v33  ;;  %v8228_v33 = vld [vmem:[%s11210_s1 + $0xf7c] ss:$12 sps:$4 sm:$0xff]  }
 0x12c   :  { %4935 = vmatpush2.bf16.msra.mxu1 %v8181_v34  ;;  %4895 = vmatprep.subr.bf16.mxu0 %v8186_v36  ;;  %v8231_v34 = vld [vmem:[%s11210_s1 + $0x10fc] ss:$12 sps:$4 sm:$0xff]  }
 0x12d   :  { %4936 = vmatprep.subr.bf16.mxu1 %v8189_v37 }
 0x12f   :  { %4896 = vmatpush2.bf16.msra.mxu0 %v8184_v32  ;;  %v8229_v32 = vld [vmem:[%s11210_s1 + $0x10f8] ss:$12 sps:$4 sm:$0xff]  }
 0x130   :  { %4937 = vmatpush2.bf16.msra.mxu1 %v8187_v40  ;;  %4897 = vmatprep.subr.bf16.mxu0 %v8192_v44 }
 0x131   :  { %4938 = vmatprep.subr.bf16.mxu1 %v8195_v45 }
 0x133   :  { %4898 = vmatpush2.bf16.msra.mxu0 %v8190_v46 }
 0x134   :  { %4939 = vmatpush2.bf16.msra.mxu1 %v8193_v47  ;;  %4899 = vmatprep.subr.bf16.mxu0 %v8198_v50  ;;  %v8234_v47 = vld [vmem:[%s11210_s1 + $0xf64] ss:$12 sps:$4 sm:$0xff]  }
 0x135   :  { %4940 = vmatprep.subr.bf16.mxu1 %v8201_v51  ;;  %v8237_v50 = vld [vmem:[%s11210_s1 + $0x10e4] ss:$12 sps:$4 sm:$0xff]   ;;  %v8232_v51 = vld [vmem:[%s11210_s1 + $0xf60] ss:$12 sps:$4 sm:$0xff]  }
 0x137   :  { %4900 = vmatpush2.bf16.msra.mxu0 %v8196_v52  ;;  %v8235_v52 = vld [vmem:[%s11210_s1 + $0x10e0] ss:$12 sps:$4 sm:$0xff]  }
 0x138   :  { %4941 = vmatpush2.bf16.msra.mxu1 %v8199_v55  ;;  %4901 = vmatprep.subr.bf16.mxu0 %v8204_v56  ;;  %v8243_v55 = vld [vmem:[%s11210_s1 + $0x10cc] ss:$12 sps:$4 sm:$0xff]   ;;  %v8238_v56 = vld [vmem:[%s11210_s1 + $0xf48] ss:$12 sps:$4 sm:$0xff]  }
 0x139   :  { %4942 = vmatprep.subr.bf16.mxu1 %v8207_v57  ;;  %v8241_v57 = vld [vmem:[%s11210_s1 + $0x10c8] ss:$12 sps:$4 sm:$0xff]  }
 0x13b   :  { %4902 = vmatpush2.bf16.msra.mxu0 %v8202_v63  ;;  %v8246_v63 = vld [vmem:[%s11210_s1 + $0xf34] ss:$12 sps:$4 sm:$0xff]  }
 0x13c   :  { %4943 = vmatpush2.bf16.msra.mxu1 %v8205_v61  ;;  %4903 = vmatprep.subr.bf16.mxu0 %v8210_v62  ;;  %v8249_v61 = vld [vmem:[%s11210_s1 + $0x10b4] ss:$12 sps:$4 sm:$0xff]   ;;  %v8244_v62 = vld [vmem:[%s11210_s1 + $0xf30] ss:$12 sps:$4 sm:$0xff]  }
 0x13d   :  { %4944 = vmatprep.subr.bf16.mxu1 %v8213_v1  ;;  %v8247_v1 = vld [vmem:[%s11210_s1 + $0x10b0] ss:$12 sps:$4 sm:$0xff]  }
 0x13f   :  { %4904 = vmatpush2.bf16.msra.mxu0 %v8208_v2  ;;  %v8252_v2 = vld [vmem:[%s11210_s1 + $0xf1c] ss:$12 sps:$4 sm:$0xff]  }
 0x140   :  { %4945 = vmatpush2.bf16.msra.mxu1 %v8211_v7  ;;  %4955 = vmatprep.subr.bf16.mxu0 %v8216_v8  ;;  %v8250_v7 = vld [vmem:[%s11210_s1 + $0xf18] ss:$12 sps:$4 sm:$0xff]  }
 0x141   :  { %4996 = vmatprep.subr.bf16.mxu1 %v8219_v9  ;;  %v8253_v8 = vld [vmem:[%s11210_s1 + $0x1098] ss:$12 sps:$4 sm:$0xff]  }
 0x142   :  { %v4661_v24 = vpop.f32.mrf.mxu0  ;;  %4906 = vmatmul.mubr.bf16.vlgmr.msra.gmra.mxu0 %v9804_v5  ;;  %v8258_v9 = vld [vmem:[%s11210_s1 + $0xf04] ss:$12 sps:$4 sm:$0xff]  }
 0x143   :  { %v4702_v27 = vpop.f32.mrf.mxu1  ;;  %4947 = vmatmul.mubr.bf16.vlgmr.msra.gmra.mxu1 %v9826_v14  ;;  %v4662_v28 = vadd.f32 %v4661_v24, %v9624_v31  ;;  %4956 = vmatpush1.bf16.msra.mxu0 %v8214_v4  ;;  %v8226_v31 = vld [vmem:[%s11210_s1 + $0xf78] ss:$12 sps:$4 sm:$0xff]   ;;  %v8265_v24 = vld [vmem:[%s11210_s1 + $0x11e8] ss:$12 sps:$4 sm:$0xff]  }
 0x144   :  { %4997 = vmatpush1.bf16.msra.mxu1 %v8217_v10  ;;  %v4663_v29 = vpop.f32.mrf.mxu0  ;;  %4957 = vmatprep.subr.bf16.mxu0 %v8222_v15  ;;  %v8261_v4 = vld [vmem:[%s11210_s1 + $0x1084] ss:$12 sps:$4 sm:$0xff]   ;;  %v8256_v10 = vld [vmem:[%s11210_s1 + $0xf00] ss:$12 sps:$4 sm:$0xff]  }
 0x145   :  { %v4704_v6 = vpop.f32.mrf.mxu1  ;;  %4998 = vmatprep.subr.bf16.mxu1 %v8225_v16  ;;  %v9853_v36 = vadd.f32 %v4702_v27, %v4662_v28  ;;  %v4664_v37 = vadd.f32 %v4663_v29, %v9632_v38  ;;  %4987 = vmatprep.mubr.bf16.mxu0 %v9822_v11  ;;  %v8259_v15 = vld [vmem:[%s11210_s1 + $0x1080] ss:$12 sps:$4 sm:$0xff]   ;;  %v8268_v29 = vld [vmem:[%s11210_s1 + $0x1050] ss:$12 sps:$4 sm:$0xff]  }
 0x146   :  { %5028 = vmatprep.mubr.bf16.mxu1 %v9842_v22  ;;  %v4665_v40 = vpop.f32.mrf.mxu0  ;;  %v8264_v16 = vld [vmem:[%s11210_s1 + $0x106c] ss:$12 sps:$4 sm:$0xff]   ;;  %v8270_v27 = vld [vmem:[%s11210_s1 + $0x1054] ss:$12 sps:$4 sm:$0xff]  }
 0x147   :  { %v4706_v44 = vpop.f32.mrf.mxu1  ;;  %v9864_v45 = vadd.f32 %v4704_v6, %v4664_v37  ;;  %4958 = vmatpush1.bf16.msra.mxu0 %v8220_v39  ;;  %v8267_v39 = vld [vmem:[%s11210_s1 + $0x11ec] ss:$12 sps:$4 sm:$0xff]   ;;  %v8273_v28 = vld [vmem:[%s11210_s1 + $0x11d4] ss:$12 sps:$4 sm:$0xff]   ;;  %v8271_v6 = vld [vmem:[%s11210_s1 + $0x11d0] ss:$12 sps:$4 sm:$0xff]  }
 0x148   :  { %4999 = vmatpush1.bf16.msra.mxu1 %v8223_v21  ;;  %v4666_v46 = vpop.f32.mrf.mxu0  ;;  %4959 = vmatprep.subr.bf16.mxu0 %v8228_v33  ;;  %v8262_v21 = vld [vmem:[%s11210_s1 + $0x1068] ss:$12 sps:$4 sm:$0xff]   ;;  %v8274_v37 = vld [vmem:[%s11210_s1 + $0x1038] ss:$12 sps:$4 sm:$0xff]   ;;  %v8280_v44 = vld [vmem:[%s11210_s1 + $0x1020] ss:$12 sps:$4 sm:$0xff]  }
 0x149   :  { %v4707_v38 = vpop.f32.mrf.mxu1  ;;  %5000 = vmatprep.subr.bf16.mxu1 %v8231_v34  ;;  %v8276_v33 = vld [vmem:[%s11210_s1 + $0x103c] ss:$12 sps:$4 sm:$0xff]   ;;  %v8285_v40 = vld [vmem:[%s11210_s1 + $0x11a4] ss:$12 sps:$4 sm:$0xff]   ;;  %v8283_v46 = vld [vmem:[%s11210_s1 + $0x11a0] ss:$12 sps:$4 sm:$0xff]  }
 0x14a   :  { %v8279_v34 = vld [vmem:[%s11210_s1 + $0x11bc] ss:$12 sps:$4 sm:$0xff]   ;;  %v8288_v38 = vld [vmem:[%s11210_s1 + $0x100c] ss:$12 sps:$4 sm:$0xff]  }
 0x14b   :  { %4960 = vmatpush1.bf16.msra.mxu0 %v8226_v31  ;;  %v8277_v31 = vld [vmem:[%s11210_s1 + $0x11b8] ss:$12 sps:$4 sm:$0xff]  }
 0x14c   :  { %5001 = vmatpush1.bf16.msra.mxu1 %v8229_v32  ;;  %4961 = vmatprep.subr.bf16.mxu0 %v8234_v47  ;;  %v8282_v32 = vld [vmem:[%s11210_s1 + $0x1024] ss:$12 sps:$4 sm:$0xff]   ;;  %v8291_v47 = vld [vmem:[%s11210_s1 + $0x118c] ss:$12 sps:$4 sm:$0xff]  }
 0x14d   :  { %5002 = vmatprep.subr.bf16.mxu1 %v8237_v50  ;;  %v8286_v50 = vld [vmem:[%s11210_s1 + $0x1008] ss:$12 sps:$4 sm:$0xff]  }
 0x14f   :  { %4962 = vmatpush1.bf16.msra.mxu0 %v8232_v51  ;;  %v8289_v51 = vld [vmem:[%s11210_s1 + $0x1188] ss:$12 sps:$4 sm:$0xff]  }
 0x150   :  { %5003 = vmatpush1.bf16.msra.mxu1 %v8235_v52  ;;  %4963 = vmatprep.subr.bf16.mxu0 %v8240_v35  ;;  %v8294_v52 = vld [vmem:[%s11210_s1 + $0xff4] ss:$12 sps:$4 sm:$0xff]  }
 0x151   :  { %5004 = vmatprep.subr.bf16.mxu1 %v8243_v55  ;;  %v8297_v35 = vld [vmem:[%s11210_s1 + $0x1174] ss:$12 sps:$4 sm:$0xff]   ;;  %v8292_v55 = vld [vmem:[%s11210_s1 + $0xff0] ss:$12 sps:$4 sm:$0xff]  }
 0x153   :  { %4964 = vmatpush1.bf16.msra.mxu0 %v8238_v56  ;;  %v8295_v56 = vld [vmem:[%s11210_s1 + $0x1170] ss:$12 sps:$4 sm:$0xff]  }
 0x154   :  { %5005 = vmatpush1.bf16.msra.mxu1 %v8241_v57  ;;  %4965 = vmatprep.subr.bf16.mxu0 %v8246_v63  ;;  %v8300_v57 = vld [vmem:[%s11210_s1 + $0xfdc] ss:$12 sps:$4 sm:$0xff]  }
 0x155   :  { %5006 = vmatprep.subr.bf16.mxu1 %v8249_v61  ;;  %v8303_v63 = vld [vmem:[%s11210_s1 + $0x115c] ss:$12 sps:$4 sm:$0xff]   ;;  %v8298_v61 = vld [vmem:[%s11210_s1 + $0xfd8] ss:$12 sps:$4 sm:$0xff]  }
 0x157   :  { %4966 = vmatpush1.bf16.msra.mxu0 %v8244_v62  ;;  %v8301_v62 = vld [vmem:[%s11210_s1 + $0x1158] ss:$12 sps:$4 sm:$0xff]  }
 0x158   :  { %5007 = vmatpush1.bf16.msra.mxu1 %v8247_v1  ;;  %4967 = vmatprep.subr.bf16.mxu0 %v8252_v2  ;;  %v8306_v1 = vld [vmem:[%s11210_s1 + $0xfc4] ss:$12 sps:$4 sm:$0xff]  }
 0x159   :  { %5008 = vmatprep.subr.bf16.mxu1 %v8255_v3  ;;  %v8309_v2 = vld [vmem:[%s11210_s1 + $0x1144] ss:$12 sps:$4 sm:$0xff]   ;;  %v8304_v3 = vld [vmem:[%s11210_s1 + $0xfc0] ss:$12 sps:$4 sm:$0xff]  }
 0x15b   :  { %4968 = vmatpush1.bf16.msra.mxu0 %v8250_v7  ;;  %v8307_v7 = vld [vmem:[%s11210_s1 + $0x1140] ss:$12 sps:$4 sm:$0xff]  }
 0x15c   :  { %5009 = vmatpush1.bf16.msra.mxu1 %v8253_v8  ;;  %4969 = vmatprep.subr.bf16.mxu0 %v8258_v9  ;;  %v10024_v8 = vrot.slane %v9786_v58, %v8842_v49  ;;  %v8313_v9 = vld [vmem:[%s11210_s1 + $0x12ac] ss:$12 sps:$4 sm:$0xff]   ;;  %v8311_v58 = vld [vmem:[%s11210_s1 + $0x12a8] ss:$12 sps:$4 sm:$0xff]  }
 0x15d   :  { %5010 = vmatprep.subr.bf16.mxu1 %v8261_v4  ;;  %v8316_v4 = vld [vmem:[%s11210_s1 + $0x142c] ss:$12 sps:$4 sm:$0xff]  }
 0x15f   :  { %4970 = vmatpush1.bf16.msra.mxu0 %v8256_v10  ;;  %v10035_v10 = vld.sshfl [vmem:[%s11211_s0 + $0x18] sm:$0x13 pattern:$0x75316420] }
 0x160   :  { %5011 = vmatpush1.bf16.msra.mxu1 %v8259_v15  ;;  %4971 = vmatprep.subr.bf16.mxu0 %v8264_v16  ;;  %v8314_v15 = vld [vmem:[%s11210_s1 + $0x1428] ss:$12 sps:$4 sm:$0xff]   ;;  %v1046_v16 = vcombine.high %v10035_v10, %v10035_v10 }
 0x161   :  { %5012 = vmatprep.subr.bf16.mxu1 %v8267_v39  ;;  %v10047_v39 = vcombine.high %v10024_v8, %v10024_v8 }
 0x163   :  { %4972 = vmatpush2.bf16.msra.mxu0 %v8262_v21  ;;  %v8319_v21 = vld [vmem:[%s11210_s1 + $0x1294] ss:$12 sps:$4 sm:$0xff]  }
 0x164   :  { %5013 = vmatpush2.bf16.msra.mxu1 %v8265_v24  ;;  %4973 = vmatprep.subr.bf16.mxu0 %v8270_v27  ;;  %v8322_v24 = vld [vmem:[%s11210_s1 + $0x1414] ss:$12 sps:$4 sm:$0xff]   ;;  %v8317_v27 = vld [vmem:[%s11210_s1 + $0x1290] ss:$12 sps:$4 sm:$0xff]  }
 0x165   :  { %5014 = vmatprep.subr.bf16.mxu1 %v8273_v28  ;;  %v8320_v28 = vld [vmem:[%s11210_s1 + $0x1410] ss:$12 sps:$4 sm:$0xff]  }
 0x167   :  { %4974 = vmatpush2.bf16.msra.mxu0 %v8268_v29  ;;  %v10062_v29 = vrot.slane %v1046_v16, %v8842_v49  ;;  %v8347_v16 = vld [vmem:[%s11210_s1 + $0x1218] ss:$12 sps:$4 sm:$0xff]  }
 0x168   :  { %5015 = vmatpush2.bf16.msra.mxu1 %v8271_v6  ;;  %4975 = vmatprep.subr.bf16.mxu0 %v8276_v33 }
 0x169   :  { %5016 = vmatprep.subr.bf16.mxu1 %v8279_v34 }
 0x16b   :  { %4976 = vmatpush2.bf16.msra.mxu0 %v8274_v37 }
 0x16c   :  { %5017 = vmatpush2.bf16.msra.mxu1 %v8277_v31  ;;  %4977 = vmatprep.subr.bf16.mxu0 %v8282_v32  ;;  %v8325_v32 = vld [vmem:[%s11210_s1 + $0x127c] ss:$12 sps:$4 sm:$0xff]  }
 0x16d   :  { %5018 = vmatprep.subr.bf16.mxu1 %v8285_v40  ;;  %v8328_v40 = vld [vmem:[%s11210_s1 + $0x13fc] ss:$12 sps:$4 sm:$0xff]  }
 0x16f   :  { %4978 = vmatpush2.bf16.msra.mxu0 %v8280_v44 }
 0x170   :  { %5019 = vmatpush2.bf16.msra.mxu1 %v8283_v46  ;;  %4979 = vmatprep.subr.bf16.mxu0 %v8288_v38  ;;  %v8326_v38 = vld [vmem:[%s11210_s1 + $0x13f8] ss:$12 sps:$4 sm:$0xff]  }
 0x171   :  { %5020 = vmatprep.subr.bf16.mxu1 %v8291_v47  ;;  %v8673_v47 = vmov 0  }
 0x173   :  { %4980 = vmatpush2.bf16.msra.mxu0 %v8286_v50 }
 0x174   :  { %5021 = vmatpush2.bf16.msra.mxu1 %v8289_v51  ;;  %4981 = vmatprep.subr.bf16.mxu0 %v8294_v52 }
 0x175   :  { %5022 = vmatprep.subr.bf16.mxu1 %v8297_v35 }
 0x177   :  { %4982 = vmatpush2.bf16.msra.mxu0 %v8292_v55  ;;  %v8331_v55 = vld [vmem:[%s11210_s1 + $0x1264] ss:$12 sps:$4 sm:$0xff]  }
 0x178   :  { %5023 = vmatpush2.bf16.msra.mxu1 %v8295_v56  ;;  %4983 = vmatprep.subr.bf16.mxu0 %v8300_v57  ;;  %v8334_v56 = vld [vmem:[%s11210_s1 + $0x13e4] ss:$12 sps:$4 sm:$0xff]   ;;  %v8329_v57 = vld [vmem:[%s11210_s1 + $0x1260] ss:$12 sps:$4 sm:$0xff]  }
 0x179   :  { %5024 = vmatprep.subr.bf16.mxu1 %v8303_v63  ;;  %v8332_v63 = vld [vmem:[%s11210_s1 + $0x13e0] ss:$12 sps:$4 sm:$0xff]  }
 0x17b   :  { %4984 = vmatpush2.bf16.msra.mxu0 %v8298_v61  ;;  %v8337_v61 = vld [vmem:[%s11210_s1 + $0x124c] ss:$12 sps:$4 sm:$0xff]  }
 0x17c   :  { %5025 = vmatpush2.bf16.msra.mxu1 %v8301_v62  ;;  %4985 = vmatprep.subr.bf16.mxu0 %v8306_v1  ;;  %v8340_v62 = vld [vmem:[%s11210_s1 + $0x13cc] ss:$12 sps:$4 sm:$0xff]   ;;  %v8335_v1 = vld [vmem:[%s11210_s1 + $0x1248] ss:$12 sps:$4 sm:$0xff]  }
 0x17d   :  { %5026 = vmatprep.subr.bf16.mxu1 %v8309_v2  ;;  %v8338_v2 = vld [vmem:[%s11210_s1 + $0x13c8] ss:$12 sps:$4 sm:$0xff]  }
 0x17f   :  { %4986 = vmatpush2.bf16.msra.mxu0 %v8304_v3  ;;  %v8343_v3 = vld [vmem:[%s11210_s1 + $0x1234] ss:$12 sps:$4 sm:$0xff]  }
 0x180   :  { %5027 = vmatpush2.bf16.msra.mxu1 %v8307_v7  ;;  %5037 = vmatprep.subr.bf16.mxu0 %v8313_v9  ;;  %v8346_v7 = vld [vmem:[%s11210_s1 + $0x13b4] ss:$12 sps:$4 sm:$0xff]   ;;  %v8341_v9 = vld [vmem:[%s11210_s1 + $0x1230] ss:$12 sps:$4 sm:$0xff]  }
 0x181   :  { %5078 = vmatprep.subr.bf16.mxu1 %v8316_v4  ;;  %v8344_v4 = vld [vmem:[%s11210_s1 + $0x13b0] ss:$12 sps:$4 sm:$0xff]  }
 0x182   :  { %v4743_v6 = vpop.f32.mrf.mxu0  ;;  %4988 = vmatmul.mubr.bf16.vlgmr.msra.gmra.mxu0 %v10024_v8 }
 0x183   :  { %v4784_v33 = vpop.f32.mrf.mxu1  ;;  %5029 = vmatmul.mubr.bf16.vlgmr.msra.gmra.mxu1 %v10047_v39  ;;  %v4744_v34 = vadd.f32 %v4743_v6, %v9853_v36  ;;  %5038 = vmatpush1.bf16.msra.mxu0 %v8311_v58  ;;  %v8323_v36 = vld [vmem:[%s11210_s1 + $0x1278] ss:$12 sps:$4 sm:$0xff]   ;;  %v8349_v58 = vld [vmem:[%s11210_s1 + $0x121c] ss:$12 sps:$4 sm:$0xff]   ;;  %v10144_v6 = vrot.slane %v10035_v10, %v8842_v49 }
 0x184   :  { %5079 = vmatpush1.bf16.msra.mxu1 %v8314_v15  ;;  %v4745_v37 = vpop.f32.mrf.mxu0  ;;  %5039 = vmatprep.subr.bf16.mxu0 %v8319_v21  ;;  %v8352_v15 = vld [vmem:[%s11210_s1 + $0x139c] ss:$12 sps:$4 sm:$0xff]   ;;  %v8350_v21 = vld [vmem:[%s11210_s1 + $0x1398] ss:$12 sps:$4 sm:$0xff]  }
 0x185   :  { %v4786_v31 = vpop.f32.mrf.mxu1  ;;  %5080 = vmatprep.subr.bf16.mxu1 %v8322_v24  ;;  %v10073_v44 = vadd.f32 %v4784_v33, %v4744_v34  ;;  %v4746_v46 = vadd.f32 %v4745_v37, %v9864_v45  ;;  %5110 = vmatprep.mubr.bf16.mxu1 %v8673_v47  ;;  %v8355_v24 = vld [vmem:[%s11210_s1 + $0x1204] ss:$12 sps:$4 sm:$0xff]   ;;  %v8356_v33 = vld [vmem:[%s11210_s1 + $0x1380] ss:$12 sps:$4 sm:$0xff]   ;;  %v8359_v10 = vld [vmem:[%s11210_s1 + $0x1368] ss:$12 sps:$4 sm:$0xff]  }
 0x186   :  { %5069 = vmatprep.mubr.bf16.mxu0 %v10062_v29  ;;  %v4747_v50 = vpop.f32.mrf.mxu0  ;;  %v8361_v34 = vld [vmem:[%s11210_s1 + $0x136c] ss:$12 sps:$4 sm:$0xff]   ;;  %v8362_v37 = vld [vmem:[%s11210_s1 + $0x170] ss:$12 sps:$4 sm:$0xff]  }
 0x187   :  { %v4788_v51 = vpop.f32.mrf.mxu1  ;;  %v10083_v52 = vadd.f32 %v4786_v31, %v4746_v46  ;;  %5040 = vmatpush1.bf16.msra.mxu0 %v8317_v27  ;;  %v8358_v27 = vld [vmem:[%s11210_s1 + $0x1384] ss:$12 sps:$4 sm:$0xff]   ;;  %v8371_v47 = vld [vmem:[%s11210_s1 + $0x133c] ss:$12 sps:$4 sm:$0xff]   ;;  %v8372_v50 = vld [vmem:[%s11210_s1 + $0x140] ss:$12 sps:$4 sm:$0xff]  }
 0x188   :  { %5081 = vmatpush1.bf16.msra.mxu1 %v8320_v28  ;;  %v4748_v35 = vpop.f32.mrf.mxu0  ;;  %5041 = vmatprep.subr.bf16.mxu0 %v8325_v32  ;;  %v8353_v28 = vld [vmem:[%s11210_s1 + $0x1200] ss:$12 sps:$4 sm:$0xff]   ;;  %v8363_v31 = vld [vmem:[%s11210_s1 + $0xb0] ss:$12 sps:$4 sm:$0xff]   ;;  %v10163_v32 = vcombine.high %v10144_v6, %v10144_v6  ;;  %v8367_v46 = vld [vmem:[%s11210_s1 + $0x158] ss:$12 sps:$4 sm:$0xff]  }
 0x189   :  { %v4789_v45 = vpop.f32.mrf.mxu1  ;;  %5082 = vmatprep.subr.bf16.mxu1 %v8328_v40  ;;  %v8366_v40 = vld [vmem:[%s11210_s1 + $0x1354] ss:$12 sps:$4 sm:$0xff]   ;;  %v8369_v51 = vld [vmem:[%s11210_s1 + $0x1338] ss:$12 sps:$4 sm:$0xff]  }
 0x18a   :  { %v8373_v35 = vld [vmem:[%s11210_s1 + $0x80] ss:$12 sps:$4 sm:$0xff]   ;;  %v8376_v45 = vld [vmem:[%s11210_s1 + $0x1324] ss:$12 sps:$4 sm:$0xff]  }
 0x18b   :  { %5042 = vmatpush1.bf16.msra.mxu0 %v8323_v36  ;;  %v8364_v36 = vld [vmem:[%s11210_s1 + $0x1350] ss:$12 sps:$4 sm:$0xff]  }
 0x18c   :  { %5083 = vmatpush1.bf16.msra.mxu1 %v8326_v38  ;;  %5043 = vmatprep.subr.bf16.mxu0 %v8331_v55  ;;  %v8368_v38 = vld [vmem:[%s11210_s1 + $0x98] ss:$12 sps:$4 sm:$0xff]   ;;  %v8377_v55 = vld [vmem:[%s11210_s1 + $0x128] ss:$12 sps:$4 sm:$0xff]  }
 0x18d   :  { %5084 = vmatprep.subr.bf16.mxu1 %v8334_v56  ;;  %v8378_v56 = vld [vmem:[%s11210_s1 + $0x68] ss:$12 sps:$4 sm:$0xff]  }
 0x18f   :  { %5044 = vmatpush1.bf16.msra.mxu0 %v8329_v57  ;;  %v8381_v57 = vld [vmem:[%s11210_s1 + $0x130c] ss:$12 sps:$4 sm:$0xff]  }
 0x190   :  { %5085 = vmatpush1.bf16.msra.mxu1 %v8332_v63  ;;  %5045 = vmatprep.subr.bf16.mxu0 %v8337_v61  ;;  %v8382_v63 = vld [vmem:[%s11210_s1 + $0x110] ss:$12 sps:$4 sm:$0xff]   ;;  %v8379_v61 = vld [vmem:[%s11210_s1 + $0x1308] ss:$12 sps:$4 sm:$0xff]  }
 0x191   :  { %5086 = vmatprep.subr.bf16.mxu1 %v8340_v62  ;;  %v8383_v62 = vld [vmem:[%s11210_s1 + $0x50] ss:$12 sps:$4 sm:$0xff]  }
 0x193   :  { %5046 = vmatpush1.bf16.msra.mxu0 %v8335_v1  ;;  %v8386_v1 = vld [vmem:[%s11210_s1 + $0x12f4] ss:$12 sps:$4 sm:$0xff]  }
 0x194   :  { %5087 = vmatpush1.bf16.msra.mxu1 %v8338_v2  ;;  %5047 = vmatprep.subr.bf16.mxu0 %v8343_v3  ;;  %v8387_v2 = vld [vmem:[%s11210_s1 + $0xf8] ss:$12 sps:$4 sm:$0xff]   ;;  %v8384_v3 = vld [vmem:[%s11210_s1 + $0x12f0] ss:$12 sps:$4 sm:$0xff]  }
 0x195   :  { %5088 = vmatprep.subr.bf16.mxu1 %v8346_v7  ;;  %v8388_v7 = vld [vmem:[%s11210_s1 + $0x38] ss:$12 sps:$4 sm:$0xff]  }
 0x197   :  { %5048 = vmatpush1.bf16.msra.mxu0 %v8341_v9  ;;  %v8391_v9 = vld [vmem:[%s11210_s1 + $0x12dc] ss:$12 sps:$4 sm:$0xff]  }
 0x198   :  { %5089 = vmatpush1.bf16.msra.mxu1 %v8344_v4  ;;  %5049 = vmatprep.subr.bf16.mxu0 %v8349_v58  ;;  %v8392_v4 = vld [vmem:[%s11210_s1 + $0xe0] ss:$12 sps:$4 sm:$0xff]   ;;  %v8389_v58 = vld [vmem:[%s11210_s1 + $0x12d8] ss:$12 sps:$4 sm:$0xff]  }
 0x199   :  { %5090 = vmatprep.subr.bf16.mxu1 %v8352_v15  ;;  %v8393_v15 = vld [vmem:[%s11210_s1 + $0x20] ss:$12 sps:$4 sm:$0xff]  }
 0x19b   :  { %5050 = vmatpush1.bf16.msra.mxu0 %v8347_v16  ;;  %v8396_v16 = vld [vmem:[%s11210_s1 + $0x12c4] ss:$12 sps:$4 sm:$0xff]  }
 0x19c   :  { %5091 = vmatpush1.bf16.msra.mxu1 %v8350_v21  ;;  %5051 = vmatprep.subr.bf16.mxu0 %v8355_v24  ;;  %v8397_v21 = vld [vmem:[%s11210_s1 + $0xc8] ss:$12 sps:$4 sm:$0xff]   ;;  %v8394_v24 = vld [vmem:[%s11210_s1 + $0x12c0] ss:$12 sps:$4 sm:$0xff]  }
 0x19d   :  { %5092 = vmatprep.subr.bf16.mxu1 %v8358_v27  ;;  %v8398_v27 = vld [vmem:[%s11210_s1 + $0x8] ss:$12 sps:$4 sm:$0xff]  }
 0x19f   :  { %5052 = vmatpush1.bf16.msra.mxu0 %v8353_v28  ;;  %v8399_v28 = vld [vmem:[%s11210_s1 + $0x2f0] ss:$12 sps:$4 sm:$0xff]  }
 0x1a0   :  { %5093 = vmatpush1.bf16.msra.mxu1 %v8356_v33  ;;  %5053 = vmatprep.subr.bf16.mxu0 %v8361_v34  ;;  %v8400_v33 = vld [vmem:[%s11210_s1 + $0x470] ss:$12 sps:$4 sm:$0xff]  }
 0x1a1   :  { %7295 = vmatprep.subr.bf16.mxu1 %v8362_v37  ;;  %v8401_v34 = vld [vmem:[%s11210_s1 + $0x230] ss:$12 sps:$4 sm:$0xff]  }
 0x1a2   :  { %v8402_v37 = vld [vmem:[%s11210_s1 + $0x3b0] ss:$12 sps:$4 sm:$0xff]  }
 0x1a3   :  { %5111 = vmatmul.mubr.bf16.vlgmr.msra.gmra.mxu1 %v10163_v32  ;;  %5054 = vmatpush2.bf16.msra.mxu0 %v8359_v10  ;;  %v8403_v10 = vld [vmem:[%s11210_s1 + $0x2d8] ss:$12 sps:$4 sm:$0xff]  }
 0x1a4   :  { %7296 = vmatpush3.bf16.msra.mxu1 %v8363_v31  ;;  %5055 = vmatprep.subr.bf16.mxu0 %v8366_v40  ;;  %v8404_v31 = vld [vmem:[%s11210_s1 + $0x458] ss:$12 sps:$4 sm:$0xff]  }
 0x1a5   :  { %7297 = vmatprep.subr.bf16.mxu1 %v8367_v46  ;;  %5151 = vmatprep.mubr.bf16.mxu1 %v8870_v60  ;;  %v8374_v60 = vld [vmem:[%s11210_s1 + $0x1320] ss:$12 sps:$4 sm:$0xff]   ;;  %v8405_v40 = vld [vmem:[%s11210_s1 + $0x218] ss:$12 sps:$4 sm:$0xff]  }
 0x1a6   :  { %v8406_v46 = vld [vmem:[%s11210_s1 + $0x398] ss:$12 sps:$4 sm:$0xff]  }
 0x1a7   :  { %5056 = vmatpush2.bf16.msra.mxu0 %v8364_v36 }
 0x1a8   :  { %7298 = vmatpush3.bf16.msra.mxu1 %v8368_v38  ;;  %5057 = vmatprep.subr.bf16.mxu0 %v8371_v47 }
 0x1a9   :  { %7299 = vmatprep.subr.bf16.mxu1 %v8372_v50 }
 0x1ab   :  { %5058 = vmatpush2.bf16.msra.mxu0 %v8369_v51 }
 0x1ac   :  { %7300 = vmatpush3.bf16.msra.mxu1 %v8373_v35  ;;  %5059 = vmatprep.subr.bf16.mxu0 %v8376_v45  ;;  %v8407_v35 = vld [vmem:[%s11210_s1 + $0x2c0] ss:$12 sps:$4 sm:$0xff]  }
 0x1ad   :  { %7301 = vmatprep.subr.bf16.mxu1 %v8377_v55  ;;  %v8408_v45 = vld [vmem:[%s11210_s1 + $0x440] ss:$12 sps:$4 sm:$0xff]  }
 0x1af   :  { %5060 = vmatpush2.bf16.msra.mxu0 %v8374_v60  ;;  %v8410_v60 = vld [vmem:[%s11210_s1 + $0x380] ss:$12 sps:$4 sm:$0xff]  }
 0x1b0   :  { %7302 = vmatpush3.bf16.msra.mxu1 %v8378_v56  ;;  %5061 = vmatprep.subr.bf16.mxu0 %v8381_v57 }
 0x1b1   :  { %7303 = vmatprep.subr.bf16.mxu1 %v8382_v63 }
 0x1b3   :  { %5062 = vmatpush2.bf16.msra.mxu0 %v8379_v61 }
 0x1b4   :  { %7304 = vmatpush3.bf16.msra.mxu1 %v8383_v62  ;;  %5063 = vmatprep.subr.bf16.mxu0 %v8386_v1  ;;  %v8411_v62 = vld [vmem:[%s11210_s1 + $0x2a8] ss:$12 sps:$4 sm:$0xff]  }
 0x1b5   :  { %7305 = vmatprep.subr.bf16.mxu1 %v8387_v2  ;;  %v8414_v1 = vld [vmem:[%s11210_s1 + $0x368] ss:$12 sps:$4 sm:$0xff]   ;;  %v8415_v2 = vld [vmem:[%s11210_s1 + $0x290] ss:$12 sps:$4 sm:$0xff]  }
 0x1b7   :  { %5064 = vmatpush2.bf16.msra.mxu0 %v8384_v3  ;;  %v8416_v3 = vld [vmem:[%s11210_s1 + $0x410] ss:$12 sps:$4 sm:$0xff]  }
 0x1b8   :  { %7306 = vmatpush3.bf16.msra.mxu1 %v8388_v7  ;;  %5065 = vmatprep.subr.bf16.mxu0 %v8391_v9  ;;  %v8417_v7 = vld [vmem:[%s11210_s1 + $0x1d0] ss:$12 sps:$4 sm:$0xff]  }
 0x1b9   :  { %7307 = vmatprep.subr.bf16.mxu1 %v8392_v4  ;;  %v8418_v9 = vld [vmem:[%s11210_s1 + $0x350] ss:$12 sps:$4 sm:$0xff]   ;;  %v8419_v4 = vld [vmem:[%s11210_s1 + $0x278] ss:$12 sps:$4 sm:$0xff]  }
 0x1bb   :  { %5066 = vmatpush2.bf16.msra.mxu0 %v8389_v58  ;;  %v8420_v58 = vld [vmem:[%s11210_s1 + $0x3f8] ss:$12 sps:$4 sm:$0xff]  }
 0x1bc   :  { %7308 = vmatpush3.bf16.msra.mxu1 %v8393_v15  ;;  %5067 = vmatprep.subr.bf16.mxu0 %v8396_v16  ;;  %v8421_v15 = vld [vmem:[%s11210_s1 + $0x1b8] ss:$12 sps:$4 sm:$0xff]  }
 0x1bd   :  { %7309 = vmatprep.subr.bf16.mxu1 %v8397_v21  ;;  %v8422_v16 = vld [vmem:[%s11210_s1 + $0x338] ss:$12 sps:$4 sm:$0xff]   ;;  %v8423_v21 = vld [vmem:[%s11210_s1 + $0x260] ss:$12 sps:$4 sm:$0xff]  }
 0x1bf   :  { %5068 = vmatpush2.bf16.msra.mxu0 %v8394_v24  ;;  %v8424_v24 = vld [vmem:[%s11210_s1 + $0x3e0] ss:$12 sps:$4 sm:$0xff]  }
 0x1c0   :  { %7310 = vmatpush3.bf16.msra.mxu1 %v8398_v27  ;;  %7317 = vmatprep.subr.bf16.mxu0 %v8399_v28  ;;  %v8425_v27 = vld [vmem:[%s11210_s1 + $0x1a0] ss:$12 sps:$4 sm:$0xff]  }
 0x1c1   :  { %7339 = vmatprep.subr.bf16.mxu1 %v8400_v33  ;;  %v8426_v28 = vld [vmem:[%s11210_s1 + $0x320] ss:$12 sps:$4 sm:$0xff]   ;;  %v8427_v33 = vld [vmem:[%s11210_s1 + $0x248] ss:$12 sps:$4 sm:$0xff]  }
 0x1c2   :  { %v4825_v36 = vpop.f32.mrf.mxu0  ;;  %5070 = vmatmul.mubr.bf16.vlgmr.msra.gmra.mxu0 %v10144_v6 }
 0x1c3   :  { %v4866_v38 = vpop.f32.mrf.mxu1  ;;  %5152 = vmatmul.mubr.bf16.vlgmr.msra.gmra.mxu1 %v8920_v13  ;;  %v4826_v47 = vadd.f32 %v4825_v36, %v10073_v44  ;;  %7318 = vmatpush3.bf16.msra.mxu0 %v8401_v34  ;;  %v8409_v44 = vld [vmem:[%s11210_s1 + $0x200] ss:$12 sps:$4 sm:$0xff]   ;;  %v8428_v34 = vld [vmem:[%s11210_s1 + $0x3c8] ss:$12 sps:$4 sm:$0xff]   ;;  %v8434_v36 = vld [vmem:[%s11210_s1 + $0x6b0] ss:$12 sps:$4 sm:$0xff]  }
 0x1c4   :  { %7340 = vmatpush3.bf16.msra.mxu1 %v8402_v37  ;;  %v4827_v50 = vpop.f32.mrf.mxu0  ;;  %7319 = vmatprep.subr.bf16.mxu0 %v8403_v10  ;;  %v8429_v37 = vld [vmem:[%s11210_s1 + $0x188] ss:$12 sps:$4 sm:$0xff]  }
 0x1c5   :  { %v4868_v51 = vpop.f32.mrf.mxu1  ;;  %7341 = vmatprep.subr.bf16.mxu1 %v8404_v31  ;;  %v10284_v55 = vadd.f32 %v4866_v38, %v4826_v47  ;;  %v4828_v13 = vadd.f32 %v4827_v50, %v10083_v52  ;;  %5191 = vmatprep.mubr.bf16.mxu0 %v8883_v0  ;;  %v8412_v0 = vld [vmem:[%s11210_s1 + $0x428] ss:$12 sps:$4 sm:$0xff]   ;;  %v8431_v31 = vld [vmem:[%s11210_s1 + $0x5f0] ss:$12 sps:$4 sm:$0xff]   ;;  %v8435_v38 = vld [vmem:[%s11210_s1 + $0x5d8] ss:$12 sps:$4 sm:$0xff]  }
 0x1c6   :  { %5231 = vmatprep.mubr.bf16.mxu1 %v8932_v17  ;;  %v4829_v56 = vpop.f32.mrf.mxu0  ;;  %v8413_v17 = vld [vmem:[%s11210_s1 + $0x1e8] ss:$12 sps:$4 sm:$0xff]   ;;  %v8436_v47 = vld [vmem:[%s11210_s1 + $0x758] ss:$12 sps:$4 sm:$0xff]  }
 0x1c7   :  { %v4870_v57 = vpop.f32.mrf.mxu1  ;;  %v10295_v63 = vadd.f32 %v4868_v51, %v4828_v13  ;;  %7320 = vmatpush3.bf16.msra.mxu0 %v8405_v40  ;;  %v8430_v10 = vld [vmem:[%s11210_s1 + $0x308] ss:$12 sps:$4 sm:$0xff]   ;;  %v8432_v40 = vld [vmem:[%s11210_s1 + $0x770] ss:$12 sps:$4 sm:$0xff]   ;;  %v8437_v50 = vld [vmem:[%s11210_s1 + $0x518] ss:$12 sps:$4 sm:$0xff]  }
 0x1c8   :  { %7342 = vmatpush3.bf16.msra.mxu1 %v8406_v46  ;;  %v4830_v61 = vpop.f32.mrf.mxu0  ;;  %7321 = vmatprep.subr.bf16.mxu0 %v8407_v35  ;;  %v8433_v46 = vld [vmem:[%s11210_s1 + $0x530] ss:$12 sps:$4 sm:$0xff]   ;;  %v8438_v51 = vld [vmem:[%s11210_s1 + $0x698] ss:$12 sps:$4 sm:$0xff]   ;;  %v8439_v35 = vld [vmem:[%s11210_s1 + $0x5c0] ss:$12 sps:$4 sm:$0xff]  }
 0x1c9   :  { %v4871_v52 = vpop.f32.mrf.mxu1  ;;  %7343 = vmatprep.subr.bf16.mxu1 %v8408_v45  ;;  %v8440_v45 = vld [vmem:[%s11210_s1 + $0x740] ss:$12 sps:$4 sm:$0xff]   ;;  %v8448_v56 = vld [vmem:[%s11210_s1 + $0x710] ss:$12 sps:$4 sm:$0xff]  }
 0x1ca   :  { %v8441_v13 = vld [vmem:[%s11210_s1 + $0x500] ss:$12 sps:$4 sm:$0xff]   ;;  %v8449_v57 = vld [vmem:[%s11210_s1 + $0x4d0] ss:$12 sps:$4 sm:$0xff]   ;;  %v8451_v52 = vld [vmem:[%s11210_s1 + $0x578] ss:$12 sps:$4 sm:$0xff]  }
 0x1cb   :  { %7322 = vmatpush3.bf16.msra.mxu0 %v8409_v44  ;;  %v8444_v44 = vld [vmem:[%s11210_s1 + $0x728] ss:$12 sps:$4 sm:$0xff]   ;;  %v8450_v61 = vld [vmem:[%s11210_s1 + $0x650] ss:$12 sps:$4 sm:$0xff]  }
 0x1cc   :  { %7344 = vmatpush3.bf16.msra.mxu1 %v8410_v60  ;;  %7323 = vmatprep.subr.bf16.mxu0 %v8411_v62  ;;  %v8445_v60 = vld [vmem:[%s11210_s1 + $0x4e8] ss:$12 sps:$4 sm:$0xff]   ;;  %v8452_v62 = vld [vmem:[%s11210_s1 + $0x6f8] ss:$12 sps:$4 sm:$0xff]  }
 0x1cd   :  { %7345 = vmatprep.subr.bf16.mxu1 %v8412_v0  ;;  %v8453_v0 = vld [vmem:[%s11210_s1 + $0x4b8] ss:$12 sps:$4 sm:$0xff]  }
 0x1cf   :  { %7324 = vmatpush3.bf16.msra.mxu0 %v8413_v17  ;;  %v8454_v17 = vld [vmem:[%s11210_s1 + $0x638] ss:$12 sps:$4 sm:$0xff]  }
 0x1d0   :  { %7346 = vmatpush3.bf16.msra.mxu1 %v8414_v1  ;;  %7325 = vmatprep.subr.bf16.mxu0 %v8415_v2  ;;  %v8455_v1 = vld [vmem:[%s11210_s1 + $0x560] ss:$12 sps:$4 sm:$0xff]  }
 0x1d1   :  { %7347 = vmatprep.subr.bf16.mxu1 %v8416_v3  ;;  %v8456_v2 = vld [vmem:[%s11210_s1 + $0x6e0] ss:$12 sps:$4 sm:$0xff]  }
 0x1d2   :  { %v8457_v3 = vld [vmem:[%s11210_s1 + $0x4a0] ss:$12 sps:$4 sm:$0xff]  }
 0x1d3   :  { %7326 = vmatpush3.bf16.msra.mxu0 %v8417_v7  ;;  %v8458_v7 = vld [vmem:[%s11210_s1 + $0x620] ss:$12 sps:$4 sm:$0xff]  }
 0x1d4   :  { %7348 = vmatpush3.bf16.msra.mxu1 %v8418_v9  ;;  %7327 = vmatprep.subr.bf16.mxu0 %v8419_v4  ;;  %v8459_v9 = vld [vmem:[%s11210_s1 + $0x548] ss:$12 sps:$4 sm:$0xff]  }
 0x1d5   :  { %7349 = vmatprep.subr.bf16.mxu1 %v8420_v58  ;;  %v8460_v4 = vld [vmem:[%s11210_s1 + $0x6c8] ss:$12 sps:$4 sm:$0xff]  }
 0x1d6   :  { %v8461_v58 = vld [vmem:[%s11210_s1 + $0x488] ss:$12 sps:$4 sm:$0xff]  }
 0x1d7   :  { %7328 = vmatpush3.bf16.msra.mxu0 %v8421_v15  ;;  %v8462_v15 = vld [vmem:[%s11210_s1 + $0x608] ss:$12 sps:$4 sm:$0xff]  }
 0x1d8   :  { %7350 = vmatpush3.bf16.msra.mxu1 %v8422_v16  ;;  %7329 = vmatprep.subr.bf16.mxu0 %v8423_v21  ;;  %v8463_v16 = vld [vmem:[%s11210_s1 + $0x8f0] ss:$12 sps:$4 sm:$0xff]  }
 0x1d9   :  { %7351 = vmatprep.subr.bf16.mxu1 %v8424_v24  ;;  %v8464_v21 = vld [vmem:[%s11210_s1 + $0xa70] ss:$12 sps:$4 sm:$0xff]  }
 0x1da   :  { %v8465_v24 = vld [vmem:[%s11210_s1 + $0x830] ss:$12 sps:$4 sm:$0xff]  }
 0x1db   :  { %7330 = vmatpush3.bf16.msra.mxu0 %v8425_v27  ;;  %v8466_v27 = vld [vmem:[%s11210_s1 + $0x9b0] ss:$12 sps:$4 sm:$0xff]  }
 0x1dc   :  { %7352 = vmatpush3.bf16.msra.mxu1 %v8426_v28  ;;  %7331 = vmatprep.subr.bf16.mxu0 %v8427_v33  ;;  %v8467_v28 = vld [vmem:[%s11210_s1 + $0x8d8] ss:$12 sps:$4 sm:$0xff]  }
 0x1dd   :  { %7353 = vmatprep.subr.bf16.mxu1 %v8428_v34  ;;  %v8468_v33 = vld [vmem:[%s11210_s1 + $0xa58] ss:$12 sps:$4 sm:$0xff]  }
 0x1de   :  { %v8469_v34 = vld [vmem:[%s11210_s1 + $0x818] ss:$12 sps:$4 sm:$0xff]  }
 0x1df   :  { %7332 = vmatpush3.bf16.msra.mxu0 %v8429_v37  ;;  %v8470_v37 = vld [vmem:[%s11210_s1 + $0x998] ss:$12 sps:$4 sm:$0xff]  }
 0x1e0   :  { %7354 = vmatpush3.bf16.msra.mxu1 %v8430_v10  ;;  %7361 = vmatprep.subr.bf16.mxu0 %v8431_v31 }
 0x1e1   :  { %7383 = vmatprep.subr.bf16.mxu1 %v8432_v40  ;;  %v8471_v40 = vld [vmem:[%s11210_s1 + $0x8c0] ss:$12 sps:$4 sm:$0xff]  }
 0x1e2   :  { %5192 = vmatmul.mubr.bf16.vlgmr.msra.gmra.mxu0 %v8936_v18  ;;  %v8442_v18 = vld [vmem:[%s11210_s1 + $0x680] ss:$12 sps:$4 sm:$0xff]  }
 0x1e3   :  { %5232 = vmatmul.mubr.bf16.vlgmr.msra.gmra.mxu1 %v9131_v26  ;;  %7362 = vmatpush3.bf16.msra.mxu0 %v8433_v46  ;;  %v8443_v26 = vld [vmem:[%s11210_s1 + $0x5a8] ss:$12 sps:$4 sm:$0xff]  }
 0x1e4   :  { %7384 = vmatpush3.bf16.msra.mxu1 %v8434_v36  ;;  %7363 = vmatprep.subr.bf16.mxu0 %v8435_v38 }
 0x1e5   :  { %7385 = vmatprep.subr.bf16.mxu1 %v8436_v47  ;;  %5271 = vmatprep.mubr.bf16.mxu0 %v8952_v23  ;;  %v8446_v23 = vld [vmem:[%s11210_s1 + $0x668] ss:$12 sps:$4 sm:$0xff]   ;;  %v8472_v47 = vld [vmem:[%s11210_s1 + $0xa40] ss:$12 sps:$4 sm:$0xff]  }
 0x1e6   :  { %5311 = vmatprep.mubr.bf16.mxu1 %v9184_v41  ;;  %v8447_v41 = vld [vmem:[%s11210_s1 + $0x590] ss:$12 sps:$4 sm:$0xff]  }
 0x1e7   :  { %7364 = vmatpush3.bf16.msra.mxu0 %v8437_v50  ;;  %v8473_v50 = vld [vmem:[%s11210_s1 + $0x800] ss:$12 sps:$4 sm:$0xff]  }
 0x1e8   :  { %7386 = vmatpush3.bf16.msra.mxu1 %v8438_v51  ;;  %7365 = vmatprep.subr.bf16.mxu0 %v8439_v35 }
 0x1e9   :  { %7387 = vmatprep.subr.bf16.mxu1 %v8440_v45  ;;  %v8475_v45 = vld [vmem:[%s11210_s1 + $0x8a8] ss:$12 sps:$4 sm:$0xff]  }
 0x1eb   :  { %7366 = vmatpush3.bf16.msra.mxu0 %v8441_v13 }
 0x1ec   :  { %7388 = vmatpush3.bf16.msra.mxu1 %v8442_v18  ;;  %7367 = vmatprep.subr.bf16.mxu0 %v8443_v26  ;;  %v8478_v26 = vld [vmem:[%s11210_s1 + $0x968] ss:$12 sps:$4 sm:$0xff]  }
 0x1ed   :  { %7389 = vmatprep.subr.bf16.mxu1 %v8444_v44  ;;  %v8479_v44 = vld [vmem:[%s11210_s1 + $0x890] ss:$12 sps:$4 sm:$0xff]  }
 0x1ef   :  { %7368 = vmatpush3.bf16.msra.mxu0 %v8445_v60  ;;  %v8480_v60 = vld [vmem:[%s11210_s1 + $0xa10] ss:$12 sps:$4 sm:$0xff]  }
 0x1f0   :  { %7390 = vmatpush3.bf16.msra.mxu1 %v8446_v23  ;;  %7369 = vmatprep.subr.bf16.mxu0 %v8447_v41  ;;  %v8481_v23 = vld [vmem:[%s11210_s1 + $0x7d0] ss:$12 sps:$4 sm:$0xff]  }
 0x1f1   :  { %7391 = vmatprep.subr.bf16.mxu1 %v8448_v56  ;;  %v8482_v41 = vld [vmem:[%s11210_s1 + $0x950] ss:$12 sps:$4 sm:$0xff]   ;;  %v8483_v56 = vld [vmem:[%s11210_s1 + $0x878] ss:$12 sps:$4 sm:$0xff]  }
 0x1f3   :  { %7370 = vmatpush3.bf16.msra.mxu0 %v8449_v57  ;;  %v8484_v57 = vld [vmem:[%s11210_s1 + $0x9f8] ss:$12 sps:$4 sm:$0xff]  }
 0x1f4   :  { %7392 = vmatpush3.bf16.msra.mxu1 %v8450_v61  ;;  %7371 = vmatprep.subr.bf16.mxu0 %v8451_v52  ;;  %v8485_v61 = vld [vmem:[%s11210_s1 + $0x7b8] ss:$12 sps:$4 sm:$0xff]  }
 0x1f5   :  { %7393 = vmatprep.subr.bf16.mxu1 %v8452_v62  ;;  %v8486_v52 = vld [vmem:[%s11210_s1 + $0x938] ss:$12 sps:$4 sm:$0xff]   ;;  %v8487_v62 = vld [vmem:[%s11210_s1 + $0x860] ss:$12 sps:$4 sm:$0xff]  }
 0x1f7   :  { %7372 = vmatpush3.bf16.msra.mxu0 %v8453_v0  ;;  %v8488_v0 = vld [vmem:[%s11210_s1 + $0x9e0] ss:$12 sps:$4 sm:$0xff]  }
 0x1f8   :  { %7394 = vmatpush3.bf16.msra.mxu1 %v8454_v17  ;;  %7373 = vmatprep.subr.bf16.mxu0 %v8455_v1  ;;  %v8489_v17 = vld [vmem:[%s11210_s1 + $0x7a0] ss:$12 sps:$4 sm:$0xff]  }
 0x1f9   :  { %7395 = vmatprep.subr.bf16.mxu1 %v8456_v2  ;;  %v8490_v1 = vld [vmem:[%s11210_s1 + $0x920] ss:$12 sps:$4 sm:$0xff]   ;;  %v8491_v2 = vld [vmem:[%s11210_s1 + $0x848] ss:$12 sps:$4 sm:$0xff]  }
 0x1fb   :  { %7374 = vmatpush3.bf16.msra.mxu0 %v8457_v3  ;;  %v8492_v3 = vld [vmem:[%s11210_s1 + $0x9c8] ss:$12 sps:$4 sm:$0xff]  }
 0x1fc   :  { %7396 = vmatpush3.bf16.msra.mxu1 %v8458_v7  ;;  %7375 = vmatprep.subr.bf16.mxu0 %v8459_v9  ;;  %v8493_v7 = vld [vmem:[%s11210_s1 + $0x788] ss:$12 sps:$4 sm:$0xff]  }
 0x1fd   :  { %7397 = vmatprep.subr.bf16.mxu1 %v8460_v4  ;;  %v8494_v9 = vld [vmem:[%s11210_s1 + $0x908] ss:$12 sps:$4 sm:$0xff]   ;;  %v8495_v4 = vld [vmem:[%s11210_s1 + $0xbf0] ss:$12 sps:$4 sm:$0xff]  }
 0x1ff   :  { %7376 = vmatpush3.bf16.msra.mxu0 %v8461_v58  ;;  %v8496_v58 = vld [vmem:[%s11210_s1 + $0xd70] ss:$12 sps:$4 sm:$0xff]  }
 0x200   :  { %7398 = vmatpush3.bf16.msra.mxu1 %v8462_v15  ;;  %7405 = vmatprep.subr.bf16.mxu0 %v8463_v16  ;;  %v8497_v15 = vld [vmem:[%s11210_s1 + $0xb30] ss:$12 sps:$4 sm:$0xff]  }
 0x201   :  { %7427 = vmatprep.subr.bf16.mxu1 %v8464_v21  ;;  %v8498_v16 = vld [vmem:[%s11210_s1 + $0xcb0] ss:$12 sps:$4 sm:$0xff]   ;;  %v8499_v21 = vld [vmem:[%s11210_s1 + $0xbd8] ss:$12 sps:$4 sm:$0xff]  }
 0x202   :  { %v4907_v10 = vpop.f32.mrf.mxu0  ;;  %5272 = vmatmul.mubr.bf16.vlgmr.msra.gmra.mxu0 %v9147_v30 }
 0x203   :  { %v4948_v31 = vpop.f32.mrf.mxu1  ;;  %5312 = vmatmul.mubr.bf16.vlgmr.msra.gmra.mxu1 %v9357_v48  ;;  %v4908_v46 = vadd.f32 %v4907_v10, %v10284_v55  ;;  %7406 = vmatpush3.bf16.msra.mxu0 %v8465_v24  ;;  %v8474_v55 = vld [vmem:[%s11210_s1 + $0x980] ss:$12 sps:$4 sm:$0xff]   ;;  %v8500_v24 = vld [vmem:[%s11210_s1 + $0xd58] ss:$12 sps:$4 sm:$0xff]   ;;  %v8508_v10 = vld [vmem:[%s11210_s1 + $0xd28] ss:$12 sps:$4 sm:$0xff]  }
 0x204   :  { %7428 = vmatpush3.bf16.msra.mxu1 %v8466_v27  ;;  %v4909_v36 = vpop.f32.mrf.mxu0  ;;  %7407 = vmatprep.subr.bf16.mxu0 %v8467_v28  ;;  %v8501_v27 = vld [vmem:[%s11210_s1 + $0xb18] ss:$12 sps:$4 sm:$0xff]  }
 0x205   :  { %v4950_v38 = vpop.f32.mrf.mxu1  ;;  %7429 = vmatprep.subr.bf16.mxu1 %v8468_v33  ;;  %v10490_v30 = vadd.f32 %v4948_v31, %v4908_v46  ;;  %v4910_v48 = vadd.f32 %v4909_v36, %v10295_v63  ;;  %5351 = vmatprep.mubr.bf16.mxu0 %v9189_v42  ;;  %v8476_v42 = vld [vmem:[%s11210_s1 + $0xa28] ss:$12 sps:$4 sm:$0xff]   ;;  %v8502_v28 = vld [vmem:[%s11210_s1 + $0xc98] ss:$12 sps:$4 sm:$0xff]   ;;  %v8503_v33 = vld [vmem:[%s11210_s1 + $0xbc0] ss:$12 sps:$4 sm:$0xff]  }
 0x206   :  { %5391 = vmatprep.mubr.bf16.mxu1 %v9372_v53  ;;  %v4911_v51 = vpop.f32.mrf.mxu0  ;;  %v8477_v53 = vld [vmem:[%s11210_s1 + $0x7e8] ss:$12 sps:$4 sm:$0xff]   ;;  %v8513_v46 = vld [vmem:[%s11210_s1 + $0xad0] ss:$12 sps:$4 sm:$0xff]  }
 0x207   :  { %v4952_v35 = vpop.f32.mrf.mxu1  ;;  %v10504_v13 = vadd.f32 %v4950_v38, %v4910_v48  ;;  %7408 = vmatpush3.bf16.msra.mxu0 %v8469_v34  ;;  %v8504_v34 = vld [vmem:[%s11210_s1 + $0xd40] ss:$12 sps:$4 sm:$0xff]   ;;  %v8509_v31 = vld [vmem:[%s11210_s1 + $0xae8] ss:$12 sps:$4 sm:$0xff]   ;;  %v8514_v36 = vld [vmem:[%s11210_s1 + $0xc50] ss:$12 sps:$4 sm:$0xff]  }
 0x208   :  { %7430 = vmatpush3.bf16.msra.mxu1 %v8470_v37  ;;  %v4912_v63 = vpop.f32.mrf.mxu0  ;;  %7409 = vmatprep.subr.bf16.mxu0 %v8471_v40  ;;  %v8505_v37 = vld [vmem:[%s11210_s1 + $0xb00] ss:$12 sps:$4 sm:$0xff]   ;;  %v8512_v40 = vld [vmem:[%s11210_s1 + $0xd10] ss:$12 sps:$4 sm:$0xff]   ;;  %v8515_v38 = vld [vmem:[%s11210_s1 + $0xb78] ss:$12 sps:$4 sm:$0xff]  }
 0x209   :  { %v4953_v18 = vpop.f32.mrf.mxu1  ;;  %7431 = vmatprep.subr.bf16.mxu1 %v8472_v47  ;;  %v8516_v47 = vld [vmem:[%s11210_s1 + $0xcf8] ss:$12 sps:$4 sm:$0xff]   ;;  %v8520_v51 = vld [vmem:[%s11210_s1 + $0xce0] ss:$12 sps:$4 sm:$0xff]   ;;  %v8523_v63 = vld [vmem:[%s11210_s1 + $0xb48] ss:$12 sps:$4 sm:$0xff]  }
 0x20a   :  { %v8517_v48 = vld [vmem:[%s11210_s1 + $0xab8] ss:$12 sps:$4 sm:$0xff]   ;;  %v8521_v35 = vld [vmem:[%s11210_s1 + $0xaa0] ss:$12 sps:$4 sm:$0xff]   ;;  %v8524_v18 = vld [vmem:[%s11210_s1 + $0xcc8] ss:$12 sps:$4 sm:$0xff]  }
 0x20b   :  { %7410 = vmatpush3.bf16.msra.mxu0 %v8473_v50  ;;  %v8518_v50 = vld [vmem:[%s11210_s1 + $0xc38] ss:$12 sps:$4 sm:$0xff]  }
 0x20c   :  { %7432 = vmatpush3.bf16.msra.mxu1 %v8474_v55  ;;  %7411 = vmatprep.subr.bf16.mxu0 %v8475_v45  ;;  %v8519_v55 = vld [vmem:[%s11210_s1 + $0xb60] ss:$12 sps:$4 sm:$0xff]  }
 0x20d   :  { %7433 = vmatprep.subr.bf16.mxu1 %v8476_v42  ;;  %v8522_v45 = vld [vmem:[%s11210_s1 + $0xc20] ss:$12 sps:$4 sm:$0xff]   ;;  %v8525_v42 = vld [vmem:[%s11210_s1 + $0xa88] ss:$12 sps:$4 sm:$0xff]  }
 0x20f   :  { %7412 = vmatpush3.bf16.msra.mxu0 %v8477_v53  ;;  %v8526_v53 = vld [vmem:[%s11210_s1 + $0xc08] ss:$12 sps:$4 sm:$0xff]  }
 0x210   :  { %7434 = vmatpush3.bf16.msra.mxu1 %v8478_v26  ;;  %7413 = vmatprep.subr.bf16.mxu0 %v8479_v44  ;;  %v8527_v26 = vld [vmem:[%s11210_s1 + $0xef0] ss:$12 sps:$4 sm:$0xff]  }
 0x211   :  { %7435 = vmatprep.subr.bf16.mxu1 %v8480_v60  ;;  %v8528_v44 = vld [vmem:[%s11210_s1 + $0x1070] ss:$12 sps:$4 sm:$0xff]  }
 0x212   :  { %v8529_v60 = vld [vmem:[%s11210_s1 + $0xe30] ss:$12 sps:$4 sm:$0xff]  }
 0x213   :  { %7414 = vmatpush3.bf16.msra.mxu0 %v8481_v23  ;;  %v8530_v23 = vld [vmem:[%s11210_s1 + $0xfb0] ss:$12 sps:$4 sm:$0xff]  }
 0x214   :  { %7436 = vmatpush3.bf16.msra.mxu1 %v8482_v41  ;;  %7415 = vmatprep.subr.bf16.mxu0 %v8483_v56  ;;  %v8531_v41 = vld [vmem:[%s11210_s1 + $0xed8] ss:$12 sps:$4 sm:$0xff]  }
 0x215   :  { %7437 = vmatprep.subr.bf16.mxu1 %v8484_v57  ;;  %v8532_v56 = vld [vmem:[%s11210_s1 + $0x1058] ss:$12 sps:$4 sm:$0xff]  }
 0x216   :  { %v8533_v57 = vld [vmem:[%s11210_s1 + $0xe18] ss:$12 sps:$4 sm:$0xff]  }
 0x217   :  { %7416 = vmatpush3.bf16.msra.mxu0 %v8485_v61  ;;  %v8534_v61 = vld [vmem:[%s11210_s1 + $0xf98] ss:$12 sps:$4 sm:$0xff]  }
 0x218   :  { %7438 = vmatpush3.bf16.msra.mxu1 %v8486_v52  ;;  %7417 = vmatprep.subr.bf16.mxu0 %v8487_v62 }
 0x219   :  { %7439 = vmatprep.subr.bf16.mxu1 %v8488_v0 }
 0x21b   :  { %7418 = vmatpush3.bf16.msra.mxu0 %v8489_v17 }
 0x21c   :  { %7440 = vmatpush3.bf16.msra.mxu1 %v8490_v1  ;;  %7419 = vmatprep.subr.bf16.mxu0 %v8491_v2  ;;  %v8535_v2 = vld [vmem:[%s11210_s1 + $0xec0] ss:$12 sps:$4 sm:$0xff]  }
 0x21d   :  { %7441 = vmatprep.subr.bf16.mxu1 %v8492_v3  ;;  %v8536_v3 = vld [vmem:[%s11210_s1 + $0x1040] ss:$12 sps:$4 sm:$0xff]  }
 0x21f   :  { %7420 = vmatpush3.bf16.msra.mxu0 %v8493_v7 }
 0x220   :  { %7442 = vmatpush3.bf16.msra.mxu1 %v8494_v9  ;;  %7449 = vmatprep.subr.bf16.mxu0 %v8495_v4  ;;  %v8537_v4 = vld [vmem:[%s11210_s1 + $0xe00] ss:$12 sps:$4 sm:$0xff]  }
 0x221   :  { %7471 = vmatprep.subr.bf16.mxu1 %v8496_v58  ;;  %v8538_v58 = vld [vmem:[%s11210_s1 + $0xf80] ss:$12 sps:$4 sm:$0xff]  }
 0x222   :  { %5352 = vmatmul.mubr.bf16.vlgmr.msra.gmra.mxu0 %v9376_v54  ;;  %v8506_v54 = vld [vmem:[%s11210_s1 + $0xc80] ss:$12 sps:$4 sm:$0xff]  }
 0x223   :  { %5392 = vmatmul.mubr.bf16.vlgmr.msra.gmra.mxu1 %v9582_v12  ;;  %7450 = vmatpush3.bf16.msra.mxu0 %v8497_v15  ;;  %v8507_v12 = vld [vmem:[%s11210_s1 + $0xba8] ss:$12 sps:$4 sm:$0xff]  }
 0x224   :  { %7472 = vmatpush3.bf16.msra.mxu1 %v8498_v16  ;;  %7451 = vmatprep.subr.bf16.mxu0 %v8499_v21  ;;  %v8541_v16 = vld [vmem:[%s11210_s1 + $0xde8] ss:$12 sps:$4 sm:$0xff]  }
 0x225   :  { %7473 = vmatprep.subr.bf16.mxu1 %v8500_v24  ;;  %5431 = vmatprep.mubr.bf16.mxu0 %v9392_v59  ;;  %v8510_v59 = vld [vmem:[%s11210_s1 + $0xc68] ss:$12 sps:$4 sm:$0xff]   ;;  %v8543_v24 = vld [vmem:[%s11210_s1 + $0xe90] ss:$12 sps:$4 sm:$0xff]  }
 0x226   :  { %5471 = vmatprep.mubr.bf16.mxu1 %v9594_v19  ;;  %v8511_v19 = vld [vmem:[%s11210_s1 + $0xb90] ss:$12 sps:$4 sm:$0xff]   ;;  %v8542_v21 = vld [vmem:[%s11210_s1 + $0xf68] ss:$12 sps:$4 sm:$0xff]  }
 0x227   :  { %7452 = vmatpush3.bf16.msra.mxu0 %v8501_v27  ;;  %v8544_v27 = vld [vmem:[%s11210_s1 + $0x1010] ss:$12 sps:$4 sm:$0xff]  }
 0x228   :  { %7474 = vmatpush3.bf16.msra.mxu1 %v8502_v28  ;;  %7453 = vmatprep.subr.bf16.mxu0 %v8503_v33  ;;  %v8545_v28 = vld [vmem:[%s11210_s1 + $0xdd0] ss:$12 sps:$4 sm:$0xff]  }
 0x229   :  { %7475 = vmatprep.subr.bf16.mxu1 %v8504_v34  ;;  %v8546_v33 = vld [vmem:[%s11210_s1 + $0xf50] ss:$12 sps:$4 sm:$0xff]   ;;  %v8547_v34 = vld [vmem:[%s11210_s1 + $0xe78] ss:$12 sps:$4 sm:$0xff]  }
 0x22b   :  { %7454 = vmatpush3.bf16.msra.mxu0 %v8505_v37  ;;  %v8548_v37 = vld [vmem:[%s11210_s1 + $0xff8] ss:$12 sps:$4 sm:$0xff]  }
 0x22c   :  { %7476 = vmatpush3.bf16.msra.mxu1 %v8506_v54  ;;  %7455 = vmatprep.subr.bf16.mxu0 %v8507_v12  ;;  %v8549_v54 = vld [vmem:[%s11210_s1 + $0xdb8] ss:$12 sps:$4 sm:$0xff]  }
 0x22d   :  { %7477 = vmatprep.subr.bf16.mxu1 %v8508_v10  ;;  %v8550_v12 = vld [vmem:[%s11210_s1 + $0xf38] ss:$12 sps:$4 sm:$0xff]   ;;  %v8551_v10 = vld [vmem:[%s11210_s1 + $0xe60] ss:$12 sps:$4 sm:$0xff]  }
 0x22f   :  { %7456 = vmatpush3.bf16.msra.mxu0 %v8509_v31  ;;  %v8552_v31 = vld [vmem:[%s11210_s1 + $0xfe0] ss:$12 sps:$4 sm:$0xff]  }
 0x230   :  { %7478 = vmatpush3.bf16.msra.mxu1 %v8510_v59  ;;  %7457 = vmatprep.subr.bf16.mxu0 %v8511_v19  ;;  %v8553_v59 = vld [vmem:[%s11210_s1 + $0xda0] ss:$12 sps:$4 sm:$0xff]  }
 0x231   :  { %7479 = vmatprep.subr.bf16.mxu1 %v8512_v40  ;;  %v8554_v19 = vld [vmem:[%s11210_s1 + $0xf20] ss:$12 sps:$4 sm:$0xff]   ;;  %v8555_v40 = vld [vmem:[%s11210_s1 + $0xe48] ss:$12 sps:$4 sm:$0xff]  }
 0x233   :  { %7458 = vmatpush3.bf16.msra.mxu0 %v8513_v46  ;;  %v8556_v46 = vld [vmem:[%s11210_s1 + $0xfc8] ss:$12 sps:$4 sm:$0xff]  }
 0x234   :  { %7480 = vmatpush3.bf16.msra.mxu1 %v8514_v36  ;;  %7459 = vmatprep.subr.bf16.mxu0 %v8515_v38  ;;  %v8557_v36 = vld [vmem:[%s11210_s1 + $0xd88] ss:$12 sps:$4 sm:$0xff]  }
 0x235   :  { %7481 = vmatprep.subr.bf16.mxu1 %v8516_v47  ;;  %v8558_v38 = vld [vmem:[%s11210_s1 + $0xf08] ss:$12 sps:$4 sm:$0xff]   ;;  %v8559_v47 = vld [vmem:[%s11210_s1 + $0x11f0] ss:$12 sps:$4 sm:$0xff]  }
 0x237   :  { %7460 = vmatpush3.bf16.msra.mxu0 %v8517_v48  ;;  %v8560_v48 = vld [vmem:[%s11210_s1 + $0x1370] ss:$12 sps:$4 sm:$0xff]  }
 0x238   :  { %7482 = vmatpush3.bf16.msra.mxu1 %v8518_v50  ;;  %7461 = vmatprep.subr.bf16.mxu0 %v8519_v55  ;;  %v8561_v50 = vld [vmem:[%s11210_s1 + $0x1130] ss:$12 sps:$4 sm:$0xff]  }
 0x239   :  { %7483 = vmatprep.subr.bf16.mxu1 %v8520_v51  ;;  %v8562_v55 = vld [vmem:[%s11210_s1 + $0x12b0] ss:$12 sps:$4 sm:$0xff]   ;;  %v8563_v51 = vld [vmem:[%s11210_s1 + $0x11d8] ss:$12 sps:$4 sm:$0xff]  }
 0x23b   :  { %7462 = vmatpush3.bf16.msra.mxu0 %v8521_v35  ;;  %v8564_v35 = vld [vmem:[%s11210_s1 + $0x1358] ss:$12 sps:$4 sm:$0xff]  }
 0x23c   :  { %7484 = vmatpush3.bf16.msra.mxu1 %v8522_v45  ;;  %7463 = vmatprep.subr.bf16.mxu0 %v8523_v63  ;;  %v8565_v63 = vld [vmem:[%s11210_s1 + $0x1118] ss:$12 sps:$4 sm:$0xff]  }
 0x23d   :  { %7485 = vmatprep.subr.bf16.mxu1 %v8524_v18  ;;  %v8566_v18 = vld [vmem:[%s11210_s1 + $0x1298] ss:$12 sps:$4 sm:$0xff]  }
 0x23f   :  { %7464 = vmatpush3.bf16.msra.mxu0 %v8525_v42 }
 0x240   :  { %7486 = vmatpush3.bf16.msra.mxu1 %v8526_v53  ;;  %7493 = vmatprep.subr.bf16.mxu0 %v8527_v26  ;;  %v8569_v26 = vld [vmem:[%s11210_s1 + $0x1100] ss:$12 sps:$4 sm:$0xff]  }
 0x241   :  { %7515 = vmatprep.subr.bf16.mxu1 %v8528_v44  ;;  %v8570_v44 = vld [vmem:[%s11210_s1 + $0x1280] ss:$12 sps:$4 sm:$0xff]  }
 0x242   :  { %v4989_v52 = vpop.f32.mrf.mxu0  ;;  %5432 = vmatmul.mubr.bf16.vlgmr.msra.gmra.mxu0 %v9601_v20 }
 0x243   :  { %v5030_v62 = vpop.f32.mrf.mxu1  ;;  %5472 = vmatmul.mubr.bf16.vlgmr.msra.gmra.mxu1 %v9804_v5  ;;  %v4990_v0 = vadd.f32 %v4989_v52, %v10490_v30  ;;  %7494 = vmatpush3.bf16.msra.mxu0 %v8529_v60  ;;  %v8578_v52 = vld [vmem:[%s11210_s1 + $0x1250] ss:$12 sps:$4 sm:$0xff]  }
 0x244   :  { %7516 = vmatpush3.bf16.msra.mxu1 %v8530_v23  ;;  %v4991_v17 = vpop.f32.mrf.mxu0  ;;  %7495 = vmatprep.subr.bf16.mxu0 %v8531_v41  ;;  %v8573_v23 = vld [vmem:[%s11210_s1 + $0x10e8] ss:$12 sps:$4 sm:$0xff]  }
 0x245   :  { %v5032_v1 = vpop.f32.mrf.mxu1  ;;  %7517 = vmatprep.subr.bf16.mxu1 %v8532_v56  ;;  %v10696_v20 = vadd.f32 %v5030_v62, %v4990_v0  ;;  %v4992_v5 = vadd.f32 %v4991_v17, %v10504_v13  ;;  %5511 = vmatprep.mubr.bf16.mxu0 %v9614_v25  ;;  %v8539_v25 = vld [vmem:[%s11210_s1 + $0xea8] ss:$12 sps:$4 sm:$0xff]   ;;  %v8575_v56 = vld [vmem:[%s11210_s1 + $0x1190] ss:$12 sps:$4 sm:$0xff]   ;;  %v8579_v62 = vld [vmem:[%s11210_s1 + $0x1178] ss:$12 sps:$4 sm:$0xff]  }
 0x246   :  { %5551 = vmatprep.mubr.bf16.mxu1 %v9822_v11  ;;  %v4993_v30 = vpop.f32.mrf.mxu0  ;;  %v8540_v11 = vld [vmem:[%s11210_s1 + $0x1028] ss:$12 sps:$4 sm:$0xff]   ;;  %v8580_v0 = vld [vmem:[%s11210_s1 + $0x12f8] ss:$12 sps:$4 sm:$0xff]  }
 0x247   :  { %v5034_v7 = vpop.f32.mrf.mxu1  ;;  %v10701_v9 = vadd.f32 %v5032_v1, %v4992_v5  ;;  %7496 = vmatpush3.bf16.msra.mxu0 %v8533_v57  ;;  %v8574_v41 = vld [vmem:[%s11210_s1 + $0x1268] ss:$12 sps:$4 sm:$0xff]   ;;  %v8576_v57 = vld [vmem:[%s11210_s1 + $0x1310] ss:$12 sps:$4 sm:$0xff]   ;;  %v8581_v17 = vld [vmem:[%s11210_s1 + $0x10b8] ss:$12 sps:$4 sm:$0xff]  }
 0x248   :  { %7518 = vmatpush3.bf16.msra.mxu1 %v8534_v61  ;;  %v4994_v15 = vpop.f32.mrf.mxu0  ;;  %7497 = vmatprep.subr.bf16.mxu0 %v8535_v2  ;;  %v8577_v61 = vld [vmem:[%s11210_s1 + $0x10d0] ss:$12 sps:$4 sm:$0xff]   ;;  %v8582_v1 = vld [vmem:[%s11210_s1 + $0x1238] ss:$12 sps:$4 sm:$0xff]   ;;  %v8583_v2 = vld [vmem:[%s11210_s1 + $0x1160] ss:$12 sps:$4 sm:$0xff]  }
 0x249   :  { %v5035_v13 = vpop.f32.mrf.mxu1  ;;  %7519 = vmatprep.subr.bf16.mxu1 %v8536_v3  ;;  %v8584_v3 = vld [vmem:[%s11210_s1 + $0x12e0] ss:$12 sps:$4 sm:$0xff]  }
 0x24a   :  { %v10858_v5 = vld [vmem:[%s11213_s2] sm:$0xff]  ;;  %v8589_v13 = vld [vmem:[%s11210_s1 + $0x1088] ss:$12 sps:$4 sm:$0xff]  }
 0x24b   :  { %7498 = vmatpush3.bf16.msra.mxu0 %v8537_v4  ;;  %v8585_v30 = vld [vmem:[%s11210_s1 + $0x10a0] ss:$12 sps:$4 sm:$0xff]   ;;  %v8587_v4 = vld [vmem:[%s11210_s1 + $0x1148] ss:$12 sps:$4 sm:$0xff]   ;;  %v10874_v15 = vrot.slane %v10858_v5, %v8842_v49 }
 0x24c   :  { %7520 = vmatpush3.bf16.msra.mxu1 %v8538_v58  ;;  %7499 = vmatprep.subr.bf16.mxu0 %v8539_v25  ;;  %v8586_v7 = vld [vmem:[%s11210_s1 + $0x1220] ss:$12 sps:$4 sm:$0xff]   ;;  %v8588_v58 = vld [vmem:[%s11210_s1 + $0x12c8] ss:$12 sps:$4 sm:$0xff]  }
 0x24d   :  { %7521 = vmatprep.subr.bf16.mxu1 %v8540_v11  ;;  %v8590_v25 = vld [vmem:[%s11210_s1 + $0x1208] ss:$12 sps:$4 sm:$0xff]   ;;  %v8591_v11 = vld [vmem:[%s11212_s3 + $0x78] sm:$0xff]  }
 0x24f   :  { %7500 = vmatpush3.bf16.msra.mxu0 %v8541_v16  ;;  %v5872_v16 = vcombine.high %v10874_v15, %v10874_v15 }
 0x250   :  { %7522 = vmatpush3.bf16.msra.mxu1 %v8542_v21  ;;  %7501 = vmatprep.subr.bf16.mxu0 %v8543_v24  ;;  %v8592_v21 = vld [vmem:[%s11210_s1 + $0x1430] ss:$12 sps:$4 sm:$0xff]  }
 0x251   :  { %7523 = vmatprep.subr.bf16.mxu1 %v8544_v27  ;;  %v8593_v24 = vld [vmem:[%s11212_s3 + $0x38] sm:$0xff]   ;;  %v8674_v27 = vmov 0.0  }
 0x253   :  { %7502 = vmatpush3.bf16.msra.mxu0 %v8545_v28  ;;  %v8594_v28 = vld [vmem:[%s11212_s3 + $0x70] sm:$0xff]  }
 0x254   :  { %7524 = vmatpush3.bf16.msra.mxu1 %v8546_v33  ;;  %7503 = vmatprep.subr.bf16.mxu0 %v8547_v34  ;;  %v10898_v33 = vrot.slane %v5872_v16, %v8842_v49 }
 0x255   :  { %7525 = vmatprep.subr.bf16.mxu1 %v8548_v37 }
 0x257   :  { %7504 = vmatpush3.bf16.msra.mxu0 %v8549_v54 }
 0x258   :  { %7526 = vmatpush3.bf16.msra.mxu1 %v8550_v12  ;;  %7505 = vmatprep.subr.bf16.mxu0 %v8551_v10  ;;  %v8595_v12 = vld [vmem:[%s11210_s1 + $0x1418] ss:$12 sps:$4 sm:$0xff]   ;;  %v8596_v10 = vld [vmem:[%s11212_s3 + $0x30] sm:$0xff]  }
 0x259   :  { %7527 = vmatprep.subr.bf16.mxu1 %v8552_v31 }
 0x25b   :  { %7506 = vmatpush3.bf16.msra.mxu0 %v8553_v59 }
 0x25c   :  { %7528 = vmatpush3.bf16.msra.mxu1 %v8554_v19  ;;  %7507 = vmatprep.subr.bf16.mxu0 %v8555_v40 }
 0x25d   :  { %7529 = vmatprep.subr.bf16.mxu1 %v8556_v46 }
 0x25f   :  { %7508 = vmatpush3.bf16.msra.mxu0 %v8557_v36 }
 0x260   :  { %7530 = vmatpush3.bf16.msra.mxu1 %v8558_v38  ;;  %7537 = vmatprep.subr.bf16.mxu0 %v8559_v47  ;;  %v8598_v47 = vld [vmem:[%s11210_s1 + $0x1400] ss:$12 sps:$4 sm:$0xff]  }
 0x261   :  { %7559 = vmatprep.subr.bf16.mxu1 %v8560_v48 }
 0x262   :  { %5512 = vmatmul.mubr.bf16.vlgmr.msra.gmra.mxu0 %v9826_v14  ;;  %v8567_v14 = vld [vmem:[%s11210_s1 + $0x11c0] ss:$12 sps:$4 sm:$0xff]  }
 0x263   :  { %v10788_v45 = vpop.f32.mrf.mxu1  ;;  %5552 = vmatmul.mubr.bf16.vlgmr.msra.gmra.mxu1 %v10024_v8  ;;  %7538 = vmatpush3.bf16.msra.mxu0 %v8561_v50  ;;  %v8568_v8 = vld [vmem:[%s11210_s1 + $0x1340] ss:$12 sps:$4 sm:$0xff]  }
 0x264   :  { %7560 = vmatpush3.bf16.msra.mxu1 %v8562_v55  ;;  %7539 = vmatprep.subr.bf16.mxu0 %v8563_v51  ;;  %v8600_v55 = vld [vmem:[%s11212_s3 + $0x60] sm:$0xff]  }
 0x265   :  { %v10797_v42 = vpop.f32.mrf.mxu1  ;;  %7561 = vmatprep.subr.bf16.mxu1 %v8564_v35  ;;  %5591 = vmatprep.mubr.bf16.mxu0 %v9842_v22  ;;  %v8571_v22 = vld [vmem:[%s11210_s1 + $0x11a8] ss:$12 sps:$4 sm:$0xff]  }
 0x266   :  { %5631 = vmatprep.mubr.bf16.mxu1 %v10062_v29  ;;  %v8572_v29 = vld [vmem:[%s11210_s1 + $0x1328] ss:$12 sps:$4 sm:$0xff]  }
 0x267   :  { %v5116_v53 = vpop.f32.mrf.mxu1  ;;  %7540 = vmatpush3.bf16.msra.mxu0 %v8565_v63  ;;  %v8601_v63 = vld [vmem:[%s11210_s1 + $0x13e8] ss:$12 sps:$4 sm:$0xff]  }
 0x268   :  { %7562 = vmatpush3.bf16.msra.mxu1 %v8566_v18  ;;  %7541 = vmatprep.subr.bf16.mxu0 %v8567_v14  ;;  %v8602_v18 = vld [vmem:[%s11212_s3 + $0x20] sm:$0xff]   ;;  %v8603_v14 = vld [vmem:[%s11212_s3 + $0x58] sm:$0xff]  }
 0x269   :  { %v5117_v60 = vpop.f32.mrf.mxu1  ;;  %7563 = vmatprep.subr.bf16.mxu1 %v8568_v8  ;;  %v8604_v8 = vld [vmem:[%s11210_s1 + $0x13d0] ss:$12 sps:$4 sm:$0xff]  }
 0x26a   :  { %v8605_v53 = vld [vmem:[%s11212_s3 + $0x18] sm:$0xff]   ;;  %v8608_v60 = vld [vmem:[%s11212_s3 + $0x10] sm:$0xff]  }
 0x26b   :  { %7542 = vmatpush3.bf16.msra.mxu0 %v8569_v26  ;;  %v8606_v26 = vld [vmem:[%s11212_s3 + $0x50] sm:$0xff]  }
 0x26c   :  { %7564 = vmatpush3.bf16.msra.mxu1 %v8570_v44  ;;  %7543 = vmatprep.subr.bf16.mxu0 %v8571_v22  ;;  %v8607_v44 = vld [vmem:[%s11210_s1 + $0x13b8] ss:$12 sps:$4 sm:$0xff]   ;;  %v8609_v22 = vld [vmem:[%s11212_s3 + $0x48] sm:$0xff]  }
 0x26d   :  { %7565 = vmatprep.subr.bf16.mxu1 %v8572_v29  ;;  %v5857_v29 = vcombine.high %v10858_v5, %v10858_v5  ;;  %v8619_v5 = vld [vmem:[%s11212_s3 + $0xf0] sm:$0xff]  }
 0x26f   :  { %7544 = vmatpush3.bf16.msra.mxu0 %v8573_v23  ;;  %v8610_v23 = vld [vmem:[%s11210_s1 + $0x13a0] ss:$12 sps:$4 sm:$0xff]  }
 0x270   :  { %7566 = vmatpush3.bf16.msra.mxu1 %v8574_v41  ;;  %7545 = vmatprep.subr.bf16.mxu0 %v8575_v56  ;;  %v8611_v41 = vld [vmem:[%s11212_s3 + $0x8] sm:$0xff]   ;;  %v8612_v56 = vld [vmem:[%s11212_s3 + $0x40] sm:$0xff]  }
 0x271   :  { %7567 = vmatprep.subr.bf16.mxu1 %v8576_v57  ;;  %v10980_v57 = vrot.slane %v5857_v29, %v8842_v49  ;;  %v8649_v29 = vld [vmem:[%s11212_s3 + $0x1b8] sm:$0xff]  }
 0x273   :  { %7546 = vmatpush3.bf16.msra.mxu0 %v8577_v61  ;;  %v8613_v61 = vld [vmem:[%s11210_s1 + $0x1388] ss:$12 sps:$4 sm:$0xff]  }
 0x274   :  { %7568 = vmatpush3.bf16.msra.mxu1 %v8578_v52  ;;  %7547 = vmatprep.subr.bf16.mxu0 %v8579_v62  ;;  %v8614_v52 = vld [vmem:[%s11212_s3] sm:$0xff]   ;;  %v8615_v62 = vld [vmem:[%s11212_s3 + $0xf8] sm:$0xff]  }
 0x275   :  { %7569 = vmatprep.subr.bf16.mxu1 %v8580_v0  ;;  %v8616_v0 = vld [vmem:[%s11212_s3 + $0x178] sm:$0xff]  }
 0x277   :  { %7548 = vmatpush3.bf16.msra.mxu0 %v8581_v17  ;;  %v5873_v17 = vcombine.high %v10980_v57, %v10980_v57 }
 0x278   :  { %7570 = vmatpush3.bf16.msra.mxu1 %v8582_v1  ;;  %7549 = vmatprep.subr.bf16.mxu0 %v8583_v2  ;;  %v10999_v1 = vrot.slane %v10874_v15, %v8842_v49  ;;  %v8617_v2 = vld [vmem:[%s11212_s3 + $0xb8] sm:$0xff]  }
 0x279   :  { %7571 = vmatprep.subr.bf16.mxu1 %v8584_v3  ;;  %v8618_v3 = vld [vmem:[%s11212_s3 + $0x138] sm:$0xff]  }
 0x27b   :  { %7550 = vmatpush3.bf16.msra.mxu0 %v8585_v30  ;;  %v8620_v30 = vld [vmem:[%s11212_s3 + $0x170] sm:$0xff]  }
 0x27c   :  { %7572 = vmatpush3.bf16.msra.mxu1 %v8586_v7  ;;  %7551 = vmatprep.subr.bf16.mxu0 %v8587_v4  ;;  %v5904_v7 = vcombine.high %v10898_v33, %v10898_v33  ;;  %v11016_v4 = vrot.slane %v5873_v17, %v8842_v49 }
 0x27d   :  { %7573 = vmatprep.subr.bf16.mxu1 %v8588_v58 }
 0x27f   :  { %7552 = vmatpush3.bf16.msra.mxu0 %v8589_v13  ;;  %v8621_v13 = vld [vmem:[%s11212_s3 + $0xb0] sm:$0xff]  }
 0x280   :  { %7574 = vmatpush3.bf16.msra.mxu1 %v8590_v25  ;;  %7687 = vmatprep.subr.bf16.mxu0 %v8674_v27  ;;  %v8622_v25 = vld [vmem:[%s11212_s3 + $0x130] sm:$0xff]  }
 0x281   :  { %7590 = vmatprep.subr.bf16.mxu1 %v8591_v11 }
 0x282   :  { %v5071_v34 = vpop.f32.mrf.mxu0  ;;  %5592 = vmatmul.mubr.bf16.vlgmr.msra.gmra.mxu0 %v10047_v39  ;;  %v8597_v39 = vld [vmem:[%s11212_s3 + $0x68] sm:$0xff]  }
 0x283   :  { %v7311_v37 = vpop.f32.mrf.mxu1  ;;  %5632 = vmatmul.mubr.bf16.vlgmr.msra.gmra.mxu1 %v10144_v6  ;;  %v5072_v54 = vadd.f32 %v5071_v34, %v10696_v20  ;;  %7688 = vmatpush3.bf16.msra.mxu0 %v8592_v21  ;;  %v8624_v21 = vld [vmem:[%s11212_s3 + $0x168] sm:$0xff]  }
 0x284   :  { %7591 = vmatpush3.bf16.msra.mxu1 %v8593_v24  ;;  %v5073_v31 = vpop.f32.mrf.mxu0  ;;  %7689 = vmatprep.subr.bf16.mxu0 %v8674_v27 }
 0x285   :  { %v7312_v59 = vpop.f32.mrf.mxu1  ;;  %7592 = vmatprep.subr.bf16.mxu1 %v8594_v28  ;;  %v5113_v6 = vadd.f32 %v10788_v45, %v5072_v54  ;;  %v5074_v20 = vadd.f32 %v5073_v31, %v10701_v9  ;;  %7703 = vmatprep.mubr.msk.bf16.mxu0 %vm8675_vm0, %v8674_v27  ;;  %v8599_v9 = vld [vmem:[%s11212_s3 + $0x28] sm:$0xff]  }
 0x286   :  { %v10915_v19 = vadd.f32 %v7312_v59, %v7311_v37  ;;  %6393 = vmatprep.mubr.bf16.mxu1 %v10898_v33  ;;  %v5075_v40 = vpop.f32.mrf.mxu0  ;;  %v8625_v54 = vld [vmem:[%s11212_s3 + $0xa8] sm:$0xff]   ;;  %v8627_v59 = vld [vmem:[%s11212_s3 + $0xe0] sm:$0xff]  }
 0x287   :  { %v7314_v46 = vpop.f32.mrf.mxu1  ;;  %v5682_v36 = vmul.f32 0.1, %v5113_v6  ;;  %v5115_v38 = vadd.f32 %v10797_v42, %v5074_v20  ;;  %7690 = vmatpush3.bf16.msra.mxu0 %v8595_v12  ;;  %vm5679_vm1 = vcmp.ge.f32.partialorder %v5113_v6, 0.0  ;;  %v8626_v12 = vld [vmem:[%s11212_s3 + $0x128] sm:$0xff]   ;;  %v8629_v20 = vld [vmem:[%s11212_s3 + $0xa0] sm:$0xff]   ;;  %v8631_v40 = vld [vmem:[%s11212_s3 + $0xd8] sm:$0xff]  }
 0x288   :  { %7593 = vmatpush3.bf16.msra.mxu1 %v8596_v10  ;;  %v5076_v48 = vpop.f32.mrf.mxu0  ;;  %7691 = vmatprep.subr.bf16.mxu0 %v8674_v27  ;;  %v8632_v46 = vld [vmem:[%s11212_s3 + $0x158] sm:$0xff]  }
 0x289   :  { %v7315_v50 = vpop.f32.mrf.mxu1  ;;  %7594 = vmatprep.subr.bf16.mxu1 %v8597_v39  ;;  %vm5680_vm2 = vcmp.ge.f32.partialorder %v5115_v38, 0.0  ;;  %v5683_v51 = vmul.f32 0.1, %v5115_v38  ;;  %v10931_v35 = vsel %vm5679_vm1, %v5113_v6, %v5682_v36  ;;  %v8628_v39 = vld [vmem:[%s11212_s3 + $0x160] sm:$0xff]   ;;  %v8633_v36 = vld [vmem:[%s11212_s3 + $0x98] sm:$0xff]   ;;  %v8637_v48 = vld [vmem:[%s11212_s3 + $0x90] sm:$0xff]  }
 0x28a   :  { %v8638_v50 = vld [vmem:[%s11212_s3 + $0x110] sm:$0xff]  }
 0x28b   :  { %v10933_v45 = vsel %vm5680_vm2, %v5115_v38, %v5683_v51  ;;  %7692 = vmatpush3.bf16.msra.mxu0 %v8598_v47  ;;  %v8634_v38 = vld [vmem:[%s11212_s3 + $0x118] sm:$0xff]   ;;  %v8635_v47 = vld [vmem:[%s11212_s3 + $0xd0] sm:$0xff]   ;;  %v8640_v51 = vld [vmem:[%s11212_s3 + $0x148] sm:$0xff]  }
 0x28c   :  { %7595 = vmatpush3.bf16.msra.mxu1 %v8599_v9  ;;  %v5691_v42 = vcombine.low %v10931_v35, %v10933_v45  ;;  %7693 = vmatprep.subr.bf16.mxu0 %v8674_v27  ;;  %v8636_v9 = vld [vmem:[%s11212_s3 + $0x150] sm:$0xff]  }
 0x28d   :  { %7596 = vmatprep.subr.bf16.mxu1 %v8600_v55  ;;  %v8639_v55 = vld [vmem:[%s11212_s3 + $0xc8] sm:$0xff]  }
 0x28f   :  { %7694 = vmatpush3.bf16.msra.mxu0 %v8601_v63  ;;  %v8641_v63 = vld [vmem:[%s11212_s3 + $0x88] sm:$0xff]  }
 0x290   :  { %7597 = vmatpush3.bf16.msra.mxu1 %v8602_v18  ;;  %7695 = vmatprep.subr.bf16.mxu0 %v8674_v27  ;;  %v8642_v18 = vld [vmem:[%s11212_s3 + $0x108] sm:$0xff]  }
 0x291   :  { %7598 = vmatprep.subr.bf16.mxu1 %v8603_v14  ;;  %v8643_v14 = vld [vmem:[%s11212_s3 + $0xc0] sm:$0xff]  }
 0x293   :  { %7696 = vmatpush3.bf16.msra.mxu0 %v8604_v8  ;;  %v8644_v8 = vld [vmem:[%s11212_s3 + $0x140] sm:$0xff]  }
 0x294   :  { %7599 = vmatpush3.bf16.msra.mxu1 %v8605_v53  ;;  %7697 = vmatprep.subr.bf16.mxu0 %v8674_v27  ;;  %v8645_v53 = vld [vmem:[%s11212_s3 + $0x80] sm:$0xff]  }
 0x295   :  { %7600 = vmatprep.subr.bf16.mxu1 %v8606_v26  ;;  %v8646_v26 = vld [vmem:[%s11212_s3 + $0x100] sm:$0xff]  }
 0x297   :  { %7698 = vmatpush3.bf16.msra.mxu0 %v8607_v44  ;;  %v8648_v44 = vld [vmem:[%s11212_s3 + $0x1f8] sm:$0xff]  }
 0x298   :  { %7601 = vmatpush3.bf16.msra.mxu1 %v8608_v60  ;;  %7699 = vmatprep.subr.bf16.mxu0 %v8674_v27  ;;  %v5902_v60 = vcombine.high %v10999_v1, %v10999_v1 }
 0x299   :  { %7602 = vmatprep.subr.bf16.mxu1 %v8609_v22  ;;  %v11109_v22 = vrot.slane %v10980_v57, %v8842_v49 }
 0x29b   :  { %7700 = vmatpush3.bf16.msra.mxu0 %v8610_v23  ;;  %v8650_v23 = vld [vmem:[%s11212_s3 + $0x238] sm:$0xff]  }
 0x29c   :  { %7603 = vmatpush3.bf16.msra.mxu1 %v8611_v41  ;;  %7701 = vmatprep.subr.bf16.mxu0 %v8674_v27  ;;  %v8651_v41 = vld [vmem:[%s11212_s3 + $0x1f0] sm:$0xff]  }
 0x29d   :  { %7604 = vmatprep.subr.bf16.mxu1 %v8612_v56  ;;  %v5905_v56 = vcombine.high %v11016_v4, %v11016_v4 }
 0x29f   :  { %7702 = vmatpush3.bf16.msra.mxu0 %v8613_v61 }
 0x2a0   :  { %7605 = vmatpush3.bf16.msra.mxu1 %v8614_v52  ;;  %7612 = vmatprep.subr.bf16.mxu0 %v8615_v62  ;;  %v8652_v52 = vld [vmem:[%s11212_s3 + $0x1b0] sm:$0xff]  }
 0x2a1   :  { %7634 = vmatprep.subr.bf16.mxu1 %v8616_v0  ;;  %v8653_v62 = vld [vmem:[%s11212_s3 + $0x230] sm:$0xff]  }
 0x2a2   :  { %v7333_v58 = vpop.f32.mrf.mxu0  ;;  %7704 = vmatmul.mubr.bf16.vlgmr.msra.gmra.mxu0 %v10163_v32  ;;  %v8623_v32 = vld [vmem:[%s11212_s3 + $0xe8] sm:$0xff]  }
 0x2a3   :  { %v7355_v15 = vpop.f32.mrf.mxu1  ;;  %6394 = vmatmul.mubr.bf16.vlgmr.msra.gmra.mxu1 %v10999_v1  ;;  %7613 = vmatpush3.bf16.msra.mxu0 %v8617_v2  ;;  %v8654_v1 = vld [vmem:[%s11212_s3 + $0x1e8] sm:$0xff]  }
 0x2a4   :  { %7635 = vmatpush3.bf16.msra.mxu1 %v8618_v3  ;;  %v7334_v11 = vpop.f32.mrf.mxu0  ;;  %7614 = vmatprep.subr.bf16.mxu0 %v8619_v5 }
 0x2a5   :  { %v7356_v16 = vpop.f32.mrf.mxu1  ;;  %7636 = vmatprep.subr.bf16.mxu1 %v8620_v30  ;;  %v7335_v24 = vadd.f32 %v7334_v11, %v7333_v58  ;;  %6433 = vmatprep.mubr.bf16.mxu0 %v5904_v7  ;;  %v8656_v58 = vld [vmem:[%s11212_s3 + $0x228] sm:$0xff]  }
 0x2a6   :  { %v7357_v28 = vadd.f32 %v7356_v16, %v7355_v15  ;;  %6473 = vmatprep.mubr.bf16.mxu1 %v11016_v4  ;;  %v7336_v33 = vpop.f32.mrf.mxu0  ;;  %v8655_v4 = vld [vmem:[%s11212_s3 + $0x1a8] sm:$0xff]   ;;  %v8658_v16 = vld [vmem:[%s11212_s3 + $0x1a0] sm:$0xff]  }
 0x2a7   :  { %v7358_v34 = vpop.f32.mrf.mxu1  ;;  %v5194_v37 = vadd.f32 %v7335_v24, %v10915_v19  ;;  %7615 = vmatpush3.bf16.msra.mxu0 %v8621_v13  ;;  %v8630_v19 = vld [vmem:[%s11212_s3 + $0x120] sm:$0xff]   ;;  %v8661_v24 = vld [vmem:[%s11212_s3 + $0x198] sm:$0xff]   ;;  %v8663_v33 = vld [vmem:[%s11212_s3 + $0x1d0] sm:$0xff]  }
 0x2a8   :  { %7637 = vmatpush3.bf16.msra.mxu1 %v8622_v25  ;;  %v7337_v10 = vpop.f32.mrf.mxu0  ;;  %7616 = vmatprep.subr.bf16.mxu0 %v8623_v32  ;;  %v8657_v25 = vld [vmem:[%s11212_s3 + $0x1e0] sm:$0xff]   ;;  %v8664_v34 = vld [vmem:[%s11212_s3 + $0x190] sm:$0xff]  }
 0x2a9   :  { %v7359_v31 = vpop.f32.mrf.mxu1  ;;  %7638 = vmatprep.subr.bf16.mxu1 %v8624_v21  ;;  %v11046_v6 = vadd.f32 %v7357_v28, %v5194_v37  ;;  %v8659_v32 = vld [vmem:[%s11212_s3 + $0x220] sm:$0xff]   ;;  %v8660_v21 = vld [vmem:[%s11212_s3 + $0x1d8] sm:$0xff]   ;;  %v8665_v37 = vld [vmem:[%s11212_s3 + $0x210] sm:$0xff]  }
 0x2aa   :  { %v8662_v28 = vld [vmem:[%s11212_s3 + $0x218] sm:$0xff]   ;;  %v8668_v10 = vld [vmem:[%s11212_s3 + $0x208] sm:$0xff]   ;;  %v8669_v31 = vld [vmem:[%s11212_s3 + $0x1c0] sm:$0xff]  }
 0x2ab   :  { %7617 = vmatpush3.bf16.msra.mxu0 %v8625_v54  ;;  %v8666_v54 = vld [vmem:[%s11212_s3 + $0x1c8] sm:$0xff]  }
 0x2ac   :  { %7639 = vmatpush3.bf16.msra.mxu1 %v8626_v12  ;;  %7618 = vmatprep.subr.bf16.mxu0 %v8627_v59  ;;  %v8667_v12 = vld [vmem:[%s11212_s3 + $0x188] sm:$0xff]   ;;  %v8670_v59 = vld [vmem:[%s11212_s3 + $0x180] sm:$0xff]  }
 0x2ad   :  { %7640 = vmatprep.subr.bf16.mxu1 %v8628_v39  ;;  %v8671_v39 = vld [vmem:[%s11212_s3 + $0x200] sm:$0xff]  }
 0x2af   :  { %7619 = vmatpush3.bf16.msra.mxu0 %v8629_v20  ;;  %v5903_v20 = vcombine.high %v11109_v22, %v11109_v22 }
 0x2b0   :  { %7641 = vmatpush3.bf16.msra.mxu1 %v8630_v19  ;;  %7620 = vmatprep.subr.bf16.mxu0 %v8631_v40 }
 0x2b1   :  { %7642 = vmatprep.subr.bf16.mxu1 %v8632_v46 }
 0x2b3   :  { %7621 = vmatpush3.bf16.msra.mxu0 %v8633_v36 }
 0x2b4   :  { %7643 = vmatpush3.bf16.msra.mxu1 %v8634_v38  ;;  %7622 = vmatprep.subr.bf16.mxu0 %v8635_v47 }
 0x2b5   :  { %7644 = vmatprep.subr.bf16.mxu1 %v8636_v9 }
 0x2b7   :  { %7623 = vmatpush3.bf16.msra.mxu0 %v8637_v48 }
 0x2b8   :  { %7645 = vmatpush3.bf16.msra.mxu1 %v8638_v50  ;;  %7624 = vmatprep.subr.bf16.mxu0 %v8639_v55 }
 0x2b9   :  { %7646 = vmatprep.subr.bf16.mxu1 %v8640_v51 }
 0x2bb   :  { %7625 = vmatpush3.bf16.msra.mxu0 %v8641_v63 }
 0x2bc   :  { %7647 = vmatpush3.bf16.msra.mxu1 %v8642_v18  ;;  %7626 = vmatprep.subr.bf16.mxu0 %v8643_v14 }
 0x2bd   :  { %7648 = vmatprep.subr.bf16.mxu1 %v8644_v8 }
 0x2bf   :  { %7627 = vmatpush3.bf16.msra.mxu0 %v8645_v53 }
 0x2c0   :  { %7649 = vmatpush3.bf16.msra.mxu1 %v8646_v26  ;;  %7656 = vmatprep.subr.bf16.mxu0 %v8648_v44 }
 0x2c1   :  { %7707 = vmatprep.subr.bf16.mxu1 %v8674_v27 }
 0x2c2   :  { %v7377_v57 = vpop.f32.mrf.mxu0  ;;  %6434 = vmatmul.mubr.bf16.vlgmr.msra.gmra.mxu0 %v5902_v60 }
 0x2c3   :  { %v7399_v61 = vpop.f32.mrf.mxu1  ;;  %6474 = vmatmul.mubr.bf16.vlgmr.msra.gmra.mxu1 %v11109_v22  ;;  %7657 = vmatpush3.bf16.msra.mxu0 %v8649_v29 }
 0x2c4   :  { %7708 = vmatpush3.bf16.msra.mxu1 %v8650_v23  ;;  %v7378_v0 = vpop.f32.mrf.mxu0  ;;  %7658 = vmatprep.subr.bf16.mxu0 %v8651_v41 }
 0x2c5   :  { %v7400_v17 = vpop.f32.mrf.mxu1  ;;  %7709 = vmatprep.subr.bf16.mxu1 %v8674_v27  ;;  %v7379_v2 = vadd.f32 %v7378_v0, %v7377_v57  ;;  %6513 = vmatprep.mubr.bf16.mxu0 %v5905_v56 }
 0x2c6   :  { %v7401_v3 = vadd.f32 %v7400_v17, %v7399_v61  ;;  %7723 = vmatprep.mubr.msk.bf16.mxu1 %vm8675_vm0, %v8674_v27  ;;  %v7380_v5 = vpop.f32.mrf.mxu0 }
 0x2c7   :  { %v7402_v30 = vpop.f32.mrf.mxu1  ;;  %v5274_v7 = vadd.f32 %v7379_v2, %v11046_v6  ;;  %7659 = vmatpush3.bf16.msra.mxu0 %v8652_v52  ;;  %v7222_v6 = vld.sshfl [vmem:[%s11213_s2 + $0x8] sm:$0x1 pattern:$0x75316420] }
 0x2c8   :  { %7710 = vmatpush3.bf16.msra.mxu1 %v8653_v62  ;;  %v7381_v15 = vpop.f32.mrf.mxu0  ;;  %7660 = vmatprep.subr.bf16.mxu0 %v8654_v1  ;;  %v5919_v19 = vrot.slane %v7222_v6, %v8842_v49 }
 0x2c9   :  { %v7403_v13 = vpop.f32.mrf.mxu1  ;;  %7711 = vmatprep.subr.bf16.mxu1 %v8674_v27  ;;  %v5314_v11 = vadd.f32 %v7401_v3, %v5274_v7 }
 0x2cb   :  { %7661 = vmatpush3.bf16.msra.mxu0 %v8655_v4 }
 0x2cc   :  { %7712 = vmatpush3.bf16.msra.mxu1 %v8656_v58  ;;  %7662 = vmatprep.subr.bf16.mxu0 %v8657_v25 }
 0x2cd   :  { %7713 = vmatprep.subr.bf16.mxu1 %v8674_v27 }
 0x2cf   :  { %7663 = vmatpush3.bf16.msra.mxu0 %v8658_v16 }
 0x2d0   :  { %7714 = vmatpush3.bf16.msra.mxu1 %v8659_v32  ;;  %7664 = vmatprep.subr.bf16.mxu0 %v8660_v21  ;;  %v8676_v21 = vmov 1983009808  }
 0x2d1   :  { %7715 = vmatprep.subr.bf16.mxu1 %v8674_v27 }
 0x2d3   :  { %7665 = vmatpush3.bf16.msra.mxu0 %v8661_v24  ;;  %v5693_v24 = vunpack.c.l.s4 %v8676_v21 }
 0x2d4   :  { %7716 = vmatpush3.bf16.msra.mxu1 %v8662_v28  ;;  %7666 = vmatprep.subr.bf16.mxu0 %v8663_v33 }
 0x2d5   :  { %7717 = vmatprep.subr.bf16.mxu1 %v8674_v27 }
 0x2d7   :  { %7667 = vmatpush3.bf16.msra.mxu0 %v8664_v34  ;;  %v5694_v34 = vunpack.c.0.s8 %v5693_v24 }
 0x2d8   :  { %7718 = vmatpush3.bf16.msra.mxu1 %v8665_v37  ;;  %7668 = vmatprep.subr.bf16.mxu0 %v8666_v54 }
 0x2d9   :  { %7719 = vmatprep.subr.bf16.mxu1 %v8674_v27 }
 0x2db   :  { %7669 = vmatpush3.bf16.msra.mxu0 %v8667_v12 }
 0x2dc   :  { %7720 = vmatpush3.bf16.msra.mxu1 %v8668_v10  ;;  %7670 = vmatprep.subr.bf16.mxu0 %v8669_v31  ;;  %v5697_v31 = vsub.s32 %v5694_v34, %v8824_v43 }
 0x2dd   :  { %7721 = vmatprep.subr.bf16.mxu1 %v8674_v27 }
 0x2df   :  { %7671 = vmatpush3.bf16.msra.mxu0 %v8670_v59 }
 0x2e0   :  { %7722 = vmatpush3.bf16.msra.mxu1 %v8671_v39 }
 0x2e2   :  { %v7421_v40 = vpop.f32.mrf.mxu0  ;;  %6514 = vmatmul.mubr.bf16.vlgmr.msra.gmra.mxu0 %v5903_v20 }
 0x2e3   :  { %7724 = vmatmul.mubr.bf16.vlgmr.msra.gmra.mxu1 %v5919_v19  ;;  %v7443_v46 = vpop.f32.mrf.mxu1 }
 0x2e4   :  { %v7422_v36 = vpop.f32.mrf.mxu0 }
 0x2e5   :  { %v7444_v38 = vpop.f32.mrf.mxu1  ;;  %v7423_v47 = vadd.f32 %v7422_v36, %v7421_v40 }
 0x2e6   :  { %v7445_v9 = vadd.f32 %v7444_v38, %v7443_v46  ;;  %v7424_v48 = vpop.f32.mrf.mxu0  ;;  %v5698_v46 = vrot.slane %v5691_v42, %v5697_v31 }
 0x2e7   :  { %v7446_v50 = vpop.f32.mrf.mxu1  ;;  %v5354_v55 = vadd.f32 %v7423_v47, %v5314_v11 }
 0x2e8   :  { %v7425_v51 = vpop.f32.mrf.mxu0 }
 0x2e9   :  { %v7447_v27 = vpop.f32.mrf.mxu1  ;;  %v5394_v63 = vadd.f32 %v7445_v9, %v5354_v55 }
 0x302   :  { %v7465_v18 = vpop.f32.mrf.mxu0 }
 0x303   :  { %v7487_v14 = vpop.f32.mrf.mxu1 }
 0x304   :  { %v7466_v8 = vpop.f32.mrf.mxu0 }
 0x305   :  { %v7488_v49 = vpop.f32.mrf.mxu1  ;;  %v7467_v53 = vadd.f32 %v7466_v8, %v7465_v18 }
 0x306   :  { %v7489_v26 = vadd.f32 %v7488_v49, %v7487_v14  ;;  %v7468_v44 = vpop.f32.mrf.mxu0 }
 0x307   :  { %v7490_v60 = vpop.f32.mrf.mxu1  ;;  %v5434_v22 = vadd.f32 %v7467_v53, %v5394_v63 }
 0x308   :  { %v7469_v29 = vpop.f32.mrf.mxu0 }
 0x309   :  { %v7491_v23 = vpop.f32.mrf.mxu1  ;;  %v5474_v41 = vadd.f32 %v7489_v26, %v5434_v22 }
 0x322   :  { %v7509_v56 = vpop.f32.mrf.mxu0 }
 0x323   :  { %v7531_v57 = vpop.f32.mrf.mxu1 }
 0x324   :  { %v7510_v61 = vpop.f32.mrf.mxu0 }
 0x325   :  { %v7532_v52 = vpop.f32.mrf.mxu1  ;;  %v7511_v13 = vadd.f32 %v7510_v61, %v7509_v56 }
 0x326   :  { %v7512_v62 = vpop.f32.mrf.mxu0  ;;  %v7533_v11 = vadd.f32 %v7532_v52, %v7531_v57 }
 0x327   :  { %v7534_v0 = vpop.f32.mrf.mxu1  ;;  %v5514_v25 = vadd.f32 %v7511_v13, %v5474_v41 }
 0x328   :  { %v7513_v17 = vpop.f32.mrf.mxu0 }
 0x329   :  { %v7535_v1 = vpop.f32.mrf.mxu1  ;;  %v5554_v32 = vadd.f32 %v7533_v11, %v5514_v25 }
 0x342   :  { %v7553_v2 = vpop.f32.mrf.mxu0 }
 0x343   :  { %v7575_v3 = vpop.f32.mrf.mxu1 }
 0x344   :  { %v7554_v5 = vpop.f32.mrf.mxu0 }
 0x345   :  { %v7576_v30 = vpop.f32.mrf.mxu1  ;;  %v7555_v16 = vadd.f32 %v7554_v5, %v7553_v2 }
 0x346   :  { %v7556_v7 = vpop.f32.mrf.mxu0  ;;  %v7577_v33 = vadd.f32 %v7576_v30, %v7575_v3 }
 0x347   :  { %v7578_v4 = vpop.f32.mrf.mxu1  ;;  %v5594_v28 = vadd.f32 %v7555_v16, %v5554_v32 }
 0x348   :  { %v7557_v58 = vpop.f32.mrf.mxu0 }
 0x349   :  { %v7579_v15 = vpop.f32.mrf.mxu1  ;;  %v5634_v37 = vadd.f32 %v7577_v33, %v5594_v28 }
 0x362   :  { %v5673_v54 = vpop.f32.mrf.mxu0 }
 0x363   :  { %v7606_v12 = vpop.f32.mrf.mxu1  ;;  %v5674_v10 = vadd.f32 %v5673_v54, %v5634_v37 }
 0x364   :  { %v7705_v59 = vpop.f32.mrf.mxu0 }
 0x365   :  { %v7607_v39 = vpop.f32.mrf.mxu1  ;;  %vm5681_vm3 = vcmp.ge.f32.partialorder %v5674_v10, 0.0  ;;  %v5684_v6 = vmul.f32 0.1, %v5674_v10 }
 0x366   :  { %v5676_v20 = vpop.f32.mrf.mxu0  ;;  %v7608_v8 = vadd.f32 %v7607_v39, %v7606_v12 }
 0x367   :  { %v7609_v19 = vpop.f32.mrf.mxu1  ;;  %v5687_v40 = vsel %vm5681_vm3, %v5674_v10, %v5684_v6 }
 0x368   :  { %v5705_v36 = vrot.slane %v5687_v40, %v5697_v31  ;;  %v7706_v38 = vpop.f32.mrf.mxu0 }
 0x369   :  { %v7610_v47 = vpop.f32.mrf.mxu1 }
 0x36a   :  { %v5706_v9 = vcombine.low %v5698_v46, %v5705_v36 }
 0x36c   :  { %5708 = vst [vmem:[%s11214_s4] sm:$0x3f] %v5706_v9 }
 0x382   :  { %v7628_v43 = vpop.f32.mrf.mxu0 }
 0x383   :  { %v7650_v48 = vpop.f32.mrf.mxu1 }
 0x384   :  { %v7629_v50 = vpop.f32.mrf.mxu0 }
 0x385   :  { %v7651_v55 = vpop.f32.mrf.mxu1  ;;  %v7630_v14 = vadd.f32 %v7629_v50, %v7628_v43 }
 0x386   :  { %v7631_v51 = vpop.f32.mrf.mxu0  ;;  %v7652_v45 = vadd.f32 %v7651_v55, %v7650_v48 }
 0x387   :  { %v7653_v27 = vpop.f32.mrf.mxu1  ;;  %v6436_v35 = vadd.f32 %v7630_v14, %v7608_v8 }
 0x388   :  { %v7632_v63 = vpop.f32.mrf.mxu0 }
 0x389   :  { %v7654_v18 = vpop.f32.mrf.mxu1  ;;  %v6476_v44 = vadd.f32 %v7652_v45, %v6436_v35 }
 0x3a2   :  { %v7672_v42 = vpop.f32.mrf.mxu0 }
 0x3a3   :  { %v6555_v49 = vpop.f32.mrf.mxu1 }
 0x3a4   :  { %v7673_v53 = vpop.f32.mrf.mxu0 }
 0x3a5   :  { %v7725_v26 = vpop.f32.mrf.mxu1  ;;  %v7674_v60 = vadd.f32 %v7673_v53, %v7672_v42 }
 0x3a6   :  { %v7675_v22 = vpop.f32.mrf.mxu0 }
 0x3a7   :  { %v6558_v29 = vpop.f32.mrf.mxu1  ;;  %v6516_v23 = vadd.f32 %v7674_v60, %v6476_v44 }
 0x3a8   :  { %v7676_v41 = vpop.f32.mrf.mxu0 }
 0x3a9   :  { %v7726_v56 = vpop.f32.mrf.mxu1  ;;  %v6556_v57 = vadd.f32 %v6555_v49, %v6516_v23 }
 0x3ab   :  { %vm6561_vm4 = vcmp.ge.f32.partialorder %v6556_v57, 0.0  ;;  %v6562_v61 = vmul.f32 0.1, %v6556_v57 }
 0x3ad   :  { %v6563_v52 = vsel %vm6561_vm4, %v6556_v57, %v6562_v61 }
 0x3ae   :  { %6564 = vst [vmem:[%s11215_s5] sm:$0x3] %v6563_v52 }

</bundles_post_ra>
